<compile_context>
chip_gen: v6e
topology: v6e:2x2x1
jax: 0.10.0
libtpu: 0.0.40
codegen_flags: <defaults>
</compile_context>

<pallas_src>
import functools

import jax
import jax.numpy as jnp
import numpy as np
from jax import lax
from jax.experimental import pallas as pl
from jax.experimental.pallas import tpu as pltpu


def _round_up(x, m):
    return ((x + m - 1) // m) * m


# ----------------------------------------------------------------------------
# Pallas kernels
# ----------------------------------------------------------------------------
def _matmul_bias_kernel(a_ref, b_ref, bias_ref, o_ref, *, activation):
    """o = act(a @ b + bias); bias broadcasts against the f32 accumulator."""
    acc = jnp.dot(a_ref[...], b_ref[...], preferred_element_type=jnp.float32)
    acc = acc + bias_ref[...]
    if activation == "relu":
        acc = jnp.maximum(acc, 0.0)
    o_ref[...] = acc.astype(o_ref.dtype)


def _decoder_fc_kernel(hf_ref, wml_ref, bml_ref, eps_ref, w1_ref, b1_ref,
                       w2_ref, b2_ref, ml_ref, h2_ref):
    """Fused mulogvar projection + reparameterize + fc1(+relu) + fc2(+relu)."""
    ml = jnp.dot(hf_ref[...], wml_ref[...],
                 preferred_element_type=jnp.float32) + bml_ref[...]
    ml_ref[...] = ml
    d = eps_ref.shape[-1]                      # latent dim (128)
    mu = ml[:, :d]
    logvar = ml[:, d:]
    # training-mode reparameterization: z = mu + eps * exp(0.5 * logvar)
    z = mu + eps_ref[...] * jnp.exp(0.5 * logvar)
    h1 = jnp.dot(z.astype(w1_ref.dtype), w1_ref[...],
                 preferred_element_type=jnp.float32)
    h1 = jnp.maximum(h1 + b1_ref[...], 0.0)
    h2 = jnp.dot(h1.astype(w2_ref.dtype), w2_ref[...],
                 preferred_element_type=jnp.float32)
    h2_ref[...] = jnp.maximum(h2 + b2_ref[...], 0.0).astype(h2_ref.dtype)


# ----------------------------------------------------------------------------
# Pallas call wrappers (single grid step, full-array blocks)
# ----------------------------------------------------------------------------
def conv_matmul(w_mat, patchesT, b_col, activation=None, out_dtype=jnp.bfloat16):
    """Column-major conv matmul: out^T (Cout, M) = w (Cout,K) @ patches^T (K,M) + b.

    One grid step; block == full array, so no padding copies are needed and the
    output's last (lane) dim is the large spatial axis M (dense stores).
    """
    Cout, K = w_mat.shape
    K2, M = patchesT.shape
    assert K == K2
    return pl.pallas_call(
        functools.partial(_matmul_bias_kernel, activation=activation),
        out_shape=jax.ShapeDtypeStruct((Cout, M), out_dtype),
        grid=(1,),
        in_specs=[
            pl.BlockSpec((Cout, K), lambda i: (0, 0)),
            pl.BlockSpec((K, M), lambda i: (0, 0)),
            pl.BlockSpec((Cout, 1), lambda i: (0, 0)),
        ],
        out_specs=pl.BlockSpec((Cout, M), lambda i: (0, 0)),
    )(w_mat, patchesT.astype(jnp.bfloat16), b_col)


def decoder_fc(h_flat, eps, mulogvar_p, fc1_p, fc2_p):
    """Fused mulogvar + reparameterize + fc1 + fc2 in one pallas_call."""
    w_ml, b_ml = mulogvar_p
    w1, b1 = fc1_p
    w2, b2 = fc2_p
    B = h_flat.shape[0]
    Bp = max(16, _round_up(B, 16))             # bf16 sublane granule
    hf = jnp.pad(h_flat.astype(jnp.bfloat16), ((0, Bp - B), (0, 0)))
    ep = jnp.pad(eps.astype(jnp.float32), ((0, Bp - B), (0, 0)))
    Nml = w_ml.shape[1]
    N2 = w2.shape[1]

    def full(shape):
        return pl.BlockSpec(tuple(shape), lambda i: (0, 0))

    ml, h2 = pl.pallas_call(
        _decoder_fc_kernel,
        out_shape=(jax.ShapeDtypeStruct((Bp, Nml), jnp.float32),
                   jax.ShapeDtypeStruct((Bp, N2), jnp.bfloat16)),
        grid=(1,),
        in_specs=[full(hf.shape), full(w_ml.shape), full(b_ml.shape),
                  full(ep.shape), full(w1.shape), full(b1.shape),
                  full(w2.shape), full(b2.shape)],
        out_specs=(full((Bp, Nml)), full((Bp, N2))),
        # ~5.4 MB of resident operands; comfortable headroom on v5e/v6e/v7x.
        compiler_params=pltpu.CompilerParams(vmem_limit_bytes=32 * 1024 * 1024),
    )(hf, w_ml, b_ml, ep, w1, b1, w2, b2)
    return ml[:B], h2[:B]


# ----------------------------------------------------------------------------
# im2col glue (pure JAX slicing/padding only), channels-first
# ----------------------------------------------------------------------------
def _im2col_T(x_cf, kh, kw, stride):
    """x_cf: (C, B, H, W) -> patches^T (kh*kw*C, B*Ho*Wo), K ordered (i, j, c)."""
    C, B, H, W = x_cf.shape
    Ho = (H - kh) // stride + 1
    Wo = (W - kw) // stride + 1
    cols = []
    for i in range(kh):
        for j in range(kw):
            cols.append(x_cf[:, :, i:i + stride * Ho:stride, j:j + stride * Wo:stride])
    pT = jnp.concatenate(cols, axis=0)           # (kh*kw*C, B, Ho, Wo)
    return pT.reshape(kh * kw * C, B * Ho * Wo), Ho, Wo


def conv2d_cf(x_cf, w_mat, b_col, kh, kw, stride=1, activation=None,
              out_dtype=jnp.bfloat16):
    """Channels-first conv.  x_cf:(Cin,B,H,W)   w_mat:(Cout, kh*kw*Cin) bf16."""
    Cout = w_mat.shape[0]
    B = x_cf.shape[1]
    patchesT, Ho, Wo = _im2col_T(x_cf, kh, kw, stride)
    outT = conv_matmul(w_mat, patchesT, b_col, activation=activation,
                       out_dtype=out_dtype)
    return outT.reshape(Cout, B, Ho, Wo)


# ----------------------------------------------------------------------------
# Parameters (deterministic synthetic init, PyTorch-style uniform bounds)
# ----------------------------------------------------------------------------
def _uniform(key, shape, bound):
    return jax.random.uniform(key, shape, jnp.float32, -bound, bound)


def init_params(key):
    keys = jax.random.split(key, 24)
    it = iter(keys)
    p = {}

    def conv_p(cout, cin, kh, kw):
        bound = 1.0 / np.sqrt(cin * kh * kw)
        return (_uniform(next(it), (cout, cin, kh, kw), bound),
                _uniform(next(it), (cout,), bound))

    def convT_p(cin, cout, kh, kw):
        bound = 1.0 / np.sqrt(cin * kh * kw)
        return (_uniform(next(it), (cin, cout, kh, kw), bound),
                _uniform(next(it), (cout,), bound))

    def lin_p(fin, fout):
        bound = 1.0 / np.sqrt(fin)
        return (_uniform(next(it), (fout, fin), bound),   # PyTorch Linear: (out, in)
                _uniform(next(it), (fout,), bound))

    p["conv1"] = conv_p(3, 3, 2, 2)
    p["conv2"] = conv_p(32, 3, 2, 2)
    p["conv3"] = conv_p(32, 32, 2, 2)
    p["conv4"] = conv_p(32, 32, 2, 2)
    p["mu"] = lin_p(5408, 128)
    p["logvar"] = lin_p(5408, 128)
    p["fc1"] = lin_p(128, 128)
    p["fc2"] = lin_p(128, 8192)
    p["deconv1"] = convT_p(32, 32, 2, 2)
    p["deconv2"] = convT_p(32, 32, 2, 2)
    p["deconv3"] = convT_p(32, 32, 3, 3)
    p["deconv4"] = convT_p(32, 3, 2, 2)
    return p


# ----------------------------------------------------------------------------
# One-time (host-side) weight re-layout and layer composition
# ----------------------------------------------------------------------------
def _compose_convT(wa, ba, wb, bb):
    """Composite of two ConvTranspose2d layers D_b(D_a(x)) (no activation between).

    wa: (Cin, Cmid, ka, ka), wb: (Cmid, Cout, kb, kb).  Returns composite
    ConvTranspose weight (Cin, Cout, ka+kb-1, ka+kb-1) and bias (Cout,).
    Exact for the (deconv1,deconv2) and (deconv3,deconv4) pairs because the
    second layer's receptive field always lies inside the first layer's output.
    """
    wa = np.asarray(wa, np.float32)
    wb = np.asarray(wb, np.float32)
    ba = np.asarray(ba, np.float32)
    bb = np.asarray(bb, np.float32)
    Cin, Cmid, ka, _ = wa.shape
    _, Cout, kb, _ = wb.shape
    kc = ka + kb - 1
    wc = np.zeros((Cin, Cout, kc, kc), np.float32)
    for iy in range(ka):
        for ix in range(ka):
            for jy in range(kb):
                for jx in range(kb):
                    wc[:, :, iy + jy, ix + jx] += wa[:, :, iy, ix] @ wb[:, :, jy, jx]
    bc = bb + np.einsum("mojk,m->o", wb, ba)
    return wc, bc


def _phase_prep_stride2(wc, bc):
    """Stride-phase weights for a composite ConvTranspose(k=4, s=2, p=1).

    All four output phases are computed from ONE 2x2 im2col (K = 4*Cin) over the
    pad-1 input; returns the stacked weight (4*Cout, 4*Cin) and bias (4*Cout, 1).
    Row order: phases (ee, eo, oe, oo), each with Cout rows.
    """
    wc = np.asarray(wc, np.float32)
    Cin, Cout = wc.shape[0], wc.shape[1]
    # tap[phase][window_row_offset] -> composite tap index (per axis)
    tap = ((3, 1), (2, 0))
    rows = []
    for py in range(2):
        for px in range(2):
            w_ph = np.zeros((Cout, 2, 2, Cin), np.float32)   # (o, ry, rx, c)
            for ry in range(2):
                for rx in range(2):
                    w_ph[:, ry, rx, :] = wc[:, :, tap[py][ry], tap[px][rx]].T
            rows.append(w_ph.reshape(Cout, 4 * Cin))
    w_big = np.concatenate(rows, axis=0)                      # (4*Cout, 4*Cin)
    b_big = np.tile(np.asarray(bc, np.float32), 4).reshape(4 * Cout, 1)
    return jnp.asarray(w_big, jnp.bfloat16), jnp.asarray(b_big, jnp.float32)


def prepare_params(p):
    """One-time (outside jit) weight re-layout into the forms the kernels consume."""
    def conv_prep(w, b):                       # w: (Cout, Cin, kh, kw) -- nn.Conv2d
        w = jnp.asarray(w, jnp.float32)
        b = jnp.asarray(b, jnp.float32)
        Cout, Cin, kh, kw = w.shape
        w_mat = jnp.transpose(w, (0, 2, 3, 1)).reshape(Cout, kh * kw * Cin)
        return (w_mat.astype(jnp.bfloat16), b.reshape(Cout, 1))

    def convT_prep(w, b):                      # w: (Cin, Cout, kh, kw) -- ConvTranspose2d
        w = jnp.asarray(w, jnp.float32)
        w_conv = jnp.transpose(jnp.flip(w, axis=(2, 3)), (1, 0, 2, 3))  # (Cout,Cin,kh,kw)
        return conv_prep(w_conv, b)

    def lin_prep(w, b):                        # w: (out, in) -- nn.Linear
        return (jnp.transpose(jnp.asarray(w)).astype(jnp.bfloat16),
                jnp.asarray(b, jnp.float32).reshape(1, -1))

    q = {}
    for name in ("conv1", "conv2", "conv3", "conv4"):
        q[name] = conv_prep(*p[name])

    # fused mu / logvar projection: concat along the output dim (N = 128 + 128)
    w_cat = jnp.concatenate([p["mu"][0], p["logvar"][0]], axis=0)     # (256, 5408)
    b_cat = jnp.concatenate([p["mu"][1], p["logvar"][1]], axis=0)     # (256,)
    q["mulogvar"] = lin_prep(w_cat, b_cat)
    q["fc1"] = lin_prep(*p["fc1"])
    q["fc2"] = lin_prep(*p["fc2"])

    # deconv1 o deconv2  ->  a single 3x3 stride-1 (pad-1) conv (exact).
    wc12, bc12 = _compose_convT(*p["deconv1"], *p["deconv2"])
    q["deconv12"] = convT_prep(jnp.asarray(wc12), jnp.asarray(bc12))

    # deconv3 o deconv4  ->  ConvTranspose(k=4, s=2, p=1), stride-phase decomposed.
    wc34, bc34 = _compose_convT(*p["deconv3"], *p["deconv4"])
    q["deconv34"] = _phase_prep_stride2(wc34, bc34)
    return q


# ----------------------------------------------------------------------------
# VAE forward (Pallas path): 7 single-step pallas_calls total
# ----------------------------------------------------------------------------
def vae_forward(prep, x_nchw, eps):
    B = x_nchw.shape[0]

    # ---- encode: 4 conv calls, one grid step each ---------------------------
    h = jnp.transpose(x_nchw, (1, 0, 2, 3)).astype(jnp.bfloat16)              # (3,B,32,32)
    h = conv2d_cf(h, *prep["conv1"], kh=2, kw=2, stride=1, activation="relu") # (3,B,31,31)
    h = conv2d_cf(h, *prep["conv2"], kh=2, kw=2, stride=2, activation="relu") # (32,B,15,15)
    h = conv2d_cf(h, *prep["conv3"], kh=2, kw=2, stride=1, activation="relu") # (32,B,14,14)
    h = conv2d_cf(h, *prep["conv4"], kh=2, kw=2, stride=1, activation="relu") # (32,B,13,13)
    h_flat = jnp.transpose(h, (1, 0, 2, 3)).reshape(B, 32 * 13 * 13)          # (B,5408)

    # ---- fused mulogvar + reparameterize + fc1 + fc2 (one call) -------------
    mulogvar, h2 = decoder_fc(h_flat, eps, prep["mulogvar"], prep["fc1"], prep["fc2"])
    mu, logvar = mulogvar[:, :128], mulogvar[:, 128:]
    h3 = jnp.transpose(h2.reshape(B, 32, 16, 16), (1, 0, 2, 3))               # (32,B,16,16)

    # ---- deconv1 o deconv2: composed 3x3 conv over pad-1 input (one call) ---
    xp = jnp.pad(h3, ((0, 0), (0, 0), (1, 1), (1, 1)))                        # (32,B,18,18)
    p12, _, _ = _im2col_T(xp, 3, 3, 1)                                        # (288, B*256)
    h12 = conv_matmul(prep["deconv12"][0], p12,
                      prep["deconv12"][1]).reshape(32, B, 16, 16)

    # ---- deconv3 o deconv4: stride-phase decomposition (one call) -----------
    xp = jnp.pad(h12, ((0, 0), (0, 0), (1, 1), (1, 1)))                       # (32,B,18,18)
    p34, _, _ = _im2col_T(xp, 2, 2, 1)                                        # (128, B*289)
    ph = conv_matmul(prep["deconv34"][0], p34, prep["deconv34"][1],
                     out_dtype=jnp.float32)                                   # (12, B*289)
    ph = ph.reshape(4, 3, B, 17, 17)
    ee, eo, oe, oo = ph[0], ph[1], ph[2], ph[3]
    # interleave the four phases into the 32x32 output
    top = jnp.stack([ee[..., :16, :16], eo[..., :16, 1:]], axis=-1).reshape(3, B, 16, 32)
    bot = jnp.stack([oe[..., 1:, :16], oo[..., 1:, 1:]], axis=-1).reshape(3, B, 16, 32)
    y = jnp.stack([top, bot], axis=-2).reshape(3, B, 32, 32)

    out = jnp.transpose(y, (1, 0, 2, 3)).reshape(B, 3 * 32 * 32)
    return out, mu, logvar


# ----------------------------------------------------------------------------
# Pure-JAX f32 reference (lax conv) for numerical sanity check
# ----------------------------------------------------------------------------
def vae_reference(params, x_nchw, eps):
    dn = ("NCHW", "OIHW", "NCHW")
    relu = lambda v: jnp.maximum(v, 0.0)

    def conv(x, w, b, stride):
        y = lax.conv_general_dilated(x, w, (stride, stride), "VALID", dimension_numbers=dn)
        return y + b.reshape(1, -1, 1, 1)

    def convT(x, w, b, stride, padding):
        kh, kw = w.shape[2], w.shape[3]
        w_conv = jnp.transpose(jnp.flip(w, (2, 3)), (1, 0, 2, 3))
        pad = [(kh - 1 - padding,) * 2, (kw - 1 - padding,) * 2]
        y = lax.conv_general_dilated(x, w_conv, (1, 1), pad,
                                     lhs_dilation=(stride, stride), dimension_numbers=dn)
        return y + b.reshape(1, -1, 1, 1)

    B = x_nchw.shape[0]
    h = relu(conv(x_nchw, *params["conv1"], 1))
    h = relu(conv(h, *params["conv2"], 2))
    h = relu(conv(h, *params["conv3"], 1))
    h = relu(conv(h, *params["conv4"], 1))
    hf = h.reshape(B, 5408)
    mu = hf @ params["mu"][0].T + params["mu"][1]
    logvar = hf @ params["logvar"][0].T + params["logvar"][1]
    z = mu + eps * jnp.exp(0.5 * logvar)
    h3 = relu(z @ params["fc1"][0].T + params["fc1"][1])
    h3 = relu(h3 @ params["fc2"][0].T + params["fc2"][1])
    h3 = h3.reshape(B, 32, 16, 16)
    h3 = convT(h3, *params["deconv1"], 1, 0)
    h3 = convT(h3, *params["deconv2"], 1, 1)
    h3 = convT(h3, *params["deconv3"], 2, 0)
    h3 = convT(h3, *params["deconv4"], 1, 1)
    return h3.reshape(B, 3 * 32 * 32), mu, logvar


# ----------------------------------------------------------------------------
if __name__ == "__main__":
    key = jax.random.PRNGKey(0)
    k_param, k_x, k_eps = jax.random.split(key, 3)

    params = init_params(k_param)
    prep = prepare_params(params)          # one-time weight re-layout / composition

    B = 2
    x = jax.random.normal(k_x, (B, 3, 32, 32), jnp.float32)   # CIFAR10-shaped NCHW input
    eps = jax.random.normal(k_eps, (B, 128), jnp.float32)

    fwd = jax.jit(vae_forward)
    out, mu, logvar = fwd(prep, x, eps)
    jax.block_until_ready((out, mu, logvar))

    assert out.shape == (B, 3 * 32 * 32)
    assert mu.shape == (B, 128) and logvar.shape == (B, 128)

    # numerical check against a pure-JAX f32 reference (kernels use bf16 matmul
    # inputs with f32 accumulation, hence the slightly looser tolerances)
    r_out, r_mu, r_logvar = jax.jit(vae_reference)(params, x, eps)
    np.testing.assert_allclose(np.asarray(mu), np.asarray(r_mu), rtol=2e-2, atol=1e-2)
    np.testing.assert_allclose(np.asarray(logvar), np.asarray(r_logvar), rtol=2e-2, atol=1e-2)
    np.testing.assert_allclose(np.asarray(out), np.asarray(r_out), rtol=5e-2, atol=3e-2)

    print("KERNEL_OK")
</pallas_src>

<mosaic_0001>
module attributes {stable_mosaic.version = 11 : i64} {
  func.func @_matmul_bias_kernel(%arg0: i32, %arg1: memref<3x12xbf16, #tpu.memory_space<vmem>>, %arg2: memref<12x1922xbf16, #tpu.memory_space<vmem>>, %arg3: memref<3x1xf32, #tpu.memory_space<vmem>>, %arg4: memref<3x1922xbf16, #tpu.memory_space<vmem>>) attributes {dimension_semantics = [#tpu.dimension_semantics<arbitrary>], iteration_bounds = array<i64: 1>, scalar_prefetch = 0 : i64, scratch_operands = 0 : i64, tpu.core_type = #tpu.core_type<tc>, window_params = [{pipeline_mode = #tpu.pipeline_mode<synchronous>, transform_indices = @transform_0, window_bounds = array<i64: 3, 12>}, {pipeline_mode = #tpu.pipeline_mode<synchronous>, transform_indices = @transform_1, window_bounds = array<i64: 12, 1922>}, {pipeline_mode = #tpu.pipeline_mode<synchronous>, transform_indices = @transform_2, window_bounds = array<i64: 3, 1>}, {pipeline_mode = #tpu.pipeline_mode<synchronous>, transform_indices = @transform_3, window_bounds = array<i64: 3, 1922>}]} {
    %c0 = arith.constant 0 : index
    %c0_0 = arith.constant 0 : index
    %0 = vector.load %arg1[%c0, %c0_0] : memref<3x12xbf16, #tpu.memory_space<vmem>>, vector<3x12xbf16>
    %c0_1 = arith.constant 0 : index
    %c0_2 = arith.constant 0 : index
    %1 = vector.load %arg2[%c0_1, %c0_2] : memref<12x1922xbf16, #tpu.memory_space<vmem>>, vector<12x1922xbf16>
    %cst = arith.constant dense<0.000000e+00> : vector<3x1922xf32>
    %2 = tpu.matmul %0, %1, %cst {dimension_numbers = #tpu.dot_dimension_numbers<[1], [0], [0], [1], [0, 0, 1, 1], [], []>} : vector<3x12xbf16>, vector<12x1922xbf16>, vector<3x1922xf32> -> vector<3x1922xf32>
    %c0_3 = arith.constant 0 : index
    %c0_4 = arith.constant 0 : index
    %3 = vector.load %arg3[%c0_3, %c0_4] : memref<3x1xf32, #tpu.memory_space<vmem>>, vector<3x1xf32>
    %4 = vector.broadcast %3 : vector<3x1xf32> to vector<3x1922xf32>
    %5 = arith.addf %2, %4 : vector<3x1922xf32>
    %cst_5 = arith.constant 0.000000e+00 : f32
    %6 = vector.broadcast %cst_5 : f32 to vector<3x1922xf32>
    %7 = arith.maximumf %5, %6 : vector<3x1922xf32>
    %8 = arith.truncf %7 : vector<3x1922xf32> to vector<3x1922xbf16>
    %c0_6 = arith.constant 0 : index
    %c0_7 = arith.constant 0 : index
    %9 = vector.load %arg4[%c0_6, %c0_7] : memref<3x1922xbf16, #tpu.memory_space<vmem>>, vector<3x1922xbf16>
    tpu.vector_store %arg4[%c0_6, %c0_7], %8 {strides = array<i32>} : memref<3x1922xbf16, #tpu.memory_space<vmem>>, vector<3x1922xbf16>,
    return
  }
  func.func @transform_0(%arg0: i32) -> (i32, i32) {
    %c0_i32 = arith.constant 0 : i32
    %c0_i32_0 = arith.constant 0 : i32
    %c0_i32_1 = arith.constant 0 : i32
    return %c0_i32, %c0_i32_0 : i32, i32
  }
  func.func @transform_1(%arg0: i32) -> (i32, i32) {
    %c0_i32 = arith.constant 0 : i32
    %c0_i32_0 = arith.constant 0 : i32
    %c0_i32_1 = arith.constant 0 : i32
    return %c0_i32, %c0_i32_0 : i32, i32
  }
  func.func @transform_2(%arg0: i32) -> (i32, i32) {
    %c0_i32 = arith.constant 0 : i32
    %c0_i32_0 = arith.constant 0 : i32
    %c0_i32_1 = arith.constant 0 : i32
    return %c0_i32, %c0_i32_0 : i32, i32
  }
  func.func @transform_3(%arg0: i32) -> (i32, i32) {
    %c0_i32 = arith.constant 0 : i32
    %c0_i32_0 = arith.constant 0 : i32
    %c0_i32_1 = arith.constant 0 : i32
    return %c0_i32, %c0_i32_0 : i32, i32
  }
}

module attributes {stable_mosaic.version = 11 : i64} {
  func.func @_matmul_bias_kernel(%arg0: i32, %arg1: memref<32x12xbf16, #tpu.memory_space<vmem>>, %arg2: memref<12x450xbf16, #tpu.memory_space<vmem>>, %arg3: memref<32x1xf32, #tpu.memory_space<vmem>>, %arg4: memref<32x450xbf16, #tpu.memory_space<vmem>>) attributes {dimension_semantics = [#tpu.dimension_semantics<arbitrary>], iteration_bounds = array<i64: 1>, scalar_prefetch = 0 : i64, scratch_operands = 0 : i64, tpu.core_type = #tpu.core_type<tc>, window_params = [{pipeline_mode = #tpu.pipeline_mode<synchronous>, transform_indices = @transform_0, window_bounds = array<i64: 32, 12>}, {pipeline_mode = #tpu.pipeline_mode<synchronous>, transform_indices = @transform_1, window_bounds = array<i64: 12, 450>}, {pipeline_mode = #tpu.pipeline_mode<synchronous>, transform_indices = @transform_2, window_bounds = array<i64: 32, 1>}, {pipeline_mode = #tpu.pipeline_mode<synchronous>, transform_indices = @transform_3, window_bounds = array<i64: 32, 450>}]} {
    %c0 = arith.constant 0 : index
    %c0_0 = arith.constant 0 : index
    %0 = vector.load %arg1[%c0, %c0_0] : memref<32x12xbf16, #tpu.memory_space<vmem>>, vector<32x12xbf16>
    %c0_1 = arith.constant 0 : index
    %c0_2 = arith.constant 0 : index
    %1 = vector.load %arg2[%c0_1, %c0_2] : memref<12x450xbf16, #tpu.memory_space<vmem>>, vector<12x450xbf16>
    %cst = arith.constant dense<0.000000e+00> : vector<32x450xf32>
    %2 = tpu.matmul %0, %1, %cst {dimension_numbers = #tpu.dot_dimension_numbers<[1], [0], [0], [1], [0, 0, 1, 1], [], []>} : vector<32x12xbf16>, vector<12x450xbf16>, vector<32x450xf32> -> vector<32x450xf32>
    %c0_3 = arith.constant 0 : index
    %c0_4 = arith.constant 0 : index
    %3 = vector.load %arg3[%c0_3, %c0_4] : memref<32x1xf32, #tpu.memory_space<vmem>>, vector<32x1xf32>
    %4 = vector.broadcast %3 : vector<32x1xf32> to vector<32x450xf32>
    %5 = arith.addf %2, %4 : vector<32x450xf32>
    %cst_5 = arith.constant 0.000000e+00 : f32
    %6 = vector.broadcast %cst_5 : f32 to vector<32x450xf32>
    %7 = arith.maximumf %5, %6 : vector<32x450xf32>
    %8 = arith.truncf %7 : vector<32x450xf32> to vector<32x450xbf16>
    %c0_6 = arith.constant 0 : index
    %c0_7 = arith.constant 0 : index
    %9 = vector.load %arg4[%c0_6, %c0_7] : memref<32x450xbf16, #tpu.memory_space<vmem>>, vector<32x450xbf16>
    tpu.vector_store %arg4[%c0_6, %c0_7], %8 {strides = array<i32>} : memref<32x450xbf16, #tpu.memory_space<vmem>>, vector<32x450xbf16>,
    return
  }
  func.func @transform_0(%arg0: i32) -> (i32, i32) {
    %c0_i32 = arith.constant 0 : i32
    %c0_i32_0 = arith.constant 0 : i32
    %c0_i32_1 = arith.constant 0 : i32
    return %c0_i32, %c0_i32_0 : i32, i32
  }
  func.func @transform_1(%arg0: i32) -> (i32, i32) {
    %c0_i32 = arith.constant 0 : i32
    %c0_i32_0 = arith.constant 0 : i32
    %c0_i32_1 = arith.constant 0 : i32
    return %c0_i32, %c0_i32_0 : i32, i32
  }
  func.func @transform_2(%arg0: i32) -> (i32, i32) {
    %c0_i32 = arith.constant 0 : i32
    %c0_i32_0 = arith.constant 0 : i32
    %c0_i32_1 = arith.constant 0 : i32
    return %c0_i32, %c0_i32_0 : i32, i32
  }
  func.func @transform_3(%arg0: i32) -> (i32, i32) {
    %c0_i32 = arith.constant 0 : i32
    %c0_i32_0 = arith.constant 0 : i32
    %c0_i32_1 = arith.constant 0 : i32
    return %c0_i32, %c0_i32_0 : i32, i32
  }
}

module attributes {stable_mosaic.version = 11 : i64} {
  func.func @_matmul_bias_kernel(%arg0: i32, %arg1: memref<32x128xbf16, #tpu.memory_space<vmem>>, %arg2: memref<128x392xbf16, #tpu.memory_space<vmem>>, %arg3: memref<32x1xf32, #tpu.memory_space<vmem>>, %arg4: memref<32x392xbf16, #tpu.memory_space<vmem>>) attributes {dimension_semantics = [#tpu.dimension_semantics<arbitrary>], iteration_bounds = array<i64: 1>, scalar_prefetch = 0 : i64, scratch_operands = 0 : i64, tpu.core_type = #tpu.core_type<tc>, window_params = [{pipeline_mode = #tpu.pipeline_mode<synchronous>, transform_indices = @transform_0, window_bounds = array<i64: 32, 128>}, {pipeline_mode = #tpu.pipeline_mode<synchronous>, transform_indices = @transform_1, window_bounds = array<i64: 128, 392>}, {pipeline_mode = #tpu.pipeline_mode<synchronous>, transform_indices = @transform_2, window_bounds = array<i64: 32, 1>}, {pipeline_mode = #tpu.pipeline_mode<synchronous>, transform_indices = @transform_3, window_bounds = array<i64: 32, 392>}]} {
    %c0 = arith.constant 0 : index
    %c0_0 = arith.constant 0 : index
    %0 = vector.load %arg1[%c0, %c0_0] : memref<32x128xbf16, #tpu.memory_space<vmem>>, vector<32x128xbf16>
    %c0_1 = arith.constant 0 : index
    %c0_2 = arith.constant 0 : index
    %1 = vector.load %arg2[%c0_1, %c0_2] : memref<128x392xbf16, #tpu.memory_space<vmem>>, vector<128x392xbf16>
    %cst = arith.constant dense<0.000000e+00> : vector<32x392xf32>
    %2 = tpu.matmul %0, %1, %cst {dimension_numbers = #tpu.dot_dimension_numbers<[1], [0], [0], [1], [0, 0, 1, 1], [], []>} : vector<32x128xbf16>, vector<128x392xbf16>, vector<32x392xf32> -> vector<32x392xf32>
    %c0_3 = arith.constant 0 : index
    %c0_4 = arith.constant 0 : index
    %3 = vector.load %arg3[%c0_3, %c0_4] : memref<32x1xf32, #tpu.memory_space<vmem>>, vector<32x1xf32>
    %4 = vector.broadcast %3 : vector<32x1xf32> to vector<32x392xf32>
    %5 = arith.addf %2, %4 : vector<32x392xf32>
    %cst_5 = arith.constant 0.000000e+00 : f32
    %6 = vector.broadcast %cst_5 : f32 to vector<32x392xf32>
    %7 = arith.maximumf %5, %6 : vector<32x392xf32>
    %8 = arith.truncf %7 : vector<32x392xf32> to vector<32x392xbf16>
    %c0_6 = arith.constant 0 : index
    %c0_7 = arith.constant 0 : index
    %9 = vector.load %arg4[%c0_6, %c0_7] : memref<32x392xbf16, #tpu.memory_space<vmem>>, vector<32x392xbf16>
    tpu.vector_store %arg4[%c0_6, %c0_7], %8 {strides = array<i32>} : memref<32x392xbf16, #tpu.memory_space<vmem>>, vector<32x392xbf16>,
    return
  }
  func.func @transform_0(%arg0: i32) -> (i32, i32) {
    %c0_i32 = arith.constant 0 : i32
    %c0_i32_0 = arith.constant 0 : i32
    %c0_i32_1 = arith.constant 0 : i32
    return %c0_i32, %c0_i32_0 : i32, i32
  }
  func.func @transform_1(%arg0: i32) -> (i32, i32) {
    %c0_i32 = arith.constant 0 : i32
    %c0_i32_0 = arith.constant 0 : i32
    %c0_i32_1 = arith.constant 0 : i32
    return %c0_i32, %c0_i32_0 : i32, i32
  }
  func.func @transform_2(%arg0: i32) -> (i32, i32) {
    %c0_i32 = arith.constant 0 : i32
    %c0_i32_0 = arith.constant 0 : i32
    %c0_i32_1 = arith.constant 0 : i32
    return %c0_i32, %c0_i32_0 : i32, i32
  }
  func.func @transform_3(%arg0: i32) -> (i32, i32) {
    %c0_i32 = arith.constant 0 : i32
    %c0_i32_0 = arith.constant 0 : i32
    %c0_i32_1 = arith.constant 0 : i32
    return %c0_i32, %c0_i32_0 : i32, i32
  }
}

module attributes {stable_mosaic.version = 11 : i64} {
  func.func @_matmul_bias_kernel(%arg0: i32, %arg1: memref<32x128xbf16, #tpu.memory_space<vmem>>, %arg2: memref<128x338xbf16, #tpu.memory_space<vmem>>, %arg3: memref<32x1xf32, #tpu.memory_space<vmem>>, %arg4: memref<32x338xbf16, #tpu.memory_space<vmem>>) attributes {dimension_semantics = [#tpu.dimension_semantics<arbitrary>], iteration_bounds = array<i64: 1>, scalar_prefetch = 0 : i64, scratch_operands = 0 : i64, tpu.core_type = #tpu.core_type<tc>, window_params = [{pipeline_mode = #tpu.pipeline_mode<synchronous>, transform_indices = @transform_0, window_bounds = array<i64: 32, 128>}, {pipeline_mode = #tpu.pipeline_mode<synchronous>, transform_indices = @transform_1, window_bounds = array<i64: 128, 338>}, {pipeline_mode = #tpu.pipeline_mode<synchronous>, transform_indices = @transform_2, window_bounds = array<i64: 32, 1>}, {pipeline_mode = #tpu.pipeline_mode<synchronous>, transform_indices = @transform_3, window_bounds = array<i64: 32, 338>}]} {
    %c0 = arith.constant 0 : index
    %c0_0 = arith.constant 0 : index
    %0 = vector.load %arg1[%c0, %c0_0] : memref<32x128xbf16, #tpu.memory_space<vmem>>, vector<32x128xbf16>
    %c0_1 = arith.constant 0 : index
    %c0_2 = arith.constant 0 : index
    %1 = vector.load %arg2[%c0_1, %c0_2] : memref<128x338xbf16, #tpu.memory_space<vmem>>, vector<128x338xbf16>
    %cst = arith.constant dense<0.000000e+00> : vector<32x338xf32>
    %2 = tpu.matmul %0, %1, %cst {dimension_numbers = #tpu.dot_dimension_numbers<[1], [0], [0], [1], [0, 0, 1, 1], [], []>} : vector<32x128xbf16>, vector<128x338xbf16>, vector<32x338xf32> -> vector<32x338xf32>
    %c0_3 = arith.constant 0 : index
    %c0_4 = arith.constant 0 : index
    %3 = vector.load %arg3[%c0_3, %c0_4] : memref<32x1xf32, #tpu.memory_space<vmem>>, vector<32x1xf32>
    %4 = vector.broadcast %3 : vector<32x1xf32> to vector<32x338xf32>
    %5 = arith.addf %2, %4 : vector<32x338xf32>
    %cst_5 = arith.constant 0.000000e+00 : f32
    %6 = vector.broadcast %cst_5 : f32 to vector<32x338xf32>
    %7 = arith.maximumf %5, %6 : vector<32x338xf32>
    %8 = arith.truncf %7 : vector<32x338xf32> to vector<32x338xbf16>
    %c0_6 = arith.constant 0 : index
    %c0_7 = arith.constant 0 : index
    %9 = vector.load %arg4[%c0_6, %c0_7] : memref<32x338xbf16, #tpu.memory_space<vmem>>, vector<32x338xbf16>
    tpu.vector_store %arg4[%c0_6, %c0_7], %8 {strides = array<i32>} : memref<32x338xbf16, #tpu.memory_space<vmem>>, vector<32x338xbf16>,
    return
  }
  func.func @transform_0(%arg0: i32) -> (i32, i32) {
    %c0_i32 = arith.constant 0 : i32
    %c0_i32_0 = arith.constant 0 : i32
    %c0_i32_1 = arith.constant 0 : i32
    return %c0_i32, %c0_i32_0 : i32, i32
  }
  func.func @transform_1(%arg0: i32) -> (i32, i32) {
    %c0_i32 = arith.constant 0 : i32
    %c0_i32_0 = arith.constant 0 : i32
    %c0_i32_1 = arith.constant 0 : i32
    return %c0_i32, %c0_i32_0 : i32, i32
  }
  func.func @transform_2(%arg0: i32) -> (i32, i32) {
    %c0_i32 = arith.constant 0 : i32
    %c0_i32_0 = arith.constant 0 : i32
    %c0_i32_1 = arith.constant 0 : i32
    return %c0_i32, %c0_i32_0 : i32, i32
  }
  func.func @transform_3(%arg0: i32) -> (i32, i32) {
    %c0_i32 = arith.constant 0 : i32
    %c0_i32_0 = arith.constant 0 : i32
    %c0_i32_1 = arith.constant 0 : i32
    return %c0_i32, %c0_i32_0 : i32, i32
  }
}

module attributes {stable_mosaic.version = 11 : i64} {
  func.func @_decoder_fc_kernel(%arg0: i32, %arg1: memref<16x5408xbf16, #tpu.memory_space<vmem>>, %arg2: memref<5408x256xbf16, #tpu.memory_space<vmem>>, %arg3: memref<1x256xf32, #tpu.memory_space<vmem>>, %arg4: memref<16x128xf32, #tpu.memory_space<vmem>>, %arg5: memref<128x128xbf16, #tpu.memory_space<vmem>>, %arg6: memref<1x128xf32, #tpu.memory_space<vmem>>, %arg7: memref<128x8192xbf16, #tpu.memory_space<vmem>>, %arg8: memref<1x8192xf32, #tpu.memory_space<vmem>>, %arg9: memref<16x256xf32, #tpu.memory_space<vmem>>, %arg10: memref<16x8192xbf16, #tpu.memory_space<vmem>>) attributes {dimension_semantics = [#tpu.dimension_semantics<arbitrary>], iteration_bounds = array<i64: 1>, scalar_prefetch = 0 : i64, scratch_operands = 0 : i64, tpu.core_type = #tpu.core_type<tc>, window_params = [{pipeline_mode = #tpu.pipeline_mode<synchronous>, transform_indices = @transform_0, window_bounds = array<i64: 16, 5408>}, {pipeline_mode = #tpu.pipeline_mode<synchronous>, transform_indices = @transform_1, window_bounds = array<i64: 5408, 256>}, {pipeline_mode = #tpu.pipeline_mode<synchronous>, transform_indices = @transform_2, window_bounds = array<i64: 1, 256>}, {pipeline_mode = #tpu.pipeline_mode<synchronous>, transform_indices = @transform_3, window_bounds = array<i64: 16, 128>}, {pipeline_mode = #tpu.pipeline_mode<synchronous>, transform_indices = @transform_4, window_bounds = array<i64: 128, 128>}, {pipeline_mode = #tpu.pipeline_mode<synchronous>, transform_indices = @transform_5, window_bounds = array<i64: 1, 128>}, {pipeline_mode = #tpu.pipeline_mode<synchronous>, transform_indices = @transform_6, window_bounds = array<i64: 128, 8192>}, {pipeline_mode = #tpu.pipeline_mode<synchronous>, transform_indices = @transform_7, window_bounds = array<i64: 1, 8192>}, {pipeline_mode = #tpu.pipeline_mode<synchronous>, transform_indices = @transform_8, window_bounds = array<i64: 16, 256>}, {pipeline_mode = #tpu.pipeline_mode<synchronous>, transform_indices = @transform_9, window_bounds = array<i64: 16, 8192>}]} {
    %c0 = arith.constant 0 : index
    %c0_0 = arith.constant 0 : index
    %0 = vector.load %arg1[%c0, %c0_0] : memref<16x5408xbf16, #tpu.memory_space<vmem>>, vector<16x5408xbf16>
    %c0_1 = arith.constant 0 : index
    %c0_2 = arith.constant 0 : index
    %1 = vector.load %arg2[%c0_1, %c0_2] : memref<5408x256xbf16, #tpu.memory_space<vmem>>, vector<5408x256xbf16>
    %cst = arith.constant dense<0.000000e+00> : vector<16x256xf32>
    %2 = tpu.matmul %0, %1, %cst {dimension_numbers = #tpu.dot_dimension_numbers<[1], [0], [0], [1], [0, 0, 1, 1], [], []>} : vector<16x5408xbf16>, vector<5408x256xbf16>, vector<16x256xf32> -> vector<16x256xf32>
    %c0_3 = arith.constant 0 : index
    %c0_4 = arith.constant 0 : index
    %3 = vector.load %arg3[%c0_3, %c0_4] : memref<1x256xf32, #tpu.memory_space<vmem>>, vector<1x256xf32>
    %4 = vector.broadcast %3 : vector<1x256xf32> to vector<16x256xf32>
    %5 = arith.addf %2, %4 : vector<16x256xf32>
    %c0_5 = arith.constant 0 : index
    %c0_6 = arith.constant 0 : index
    %6 = vector.load %arg9[%c0_5, %c0_6] : memref<16x256xf32, #tpu.memory_space<vmem>>, vector<16x256xf32>
    tpu.vector_store %arg9[%c0_5, %c0_6], %5 {strides = array<i32>} : memref<16x256xf32, #tpu.memory_space<vmem>>, vector<16x256xf32>,
    %7 = vector.extract_strided_slice %5 {offsets = [0, 0], sizes = [16, 128], strides = [1, 1]} : vector<16x256xf32> to vector<16x128xf32>
    %8 = vector.extract_strided_slice %5 {offsets = [0, 128], sizes = [16, 128], strides = [1, 1]} : vector<16x256xf32> to vector<16x128xf32>
    %c0_7 = arith.constant 0 : index
    %c0_8 = arith.constant 0 : index
    %9 = vector.load %arg4[%c0_7, %c0_8] : memref<16x128xf32, #tpu.memory_space<vmem>>, vector<16x128xf32>
    %cst_9 = arith.constant 5.000000e-01 : f32
    %10 = vector.broadcast %cst_9 : f32 to vector<16x128xf32>
    %11 = arith.mulf %10, %8 : vector<16x128xf32>
    %12 = math.exp %11 : vector<16x128xf32>
    %13 = arith.mulf %9, %12 : vector<16x128xf32>
    %14 = arith.addf %7, %13 : vector<16x128xf32>
    %15 = arith.truncf %14 : vector<16x128xf32> to vector<16x128xbf16>
    %c0_10 = arith.constant 0 : index
    %c0_11 = arith.constant 0 : index
    %16 = vector.load %arg5[%c0_10, %c0_11] : memref<128x128xbf16, #tpu.memory_space<vmem>>, vector<128x128xbf16>
    %cst_12 = arith.constant dense<0.000000e+00> : vector<16x128xf32>
    %17 = tpu.matmul %15, %16, %cst_12 {dimension_numbers = #tpu.dot_dimension_numbers<[1], [0], [0], [1], [0, 0, 1, 1], [], []>} : vector<16x128xbf16>, vector<128x128xbf16>, vector<16x128xf32> -> vector<16x128xf32>
    %c0_13 = arith.constant 0 : index
    %c0_14 = arith.constant 0 : index
    %18 = vector.load %arg6[%c0_13, %c0_14] : memref<1x128xf32, #tpu.memory_space<vmem>>, vector<1x128xf32>
    %19 = vector.broadcast %18 : vector<1x128xf32> to vector<16x128xf32>
    %20 = arith.addf %17, %19 : vector<16x128xf32>
    %cst_15 = arith.constant 0.000000e+00 : f32
    %21 = vector.broadcast %cst_15 : f32 to vector<16x128xf32>
    %22 = arith.maximumf %20, %21 : vector<16x128xf32>
    %23 = arith.truncf %22 : vector<16x128xf32> to vector<16x128xbf16>
    %c0_16 = arith.constant 0 : index
    %c0_17 = arith.constant 0 : index
    %24 = vector.load %arg7[%c0_16, %c0_17] : memref<128x8192xbf16, #tpu.memory_space<vmem>>, vector<128x8192xbf16>
    %cst_18 = arith.constant dense<0.000000e+00> : vector<16x8192xf32>
    %25 = tpu.matmul %23, %24, %cst_18 {dimension_numbers = #tpu.dot_dimension_numbers<[1], [0], [0], [1], [0, 0, 1, 1], [], []>} : vector<16x128xbf16>, vector<128x8192xbf16>, vector<16x8192xf32> -> vector<16x8192xf32>
    %c0_19 = arith.constant 0 : index
    %c0_20 = arith.constant 0 : index
    %26 = vector.load %arg8[%c0_19, %c0_20] : memref<1x8192xf32, #tpu.memory_space<vmem>>, vector<1x8192xf32>
    %27 = vector.broadcast %26 : vector<1x8192xf32> to vector<16x8192xf32>
    %28 = arith.addf %25, %27 : vector<16x8192xf32>
    %cst_21 = arith.constant 0.000000e+00 : f32
    %29 = vector.broadcast %cst_21 : f32 to vector<16x8192xf32>
    %30 = arith.maximumf %28, %29 : vector<16x8192xf32>
    %31 = arith.truncf %30 : vector<16x8192xf32> to vector<16x8192xbf16>
    %c0_22 = arith.constant 0 : index
    %c0_23 = arith.constant 0 : index
    %32 = vector.load %arg10[%c0_22, %c0_23] : memref<16x8192xbf16, #tpu.memory_space<vmem>>, vector<16x8192xbf16>
    tpu.vector_store %arg10[%c0_22, %c0_23], %31 {strides = array<i32>} : memref<16x8192xbf16, #tpu.memory_space<vmem>>, vector<16x8192xbf16>,
    return
  }
  func.func @transform_0(%arg0: i32) -> (i32, i32) {
    %c0_i32 = arith.constant 0 : i32
    %c0_i32_0 = arith.constant 0 : i32
    %c0_i32_1 = arith.constant 0 : i32
    return %c0_i32, %c0_i32_0 : i32, i32
  }
  func.func @transform_1(%arg0: i32) -> (i32, i32) {
    %c0_i32 = arith.constant 0 : i32
    %c0_i32_0 = arith.constant 0 : i32
    %c0_i32_1 = arith.constant 0 : i32
    return %c0_i32, %c0_i32_0 : i32, i32
  }
  func.func @transform_2(%arg0: i32) -> (i32, i32) {
    %c0_i32 = arith.constant 0 : i32
    %c0_i32_0 = arith.constant 0 : i32
    %c0_i32_1 = arith.constant 0 : i32
    return %c0_i32, %c0_i32_0 : i32, i32
  }
  func.func @transform_3(%arg0: i32) -> (i32, i32) {
    %c0_i32 = arith.constant 0 : i32
    %c0_i32_0 = arith.constant 0 : i32
    %c0_i32_1 = arith.constant 0 : i32
    return %c0_i32, %c0_i32_0 : i32, i32
  }
  func.func @transform_4(%arg0: i32) -> (i32, i32) {
    %c0_i32 = arith.constant 0 : i32
    %c0_i32_0 = arith.constant 0 : i32
    %c0_i32_1 = arith.constant 0 : i32
    return %c0_i32, %c0_i32_0 : i32, i32
  }
  func.func @transform_5(%arg0: i32) -> (i32, i32) {
    %c0_i32 = arith.constant 0 : i32
    %c0_i32_0 = arith.constant 0 : i32
    %c0_i32_1 = arith.constant 0 : i32
    return %c0_i32, %c0_i32_0 : i32, i32
  }
  func.func @transform_6(%arg0: i32) -> (i32, i32) {
    %c0_i32 = arith.constant 0 : i32
    %c0_i32_0 = arith.constant 0 : i32
    %c0_i32_1 = arith.constant 0 : i32
    return %c0_i32, %c0_i32_0 : i32, i32
  }
  func.func @transform_7(%arg0: i32) -> (i32, i32) {
    %c0_i32 = arith.constant 0 : i32
    %c0_i32_0 = arith.constant 0 : i32
    %c0_i32_1 = arith.constant 0 : i32
    return %c0_i32, %c0_i32_0 : i32, i32
  }
  func.func @transform_8(%arg0: i32) -> (i32, i32) {
    %c0_i32 = arith.constant 0 : i32
    %c0_i32_0 = arith.constant 0 : i32
    %c0_i32_1 = arith.constant 0 : i32
    return %c0_i32, %c0_i32_0 : i32, i32
  }
  func.func @transform_9(%arg0: i32) -> (i32, i32) {
    %c0_i32 = arith.constant 0 : i32
    %c0_i32_0 = arith.constant 0 : i32
    %c0_i32_1 = arith.constant 0 : i32
    return %c0_i32, %c0_i32_0 : i32, i32
  }
}

module attributes {stable_mosaic.version = 11 : i64} {
  func.func @_matmul_bias_kernel(%arg0: i32, %arg1: memref<32x288xbf16, #tpu.memory_space<vmem>>, %arg2: memref<288x512xbf16, #tpu.memory_space<vmem>>, %arg3: memref<32x1xf32, #tpu.memory_space<vmem>>, %arg4: memref<32x512xbf16, #tpu.memory_space<vmem>>) attributes {dimension_semantics = [#tpu.dimension_semantics<arbitrary>], iteration_bounds = array<i64: 1>, scalar_prefetch = 0 : i64, scratch_operands = 0 : i64, tpu.core_type = #tpu.core_type<tc>, window_params = [{pipeline_mode = #tpu.pipeline_mode<synchronous>, transform_indices = @transform_0, window_bounds = array<i64: 32, 288>}, {pipeline_mode = #tpu.pipeline_mode<synchronous>, transform_indices = @transform_1, window_bounds = array<i64: 288, 512>}, {pipeline_mode = #tpu.pipeline_mode<synchronous>, transform_indices = @transform_2, window_bounds = array<i64: 32, 1>}, {pipeline_mode = #tpu.pipeline_mode<synchronous>, transform_indices = @transform_3, window_bounds = array<i64: 32, 512>}]} {
    %c0 = arith.constant 0 : index
    %c0_0 = arith.constant 0 : index
    %0 = vector.load %arg1[%c0, %c0_0] : memref<32x288xbf16, #tpu.memory_space<vmem>>, vector<32x288xbf16>
    %c0_1 = arith.constant 0 : index
    %c0_2 = arith.constant 0 : index
    %1 = vector.load %arg2[%c0_1, %c0_2] : memref<288x512xbf16, #tpu.memory_space<vmem>>, vector<288x512xbf16>
    %cst = arith.constant dense<0.000000e+00> : vector<32x512xf32>
    %2 = tpu.matmul %0, %1, %cst {dimension_numbers = #tpu.dot_dimension_numbers<[1], [0], [0], [1], [0, 0, 1, 1], [], []>} : vector<32x288xbf16>, vector<288x512xbf16>, vector<32x512xf32> -> vector<32x512xf32>
    %c0_3 = arith.constant 0 : index
    %c0_4 = arith.constant 0 : index
    %3 = vector.load %arg3[%c0_3, %c0_4] : memref<32x1xf32, #tpu.memory_space<vmem>>, vector<32x1xf32>
    %4 = vector.broadcast %3 : vector<32x1xf32> to vector<32x512xf32>
    %5 = arith.addf %2, %4 : vector<32x512xf32>
    %6 = arith.truncf %5 : vector<32x512xf32> to vector<32x512xbf16>
    %c0_5 = arith.constant 0 : index
    %c0_6 = arith.constant 0 : index
    %7 = vector.load %arg4[%c0_5, %c0_6] : memref<32x512xbf16, #tpu.memory_space<vmem>>, vector<32x512xbf16>
    tpu.vector_store %arg4[%c0_5, %c0_6], %6 {strides = array<i32>} : memref<32x512xbf16, #tpu.memory_space<vmem>>, vector<32x512xbf16>,
    return
  }
  func.func @transform_0(%arg0: i32) -> (i32, i32) {
    %c0_i32 = arith.constant 0 : i32
    %c0_i32_0 = arith.constant 0 : i32
    %c0_i32_1 = arith.constant 0 : i32
    return %c0_i32, %c0_i32_0 : i32, i32
  }
  func.func @transform_1(%arg0: i32) -> (i32, i32) {
    %c0_i32 = arith.constant 0 : i32
    %c0_i32_0 = arith.constant 0 : i32
    %c0_i32_1 = arith.constant 0 : i32
    return %c0_i32, %c0_i32_0 : i32, i32
  }
  func.func @transform_2(%arg0: i32) -> (i32, i32) {
    %c0_i32 = arith.constant 0 : i32
    %c0_i32_0 = arith.constant 0 : i32
    %c0_i32_1 = arith.constant 0 : i32
    return %c0_i32, %c0_i32_0 : i32, i32
  }
  func.func @transform_3(%arg0: i32) -> (i32, i32) {
    %c0_i32 = arith.constant 0 : i32
    %c0_i32_0 = arith.constant 0 : i32
    %c0_i32_1 = arith.constant 0 : i32
    return %c0_i32, %c0_i32_0 : i32, i32
  }
}

module attributes {stable_mosaic.version = 11 : i64} {
  func.func @_matmul_bias_kernel(%arg0: i32, %arg1: memref<12x128xbf16, #tpu.memory_space<vmem>>, %arg2: memref<128x578xbf16, #tpu.memory_space<vmem>>, %arg3: memref<12x1xf32, #tpu.memory_space<vmem>>, %arg4: memref<12x578xf32, #tpu.memory_space<vmem>>) attributes {dimension_semantics = [#tpu.dimension_semantics<arbitrary>], iteration_bounds = array<i64: 1>, scalar_prefetch = 0 : i64, scratch_operands = 0 : i64, tpu.core_type = #tpu.core_type<tc>, window_params = [{pipeline_mode = #tpu.pipeline_mode<synchronous>, transform_indices = @transform_0, window_bounds = array<i64: 12, 128>}, {pipeline_mode = #tpu.pipeline_mode<synchronous>, transform_indices = @transform_1, window_bounds = array<i64: 128, 578>}, {pipeline_mode = #tpu.pipeline_mode<synchronous>, transform_indices = @transform_2, window_bounds = array<i64: 12, 1>}, {pipeline_mode = #tpu.pipeline_mode<synchronous>, transform_indices = @transform_3, window_bounds = array<i64: 12, 578>}]} {
    %c0 = arith.constant 0 : index
    %c0_0 = arith.constant 0 : index
    %0 = vector.load %arg1[%c0, %c0_0] : memref<12x128xbf16, #tpu.memory_space<vmem>>, vector<12x128xbf16>
    %c0_1 = arith.constant 0 : index
    %c0_2 = arith.constant 0 : index
    %1 = vector.load %arg2[%c0_1, %c0_2] : memref<128x578xbf16, #tpu.memory_space<vmem>>, vector<128x578xbf16>
    %cst = arith.constant dense<0.000000e+00> : vector<12x578xf32>
    %2 = tpu.matmul %0, %1, %cst {dimension_numbers = #tpu.dot_dimension_numbers<[1], [0], [0], [1], [0, 0, 1, 1], [], []>} : vector<12x128xbf16>, vector<128x578xbf16>, vector<12x578xf32> -> vector<12x578xf32>
    %c0_3 = arith.constant 0 : index
    %c0_4 = arith.constant 0 : index
    %3 = vector.load %arg3[%c0_3, %c0_4] : memref<12x1xf32, #tpu.memory_space<vmem>>, vector<12x1xf32>
    %4 = vector.broadcast %3 : vector<12x1xf32> to vector<12x578xf32>
    %5 = arith.addf %2, %4 : vector<12x578xf32>
    %c0_5 = arith.constant 0 : index
    %c0_6 = arith.constant 0 : index
    %6 = vector.load %arg4[%c0_5, %c0_6] : memref<12x578xf32, #tpu.memory_space<vmem>>, vector<12x578xf32>
    tpu.vector_store %arg4[%c0_5, %c0_6], %5 {strides = array<i32>} : memref<12x578xf32, #tpu.memory_space<vmem>>, vector<12x578xf32>,
    return
  }
  func.func @transform_0(%arg0: i32) -> (i32, i32) {
    %c0_i32 = arith.constant 0 : i32
    %c0_i32_0 = arith.constant 0 : i32
    %c0_i32_1 = arith.constant 0 : i32
    return %c0_i32, %c0_i32_0 : i32, i32
  }
  func.func @transform_1(%arg0: i32) -> (i32, i32) {
    %c0_i32 = arith.constant 0 : i32
    %c0_i32_0 = arith.constant 0 : i32
    %c0_i32_1 = arith.constant 0 : i32
    return %c0_i32, %c0_i32_0 : i32, i32
  }
  func.func @transform_2(%arg0: i32) -> (i32, i32) {
    %c0_i32 = arith.constant 0 : i32
    %c0_i32_0 = arith.constant 0 : i32
    %c0_i32_1 = arith.constant 0 : i32
    return %c0_i32, %c0_i32_0 : i32, i32
  }
  func.func @transform_3(%arg0: i32) -> (i32, i32) {
    %c0_i32 = arith.constant 0 : i32
    %c0_i32_0 = arith.constant 0 : i32
    %c0_i32_1 = arith.constant 0 : i32
    return %c0_i32, %c0_i32_0 : i32, i32
  }
}

</mosaic_0001>

<bundles_post_ra>
// kernel: vae_forward.7
= control target key start
LH: loop header
LB: loop body
LE: loop exit
PB: predicated region body
PF: predicated region fallthrough
CT: control target
= control target key end

     0   :  { %8 = vsyncpa [#allocation3], 0  ;;  %s716_s12 = smov [#allocation2]   ;;  %s910_s0 = inlined_call_operand.hbm [shape: bf16[3,12], index: 0, kind: input, shape index: {}]   ;;  %s911_s1 = inlined_call_operand.vmem [shape: bf16[12,1922], index: 1, kind: input, shape index: {}]   ;;  %s912_s2 = inlined_call_operand.vmem [shape: f32[3,1], index: 2, kind: input, shape index: {}]   ;;  %s913_s3 = inlined_call_operand.vmem [shape: bf16[3,1922], index: 3, kind: output, shape index: {}]  }
   0x1   :  { %s15_s13 = sshll.u32 %s716_s12, 4  ;;  %s16_s13 = int_to_ptr.vmem [resolvable:$true] %s15_s13 }
   0x2   :  { %s702_s14 = scalar_lea.vmem %s16_s13, 32  ;;  %p707_p1 = scmp.lt.s32.totalorder %s16_s13, %s16_s13 }
   0x3   :  { %p703_p0 = scmp.ne.s32.totalorder %s16_s13, %s702_s14  ;;  %p708_p2 = scmp.lt.s32.totalorder %s702_s14, %s702_s14 }
   0x5   :  { %p709_p3 = por %p708_p2, %p707_p1 }
   0x7   :  { %p710_p4 = pnand %p709_p3, %p703_p0 }
   0x9   :  { %713 = shalt.err (!%p710_p4)
}
   0xa   :  { %18 = dma.hbm_to_vmem [thread:$0]  %s910_s0, 32, %s16_s13, [#allocation3]  }
   0xb   :  { %714 = dma.done.wait [#allocation3], 32  }
   0xc   :  { %715 = vsyncadd [#allocation3], 4294967264  ;;  %v717_v0 = vmov 0   ;;  %v28_v1 = vld [vmem:[%s911_s1] sm:$0xff]  ;;  %vm118_vm0 = vcmask 1045504   ;;  %v29_v3 = vld [vmem:[%s911_s1 + $0x8] sm:$0xff]  ;;  %v548_v45 = vlaneseq }
   0xd   :  { %199 = vmatprep.mubr.bf16.mxu0 %v717_v0  ;;  %240 = vmatprep.mubr.bf16.mxu1 %v717_v0  ;;  %v36_v2 = vld [vmem:[%s911_s1 + $0x40] sm:$0x33]  ;;  %v37_v5 = vld [vmem:[%s911_s1 + $0x48] sm:$0x33]  ;;  %v30_v7 = vld [vmem:[%s911_s1 + $0x10] sm:$0xff]  ;;  %vm114_vm1 = vcmask 97280  }
   0xe   :  { %693 = vset.pattern.permute.xlu0 %v717_v0  ;;  %v651_v4 = vcombine.high %v28_v1, %v36_v2  ;;  %v650_v6 = vcombine.low %v28_v1, %v36_v2  ;;  %v653_v8 = vcombine.high %v29_v3, %v37_v5  ;;  %v652_v9 = vcombine.low %v29_v3, %v37_v5  ;;  %v38_v10 = vld [vmem:[%s911_s1 + $0x50] sm:$0x33]  ;;  %v31_v11 = vld [vmem:[%s911_s1 + $0x18] sm:$0xff]  ;;  %v32_v17 = vld [vmem:[%s911_s1 + $0x20] sm:$0xff] }
   0xf   :  { %v39_v12 = vld [vmem:[%s911_s1 + $0x58] sm:$0x33]  ;;  %v655_v14 = vcombine.high %v30_v7, %v38_v10  ;;  %v654_v16 = vcombine.low %v30_v7, %v38_v10  ;;  %v40_v18 = vld [vmem:[%s911_s1 + $0x60] sm:$0x33]  ;;  %v33_v22 = vld [vmem:[%s911_s1 + $0x28] sm:$0xff]  ;;  %vm615_vm2 = vcmask 1041408  }
  0x10   :  { %666 = vmatprep.subr.msk.bf16.mxu0 %vm118_vm0, %v651_v4  ;;  %v120_v13 = vsel %vm118_vm0, %v650_v6, 0  ;;  %v657_v15 = vcombine.high %v31_v11, %v39_v12  ;;  %668 = vmatprep.subr.msk.bf16.mxu1 %vm118_vm0, %v653_v8  ;;  %v126_v19 = vsel %vm118_vm0, %v652_v9, 0  ;;  %v27_v20 = vld [vmem:[#allocation2] sm:$0x3]  ;;  %v656_v21 = vcombine.low %v31_v11, %v39_v12  ;;  %v41_v23 = vld [vmem:[%s911_s1 + $0x68] sm:$0x33] }
  0x11   :  { %182 = vmatpush1.bf16.msra.mxu0 %v120_v13  ;;  %223 = vmatpush1.bf16.msra.mxu1 %v126_v19  ;;  %v132_v24 = vsel %vm118_vm0, %v654_v16, 0  ;;  %v44_v25 = vld [vmem:[%s912_s2] sm:$0x7]  ;;  %v659_v27 = vcombine.high %v32_v17, %v40_v18  ;;  %v661_v28 = vcombine.high %v33_v22, %v41_v23  ;;  %v658_v29 = vcombine.low %v32_v17, %v40_v18  ;;  %v34_v31 = vld [vmem:[%s911_s1 + $0x30] sm:$0xff]  ;;  %v35_v33 = vld [vmem:[%s911_s1 + $0x38] sm:$0xff] }
  0x12   :  { %670 = vmatprep.subr.msk.bf16.mxu0 %vm118_vm0, %v655_v14  ;;  %672 = vmatprep.subr.msk.bf16.mxu1 %vm118_vm0, %v657_v15  ;;  %v138_v26 = vsel %vm118_vm0, %v656_v21, 0  ;;  %v660_v30 = vcombine.low %v33_v22, %v41_v23  ;;  %v42_v32 = vld [vmem:[%s911_s1 + $0x70] sm:$0x33]  ;;  %v43_v34 = vld [vmem:[%s911_s1 + $0x78] sm:$0x33]  ;;  %vm618_vm4 = vcmask 1043458  }
  0x13   :  { %47 = vperm.xlu0 %693, %v44_v25   ;;  %v144_v35 = vsel %vm118_vm0, %v658_v29, 0  ;;  %v663_v37 = vcombine.high %v34_v31, %v42_v32  ;;  %v665_v38 = vcombine.high %v35_v33, %v43_v34  ;;  %v662_v39 = vcombine.low %v34_v31, %v42_v32  ;;  %v630_v15 = vld [vmem:[%s913_s3] sm:$0xff]  ;;  %v642_v14 = vld [vmem:[%s913_s3 + $0x18] sm:$0xff] }
  0x14   :  { %667 = vmatmul.mubr.msk.bf16.vlgmr.msra.gmra.mxu0 %vm114_vm1, %v27_v20  ;;  %669 = vmatmul.mubr.msk.bf16.vlgmr.msra.gmra.mxu1 %vm114_vm1, %v27_v20  ;;  %v150_v36 = vsel %vm118_vm0, %v660_v30, 0  ;;  %v664_v40 = vcombine.low %v35_v33, %v43_v34  ;;  %v718_v43 = vmov 1983009808   ;;  %vm616_vm3 = vsmask.f32 1280 }
  0x15   :  { %264 = vmatpush1.bf16.msra.mxu0 %v132_v24  ;;  %305 = vmatpush1.bf16.msra.mxu1 %v138_v26  ;;  %v156_v41 = vsel %vm118_vm0, %v662_v39, 0  ;;  %v546_v44 = vunpack.c.l.s4 %v718_v43  ;;  %vm619_vm5 = vsmask.f32 3328  ;;  %vm828_vm6 = vmand %vm615_vm2, %vm616_vm3  ;;  %v549_v50 = vshrl.u32 %v548_v45, 7 }
  0x16   :  { %281 = vmatprep.mubr.bf16.mxu0 %v717_v0  ;;  %322 = vmatprep.mubr.bf16.mxu1 %v717_v0  ;;  %v162_v42 = vsel %vm118_vm0, %v664_v40, 0  ;;  %vm832_vm7 = vmand %vm618_vm4, %vm619_vm5  ;;  %vm622_vm8 = vcmask 1045508   ;;  %vm623_vm9 = vsmask.f32 5376  ;;  %vm626_vm12 = vcmask 1047558  }
  0x17   :  { %674 = vmatprep.subr.msk.bf16.mxu0 %vm118_vm0, %v659_v27  ;;  %676 = vmatprep.subr.msk.bf16.mxu1 %vm118_vm0, %v661_v28  ;;  %v547_v49 = vunpack.c.0.s8 %v546_v44  ;;  %vm621_vm10 = vmor %vm832_vm7, %vm828_vm6  ;;  %vm627_vm13 = vsmask.f32 7424 }
  0x18   :  { %vm624_vm11 = vmand %vm622_vm8, %vm623_vm9 }
  0x19   :  { %v843_v58 = vsub.s32 %v547_v49, %v549_v50  ;;  %vm846_vm14 = vmor %vm624_vm11, %vm621_vm10 }
  0x1a   :  { %vm628_vm15 = vmand %vm626_vm12, %vm627_vm13 }
  0x1c   :  { %671 = vmatmul.mubr.msk.bf16.vlgmr.msra.gmra.mxu0 %vm114_vm1, %v27_v20  ;;  %673 = vmatmul.mubr.msk.bf16.vlgmr.msra.gmra.mxu1 %vm114_vm1, %v27_v20 }
  0x1d   :  { %346 = vmatpush1.bf16.msra.mxu0 %v144_v35  ;;  %387 = vmatpush1.bf16.msra.mxu1 %v150_v36 }
  0x1e   :  { %363 = vmatprep.mubr.bf16.mxu0 %v717_v0  ;;  %404 = vmatprep.mubr.bf16.mxu1 %v717_v0 }
  0x1f   :  { %678 = vmatprep.subr.msk.bf16.mxu0 %vm118_vm0, %v663_v37  ;;  %680 = vmatprep.subr.msk.bf16.mxu1 %vm118_vm0, %v665_v38  ;;  %vm857_vm0 = vmor %vm628_vm15, %vm846_vm14  ;;  %v633_v38 = vld [vmem:[%s913_s3 + $0x8] sm:$0xff] }
  0x24   :  { %675 = vmatmul.mubr.msk.bf16.vlgmr.msra.gmra.mxu0 %vm114_vm1, %v27_v20  ;;  %677 = vmatmul.mubr.msk.bf16.vlgmr.msra.gmra.mxu1 %vm114_vm1, %v27_v20 }
  0x25   :  { %428 = vmatpush1.bf16.msra.mxu0 %v156_v41  ;;  %469 = vmatpush1.bf16.msra.mxu1 %v162_v42 }
  0x26   :  { %445 = vmatprep.mubr.bf16.mxu0 %v717_v0  ;;  %486 = vmatprep.mubr.bf16.mxu1 %v717_v0 }
  0x2c   :  { %679 = vmatmul.mubr.msk.bf16.vlgmr.msra.gmra.mxu0 %vm114_vm1, %v27_v20  ;;  %681 = vmatmul.mubr.msk.bf16.vlgmr.msra.gmra.mxu1 %vm114_vm1, %v27_v20  ;;  %vm639_vm1 = vcmask 15366  }
  0x2d   :  { %vm640_vm2 = vmand %vm639_vm1, %vm627_vm13 }
  0x2e   :  { %vm641_vm3 = vmor %vm640_vm2, %vm846_vm14 }
  0x8e   :  { %v826_v46 = vpop.permute.xlu0 %47 }
  0xd4   :  { %v201_v48 = vpop.f32.mrf.mxu0  ;;  %v242_v52 = vpop.f32.mrf.mxu1 }
  0xd5   :  { %v202_v53 = vadd.f32 %v201_v48, %v826_v46  ;;  %v243_v55 = vadd.f32 %v242_v52, %v826_v46 }
  0xd6   :  { %v203_v54 = vpop.f32.mrf.mxu0  ;;  %v244_v57 = vpop.f32.mrf.mxu1 }
  0xd7   :  { %v204_v56 = vadd.f32 %v203_v54, %v826_v46  ;;  %v245_v59 = vadd.f32 %v244_v57, %v826_v46  ;;  %v495_v61 = vmax.f32 %v202_v53, 0.0  ;;  %v497_v0 = vmax.f32 %v243_v55, 0.0 }
  0xd8   :  { %v205_v60 = vpop.f32.mrf.mxu0  ;;  %v246_v63 = vpop.f32.mrf.mxu1 }
  0xd9   :  { %v496_v62 = vmax.f32 %v204_v56, 0.0  ;;  %v498_v1 = vmax.f32 %v245_v59, 0.0  ;;  %v636_v63 = vld [vmem:[%s913_s3 + $0x10] sm:$0xff] }
  0xda   :  { %v206_v2 = vpop.f32.mrf.mxu0  ;;  %v247_v5 = vpop.f32.mrf.mxu1 }
  0xdb   :  { %v682_v3 = vpack.c.bf16 %v496_v62, %v495_v61  ;;  %v683_v6 = vpack.c.bf16 %v498_v1, %v497_v0 }
  0xdc   :  { %v283_v7 = vpop.f32.mrf.mxu0  ;;  %v324_v10 = vpop.f32.mrf.mxu1 }
  0xdd   :  { %v551_v8 = vrot.slane %v682_v3, %v843_v58  ;;  %v284_v9 = vadd.f32 %v283_v7, %v826_v46  ;;  %v558_v11 = vrot.slane %v683_v6, %v843_v58  ;;  %v325_v12 = vadd.f32 %v324_v10, %v826_v46 }
  0xde   :  { %v285_v13 = vpop.f32.mrf.mxu0  ;;  %v326_v17 = vpop.f32.mrf.mxu1 }
  0xdf   :  { %v286_v16 = vadd.f32 %v285_v13, %v826_v46  ;;  %v559_v18 = vcombine.low %v551_v8, %v558_v11  ;;  %v327_v19 = vadd.f32 %v326_v17, %v826_v46  ;;  %v499_v21 = vmax.f32 %v284_v9, 0.0 }
  0xe0   :  { %v287_v20 = vpop.f32.mrf.mxu0  ;;  %v328_v23 = vpop.f32.mrf.mxu1  ;;  %v501_v25 = vmax.f32 %v325_v12, 0.0 }
  0xe1   :  { %v500_v22 = vmax.f32 %v286_v16, 0.0  ;;  %v631_v24 = vsel %vm857_vm0, %v559_v18, %v630_v15  ;;  %v502_v26 = vmax.f32 %v327_v19, 0.0 }
  0xe2   :  { %v288_v27 = vpop.f32.mrf.mxu0  ;;  %632 = vst [vmem:[%s913_s3] sm:$0xff] %v631_v24  ;;  %v329_v29 = vpop.f32.mrf.mxu1 }
  0xe3   :  { %v684_v28 = vpack.c.bf16 %v500_v22, %v499_v21  ;;  %v685_v30 = vpack.c.bf16 %v502_v26, %v501_v25 }
  0xe4   :  { %v365_v31 = vpop.f32.mrf.mxu0  ;;  %v406_v34 = vpop.f32.mrf.mxu1 }
  0xe5   :  { %v568_v32 = vrot.slane %v684_v28, %v843_v58  ;;  %v366_v33 = vadd.f32 %v365_v31, %v826_v46  ;;  %v575_v35 = vrot.slane %v685_v30, %v843_v58  ;;  %v407_v36 = vadd.f32 %v406_v34, %v826_v46 }
  0xe6   :  { %v367_v37 = vpop.f32.mrf.mxu0  ;;  %v408_v40 = vpop.f32.mrf.mxu1 }
  0xe7   :  { %v368_v39 = vadd.f32 %v367_v37, %v826_v46  ;;  %v576_v41 = vcombine.low %v568_v32, %v575_v35  ;;  %v409_v42 = vadd.f32 %v408_v40, %v826_v46  ;;  %v503_v44 = vmax.f32 %v366_v33, 0.0 }
  0xe8   :  { %v369_v43 = vpop.f32.mrf.mxu0  ;;  %v410_v47 = vpop.f32.mrf.mxu1  ;;  %v505_v49 = vmax.f32 %v407_v36, 0.0 }
  0xe9   :  { %v504_v45 = vmax.f32 %v368_v39, 0.0  ;;  %v634_v48 = vsel %vm857_vm0, %v576_v41, %v633_v38  ;;  %v506_v50 = vmax.f32 %v409_v42, 0.0 }
  0xea   :  { %v370_v51 = vpop.f32.mrf.mxu0  ;;  %635 = vst [vmem:[%s913_s3 + $0x8] sm:$0xff] %v634_v48  ;;  %v411_v53 = vpop.f32.mrf.mxu1 }
  0xeb   :  { %v686_v52 = vpack.c.bf16 %v504_v45, %v503_v44  ;;  %v687_v54 = vpack.c.bf16 %v506_v50, %v505_v49 }
  0xec   :  { %v447_v55 = vpop.f32.mrf.mxu0  ;;  %v488_v59 = vpop.f32.mrf.mxu1 }
  0xed   :  { %v585_v56 = vrot.slane %v686_v52, %v843_v58  ;;  %v448_v57 = vadd.f32 %v447_v55, %v826_v46  ;;  %v592_v60 = vrot.slane %v687_v54, %v843_v58  ;;  %v489_v61 = vadd.f32 %v488_v59, %v826_v46 }
  0xee   :  { %v449_v62 = vpop.f32.mrf.mxu0  ;;  %v490_v1 = vpop.f32.mrf.mxu1 }
  0xef   :  { %v450_v0 = vadd.f32 %v449_v62, %v826_v46  ;;  %v593_v2 = vcombine.low %v585_v56, %v592_v60  ;;  %v491_v3 = vadd.f32 %v490_v1, %v826_v46  ;;  %v507_v6 = vmax.f32 %v448_v57, 0.0 }
  0xf0   :  { %v451_v5 = vpop.f32.mrf.mxu0  ;;  %v492_v8 = vpop.f32.mrf.mxu1  ;;  %v509_v10 = vmax.f32 %v489_v61, 0.0 }
  0xf1   :  { %v508_v7 = vmax.f32 %v450_v0, 0.0  ;;  %v637_v9 = vsel %vm857_vm0, %v593_v2, %v636_v63  ;;  %v510_v11 = vmax.f32 %v491_v3, 0.0 }
  0xf2   :  { %v452_v12 = vpop.f32.mrf.mxu0  ;;  %638 = vst [vmem:[%s913_s3 + $0x10] sm:$0xff] %v637_v9  ;;  %v493_v15 = vpop.f32.mrf.mxu1 }
  0xf3   :  { %v688_v13 = vpack.c.bf16 %v508_v7, %v507_v6  ;;  %v689_v16 = vpack.c.bf16 %v510_v11, %v509_v10 }
  0xf5   :  { %v602_v46 = vrot.slane %v688_v13, %v843_v58  ;;  %v609_v17 = vrot.slane %v689_v16, %v843_v58 }
  0xf7   :  { %v610_v18 = vcombine.low %v602_v46, %v609_v17 }
  0xf9   :  { %v643_v19 = vsel %vm641_vm3, %v610_v18, %v642_v14 }
  0xfa   :  { %644 = vst [vmem:[%s913_s3 + $0x18] sm:$0xff] %v643_v19 }
  0xfb   :  { %649 = vsyncpa [#allocation3], 1 }

// kernel: vae_forward.8
= control target key start
LH: loop header
LB: loop body
LE: loop exit
PB: predicated region body
PF: predicated region fallthrough
CT: control target
= control target key end

     0   :  { %vm80_vm0 = vcmask 1045504   ;;  %v317_v1 = vmov 0   ;;  %vm73_vm1 = vcmask 97280   ;;  %vm264_vm2 = vcmask 1043456   ;;  %s408_s1 = inlined_call_operand.vmem [shape: bf16[12,450], index: 1, kind: input, shape index: {}]   ;;  %s409_s0 = inlined_call_operand.vmem [shape: bf16[32,12], index: 0, kind: input, shape index: {}]   ;;  %s410_s2 = inlined_call_operand.vmem [shape: f32[32,1], index: 2, kind: input, shape index: {}]   ;;  %s411_s3 = inlined_call_operand.vmem [shape: bf16[32,450], index: 3, kind: output, shape index: {}]  }
   0x1   :  { %v309_v0 = vld [vmem:[%s408_s1 + $0x4] ss:$16 sps:$4 sm:$0x3f]   ;;  %125 = vmatprep.mubr.bf16.mxu0 %v317_v1  ;;  %178 = vmatprep.mubr.bf16.mxu1 %v317_v1  ;;  %v311_v2 = vld [vmem:[%s408_s1 + $0xc] ss:$16 sps:$4 sm:$0x3f]  }
   0x2   :  { %307 = vset.pattern.permute.xlu0 %v317_v1  ;;  %308 = vset.pattern.permute.xlu1 %v317_v1  ;;  %v313_v3 = vld [vmem:[%s408_s1] ss:$16 sps:$4 sm:$0x3f]   ;;  %v314_v4 = vld [vmem:[%s408_s1 + $0x8] ss:$16 sps:$4 sm:$0x3f]  }
   0x3   :  { %284 = vmatprep.subr.msk.bf16.mxu0 %vm80_vm0, %v309_v0  ;;  %287 = vmatprep.subr.msk.bf16.mxu1 %vm80_vm0, %v311_v2  ;;  %v315_v5 = vld [vmem:[%s409_s0] sm:$0xff]   ;;  %v82_v6 = vsel %vm80_vm0, %v313_v3, 0  ;;  %v88_v7 = vsel %vm80_vm0, %v314_v4, 0  ;;  %v25_v9 = vld [vmem:[%s410_s2 + $0x10] sm:$0xff]  ;;  %v24_v10 = vld [vmem:[%s410_s2 + $0x8] sm:$0xff]  ;;  %vm265_vm3 = vcmask 539652  }
   0x4   :  { %108 = vmatpush1.bf16.msra.mxu0 %v82_v6  ;;  %161 = vmatpush1.bf16.msra.mxu1 %v88_v7  ;;  %v23_v8 = vld [vmem:[%s410_s2] sm:$0xff]  ;;  %v26_v11 = vld [vmem:[%s410_s2 + $0x18] sm:$0xff]  ;;  %v316_v12 = vld [vmem:[%s409_s0 + $0x8] sm:$0xff]  }
   0x5   :  { %29 = vperm.xlu0 %307, %v23_v8   ;;  %39 = vperm.xlu1 %308, %v25_v9   ;;  %vm372_vm4 = vmor %vm265_vm3, %vm264_vm2 }
   0x7   :  { %285 = vmatmul.mubr.msk.bf16.vlgmr.msra.gmra.mxu0 %vm73_vm1, %v315_v5  ;;  %288 = vmatmul.mubr.msk.bf16.vlgmr.msra.gmra.mxu1 %vm73_vm1, %v315_v5 }
   0x8   :  { %135 = vmatprep.mubr.bf16.mxu0 %v317_v1  ;;  %188 = vmatprep.mubr.bf16.mxu1 %v317_v1 }
   0x9   :  { %34 = vperm.xlu0 %307, %v24_v10   ;;  %44 = vperm.xlu1 %308, %v26_v11  }
   0xf   :  { %286 = vmatmul.mubr.msk.bf16.gmra.mxu0 %vm73_vm1, %v316_v12  ;;  %289 = vmatmul.mubr.msk.bf16.gmra.mxu1 %vm73_vm1, %v316_v12 }
  0x80   :  { %v30_v13 = vpop.permute.xlu0 %29  ;;  %v40_v36 = vpop.permute.xlu1 %39 }
  0x84   :  { %v35_v22 = vpop.permute.xlu0 %34  ;;  %v45_v57 = vpop.permute.xlu1 %44 }
  0xc7   :  { %v127_v14 = vpop.f32.mrf.mxu0  ;;  %v180_v15 = vpop.f32.mrf.mxu1 }
  0xc8   :  { %v128_v16 = vadd.f32 %v127_v14, %v30_v13  ;;  %v181_v17 = vadd.f32 %v180_v15, %v30_v13 }
  0xc9   :  { %v129_v18 = vpop.f32.mrf.mxu0  ;;  %v182_v19 = vpop.f32.mrf.mxu1 }
  0xca   :  { %v130_v20 = vadd.f32 %v129_v18, %v30_v13  ;;  %v183_v21 = vadd.f32 %v182_v19, %v30_v13  ;;  %v199_v25 = vmax.f32 %v128_v16, 0.0  ;;  %v201_v26 = vmax.f32 %v181_v17, 0.0 }
  0xcb   :  { %v131_v23 = vpop.f32.mrf.mxu0  ;;  %v184_v24 = vpop.f32.mrf.mxu1 }
  0xcc   :  { %v200_v27 = vmax.f32 %v130_v20, 0.0  ;;  %v202_v28 = vmax.f32 %v183_v21, 0.0  ;;  %v132_v30 = vadd.f32 %v131_v23, %v35_v22  ;;  %v185_v31 = vadd.f32 %v184_v24, %v35_v22 }
  0xcd   :  { %v133_v32 = vpop.f32.mrf.mxu0  ;;  %v186_v33 = vpop.f32.mrf.mxu1 }
  0xce   :  { %v298_v34 = vpack.c.bf16 %v200_v27, %v199_v25  ;;  %v299_v35 = vpack.c.bf16 %v202_v28, %v201_v26  ;;  %v134_v37 = vadd.f32 %v133_v32, %v35_v22  ;;  %v187_v38 = vadd.f32 %v186_v33, %v35_v22 }
  0xcf   :  { %v137_v39 = vpop.f32.mrf.mxu0  ;;  %v190_v40 = vpop.f32.mrf.mxu1  ;;  %v203_v43 = vmax.f32 %v132_v30, 0.0  ;;  %v205_v44 = vmax.f32 %v185_v31, 0.0 }
  0xd0   :  { %263 = vst [vmem:[%s411_s3] sm:$0xff] %v298_v34  ;;  %267 = vst.msk [vmem:[%s411_s3 + $0x8] sm:$0xff] %vm372_vm4, %v299_v35  ;;  %v138_v41 = vadd.f32 %v137_v39, %v40_v36  ;;  %v191_v42 = vadd.f32 %v190_v40, %v40_v36  ;;  %v204_v45 = vmax.f32 %v134_v37, 0.0  ;;  %v206_v46 = vmax.f32 %v187_v38, 0.0 }
  0xd1   :  { %v139_v47 = vpop.f32.mrf.mxu0  ;;  %v192_v48 = vpop.f32.mrf.mxu1 }
  0xd2   :  { %v140_v49 = vadd.f32 %v139_v47, %v40_v36  ;;  %v193_v50 = vadd.f32 %v192_v48, %v40_v36  ;;  %v300_v51 = vpack.c.bf16 %v204_v45, %v203_v43  ;;  %v301_v52 = vpack.c.bf16 %v206_v46, %v205_v44 }
  0xd3   :  { %v141_v53 = vpop.f32.mrf.mxu0  ;;  %v194_v54 = vpop.f32.mrf.mxu1  ;;  %v207_v55 = vmax.f32 %v138_v41, 0.0  ;;  %v209_v56 = vmax.f32 %v191_v42, 0.0 }
  0xd4   :  { %v208_v58 = vmax.f32 %v140_v49, 0.0  ;;  %v210_v59 = vmax.f32 %v193_v50, 0.0  ;;  %268 = vst [vmem:[%s411_s3 + $0x10] sm:$0xff] %v300_v51  ;;  %269 = vst.msk [vmem:[%s411_s3 + $0x18] sm:$0xff] %vm372_vm4, %v301_v52  ;;  %v142_v60 = vadd.f32 %v141_v53, %v45_v57  ;;  %v195_v61 = vadd.f32 %v194_v54, %v45_v57 }
  0xd5   :  { %v143_v62 = vpop.f32.mrf.mxu0  ;;  %v196_v63 = vpop.f32.mrf.mxu1 }
  0xd6   :  { %v302_v0 = vpack.c.bf16 %v208_v58, %v207_v55  ;;  %v303_v1 = vpack.c.bf16 %v210_v59, %v209_v56  ;;  %v144_v2 = vadd.f32 %v143_v62, %v45_v57  ;;  %v197_v3 = vadd.f32 %v196_v63, %v45_v57 }
  0xd7   :  { %v211_v4 = vmax.f32 %v142_v60, 0.0  ;;  %v213_v5 = vmax.f32 %v195_v61, 0.0 }
  0xd8   :  { %270 = vst [vmem:[%s411_s3 + $0x20] sm:$0xff] %v302_v0  ;;  %271 = vst.msk [vmem:[%s411_s3 + $0x28] sm:$0xff] %vm372_vm4, %v303_v1  ;;  %v212_v6 = vmax.f32 %v144_v2, 0.0  ;;  %v214_v7 = vmax.f32 %v197_v3, 0.0 }
  0xda   :  { %v304_v8 = vpack.c.bf16 %v212_v6, %v211_v4  ;;  %v305_v9 = vpack.c.bf16 %v214_v7, %v213_v5 }
  0xdc   :  { %272 = vst [vmem:[%s411_s3 + $0x30] sm:$0xff] %v304_v8  ;;  %273 = vst.msk [vmem:[%s411_s3 + $0x38] sm:$0xff] %vm372_vm4, %v305_v9 }

// kernel: vae_forward.9
= control target key start
LH: loop header
LB: loop body
LE: loop exit
PB: predicated region body
PF: predicated region fallthrough
CT: control target
= control target key end

     0   :  { %v535_v1 = vmov 0   ;;  %vm418_vm0 = vcmask 1043456   ;;  %vm419_vm1 = vcmask 64516   ;;  %s712_s1 = inlined_call_operand.vmem [shape: bf16[128,392], index: 1, kind: input, shape index: {}]   ;;  %s713_s0 = inlined_call_operand.vmem [shape: bf16[32,128], index: 0, kind: input, shape index: {}]   ;;  %s714_s2 = inlined_call_operand.vmem [shape: f32[32,1], index: 2, kind: input, shape index: {}]   ;;  %s715_s3 = inlined_call_operand.vmem [shape: bf16[32,392], index: 3, kind: output, shape index: {}]  }
   0x1   :  { %v485_v0 = vld [vmem:[%s712_s1 + $0xe4] ss:$16 sps:$4 sm:$0xff]   ;;  %279 = vmatprep.mubr.bf16.mxu0 %v535_v1  ;;  %332 = vmatprep.mubr.bf16.mxu1 %v535_v1  ;;  %v487_v2 = vld [vmem:[%s712_s1 + $0xec] ss:$16 sps:$4 sm:$0xff]   ;;  %v489_v3 = vld [vmem:[%s712_s1 + $0xe0] ss:$16 sps:$4 sm:$0xff]  }
   0x2   :  { %483 = vset.pattern.permute.xlu0 %v535_v1  ;;  %484 = vset.pattern.permute.xlu1 %v535_v1  ;;  %v490_v4 = vld [vmem:[%s712_s1 + $0xe8] ss:$16 sps:$4 sm:$0xff]   ;;  %v491_v5 = vld [vmem:[%s712_s1 + $0xc4] ss:$16 sps:$4 sm:$0xff]   ;;  %v493_v6 = vld [vmem:[%s712_s1 + $0xcc] ss:$16 sps:$4 sm:$0xff]  }
   0x3   :  { %247 = vmatprep.subr.bf16.mxu0 %v485_v0  ;;  %300 = vmatprep.subr.bf16.mxu1 %v487_v2  ;;  %v495_v7 = vld [vmem:[%s712_s1 + $0xc0] ss:$16 sps:$4 sm:$0xff]   ;;  %v496_v8 = vld [vmem:[%s712_s1 + $0xc8] ss:$16 sps:$4 sm:$0xff]   ;;  %v497_v9 = vld [vmem:[%s712_s1 + $0xa4] ss:$16 sps:$4 sm:$0xff]  }
   0x4   :  { %248 = vmatpush1.bf16.msra.mxu0 %v489_v3  ;;  %301 = vmatpush1.bf16.msra.mxu1 %v490_v4  ;;  %v499_v10 = vld [vmem:[%s712_s1 + $0xac] ss:$16 sps:$4 sm:$0xff]   ;;  %v501_v11 = vld [vmem:[%s712_s1 + $0xa0] ss:$16 sps:$4 sm:$0xff]   ;;  %v502_v12 = vld [vmem:[%s712_s1 + $0xa8] ss:$16 sps:$4 sm:$0xff]  }
   0x5   :  { %249 = vmatprep.subr.bf16.mxu0 %v491_v5  ;;  %302 = vmatprep.subr.bf16.mxu1 %v493_v6  ;;  %v503_v13 = vld [vmem:[%s712_s1 + $0x84] ss:$16 sps:$4 sm:$0xff]   ;;  %v505_v14 = vld [vmem:[%s712_s1 + $0x8c] ss:$16 sps:$4 sm:$0xff]   ;;  %v507_v15 = vld [vmem:[%s712_s1 + $0x80] ss:$16 sps:$4 sm:$0xff]  }
   0x6   :  { %v508_v16 = vld [vmem:[%s712_s1 + $0x88] ss:$16 sps:$4 sm:$0xff]   ;;  %v509_v17 = vld [vmem:[%s712_s1 + $0x64] ss:$16 sps:$4 sm:$0xff]   ;;  %v511_v18 = vld [vmem:[%s712_s1 + $0x6c] ss:$16 sps:$4 sm:$0xff]  }
   0x7   :  { %v513_v19 = vld [vmem:[%s712_s1 + $0x60] ss:$16 sps:$4 sm:$0xff]   ;;  %v514_v20 = vld [vmem:[%s712_s1 + $0x68] ss:$16 sps:$4 sm:$0xff]   ;;  %v515_v21 = vld [vmem:[%s712_s1 + $0x44] ss:$16 sps:$4 sm:$0xff]  }
   0x8   :  { %250 = vmatpush1.bf16.msra.mxu0 %v495_v7  ;;  %303 = vmatpush1.bf16.msra.mxu1 %v496_v8  ;;  %v517_v22 = vld [vmem:[%s712_s1 + $0x4c] ss:$16 sps:$4 sm:$0xff]   ;;  %v519_v23 = vld [vmem:[%s712_s1 + $0x40] ss:$16 sps:$4 sm:$0xff]   ;;  %v520_v24 = vld [vmem:[%s712_s1 + $0x48] ss:$16 sps:$4 sm:$0xff]  }
   0x9   :  { %251 = vmatprep.subr.bf16.mxu0 %v497_v9  ;;  %304 = vmatprep.subr.bf16.mxu1 %v499_v10  ;;  %v521_v25 = vld [vmem:[%s712_s1 + $0x24] ss:$16 sps:$4 sm:$0xff]   ;;  %v523_v26 = vld [vmem:[%s712_s1 + $0x2c] ss:$16 sps:$4 sm:$0xff]   ;;  %v525_v28 = vld [vmem:[%s712_s1 + $0x20] ss:$16 sps:$4 sm:$0xff]  }
   0xa   :  { %v51_v27 = vld [vmem:[%s714_s2] sm:$0xff]  ;;  %v526_v29 = vld [vmem:[%s712_s1 + $0x28] ss:$16 sps:$4 sm:$0xff]   ;;  %v53_v30 = vld [vmem:[%s714_s2 + $0x10] sm:$0xff] }
   0xb   :  { %v527_v31 = vld [vmem:[%s712_s1 + $0x4] ss:$16 sps:$4 sm:$0xff]   ;;  %v529_v32 = vld [vmem:[%s712_s1 + $0xc] ss:$16 sps:$4 sm:$0xff]   ;;  %57 = vperm.xlu0 %483, %v51_v27   ;;  %67 = vperm.xlu1 %484, %v53_v30   ;;  %v531_v35 = vld [vmem:[%s712_s1] ss:$16 sps:$4 sm:$0xff]  }
   0xc   :  { %252 = vmatpush1.bf16.msra.mxu0 %v501_v11  ;;  %305 = vmatpush1.bf16.msra.mxu1 %v502_v12  ;;  %v52_v33 = vld [vmem:[%s714_s2 + $0x8] sm:$0xff]  ;;  %v54_v34 = vld [vmem:[%s714_s2 + $0x18] sm:$0xff]  ;;  %v533_v37 = vld [vmem:[%s713_s0] sm:$0xff]  }
   0xd   :  { %253 = vmatprep.subr.bf16.mxu0 %v503_v13  ;;  %306 = vmatprep.subr.bf16.mxu1 %v505_v14  ;;  %v532_v36 = vld [vmem:[%s712_s1 + $0x8] ss:$16 sps:$4 sm:$0xff]   ;;  %vm676_vm2 = vmor %vm419_vm1, %vm418_vm0 }
   0xe   :  { %v534_v38 = vld [vmem:[%s713_s0 + $0x8] sm:$0xff]  }
   0xf   :  { %62 = vperm.xlu0 %483, %v52_v33   ;;  %72 = vperm.xlu1 %484, %v54_v34  }
  0x10   :  { %254 = vmatpush1.bf16.msra.mxu0 %v507_v15  ;;  %307 = vmatpush1.bf16.msra.mxu1 %v508_v16 }
  0x11   :  { %255 = vmatprep.subr.bf16.mxu0 %v509_v17  ;;  %308 = vmatprep.subr.bf16.mxu1 %v511_v18 }
  0x14   :  { %256 = vmatpush1.bf16.msra.mxu0 %v513_v19  ;;  %309 = vmatpush1.bf16.msra.mxu1 %v514_v20 }
  0x15   :  { %257 = vmatprep.subr.bf16.mxu0 %v515_v21  ;;  %310 = vmatprep.subr.bf16.mxu1 %v517_v22 }
  0x18   :  { %258 = vmatpush1.bf16.msra.mxu0 %v519_v23  ;;  %311 = vmatpush1.bf16.msra.mxu1 %v520_v24 }
  0x19   :  { %259 = vmatprep.subr.bf16.mxu0 %v521_v25  ;;  %312 = vmatprep.subr.bf16.mxu1 %v523_v26 }
  0x1c   :  { %260 = vmatpush1.bf16.msra.mxu0 %v525_v28  ;;  %313 = vmatpush1.bf16.msra.mxu1 %v526_v29 }
  0x1d   :  { %261 = vmatprep.subr.bf16.mxu0 %v527_v31  ;;  %314 = vmatprep.subr.bf16.mxu1 %v529_v32 }
  0x20   :  { %262 = vmatpush1.bf16.msra.mxu0 %v531_v35  ;;  %315 = vmatpush1.bf16.msra.mxu1 %v532_v36 }
  0x23   :  { %280 = vmatmul.mubr.bf16.vlgmr.msra.gmra.mxu0 %v533_v37  ;;  %333 = vmatmul.mubr.bf16.vlgmr.msra.gmra.mxu1 %v533_v37 }
  0x24   :  { %289 = vmatprep.mubr.bf16.mxu0 %v535_v1  ;;  %342 = vmatprep.mubr.bf16.mxu1 %v535_v1 }
  0x2b   :  { %290 = vmatmul.mubr.bf16.gmra.mxu0 %v534_v38  ;;  %343 = vmatmul.mubr.bf16.gmra.mxu1 %v534_v38 }
  0x86   :  { %v58_v39 = vpop.permute.xlu0 %57  ;;  %v68_v62 = vpop.permute.xlu1 %67 }
  0x8a   :  { %v63_v48 = vpop.permute.xlu0 %62  ;;  %v73_v19 = vpop.permute.xlu1 %72 }
  0xe3   :  { %v281_v40 = vpop.f32.mrf.mxu0  ;;  %v334_v41 = vpop.f32.mrf.mxu1 }
  0xe4   :  { %v282_v42 = vadd.f32 %v281_v40, %v58_v39  ;;  %v335_v43 = vadd.f32 %v334_v41, %v58_v39 }
  0xe5   :  { %v283_v44 = vpop.f32.mrf.mxu0  ;;  %v336_v45 = vpop.f32.mrf.mxu1 }
  0xe6   :  { %v284_v46 = vadd.f32 %v283_v44, %v58_v39  ;;  %v337_v47 = vadd.f32 %v336_v45, %v58_v39  ;;  %v353_v51 = vmax.f32 %v282_v42, 0.0  ;;  %v355_v52 = vmax.f32 %v335_v43, 0.0 }
  0xe7   :  { %v285_v49 = vpop.f32.mrf.mxu0  ;;  %v338_v50 = vpop.f32.mrf.mxu1 }
  0xe8   :  { %v354_v53 = vmax.f32 %v284_v46, 0.0  ;;  %v356_v54 = vmax.f32 %v337_v47, 0.0  ;;  %v286_v56 = vadd.f32 %v285_v49, %v63_v48  ;;  %v339_v57 = vadd.f32 %v338_v50, %v63_v48 }
  0xe9   :  { %v287_v58 = vpop.f32.mrf.mxu0  ;;  %v340_v59 = vpop.f32.mrf.mxu1 }
  0xea   :  { %v474_v60 = vpack.c.bf16 %v354_v53, %v353_v51  ;;  %v475_v61 = vpack.c.bf16 %v356_v54, %v355_v52  ;;  %v288_v63 = vadd.f32 %v287_v58, %v63_v48  ;;  %v341_v0 = vadd.f32 %v340_v59, %v63_v48 }
  0xeb   :  { %v291_v1 = vpop.f32.mrf.mxu0  ;;  %v344_v2 = vpop.f32.mrf.mxu1  ;;  %v357_v5 = vmax.f32 %v286_v56, 0.0  ;;  %v359_v6 = vmax.f32 %v339_v57, 0.0 }
  0xec   :  { %417 = vst [vmem:[%s715_s3] sm:$0xff] %v474_v60  ;;  %421 = vst.msk [vmem:[%s715_s3 + $0x8] sm:$0xff] %vm676_vm2, %v475_v61  ;;  %v292_v3 = vadd.f32 %v291_v1, %v68_v62  ;;  %v345_v4 = vadd.f32 %v344_v2, %v68_v62  ;;  %v358_v7 = vmax.f32 %v288_v63, 0.0  ;;  %v360_v8 = vmax.f32 %v341_v0, 0.0 }
  0xed   :  { %v293_v9 = vpop.f32.mrf.mxu0  ;;  %v346_v10 = vpop.f32.mrf.mxu1 }
  0xee   :  { %v294_v11 = vadd.f32 %v293_v9, %v68_v62  ;;  %v347_v12 = vadd.f32 %v346_v10, %v68_v62  ;;  %v476_v13 = vpack.c.bf16 %v358_v7, %v357_v5  ;;  %v477_v14 = vpack.c.bf16 %v360_v8, %v359_v6 }
  0xef   :  { %v295_v15 = vpop.f32.mrf.mxu0  ;;  %v348_v16 = vpop.f32.mrf.mxu1  ;;  %v361_v17 = vmax.f32 %v292_v3, 0.0  ;;  %v363_v18 = vmax.f32 %v345_v4, 0.0 }
  0xf0   :  { %v362_v20 = vmax.f32 %v294_v11, 0.0  ;;  %v364_v21 = vmax.f32 %v347_v12, 0.0  ;;  %422 = vst [vmem:[%s715_s3 + $0x10] sm:$0xff] %v476_v13  ;;  %423 = vst.msk [vmem:[%s715_s3 + $0x18] sm:$0xff] %vm676_vm2, %v477_v14  ;;  %v296_v22 = vadd.f32 %v295_v15, %v73_v19  ;;  %v349_v23 = vadd.f32 %v348_v16, %v73_v19 }
  0xf1   :  { %v297_v24 = vpop.f32.mrf.mxu0  ;;  %v350_v25 = vpop.f32.mrf.mxu1 }
  0xf2   :  { %v478_v26 = vpack.c.bf16 %v362_v20, %v361_v17  ;;  %v479_v27 = vpack.c.bf16 %v364_v21, %v363_v18  ;;  %v298_v28 = vadd.f32 %v297_v24, %v73_v19  ;;  %v351_v29 = vadd.f32 %v350_v25, %v73_v19 }
  0xf3   :  { %v365_v30 = vmax.f32 %v296_v22, 0.0  ;;  %v367_v31 = vmax.f32 %v349_v23, 0.0 }
  0xf4   :  { %424 = vst [vmem:[%s715_s3 + $0x20] sm:$0xff] %v478_v26  ;;  %425 = vst.msk [vmem:[%s715_s3 + $0x28] sm:$0xff] %vm676_vm2, %v479_v27  ;;  %v366_v32 = vmax.f32 %v298_v28, 0.0  ;;  %v368_v33 = vmax.f32 %v351_v29, 0.0 }
  0xf6   :  { %v480_v34 = vpack.c.bf16 %v366_v32, %v365_v30  ;;  %v481_v35 = vpack.c.bf16 %v368_v33, %v367_v31 }
  0xf8   :  { %426 = vst [vmem:[%s715_s3 + $0x30] sm:$0xff] %v480_v34  ;;  %427 = vst.msk [vmem:[%s715_s3 + $0x38] sm:$0xff] %vm676_vm2, %v481_v35 }

// kernel: vae_forward.10
= control target key start
LH: loop header
LB: loop body
LE: loop exit
PB: predicated region body
PF: predicated region fallthrough
CT: control target
= control target key end

     0   :  { %v491_v1 = vmov 0   ;;  %vm370_vm0 = vcmask 666624   ;;  %s634_s1 = inlined_call_operand.vmem [shape: bf16[128,338], index: 1, kind: input, shape index: {}]   ;;  %s635_s0 = inlined_call_operand.vmem [shape: bf16[32,128], index: 0, kind: input, shape index: {}]   ;;  %s636_s2 = inlined_call_operand.vmem [shape: f32[32,1], index: 2, kind: input, shape index: {}]   ;;  %s637_s3 = inlined_call_operand.vmem [shape: bf16[32,338], index: 3, kind: output, shape index: {}]  }
   0x1   :  { %v457_v0 = vld [vmem:[%s634_s1 + $0xac] ss:$12 sps:$4 sm:$0xff]   ;;  %247 = vmatprep.mubr.bf16.mxu0 %v491_v1  ;;  %455 = vset.pattern.permute.xlu0 %v491_v1  ;;  %v459_v2 = vld [vmem:[%s634_s1 + $0xa8] ss:$12 sps:$4 sm:$0xff]   ;;  %v460_v3 = vld [vmem:[%s634_s1 + $0xb0] ss:$12 sps:$4 sm:$0xff]  }
   0x2   :  { %456 = vset.pattern.permute.xlu1 %v491_v1  ;;  %215 = vmatprep.subr.bf16.mxu0 %v457_v0  ;;  %v461_v4 = vld [vmem:[%s634_s1 + $0x94] ss:$12 sps:$4 sm:$0xff]   ;;  %v463_v5 = vld [vmem:[%s634_s1 + $0x90] ss:$12 sps:$4 sm:$0xff]   ;;  %v464_v6 = vld [vmem:[%s634_s1 + $0x98] ss:$12 sps:$4 sm:$0xff]  }
   0x3   :  { %216 = vmatpush1.bf16.msra.mxu0 %v459_v2  ;;  %434 = vmatprep.subr.bf16.mxu1 %v460_v3  ;;  %v465_v7 = vld [vmem:[%s634_s1 + $0x7c] ss:$12 sps:$4 sm:$0xff]   ;;  %v468_v8 = vld [vmem:[%s634_s1 + $0x80] ss:$12 sps:$4 sm:$0xff]   ;;  %v467_v9 = vld [vmem:[%s634_s1 + $0x78] ss:$12 sps:$4 sm:$0xff]  }
   0x4   :  { %435 = vmatpush3.bf16.msra.mxu1 %v460_v3  ;;  %217 = vmatprep.subr.bf16.mxu0 %v461_v4  ;;  %v469_v10 = vld [vmem:[%s634_s1 + $0x64] ss:$12 sps:$4 sm:$0xff]   ;;  %v472_v11 = vld [vmem:[%s634_s1 + $0x68] ss:$12 sps:$4 sm:$0xff]   ;;  %v471_v12 = vld [vmem:[%s634_s1 + $0x60] ss:$12 sps:$4 sm:$0xff]  }
   0x5   :  { %436 = vmatprep.subr.bf16.mxu1 %v464_v6  ;;  %v473_v13 = vld [vmem:[%s634_s1 + $0x4c] ss:$12 sps:$4 sm:$0xff]   ;;  %v476_v14 = vld [vmem:[%s634_s1 + $0x50] ss:$12 sps:$4 sm:$0xff]   ;;  %v475_v15 = vld [vmem:[%s634_s1 + $0x48] ss:$12 sps:$4 sm:$0xff]  }
   0x6   :  { %v477_v16 = vld [vmem:[%s634_s1 + $0x34] ss:$12 sps:$4 sm:$0xff]   ;;  %v479_v17 = vld [vmem:[%s634_s1 + $0x30] ss:$12 sps:$4 sm:$0xff]   ;;  %v480_v18 = vld [vmem:[%s634_s1 + $0x38] ss:$12 sps:$4 sm:$0xff]  }
   0x7   :  { %218 = vmatpush1.bf16.msra.mxu0 %v463_v5  ;;  %v489_v19 = vld [vmem:[%s635_s0] sm:$0xff]   ;;  %v481_v20 = vld [vmem:[%s634_s1 + $0x1c] ss:$12 sps:$4 sm:$0xff]   ;;  %v53_v22 = vld [vmem:[%s636_s2 + $0x10] sm:$0xff] }
   0x8   :  { %219 = vmatprep.subr.bf16.mxu0 %v465_v7  ;;  %437 = vmatpush3.bf16.msra.mxu1 %v464_v6  ;;  %v51_v21 = vld [vmem:[%s636_s2] sm:$0xff]  ;;  %v52_v25 = vld [vmem:[%s636_s2 + $0x8] sm:$0xff]  ;;  %v54_v27 = vld [vmem:[%s636_s2 + $0x18] sm:$0xff] }
   0x9   :  { %438 = vmatprep.subr.bf16.mxu1 %v468_v8  ;;  %450 = vmatprep.mubr.bf16.mxu1 %v489_v19  ;;  %v484_v23 = vld [vmem:[%s634_s1 + $0x20] ss:$12 sps:$4 sm:$0xff]   ;;  %v483_v24 = vld [vmem:[%s634_s1 + $0x18] ss:$12 sps:$4 sm:$0xff]   ;;  %v488_v28 = vld [vmem:[%s634_s1 + $0x8] ss:$12 sps:$4 sm:$0xff]  }
   0xa   :  { %57 = vperm.xlu0 %455, %v51_v21   ;;  %67 = vperm.xlu1 %456, %v53_v22   ;;  %v485_v26 = vld [vmem:[%s634_s1 + $0x4] ss:$12 sps:$4 sm:$0xff]   ;;  %v487_v29 = vld [vmem:[%s634_s1] ss:$12 sps:$4 sm:$0xff]  }
   0xb   :  { %220 = vmatpush1.bf16.msra.mxu0 %v467_v9  ;;  %v490_v30 = vld [vmem:[%s635_s0 + $0x8] sm:$0xff]  }
   0xc   :  { %221 = vmatprep.subr.bf16.mxu0 %v469_v10  ;;  %439 = vmatpush3.bf16.msra.mxu1 %v468_v8 }
   0xd   :  { %440 = vmatprep.subr.bf16.mxu1 %v472_v11 }
   0xe   :  { %62 = vperm.xlu0 %455, %v52_v25   ;;  %72 = vperm.xlu1 %456, %v54_v27  }
   0xf   :  { %222 = vmatpush1.bf16.msra.mxu0 %v471_v12 }
  0x10   :  { %223 = vmatprep.subr.bf16.mxu0 %v473_v13  ;;  %441 = vmatpush3.bf16.msra.mxu1 %v472_v11 }
  0x11   :  { %442 = vmatprep.subr.bf16.mxu1 %v476_v14 }
  0x13   :  { %224 = vmatpush1.bf16.msra.mxu0 %v475_v15 }
  0x14   :  { %225 = vmatprep.subr.bf16.mxu0 %v477_v16  ;;  %443 = vmatpush3.bf16.msra.mxu1 %v476_v14 }
  0x15   :  { %444 = vmatprep.subr.bf16.mxu1 %v480_v18 }
  0x17   :  { %226 = vmatpush1.bf16.msra.mxu0 %v479_v17 }
  0x18   :  { %227 = vmatprep.subr.bf16.mxu0 %v481_v20  ;;  %445 = vmatpush3.bf16.msra.mxu1 %v480_v18 }
  0x19   :  { %446 = vmatprep.subr.bf16.mxu1 %v484_v23 }
  0x1b   :  { %228 = vmatpush1.bf16.msra.mxu0 %v483_v24 }
  0x1c   :  { %229 = vmatprep.subr.bf16.mxu0 %v485_v26  ;;  %447 = vmatpush3.bf16.msra.mxu1 %v484_v23 }
  0x1d   :  { %448 = vmatprep.subr.bf16.mxu1 %v488_v28 }
  0x1f   :  { %230 = vmatpush1.bf16.msra.mxu0 %v487_v29 }
  0x20   :  { %449 = vmatpush3.bf16.msra.mxu1 %v488_v28 }
  0x22   :  { %248 = vmatmul.mubr.bf16.vlgmr.msra.gmra.mxu0 %v489_v19 }
  0x23   :  { %257 = vmatprep.mubr.bf16.mxu0 %v491_v1  ;;  %451 = vmatmul.mubr.bf16.vlgmr.msra.gmra.mxu1 %v490_v30 }
  0x2a   :  { %258 = vmatmul.mubr.bf16.gmra.mxu0 %v490_v30 }
  0x85   :  { %v58_v31 = vpop.permute.xlu0 %57  ;;  %v68_v32 = vpop.permute.xlu1 %67 }
  0x89   :  { %v63_v39 = vpop.permute.xlu0 %62  ;;  %v73_v46 = vpop.permute.xlu1 %72 }
  0xe2   :  { %v249_v33 = vpop.f32.mrf.mxu0 }
  0xe3   :  { %v250_v34 = vadd.f32 %v249_v33, %v58_v31  ;;  %v452_v36 = vpop.f32.mrf.mxu1 }
  0xe4   :  { %v251_v35 = vpop.f32.mrf.mxu0  ;;  %v311_v38 = vadd.f32 %v452_v36, %v68_v32 }
  0xe5   :  { %v252_v37 = vadd.f32 %v251_v35, %v58_v31  ;;  %v302_v41 = vpop.f32.mrf.mxu1  ;;  %v317_v42 = vmax.f32 %v250_v34, 0.0 }
  0xe6   :  { %v253_v40 = vpop.f32.mrf.mxu0  ;;  %v325_v44 = vmax.f32 %v311_v38, 0.0  ;;  %v303_v45 = vadd.f32 %v302_v41, %v58_v31 }
  0xe7   :  { %v318_v43 = vmax.f32 %v252_v37, 0.0  ;;  %v254_v47 = vadd.f32 %v253_v40, %v63_v39  ;;  %v453_v49 = vpop.f32.mrf.mxu1 }
  0xe8   :  { %v255_v48 = vpop.f32.mrf.mxu0  ;;  %v421_v51 = vpack.c.bf16 %v325_v44, %v325_v44  ;;  %v319_v52 = vmax.f32 %v303_v45, 0.0  ;;  %v314_v54 = vadd.f32 %v453_v49, %v73_v46 }
  0xe9   :  { %v416_v50 = vpack.c.bf16 %v318_v43, %v317_v42  ;;  %v256_v53 = vadd.f32 %v255_v48, %v63_v39  ;;  %v305_v56 = vpop.f32.mrf.mxu1  ;;  %v320_v60 = vmax.f32 %v254_v47, 0.0 }
  0xea   :  { %v259_v55 = vpop.f32.mrf.mxu0  ;;  %375 = vst.msk [vmem:[%s637_s3 + $0x20] sm:$0xf] %vm370_vm0, %v421_v51  ;;  %v417_v57 = vpack.c.bf16 %v319_v52, %v319_v52  ;;  %v306_v59 = vadd.f32 %v305_v56, %v63_v39  ;;  %v328_v62 = vmax.f32 %v314_v54, 0.0 }
  0xeb   :  { %369 = vst [vmem:[%s637_s3] sm:$0xff] %v416_v50  ;;  %v260_v58 = vadd.f32 %v259_v55, %v68_v32  ;;  %v321_v61 = vmax.f32 %v256_v53, 0.0 }
  0xec   :  { %v261_v63 = vpop.f32.mrf.mxu0  ;;  %371 = vst.msk [vmem:[%s637_s3 + $0x8] sm:$0xf] %vm370_vm0, %v417_v57  ;;  %v322_v0 = vmax.f32 %v306_v59, 0.0  ;;  %v423_v3 = vpack.c.bf16 %v328_v62, %v328_v62 }
  0xed   :  { %v262_v1 = vadd.f32 %v261_v63, %v68_v32  ;;  %v418_v2 = vpack.c.bf16 %v321_v61, %v320_v60  ;;  %v323_v5 = vmax.f32 %v260_v58, 0.0 }
  0xee   :  { %v263_v4 = vpop.f32.mrf.mxu0  ;;  %v419_v6 = vpack.c.bf16 %v322_v0, %v322_v0  ;;  %377 = vst.msk [vmem:[%s637_s3 + $0x2c] sm:$0xf] %vm370_vm0, %v423_v3 }
  0xef   :  { %v324_v7 = vmax.f32 %v262_v1, 0.0  ;;  %v264_v8 = vadd.f32 %v263_v4, %v73_v46  ;;  %372 = vst [vmem:[%s637_s3 + $0xc] sm:$0xff] %v418_v2 }
  0xf0   :  { %v265_v9 = vpop.f32.mrf.mxu0  ;;  %373 = vst.msk [vmem:[%s637_s3 + $0x14] sm:$0xf] %vm370_vm0, %v419_v6 }
  0xf1   :  { %v420_v10 = vpack.c.bf16 %v324_v7, %v323_v5  ;;  %v266_v11 = vadd.f32 %v265_v9, %v73_v46  ;;  %v326_v12 = vmax.f32 %v264_v8, 0.0 }
  0xf3   :  { %374 = vst [vmem:[%s637_s3 + $0x18] sm:$0xff] %v420_v10  ;;  %v327_v13 = vmax.f32 %v266_v11, 0.0 }
  0xf5   :  { %v422_v14 = vpack.c.bf16 %v327_v13, %v326_v12 }
  0xf7   :  { %376 = vst [vmem:[%s637_s3 + $0x24] sm:$0xff] %v422_v14 }

// kernel: vae_forward.12
= control target key start
LH: loop header
LB: loop body
LE: loop exit
PB: predicated region body
PF: predicated region fallthrough
CT: control target
= control target key end

     0   :  { %v1005_v1 = vmov 0   ;;  %vm509_vm0 = vcmask 261120   ;;  %s1314_s1 = inlined_call_operand.vmem [shape: bf16[288,512], index: 1, kind: input, shape index: {}]   ;;  %s1315_s0 = inlined_call_operand.vmem [shape: bf16[32,288], index: 0, kind: input, shape index: {}]   ;;  %s1316_s2 = inlined_call_operand.vmem [shape: f32[32,1], index: 2, kind: input, shape index: {}]   ;;  %s1317_s3 = inlined_call_operand.vmem [shape: bf16[32,512], index: 3, kind: output, shape index: {}]  }
   0x1   :  { %v889_v0 = vld [vmem:[%s1314_s1 + $0xe4] ss:$16 sps:$4 sm:$0xff]   ;;  %601 = vmatprep.mubr.bf16.mxu1 %v1005_v1  ;;  %887 = vset.pattern.permute.xlu0 %v1005_v1  ;;  %v891_v2 = vld [vmem:[%s1314_s1 + $0xe0] ss:$16 sps:$4 sm:$0xff]   ;;  %v904_v11 = vld [vmem:[%s1314_s1 + $0xe8] ss:$16 sps:$4 sm:$0xff]  }
   0x2   :  { %888 = vset.pattern.permute.xlu1 %v1005_v1  ;;  %516 = vmatprep.subr.bf16.mxu0 %v889_v0  ;;  %v892_v3 = vld [vmem:[%s1314_s1 + $0x224] ss:$16 sps:$4 sm:$0xff]   ;;  %v894_v4 = vld [vmem:[%s1314_s1 + $0x220] ss:$16 sps:$4 sm:$0xff]   ;;  %v906_v12 = vld [vmem:[%s1314_s1 + $0xec] ss:$16 sps:$4 sm:$0xff]  }
   0x3   :  { %517 = vmatpush1.bf16.msra.mxu0 %v891_v2  ;;  %v895_v5 = vld [vmem:[%s1314_s1 + $0xc4] ss:$16 sps:$4 sm:$0xff]   ;;  %v897_v6 = vld [vmem:[%s1314_s1 + $0xc0] ss:$16 sps:$4 sm:$0xff]   ;;  %581 = vmatprep.subr.bf16.mxu1 %v892_v3  ;;  %v913_v16 = vld [vmem:[%s1314_s1 + $0xcc] ss:$16 sps:$4 sm:$0xff]  }
   0x4   :  { %v898_v7 = vld [vmem:[%s1314_s1 + $0x204] ss:$16 sps:$4 sm:$0xff]   ;;  %582 = vmatpush1.bf16.msra.mxu1 %v894_v4  ;;  %518 = vmatprep.subr.bf16.mxu0 %v895_v5  ;;  %v900_v8 = vld [vmem:[%s1314_s1 + $0x200] ss:$16 sps:$4 sm:$0xff]   ;;  %v911_v18 = vld [vmem:[%s1314_s1 + $0xc8] ss:$16 sps:$4 sm:$0xff]  }
   0x5   :  { %583 = vmatprep.subr.bf16.mxu1 %v898_v7  ;;  %v901_v9 = vld [vmem:[%s1314_s1 + $0xa4] ss:$16 sps:$4 sm:$0xff]   ;;  %v903_v10 = vld [vmem:[%s1314_s1 + $0xa0] ss:$16 sps:$4 sm:$0xff]   ;;  %v919_v19 = vld [vmem:[%s1314_s1 + $0xac] ss:$16 sps:$4 sm:$0xff]  }
   0x6   :  { %v1068_v13 = vld [vmem:[%s1315_s0 + $0x8] ss:$12 sps:$4 sm:$0xff]   ;;  %v910_v15 = vld [vmem:[%s1314_s1 + $0x80] ss:$16 sps:$4 sm:$0xff]   ;;  %v925_v23 = vld [vmem:[%s1314_s1 + $0x8c] ss:$16 sps:$4 sm:$0xff]  }
   0x7   :  { %519 = vmatpush1.bf16.msra.mxu0 %v897_v6  ;;  %v908_v14 = vld [vmem:[%s1314_s1 + $0x84] ss:$16 sps:$4 sm:$0xff]   ;;  %v916_v20 = vld [vmem:[%s1314_s1 + $0x60] ss:$16 sps:$4 sm:$0xff]   ;;  %v917_v22 = vld [vmem:[%s1314_s1 + $0xa8] ss:$16 sps:$4 sm:$0xff]  }
   0x8   :  { %520 = vmatprep.subr.bf16.mxu0 %v901_v9  ;;  %584 = vmatpush1.bf16.msra.mxu1 %v900_v8  ;;  %v914_v17 = vld [vmem:[%s1314_s1 + $0x64] ss:$16 sps:$4 sm:$0xff]   ;;  %v922_v24 = vld [vmem:[%s1314_s1 + $0x40] ss:$16 sps:$4 sm:$0xff]   ;;  %v923_v26 = vld [vmem:[%s1314_s1 + $0x88] ss:$16 sps:$4 sm:$0xff]  }
   0x9   :  { %622 = vmatprep.subr.bf16.mxu1 %v906_v12  ;;  %v920_v21 = vld [vmem:[%s1314_s1 + $0x44] ss:$16 sps:$4 sm:$0xff]   ;;  %v931_v27 = vld [vmem:[%s1314_s1 + $0x6c] ss:$16 sps:$4 sm:$0xff]   ;;  %v928_v28 = vld [vmem:[%s1314_s1 + $0x20] ss:$16 sps:$4 sm:$0xff]  }
   0xa   :  { %v926_v25 = vld [vmem:[%s1314_s1 + $0x24] ss:$16 sps:$4 sm:$0xff]   ;;  %v929_v30 = vld [vmem:[%s1314_s1 + $0x68] ss:$16 sps:$4 sm:$0xff]   ;;  %v937_v31 = vld [vmem:[%s1314_s1 + $0x4c] ss:$16 sps:$4 sm:$0xff]  }
   0xb   :  { %521 = vmatpush1.bf16.msra.mxu0 %v903_v10  ;;  %866 = vmatmul.mubr.msk.bf16.vlgmr.msra.gmra.mxu1 %vm509_vm0, %v1068_v13  ;;  %v932_v29 = vld [vmem:[%s1314_s1 + $0x4] ss:$16 sps:$4 sm:$0xff]   ;;  %v934_v32 = vld [vmem:[%s1314_s1] ss:$16 sps:$4 sm:$0xff]   ;;  %v935_v34 = vld [vmem:[%s1314_s1 + $0x48] ss:$16 sps:$4 sm:$0xff]  }
   0xc   :  { %522 = vmatprep.subr.bf16.mxu0 %v908_v14  ;;  %623 = vmatpush1.bf16.msra.mxu1 %v904_v11  ;;  %v938_v33 = vld [vmem:[%s1314_s1 + $0x1e4] ss:$16 sps:$4 sm:$0xff]   ;;  %v943_v35 = vld [vmem:[%s1314_s1 + $0x2c] ss:$16 sps:$4 sm:$0xff]   ;;  %v940_v36 = vld [vmem:[%s1314_s1 + $0x1e0] ss:$16 sps:$4 sm:$0xff]  }
   0xd   :  { %611 = vmatprep.mubr.bf16.mxu1 %v1005_v1  ;;  %624 = vmatprep.subr.bf16.mxu1 %v913_v16  ;;  %v944_v37 = vld [vmem:[%s1314_s1 + $0x1c4] ss:$16 sps:$4 sm:$0xff]   ;;  %v941_v38 = vld [vmem:[%s1314_s1 + $0x28] ss:$16 sps:$4 sm:$0xff]   ;;  %v949_v39 = vld [vmem:[%s1314_s1 + $0xc] ss:$16 sps:$4 sm:$0xff]  }
   0xe   :  { %v946_v40 = vld [vmem:[%s1314_s1 + $0x1c0] ss:$16 sps:$4 sm:$0xff]   ;;  %v950_v41 = vld [vmem:[%s1314_s1 + $0x1a4] ss:$16 sps:$4 sm:$0xff]   ;;  %v947_v42 = vld [vmem:[%s1314_s1 + $0x8] ss:$16 sps:$4 sm:$0xff]  }
   0xf   :  { %523 = vmatpush1.bf16.msra.mxu0 %v910_v15  ;;  %v955_v43 = vld [vmem:[%s1314_s1 + $0x1ec] ss:$16 sps:$4 sm:$0xff]   ;;  %v952_v44 = vld [vmem:[%s1314_s1 + $0x1a0] ss:$16 sps:$4 sm:$0xff]   ;;  %v956_v45 = vld [vmem:[%s1314_s1 + $0x184] ss:$16 sps:$4 sm:$0xff]  }
  0x10   :  { %524 = vmatprep.subr.bf16.mxu0 %v914_v17  ;;  %625 = vmatpush1.bf16.msra.mxu1 %v911_v18  ;;  %v953_v46 = vld [vmem:[%s1314_s1 + $0x1e8] ss:$16 sps:$4 sm:$0xff]   ;;  %v961_v47 = vld [vmem:[%s1314_s1 + $0x1cc] ss:$16 sps:$4 sm:$0xff]   ;;  %v958_v48 = vld [vmem:[%s1314_s1 + $0x180] ss:$16 sps:$4 sm:$0xff]  }
  0x11   :  { %626 = vmatprep.subr.bf16.mxu1 %v919_v19  ;;  %v959_v49 = vld [vmem:[%s1314_s1 + $0x1c8] ss:$16 sps:$4 sm:$0xff]   ;;  %v962_v50 = vld [vmem:[%s1314_s1 + $0x164] ss:$16 sps:$4 sm:$0xff]   ;;  %v964_v52 = vld [vmem:[%s1314_s1 + $0x160] ss:$16 sps:$4 sm:$0xff]  }
  0x12   :  { %v988_v51 = vld [vmem:[%s1315_s0 + $0x4] ss:$12 sps:$4 sm:$0xff]   ;;  %v967_v53 = vld [vmem:[%s1314_s1 + $0x1ac] ss:$16 sps:$4 sm:$0xff]   ;;  %v965_v56 = vld [vmem:[%s1314_s1 + $0x1a8] ss:$16 sps:$4 sm:$0xff]  }
  0x13   :  { %525 = vmatpush1.bf16.msra.mxu0 %v916_v20  ;;  %548 = vmatprep.mubr.bf16.mxu0 %v988_v51  ;;  %v1196_v54 = vld [vmem:[%s1315_s0 + $0x20] ss:$12 sps:$4 sm:$0xff]   ;;  %v968_v55 = vld [vmem:[%s1314_s1 + $0x144] ss:$16 sps:$4 sm:$0xff]   ;;  %v971_v61 = vld [vmem:[%s1314_s1 + $0x188] ss:$16 sps:$4 sm:$0xff]  }
  0x14   :  { %526 = vmatprep.subr.bf16.mxu0 %v920_v21  ;;  %627 = vmatpush1.bf16.msra.mxu1 %v917_v22  ;;  %v973_v57 = vld [vmem:[%s1314_s1 + $0x18c] ss:$16 sps:$4 sm:$0xff]   ;;  %v970_v58 = vld [vmem:[%s1314_s1 + $0x140] ss:$16 sps:$4 sm:$0xff]   ;;  %v974_v59 = vld [vmem:[%s1314_s1 + $0x124] ss:$16 sps:$4 sm:$0xff]  }
  0x15   :  { %628 = vmatprep.subr.bf16.mxu1 %v925_v23  ;;  %867 = vmatmul.mubr.msk.bf16.gmra.mxu1 %vm509_vm0, %v1196_v54  ;;  %v95_v60 = vld [vmem:[%s1316_s2] sm:$0xff]  ;;  %v97_v62 = vld [vmem:[%s1316_s2 + $0x10] sm:$0xff]  ;;  %v979_v63 = vld [vmem:[%s1314_s1 + $0x16c] ss:$16 sps:$4 sm:$0xff]  }
  0x16   :  { %654 = vmatprep.mubr.bf16.mxu1 %v988_v51  ;;  %101 = vperm.xlu0 %887, %v95_v60   ;;  %v96_v0 = vld [vmem:[%s1316_s2 + $0x8] sm:$0xff]  ;;  %v976_v2 = vld [vmem:[%s1314_s1 + $0x120] ss:$16 sps:$4 sm:$0xff]   ;;  %v98_v3 = vld [vmem:[%s1316_s2 + $0x18] sm:$0xff] }
  0x17   :  { %527 = vmatpush1.bf16.msra.mxu0 %v922_v24  ;;  %111 = vperm.xlu1 %888, %v97_v62   ;;  %v980_v4 = vld [vmem:[%s1314_s1 + $0x104] ss:$16 sps:$4 sm:$0xff]   ;;  %v977_v5 = vld [vmem:[%s1314_s1 + $0x168] ss:$16 sps:$4 sm:$0xff]   ;;  %v985_v6 = vld [vmem:[%s1314_s1 + $0x14c] ss:$16 sps:$4 sm:$0xff]  }
  0x18   :  { %528 = vmatprep.subr.bf16.mxu0 %v926_v25  ;;  %629 = vmatpush1.bf16.msra.mxu1 %v923_v26  ;;  %v982_v7 = vld [vmem:[%s1314_s1 + $0x100] ss:$16 sps:$4 sm:$0xff]   ;;  %v991_v8 = vld [vmem:[%s1314_s1 + $0x22c] ss:$16 sps:$4 sm:$0xff]   ;;  %v983_v9 = vld [vmem:[%s1314_s1 + $0x148] ss:$16 sps:$4 sm:$0xff]  }
  0x19   :  { %630 = vmatprep.subr.bf16.mxu1 %v931_v27  ;;  %v986_v10 = vld [vmem:[%s1315_s0] ss:$12 sps:$4 sm:$0xff]   ;;  %v989_v12 = vld [vmem:[%s1314_s1 + $0x228] ss:$16 sps:$4 sm:$0xff]  }
  0x1a   :  { %106 = vperm.xlu0 %887, %v96_v0   ;;  %v995_v11 = vld [vmem:[%s1314_s1 + $0x12c] ss:$16 sps:$4 sm:$0xff]   ;;  %v993_v16 = vld [vmem:[%s1314_s1 + $0x128] ss:$16 sps:$4 sm:$0xff]  }
  0x1b   :  { %529 = vmatpush1.bf16.msra.mxu0 %v928_v28  ;;  %116 = vperm.xlu1 %888, %v98_v3   ;;  %v999_v14 = vld [vmem:[%s1315_s0 + $0x1c] ss:$12 sps:$4 sm:$0xff]   ;;  %v1001_v20 = vld [vmem:[%s1315_s0 + $0x18] ss:$12 sps:$4 sm:$0xff]  }
  0x1c   :  { %530 = vmatprep.subr.bf16.mxu0 %v932_v29  ;;  %631 = vmatpush1.bf16.msra.mxu1 %v929_v30  ;;  %v1004_v15 = vld [vmem:[%s1314_s1 + $0x20c] ss:$16 sps:$4 sm:$0xff]   ;;  %v1002_v18 = vld [vmem:[%s1314_s1 + $0x208] ss:$16 sps:$4 sm:$0xff]  }
  0x1d   :  { %632 = vmatprep.subr.bf16.mxu1 %v937_v31  ;;  %v998_v17 = vld [vmem:[%s1314_s1 + $0x10c] ss:$16 sps:$4 sm:$0xff]   ;;  %v996_v19 = vld [vmem:[%s1314_s1 + $0x108] ss:$16 sps:$4 sm:$0xff]  }
  0x1f   :  { %531 = vmatpush1.bf16.msra.mxu0 %v934_v32 }
  0x20   :  { %532 = vmatprep.subr.bf16.mxu0 %v938_v33  ;;  %633 = vmatpush1.bf16.msra.mxu1 %v935_v34 }
  0x21   :  { %634 = vmatprep.subr.bf16.mxu1 %v943_v35 }
  0x23   :  { %533 = vmatpush2.bf16.msra.mxu0 %v940_v36 }
  0x24   :  { %534 = vmatprep.subr.bf16.mxu0 %v944_v37  ;;  %635 = vmatpush1.bf16.msra.mxu1 %v941_v38 }
  0x25   :  { %636 = vmatprep.subr.bf16.mxu1 %v949_v39 }
  0x27   :  { %535 = vmatpush2.bf16.msra.mxu0 %v946_v40 }
  0x28   :  { %536 = vmatprep.subr.bf16.mxu0 %v950_v41  ;;  %637 = vmatpush1.bf16.msra.mxu1 %v947_v42 }
  0x29   :  { %638 = vmatprep.subr.bf16.mxu1 %v955_v43 }
  0x2b   :  { %537 = vmatpush2.bf16.msra.mxu0 %v952_v44 }
  0x2c   :  { %538 = vmatprep.subr.bf16.mxu0 %v956_v45  ;;  %639 = vmatpush2.bf16.msra.mxu1 %v953_v46 }
  0x2d   :  { %640 = vmatprep.subr.bf16.mxu1 %v961_v47 }
  0x2f   :  { %539 = vmatpush2.bf16.msra.mxu0 %v958_v48 }
  0x30   :  { %540 = vmatprep.subr.bf16.mxu0 %v962_v50  ;;  %641 = vmatpush2.bf16.msra.mxu1 %v959_v49 }
  0x31   :  { %642 = vmatprep.subr.bf16.mxu1 %v967_v53 }
  0x33   :  { %541 = vmatpush2.bf16.msra.mxu0 %v964_v52 }
  0x34   :  { %542 = vmatprep.subr.bf16.mxu0 %v968_v55  ;;  %643 = vmatpush2.bf16.msra.mxu1 %v965_v56 }
  0x35   :  { %644 = vmatprep.subr.bf16.mxu1 %v973_v57 }
  0x37   :  { %543 = vmatpush2.bf16.msra.mxu0 %v970_v58 }
  0x38   :  { %544 = vmatprep.subr.bf16.mxu0 %v974_v59  ;;  %645 = vmatpush2.bf16.msra.mxu1 %v971_v61 }
  0x39   :  { %646 = vmatprep.subr.bf16.mxu1 %v979_v63 }
  0x3b   :  { %545 = vmatpush2.bf16.msra.mxu0 %v976_v2 }
  0x3c   :  { %546 = vmatprep.subr.bf16.mxu0 %v980_v4  ;;  %647 = vmatpush2.bf16.msra.mxu1 %v977_v5 }
  0x3d   :  { %648 = vmatprep.subr.bf16.mxu1 %v985_v6 }
  0x3f   :  { %547 = vmatpush2.bf16.msra.mxu0 %v982_v7 }
  0x40   :  { %687 = vmatprep.subr.bf16.mxu0 %v991_v8  ;;  %649 = vmatpush2.bf16.msra.mxu1 %v983_v9 }
  0x41   :  { %650 = vmatprep.subr.bf16.mxu1 %v995_v11 }
  0x42   :  { %549 = vmatmul.mubr.bf16.vlgmr.msra.gmra.mxu0 %v986_v10 }
  0x43   :  { %688 = vmatpush1.bf16.msra.mxu0 %v989_v12  ;;  %558 = vmatprep.mubr.bf16.mxu0 %v999_v14 }
  0x44   :  { %689 = vmatprep.subr.bf16.mxu0 %v1004_v15  ;;  %651 = vmatpush2.bf16.msra.mxu1 %v993_v16 }
  0x45   :  { %652 = vmatprep.subr.bf16.mxu1 %v998_v17 }
  0x47   :  { %690 = vmatpush1.bf16.msra.mxu0 %v1002_v18 }
  0x48   :  { %653 = vmatpush2.bf16.msra.mxu1 %v996_v19 }
  0x4a   :  { %559 = vmatmul.mubr.bf16.gmra.mxu0 %v1001_v20 }
  0x4b   :  { %707 = vmatprep.mubr.bf16.mxu0 %v1005_v1  ;;  %655 = vmatmul.mubr.bf16.vlgmr.msra.gmra.mxu1 %v986_v10 }
  0x4c   :  { %664 = vmatprep.mubr.bf16.mxu1 %v999_v14 }
  0x52   :  { %868 = vmatmul.mubr.msk.bf16.vlgmr.msra.gmra.mxu0 %vm509_vm0, %v1068_v13 }
  0x53   :  { %717 = vmatprep.mubr.bf16.mxu0 %v1005_v1  ;;  %665 = vmatmul.mubr.bf16.gmra.mxu1 %v1001_v20 }
  0x5a   :  { %869 = vmatmul.mubr.msk.bf16.gmra.mxu0 %vm509_vm0, %v1196_v54 }
  0x91   :  { %v102_v26 = vpop.permute.xlu0 %101 }
  0x92   :  { %v112_v13 = vpop.permute.xlu1 %111 }
  0x95   :  { %v107_v30 = vpop.permute.xlu0 %106 }
  0x96   :  { %v117_v45 = vpop.permute.xlu1 %116 }
  0xcb   :  { %v603_v21 = vpop.f32.mrf.mxu1 }
  0xcd   :  { %v605_v22 = vpop.f32.mrf.mxu1 }
  0xcf   :  { %v607_v23 = vpop.f32.mrf.mxu1 }
  0xd1   :  { %v609_v24 = vpop.f32.mrf.mxu1 }
  0xd5   :  { %v613_v25 = vpop.f32.mrf.mxu1 }
  0xd7   :  { %v615_v27 = vpop.f32.mrf.mxu1 }
  0xd9   :  { %v617_v32 = vpop.f32.mrf.mxu1 }
  0xdb   :  { %v619_v38 = vpop.f32.mrf.mxu1 }
 0x102   :  { %v550_v28 = vpop.f32.mrf.mxu0 }
 0x103   :  { %v551_v29 = vadd.f32 %v550_v28, %v102_v26 }
 0x104   :  { %v552_v31 = vpop.f32.mrf.mxu0 }
 0x105   :  { %v553_v33 = vadd.f32 %v552_v31, %v102_v26  ;;  %v604_v1 = vadd.f32 %v603_v21, %v551_v29 }
 0x106   :  { %v554_v34 = vpop.f32.mrf.mxu0 }
 0x107   :  { %v606_v35 = vadd.f32 %v605_v22, %v553_v33  ;;  %v555_v36 = vadd.f32 %v554_v34, %v107_v30 }
 0x108   :  { %v556_v37 = vpop.f32.mrf.mxu0 }
 0x109   :  { %v878_v39 = vpack.c.bf16 %v606_v35, %v604_v1  ;;  %v557_v40 = vadd.f32 %v556_v37, %v107_v30  ;;  %v608_v42 = vadd.f32 %v607_v23, %v555_v36 }
 0x10a   :  { %v560_v41 = vpop.f32.mrf.mxu0 }
 0x10b   :  { %776 = vst [vmem:[%s1317_s3] sm:$0xff] %v878_v39  ;;  %v610_v43 = vadd.f32 %v609_v24, %v557_v40  ;;  %v561_v44 = vadd.f32 %v560_v41, %v112_v13  ;;  %v656_v46 = vpop.f32.mrf.mxu1 }
 0x10c   :  { %v562_v47 = vpop.f32.mrf.mxu0  ;;  %v657_v57 = vadd.f32 %v656_v46, %v102_v26 }
 0x10d   :  { %v880_v48 = vpack.c.bf16 %v610_v43, %v608_v42  ;;  %v563_v49 = vadd.f32 %v562_v47, %v112_v13  ;;  %v658_v50 = vpop.f32.mrf.mxu1  ;;  %v614_v52 = vadd.f32 %v613_v25, %v561_v44 }
 0x10e   :  { %v564_v51 = vpop.f32.mrf.mxu0  ;;  %v659_v62 = vadd.f32 %v658_v50, %v102_v26 }
 0x10f   :  { %778 = vst [vmem:[%s1317_s3 + $0x10] sm:$0xff] %v880_v48  ;;  %v616_v53 = vadd.f32 %v615_v27, %v563_v49  ;;  %v565_v54 = vadd.f32 %v564_v51, %v117_v45  ;;  %v660_v55 = vpop.f32.mrf.mxu1 }
 0x110   :  { %v566_v56 = vpop.f32.mrf.mxu0  ;;  %v661_v9 = vadd.f32 %v660_v55, %v107_v30 }
 0x111   :  { %v882_v58 = vpack.c.bf16 %v616_v53, %v614_v52  ;;  %v567_v59 = vadd.f32 %v566_v56, %v117_v45  ;;  %v662_v60 = vpop.f32.mrf.mxu1  ;;  %v618_v63 = vadd.f32 %v617_v32, %v565_v54 }
 0x112   :  { %v709_v61 = vpop.f32.mrf.mxu0  ;;  %v663_v10 = vadd.f32 %v662_v60, %v107_v30 }
 0x113   :  { %780 = vst [vmem:[%s1317_s3 + $0x20] sm:$0xff] %v882_v58  ;;  %v620_v0 = vadd.f32 %v619_v38, %v567_v59  ;;  %v666_v2 = vpop.f32.mrf.mxu1  ;;  %v710_v5 = vadd.f32 %v709_v61, %v657_v57 }
 0x114   :  { %v711_v3 = vpop.f32.mrf.mxu0  ;;  %v667_v15 = vadd.f32 %v666_v2, %v112_v13 }
 0x115   :  { %v884_v4 = vpack.c.bf16 %v620_v0, %v618_v63  ;;  %v712_v6 = vadd.f32 %v711_v3, %v659_v62  ;;  %v668_v7 = vpop.f32.mrf.mxu1 }
 0x116   :  { %v713_v8 = vpop.f32.mrf.mxu0  ;;  %v669_v19 = vadd.f32 %v668_v7, %v112_v13 }
 0x117   :  { %782 = vst [vmem:[%s1317_s3 + $0x30] sm:$0xff] %v884_v4  ;;  %v879_v11 = vpack.c.bf16 %v712_v6, %v710_v5  ;;  %v670_v12 = vpop.f32.mrf.mxu1  ;;  %v714_v16 = vadd.f32 %v713_v8, %v661_v9 }
 0x118   :  { %v715_v14 = vpop.f32.mrf.mxu0  ;;  %v671_v26 = vadd.f32 %v670_v12, %v117_v45 }
 0x119   :  { %777 = vst [vmem:[%s1317_s3 + $0x8] sm:$0xff] %v879_v11  ;;  %v716_v17 = vadd.f32 %v715_v14, %v663_v10  ;;  %v672_v21 = vpop.f32.mrf.mxu1 }
 0x11a   :  { %v719_v18 = vpop.f32.mrf.mxu0  ;;  %v673_v27 = vadd.f32 %v672_v21, %v117_v45 }
 0x11b   :  { %v881_v20 = vpack.c.bf16 %v716_v17, %v714_v16  ;;  %v720_v23 = vadd.f32 %v719_v18, %v667_v15 }
 0x11c   :  { %v721_v22 = vpop.f32.mrf.mxu0 }
 0x11d   :  { %779 = vst [vmem:[%s1317_s3 + $0x18] sm:$0xff] %v881_v20  ;;  %v722_v24 = vadd.f32 %v721_v22, %v669_v19 }
 0x11e   :  { %v723_v25 = vpop.f32.mrf.mxu0 }
 0x11f   :  { %v883_v28 = vpack.c.bf16 %v722_v24, %v720_v23  ;;  %v724_v30 = vadd.f32 %v723_v25, %v671_v26 }
 0x120   :  { %v725_v29 = vpop.f32.mrf.mxu0 }
 0x121   :  { %781 = vst [vmem:[%s1317_s3 + $0x28] sm:$0xff] %v883_v28  ;;  %v726_v31 = vadd.f32 %v725_v29, %v673_v27 }
 0x123   :  { %v885_v32 = vpack.c.bf16 %v726_v31, %v724_v30 }
 0x125   :  { %783 = vst [vmem:[%s1317_s3 + $0x38] sm:$0xff] %v885_v32 }

// kernel: vae_forward.11
= control target key start
LH: loop header
LB: loop body
LE: loop exit
PB: predicated region body
PF: predicated region fallthrough
CT: control target
= control target key end

     0   :  { %vm4359_vm0 = vcmask 261120   ;;  %vm13302_vm1 = vmmov 0   ;;  %s17692_s1 = inlined_call_operand.vmem [shape: bf16[5408,256], index: 1, kind: input, shape index: {}]   ;;  %s17693_s0 = inlined_call_operand.vmem [shape: bf16[16,5408], index: 0, kind: input, shape index: {}]   ;;  %s17694_s4 = inlined_call_operand.vmem [shape: bf16[128,128], index: 4, kind: input, shape index: {}]   ;;  %s17695_s6 = inlined_call_operand.vmem [shape: bf16[128,8192], index: 6, kind: input, shape index: {}]   ;;  %s17696_s2 = inlined_call_operand.vmem [shape: f32[1,256], index: 2, kind: input, shape index: {}]   ;;  %s17697_s8 = inlined_call_operand.vmem [shape: f32[16,256], index: 8, kind: output, shape index: {0}]   ;;  %s17698_s3 = inlined_call_operand.vmem [shape: f32[16,128], index: 3, kind: input, shape index: {}]   ;;  %s17699_s5 = inlined_call_operand.vmem [shape: f32[1,128], index: 5, kind: input, shape index: {}]   ;;  %s17700_s7 = inlined_call_operand.vmem [shape: f32[1,8192], index: 7, kind: input, shape index: {}]   ;;  %s17701_s9 = inlined_call_operand.vmem [shape: bf16[16,8192], index: 9, kind: output, shape index: {1}]  }
   0x1   :  { %v12210_v0 = vld [vmem:[%s17692_s1 + $0x74] ss:$8 sps:$4 sm:$0xff]   ;;  %v12212_v1 = vld [vmem:[%s17692_s1 + $0x70] ss:$8 sps:$4 sm:$0xff]   ;;  %v12216_v4 = vld [vmem:[%s17692_s1 + $0x64] ss:$8 sps:$4 sm:$0xff]  }
   0x2   :  { %4363 = vmatprep.subr.bf16.mxu0 %v12210_v0  ;;  %v12213_v2 = vld [vmem:[%s17692_s1 + $0x174] ss:$8 sps:$4 sm:$0xff]   ;;  %v12215_v3 = vld [vmem:[%s17692_s1 + $0x170] ss:$8 sps:$4 sm:$0xff]   ;;  %v12218_v5 = vld [vmem:[%s17692_s1 + $0x60] ss:$8 sps:$4 sm:$0xff]  }
   0x3   :  { %4364 = vmatpush1.bf16.msra.mxu0 %v12212_v1  ;;  %4406 = vmatprep.subr.bf16.mxu1 %v12213_v2  ;;  %v12219_v6 = vld [vmem:[%s17692_s1 + $0x164] ss:$8 sps:$4 sm:$0xff]   ;;  %v12221_v7 = vld [vmem:[%s17692_s1 + $0x160] ss:$8 sps:$4 sm:$0xff]   ;;  %v12222_v8 = vld [vmem:[%s17692_s1 + $0x54] ss:$8 sps:$4 sm:$0xff]  }
   0x4   :  { %4407 = vmatpush1.bf16.msra.mxu1 %v12215_v3  ;;  %4365 = vmatprep.subr.bf16.mxu0 %v12216_v4  ;;  %v12224_v9 = vld [vmem:[%s17692_s1 + $0x50] ss:$8 sps:$4 sm:$0xff]   ;;  %v12225_v10 = vld [vmem:[%s17692_s1 + $0x154] ss:$8 sps:$4 sm:$0xff]   ;;  %v12228_v11 = vld [vmem:[%s17692_s1 + $0x44] ss:$8 sps:$4 sm:$0xff]  }
   0x5   :  { %4408 = vmatprep.subr.bf16.mxu1 %v12219_v6  ;;  %v12227_v12 = vld [vmem:[%s17692_s1 + $0x150] ss:$8 sps:$4 sm:$0xff]   ;;  %v12231_v13 = vld [vmem:[%s17692_s1 + $0x144] ss:$8 sps:$4 sm:$0xff]   ;;  %v12230_v14 = vld [vmem:[%s17692_s1 + $0x40] ss:$8 sps:$4 sm:$0xff]  }
   0x6   :  { %v12234_v15 = vld [vmem:[%s17692_s1 + $0x34] ss:$8 sps:$4 sm:$0xff]   ;;  %v12233_v16 = vld [vmem:[%s17692_s1 + $0x140] ss:$8 sps:$4 sm:$0xff]   ;;  %v12236_v18 = vld [vmem:[%s17692_s1 + $0x30] ss:$8 sps:$4 sm:$0xff]  }
   0x7   :  { %4366 = vmatpush1.bf16.msra.mxu0 %v12218_v5  ;;  %v12237_v17 = vld [vmem:[%s17692_s1 + $0x134] ss:$8 sps:$4 sm:$0xff]   ;;  %v12240_v19 = vld [vmem:[%s17692_s1 + $0x24] ss:$8 sps:$4 sm:$0xff]   ;;  %v12239_v20 = vld [vmem:[%s17692_s1 + $0x130] ss:$8 sps:$4 sm:$0xff]  }
   0x8   :  { %4367 = vmatprep.subr.bf16.mxu0 %v12222_v8  ;;  %4409 = vmatpush1.bf16.msra.mxu1 %v12221_v7  ;;  %v12243_v21 = vld [vmem:[%s17692_s1 + $0x124] ss:$8 sps:$4 sm:$0xff]   ;;  %v12242_v22 = vld [vmem:[%s17692_s1 + $0x20] ss:$8 sps:$4 sm:$0xff]   ;;  %v12246_v23 = vld [vmem:[%s17692_s1 + $0x14] ss:$8 sps:$4 sm:$0xff]  }
   0x9   :  { %4410 = vmatprep.subr.bf16.mxu1 %v12225_v10  ;;  %v12245_v24 = vld [vmem:[%s17692_s1 + $0x120] ss:$8 sps:$4 sm:$0xff]   ;;  %v12249_v25 = vld [vmem:[%s17692_s1 + $0x114] ss:$8 sps:$4 sm:$0xff]   ;;  %v12248_v26 = vld [vmem:[%s17692_s1 + $0x10] ss:$8 sps:$4 sm:$0xff]  }
   0xa   :  { %v12252_v27 = vld [vmem:[%s17692_s1 + $0x4] ss:$8 sps:$4 sm:$0xff]   ;;  %v12251_v28 = vld [vmem:[%s17692_s1 + $0x110] ss:$8 sps:$4 sm:$0xff]   ;;  %v12254_v30 = vld [vmem:[%s17692_s1] ss:$8 sps:$4 sm:$0xff]  }
   0xb   :  { %4368 = vmatpush1.bf16.msra.mxu0 %v12224_v9  ;;  %v12255_v29 = vld [vmem:[%s17692_s1 + $0x104] ss:$8 sps:$4 sm:$0xff]   ;;  %v12258_v31 = vld [vmem:[%s17692_s1 + $0xf4] ss:$8 sps:$4 sm:$0xff]   ;;  %v12257_v32 = vld [vmem:[%s17692_s1 + $0x100] ss:$8 sps:$4 sm:$0xff]  }
   0xc   :  { %4369 = vmatprep.subr.bf16.mxu0 %v12228_v11  ;;  %4411 = vmatpush1.bf16.msra.mxu1 %v12227_v12  ;;  %v12261_v33 = vld [vmem:[%s17692_s1 + $0x1f4] ss:$8 sps:$4 sm:$0xff]   ;;  %v12260_v34 = vld [vmem:[%s17692_s1 + $0xf0] ss:$8 sps:$4 sm:$0xff]   ;;  %v12264_v35 = vld [vmem:[%s17692_s1 + $0xe4] ss:$8 sps:$4 sm:$0xff]  }
   0xd   :  { %4412 = vmatprep.subr.bf16.mxu1 %v12231_v13  ;;  %v12263_v36 = vld [vmem:[%s17692_s1 + $0x1f0] ss:$8 sps:$4 sm:$0xff]   ;;  %v12267_v37 = vld [vmem:[%s17692_s1 + $0x1e4] ss:$8 sps:$4 sm:$0xff]   ;;  %v12266_v38 = vld [vmem:[%s17692_s1 + $0xe0] ss:$8 sps:$4 sm:$0xff]  }
   0xe   :  { %v12270_v39 = vld [vmem:[%s17692_s1 + $0xd4] ss:$8 sps:$4 sm:$0xff]   ;;  %v12269_v40 = vld [vmem:[%s17692_s1 + $0x1e0] ss:$8 sps:$4 sm:$0xff]   ;;  %v12272_v42 = vld [vmem:[%s17692_s1 + $0xd0] ss:$8 sps:$4 sm:$0xff]  }
   0xf   :  { %4370 = vmatpush1.bf16.msra.mxu0 %v12230_v14  ;;  %v12273_v41 = vld [vmem:[%s17692_s1 + $0x1d4] ss:$8 sps:$4 sm:$0xff]   ;;  %v12276_v43 = vld [vmem:[%s17692_s1 + $0xc4] ss:$8 sps:$4 sm:$0xff]   ;;  %v12275_v44 = vld [vmem:[%s17692_s1 + $0x1d0] ss:$8 sps:$4 sm:$0xff]  }
  0x10   :  { %4371 = vmatprep.subr.bf16.mxu0 %v12234_v15  ;;  %4413 = vmatpush1.bf16.msra.mxu1 %v12233_v16  ;;  %v12279_v45 = vld [vmem:[%s17692_s1 + $0x1c4] ss:$8 sps:$4 sm:$0xff]   ;;  %v12278_v46 = vld [vmem:[%s17692_s1 + $0xc0] ss:$8 sps:$4 sm:$0xff]   ;;  %v12282_v48 = vld [vmem:[%s17692_s1 + $0xb4] ss:$8 sps:$4 sm:$0xff]  }
  0x11   :  { %4414 = vmatprep.subr.bf16.mxu1 %v12237_v17  ;;  %v12307_v47 = vld [vmem:[%s17693_s0 + $0x4] ss:$172 sps:$4 sm:$0xff]   ;;  %v12281_v49 = vld [vmem:[%s17692_s1 + $0x1c0] ss:$8 sps:$4 sm:$0xff]   ;;  %v12285_v50 = vld [vmem:[%s17692_s1 + $0x1b4] ss:$8 sps:$4 sm:$0xff]  }
  0x12   :  { %4395 = vmatprep.mubr.bf16.mxu0 %v12307_v47  ;;  %v12314_v51 = vld [vmem:[%s17693_s0 + $0xc] ss:$172 sps:$4 sm:$0xff]   ;;  %v12290_v56 = vld [vmem:[%s17692_s1 + $0xa0] ss:$8 sps:$4 sm:$0xff]   ;;  %v12294_v57 = vld [vmem:[%s17692_s1 + $0x94] ss:$8 sps:$4 sm:$0xff]  }
  0x13   :  { %4372 = vmatpush1.bf16.msra.mxu0 %v12236_v18  ;;  %v12284_v52 = vld [vmem:[%s17692_s1 + $0xb0] ss:$8 sps:$4 sm:$0xff]   ;;  %v12288_v53 = vld [vmem:[%s17692_s1 + $0xa4] ss:$8 sps:$4 sm:$0xff]   ;;  %4438 = vmatprep.mubr.bf16.mxu1 %v12314_v51  ;;  %v12293_v58 = vld [vmem:[%s17692_s1 + $0x1a0] ss:$8 sps:$4 sm:$0xff]  }
  0x14   :  { %4373 = vmatprep.subr.bf16.mxu0 %v12240_v19  ;;  %4415 = vmatpush1.bf16.msra.mxu1 %v12239_v20  ;;  %v12287_v54 = vld [vmem:[%s17692_s1 + $0x1b0] ss:$8 sps:$4 sm:$0xff]   ;;  %v12291_v55 = vld [vmem:[%s17692_s1 + $0x1a4] ss:$8 sps:$4 sm:$0xff]   ;;  %v12297_v59 = vld [vmem:[%s17692_s1 + $0x194] ss:$8 sps:$4 sm:$0xff]  }
  0x15   :  { %4416 = vmatprep.subr.bf16.mxu1 %v12243_v21  ;;  %v12296_v60 = vld [vmem:[%s17692_s1 + $0x90] ss:$8 sps:$4 sm:$0xff]   ;;  %v12300_v61 = vld [vmem:[%s17692_s1 + $0x84] ss:$8 sps:$4 sm:$0xff]   ;;  %v12302_v0 = vld [vmem:[%s17692_s1 + $0x80] ss:$8 sps:$4 sm:$0xff]  }
  0x16   :  { %v12299_v62 = vld [vmem:[%s17692_s1 + $0x190] ss:$8 sps:$4 sm:$0xff]   ;;  %v12303_v63 = vld [vmem:[%s17692_s1 + $0x184] ss:$8 sps:$4 sm:$0xff]   ;;  %v12311_v1 = vld [vmem:[%s17692_s1 + $0x274] ss:$8 sps:$4 sm:$0xff]  }
  0x17   :  { %4374 = vmatpush1.bf16.msra.mxu0 %v12242_v22  ;;  %v12308_v2 = vld [vmem:[%s17692_s1 + $0x180] ss:$8 sps:$4 sm:$0xff]   ;;  %v12317_v4 = vld [vmem:[%s17692_s1 + $0x374] ss:$8 sps:$4 sm:$0xff]   ;;  %v12309_v5 = vld [vmem:[%s17692_s1 + $0x270] ss:$8 sps:$4 sm:$0xff]  }
  0x18   :  { %4375 = vmatprep.subr.bf16.mxu0 %v12246_v23  ;;  %4417 = vmatpush1.bf16.msra.mxu1 %v12245_v24  ;;  %v12305_v3 = vld [vmem:[%s17693_s0] ss:$172 sps:$4 sm:$0xff]   ;;  %v12312_v6 = vld [vmem:[%s17693_s0 + $0x8] ss:$172 sps:$4 sm:$0xff]   ;;  %v12315_v8 = vld [vmem:[%s17692_s1 + $0x370] ss:$8 sps:$4 sm:$0xff]  }
  0x19   :  { %4418 = vmatprep.subr.bf16.mxu1 %v12249_v25  ;;  %v12320_v7 = vld [vmem:[%s17692_s1 + $0x264] ss:$8 sps:$4 sm:$0xff]   ;;  %v12318_v10 = vld [vmem:[%s17692_s1 + $0x260] ss:$8 sps:$4 sm:$0xff]   ;;  %v12326_v11 = vld [vmem:[%s17692_s1 + $0x254] ss:$8 sps:$4 sm:$0xff]  }
  0x1a   :  { %v12323_v9 = vld [vmem:[%s17692_s1 + $0x364] ss:$8 sps:$4 sm:$0xff]   ;;  %v12321_v12 = vld [vmem:[%s17692_s1 + $0x360] ss:$8 sps:$4 sm:$0xff]   ;;  %v12329_v13 = vld [vmem:[%s17692_s1 + $0x354] ss:$8 sps:$4 sm:$0xff]  }
  0x1b   :  { %4376 = vmatpush1.bf16.msra.mxu0 %v12248_v26  ;;  %v12324_v14 = vld [vmem:[%s17692_s1 + $0x250] ss:$8 sps:$4 sm:$0xff]   ;;  %v12332_v15 = vld [vmem:[%s17692_s1 + $0x244] ss:$8 sps:$4 sm:$0xff]   ;;  %v12330_v18 = vld [vmem:[%s17692_s1 + $0x240] ss:$8 sps:$4 sm:$0xff]  }
  0x1c   :  { %4377 = vmatprep.subr.bf16.mxu0 %v12252_v27  ;;  %4419 = vmatpush1.bf16.msra.mxu1 %v12251_v28  ;;  %v12327_v16 = vld [vmem:[%s17692_s1 + $0x350] ss:$8 sps:$4 sm:$0xff]   ;;  %v12335_v17 = vld [vmem:[%s17692_s1 + $0x344] ss:$8 sps:$4 sm:$0xff]   ;;  %v12338_v19 = vld [vmem:[%s17692_s1 + $0x234] ss:$8 sps:$4 sm:$0xff]  }
  0x1d   :  { %4420 = vmatprep.subr.bf16.mxu1 %v12255_v29  ;;  %v12333_v20 = vld [vmem:[%s17692_s1 + $0x340] ss:$8 sps:$4 sm:$0xff]   ;;  %v12341_v21 = vld [vmem:[%s17692_s1 + $0x334] ss:$8 sps:$4 sm:$0xff]   ;;  %v12336_v22 = vld [vmem:[%s17692_s1 + $0x230] ss:$8 sps:$4 sm:$0xff]  }
  0x1e   :  { %v12344_v23 = vld [vmem:[%s17692_s1 + $0x224] ss:$8 sps:$4 sm:$0xff]   ;;  %v12339_v24 = vld [vmem:[%s17692_s1 + $0x330] ss:$8 sps:$4 sm:$0xff]   ;;  %v12342_v26 = vld [vmem:[%s17692_s1 + $0x220] ss:$8 sps:$4 sm:$0xff]  }
  0x1f   :  { %4378 = vmatpush1.bf16.msra.mxu0 %v12254_v30  ;;  %v12347_v25 = vld [vmem:[%s17692_s1 + $0x324] ss:$8 sps:$4 sm:$0xff]   ;;  %v12350_v27 = vld [vmem:[%s17692_s1 + $0x214] ss:$8 sps:$4 sm:$0xff]   ;;  %v12345_v28 = vld [vmem:[%s17692_s1 + $0x320] ss:$8 sps:$4 sm:$0xff]  }
  0x20   :  { %4379 = vmatprep.subr.bf16.mxu0 %v12258_v31  ;;  %4421 = vmatpush1.bf16.msra.mxu1 %v12257_v32  ;;  %v12353_v29 = vld [vmem:[%s17692_s1 + $0x314] ss:$8 sps:$4 sm:$0xff]   ;;  %v12348_v30 = vld [vmem:[%s17692_s1 + $0x210] ss:$8 sps:$4 sm:$0xff]   ;;  %v12356_v32 = vld [vmem:[%s17692_s1 + $0x204] ss:$8 sps:$4 sm:$0xff]  }
  0x21   :  { %4422 = vmatprep.subr.bf16.mxu1 %v12261_v33  ;;  %v12351_v31 = vld [vmem:[%s17692_s1 + $0x310] ss:$8 sps:$4 sm:$0xff]   ;;  %v12410_v33 = vld [vmem:[%s17693_s0 + $0x14] ss:$172 sps:$4 sm:$0xff]   ;;  %v12383_v51 = vld [vmem:[%s17692_s1 + $0x3c4] ss:$8 sps:$4 sm:$0xff]  }
  0x22   :  { %v12377_v47 = vld [vmem:[%s17692_s1 + $0x3d4] ss:$8 sps:$4 sm:$0xff]  }
  0x23   :  { %4380 = vmatpush2.bf16.msra.mxu0 %v12260_v34  ;;  %v12359_v34 = vld [vmem:[%s17692_s1 + $0x304] ss:$8 sps:$4 sm:$0xff]  }
  0x24   :  { %4381 = vmatprep.subr.bf16.mxu0 %v12264_v35  ;;  %4423 = vmatpush2.bf16.msra.mxu1 %v12263_v36  ;;  %v12354_v35 = vld [vmem:[%s17692_s1 + $0x200] ss:$8 sps:$4 sm:$0xff]  }
  0x25   :  { %4424 = vmatprep.subr.bf16.mxu1 %v12267_v37  ;;  %v12416_v36 = vld [vmem:[%s17693_s0 + $0x1c] ss:$172 sps:$4 sm:$0xff]  }
  0x26   :  { %v12362_v37 = vld [vmem:[%s17692_s1 + $0x2f4] ss:$8 sps:$4 sm:$0xff]  }
  0x27   :  { %4382 = vmatpush2.bf16.msra.mxu0 %v12266_v38  ;;  %v12357_v38 = vld [vmem:[%s17692_s1 + $0x300] ss:$8 sps:$4 sm:$0xff]  }
  0x28   :  { %4383 = vmatprep.subr.bf16.mxu0 %v12270_v39  ;;  %4425 = vmatpush2.bf16.msra.mxu1 %v12269_v40  ;;  %v12365_v39 = vld [vmem:[%s17692_s1 + $0x3f4] ss:$8 sps:$4 sm:$0xff]   ;;  %v12360_v40 = vld [vmem:[%s17692_s1 + $0x2f0] ss:$8 sps:$4 sm:$0xff]  }
  0x29   :  { %4426 = vmatprep.subr.bf16.mxu1 %v12273_v41  ;;  %v12368_v41 = vld [vmem:[%s17692_s1 + $0x2e4] ss:$8 sps:$4 sm:$0xff]  }
  0x2b   :  { %4384 = vmatpush2.bf16.msra.mxu0 %v12272_v42  ;;  %v12363_v42 = vld [vmem:[%s17692_s1 + $0x3f0] ss:$8 sps:$4 sm:$0xff]  }
  0x2c   :  { %4385 = vmatprep.subr.bf16.mxu0 %v12276_v43  ;;  %4427 = vmatpush2.bf16.msra.mxu1 %v12275_v44  ;;  %v12371_v43 = vld [vmem:[%s17692_s1 + $0x3e4] ss:$8 sps:$4 sm:$0xff]   ;;  %v12366_v44 = vld [vmem:[%s17692_s1 + $0x2e0] ss:$8 sps:$4 sm:$0xff]  }
  0x2d   :  { %4428 = vmatprep.subr.bf16.mxu1 %v12279_v45  ;;  %v12374_v45 = vld [vmem:[%s17692_s1 + $0x2d4] ss:$8 sps:$4 sm:$0xff]  }
  0x2f   :  { %4386 = vmatpush2.bf16.msra.mxu0 %v12278_v46  ;;  %v12369_v46 = vld [vmem:[%s17692_s1 + $0x3e0] ss:$8 sps:$4 sm:$0xff]  }
  0x30   :  { %4387 = vmatprep.subr.bf16.mxu0 %v12282_v48  ;;  %4429 = vmatpush2.bf16.msra.mxu1 %v12281_v49  ;;  %v12372_v48 = vld [vmem:[%s17692_s1 + $0x2d0] ss:$8 sps:$4 sm:$0xff]   ;;  %v12380_v49 = vld [vmem:[%s17692_s1 + $0x2c4] ss:$8 sps:$4 sm:$0xff]  }
  0x31   :  { %4430 = vmatprep.subr.bf16.mxu1 %v12285_v50  ;;  %v12375_v50 = vld [vmem:[%s17692_s1 + $0x3d0] ss:$8 sps:$4 sm:$0xff]  }
  0x33   :  { %4388 = vmatpush2.bf16.msra.mxu0 %v12284_v52  ;;  %v12378_v52 = vld [vmem:[%s17692_s1 + $0x2c0] ss:$8 sps:$4 sm:$0xff]  }
  0x34   :  { %4389 = vmatprep.subr.bf16.mxu0 %v12288_v53  ;;  %4431 = vmatpush2.bf16.msra.mxu1 %v12287_v54  ;;  %v12386_v53 = vld [vmem:[%s17692_s1 + $0x2b4] ss:$8 sps:$4 sm:$0xff]   ;;  %v12381_v54 = vld [vmem:[%s17692_s1 + $0x3c0] ss:$8 sps:$4 sm:$0xff]  }
  0x35   :  { %4432 = vmatprep.subr.bf16.mxu1 %v12291_v55  ;;  %v12389_v55 = vld [vmem:[%s17692_s1 + $0x3b4] ss:$8 sps:$4 sm:$0xff]  }
  0x37   :  { %4390 = vmatpush2.bf16.msra.mxu0 %v12290_v56  ;;  %v12384_v56 = vld [vmem:[%s17692_s1 + $0x2b0] ss:$8 sps:$4 sm:$0xff]  }
  0x38   :  { %4391 = vmatprep.subr.bf16.mxu0 %v12294_v57  ;;  %4433 = vmatpush2.bf16.msra.mxu1 %v12293_v58  ;;  %v12392_v57 = vld [vmem:[%s17692_s1 + $0x2a4] ss:$8 sps:$4 sm:$0xff]   ;;  %v12387_v58 = vld [vmem:[%s17692_s1 + $0x3b0] ss:$8 sps:$4 sm:$0xff]  }
  0x39   :  { %4434 = vmatprep.subr.bf16.mxu1 %v12297_v59  ;;  %v12395_v59 = vld [vmem:[%s17692_s1 + $0x3a4] ss:$8 sps:$4 sm:$0xff]  }
  0x3b   :  { %4392 = vmatpush2.bf16.msra.mxu0 %v12296_v60  ;;  %v12390_v60 = vld [vmem:[%s17692_s1 + $0x2a0] ss:$8 sps:$4 sm:$0xff]  }
  0x3c   :  { %4393 = vmatprep.subr.bf16.mxu0 %v12300_v61  ;;  %4435 = vmatpush2.bf16.msra.mxu1 %v12299_v62  ;;  %v12398_v61 = vld [vmem:[%s17692_s1 + $0x294] ss:$8 sps:$4 sm:$0xff]   ;;  %v12393_v62 = vld [vmem:[%s17692_s1 + $0x3a0] ss:$8 sps:$4 sm:$0xff]  }
  0x3d   :  { %4436 = vmatprep.subr.bf16.mxu1 %v12303_v63  ;;  %v12401_v63 = vld [vmem:[%s17692_s1 + $0x394] ss:$8 sps:$4 sm:$0xff]  }
  0x3f   :  { %4394 = vmatpush2.bf16.msra.mxu0 %v12302_v0  ;;  %v12396_v0 = vld [vmem:[%s17692_s1 + $0x290] ss:$8 sps:$4 sm:$0xff]  }
  0x40   :  { %4449 = vmatprep.subr.bf16.mxu0 %v12311_v1  ;;  %4437 = vmatpush2.bf16.msra.mxu1 %v12308_v2  ;;  %v12404_v1 = vld [vmem:[%s17692_s1 + $0x284] ss:$8 sps:$4 sm:$0xff]   ;;  %v12399_v2 = vld [vmem:[%s17692_s1 + $0x390] ss:$8 sps:$4 sm:$0xff]  }
  0x41   :  { %4492 = vmatprep.subr.bf16.mxu1 %v12317_v4  ;;  %v12402_v4 = vld [vmem:[%s17692_s1 + $0x280] ss:$8 sps:$4 sm:$0xff]  }
  0x42   :  { %4396 = vmatmul.mubr.bf16.vlgmr.msra.gmra.mxu0 %v12305_v3  ;;  %v12407_v3 = vld [vmem:[%s17692_s1 + $0x384] ss:$8 sps:$4 sm:$0xff]  }
  0x43   :  { %4450 = vmatpush1.bf16.msra.mxu0 %v12309_v5  ;;  %4439 = vmatmul.mubr.bf16.vlgmr.msra.gmra.mxu1 %v12312_v6  ;;  %v12413_v5 = vld [vmem:[%s17692_s1 + $0x474] ss:$8 sps:$4 sm:$0xff]   ;;  %v12405_v6 = vld [vmem:[%s17692_s1 + $0x380] ss:$8 sps:$4 sm:$0xff]  }
  0x44   :  { %4451 = vmatprep.subr.bf16.mxu0 %v12320_v7  ;;  %4493 = vmatpush1.bf16.msra.mxu1 %v12315_v8  ;;  %v12408_v7 = vld [vmem:[%s17693_s0 + $0x10] ss:$172 sps:$4 sm:$0xff]  }
  0x45   :  { %4494 = vmatprep.subr.bf16.mxu1 %v12323_v9  ;;  %4481 = vmatprep.mubr.bf16.mxu0 %v12410_v33  ;;  %v12419_v8 = vld [vmem:[%s17692_s1 + $0x574] ss:$8 sps:$4 sm:$0xff]   ;;  %v12411_v9 = vld [vmem:[%s17692_s1 + $0x470] ss:$8 sps:$4 sm:$0xff]  }
  0x46   :  { %4524 = vmatprep.mubr.bf16.mxu1 %v12416_v36  ;;  %v12452_v33 = vld [vmem:[%s17692_s1 + $0x414] ss:$8 sps:$4 sm:$0xff]   ;;  %v12450_v36 = vld [vmem:[%s17692_s1 + $0x410] ss:$8 sps:$4 sm:$0xff]  }
  0x47   :  { %4452 = vmatpush1.bf16.msra.mxu0 %v12318_v10  ;;  %v12414_v10 = vld [vmem:[%s17693_s0 + $0x18] ss:$172 sps:$4 sm:$0xff]  }
  0x48   :  { %4453 = vmatprep.subr.bf16.mxu0 %v12326_v11  ;;  %4495 = vmatpush1.bf16.msra.mxu1 %v12321_v12  ;;  %v12422_v11 = vld [vmem:[%s17692_s1 + $0x464] ss:$8 sps:$4 sm:$0xff]   ;;  %v12417_v12 = vld [vmem:[%s17692_s1 + $0x570] ss:$8 sps:$4 sm:$0xff]  }
  0x49   :  { %4496 = vmatprep.subr.bf16.mxu1 %v12329_v13  ;;  %v12425_v13 = vld [vmem:[%s17692_s1 + $0x564] ss:$8 sps:$4 sm:$0xff]  }
  0x4b   :  { %4454 = vmatpush1.bf16.msra.mxu0 %v12324_v14  ;;  %v12420_v14 = vld [vmem:[%s17692_s1 + $0x460] ss:$8 sps:$4 sm:$0xff]  }
  0x4c   :  { %4455 = vmatprep.subr.bf16.mxu0 %v12332_v15  ;;  %4497 = vmatpush1.bf16.msra.mxu1 %v12327_v16  ;;  %v12428_v15 = vld [vmem:[%s17692_s1 + $0x454] ss:$8 sps:$4 sm:$0xff]   ;;  %v12423_v16 = vld [vmem:[%s17692_s1 + $0x560] ss:$8 sps:$4 sm:$0xff]  }
  0x4d   :  { %4498 = vmatprep.subr.bf16.mxu1 %v12335_v17  ;;  %v12431_v17 = vld [vmem:[%s17692_s1 + $0x554] ss:$8 sps:$4 sm:$0xff]  }
  0x4f   :  { %4456 = vmatpush1.bf16.msra.mxu0 %v12330_v18  ;;  %v12512_v18 = vld [vmem:[%s17693_s0 + $0x24] ss:$172 sps:$4 sm:$0xff]  }
  0x50   :  { %4457 = vmatprep.subr.bf16.mxu0 %v12338_v19  ;;  %4499 = vmatpush1.bf16.msra.mxu1 %v12333_v20  ;;  %v12426_v19 = vld [vmem:[%s17692_s1 + $0x450] ss:$8 sps:$4 sm:$0xff]  }
  0x51   :  { %4500 = vmatprep.subr.bf16.mxu1 %v12341_v21  ;;  %v12429_v20 = vld [vmem:[%s17692_s1 + $0x550] ss:$8 sps:$4 sm:$0xff]   ;;  %v12434_v21 = vld [vmem:[%s17692_s1 + $0x444] ss:$8 sps:$4 sm:$0xff]  }
  0x53   :  { %4458 = vmatpush1.bf16.msra.mxu0 %v12336_v22  ;;  %v12518_v22 = vld [vmem:[%s17693_s0 + $0x2c] ss:$172 sps:$4 sm:$0xff]  }
  0x54   :  { %4459 = vmatprep.subr.bf16.mxu0 %v12344_v23  ;;  %4501 = vmatpush1.bf16.msra.mxu1 %v12339_v24  ;;  %v12437_v23 = vld [vmem:[%s17692_s1 + $0x544] ss:$8 sps:$4 sm:$0xff]   ;;  %v12432_v24 = vld [vmem:[%s17692_s1 + $0x440] ss:$8 sps:$4 sm:$0xff]  }
  0x55   :  { %4502 = vmatprep.subr.bf16.mxu1 %v12347_v25  ;;  %v12440_v25 = vld [vmem:[%s17692_s1 + $0x434] ss:$8 sps:$4 sm:$0xff]  }
  0x57   :  { %4460 = vmatpush1.bf16.msra.mxu0 %v12342_v26  ;;  %v12435_v26 = vld [vmem:[%s17692_s1 + $0x540] ss:$8 sps:$4 sm:$0xff]  }
  0x58   :  { %4461 = vmatprep.subr.bf16.mxu0 %v12350_v27  ;;  %4503 = vmatpush1.bf16.msra.mxu1 %v12345_v28  ;;  %v12443_v27 = vld [vmem:[%s17692_s1 + $0x534] ss:$8 sps:$4 sm:$0xff]   ;;  %v12438_v28 = vld [vmem:[%s17692_s1 + $0x430] ss:$8 sps:$4 sm:$0xff]  }
  0x59   :  { %4504 = vmatprep.subr.bf16.mxu1 %v12353_v29  ;;  %v12446_v29 = vld [vmem:[%s17692_s1 + $0x424] ss:$8 sps:$4 sm:$0xff]  }
  0x5b   :  { %4462 = vmatpush1.bf16.msra.mxu0 %v12348_v30  ;;  %v12441_v30 = vld [vmem:[%s17692_s1 + $0x530] ss:$8 sps:$4 sm:$0xff]  }
  0x5c   :  { %4463 = vmatprep.subr.bf16.mxu0 %v12356_v32  ;;  %4505 = vmatpush1.bf16.msra.mxu1 %v12351_v31  ;;  %v12449_v31 = vld [vmem:[%s17692_s1 + $0x524] ss:$8 sps:$4 sm:$0xff]   ;;  %v12444_v32 = vld [vmem:[%s17692_s1 + $0x420] ss:$8 sps:$4 sm:$0xff]  }
  0x5d   :  { %4506 = vmatprep.subr.bf16.mxu1 %v12359_v34  ;;  %v12447_v34 = vld [vmem:[%s17692_s1 + $0x520] ss:$8 sps:$4 sm:$0xff]  }
  0x5f   :  { %4464 = vmatpush1.bf16.msra.mxu0 %v12354_v35  ;;  %v12455_v35 = vld [vmem:[%s17692_s1 + $0x514] ss:$8 sps:$4 sm:$0xff]  }
  0x60   :  { %4465 = vmatprep.subr.bf16.mxu0 %v12362_v37  ;;  %4507 = vmatpush1.bf16.msra.mxu1 %v12357_v38  ;;  %v12458_v37 = vld [vmem:[%s17692_s1 + $0x404] ss:$8 sps:$4 sm:$0xff]   ;;  %v12453_v38 = vld [vmem:[%s17692_s1 + $0x510] ss:$8 sps:$4 sm:$0xff]  }
  0x61   :  { %4508 = vmatprep.subr.bf16.mxu1 %v12365_v39  ;;  %v12461_v39 = vld [vmem:[%s17692_s1 + $0x504] ss:$8 sps:$4 sm:$0xff]  }
  0x63   :  { %4466 = vmatpush2.bf16.msra.mxu0 %v12360_v40  ;;  %v12456_v40 = vld [vmem:[%s17692_s1 + $0x400] ss:$8 sps:$4 sm:$0xff]  }
  0x64   :  { %4467 = vmatprep.subr.bf16.mxu0 %v12368_v41  ;;  %4509 = vmatpush2.bf16.msra.mxu1 %v12363_v42  ;;  %v12464_v41 = vld [vmem:[%s17692_s1 + $0x4f4] ss:$8 sps:$4 sm:$0xff]   ;;  %v12459_v42 = vld [vmem:[%s17692_s1 + $0x500] ss:$8 sps:$4 sm:$0xff]  }
  0x65   :  { %4510 = vmatprep.subr.bf16.mxu1 %v12371_v43  ;;  %v12467_v43 = vld [vmem:[%s17692_s1 + $0x5f4] ss:$8 sps:$4 sm:$0xff]  }
  0x67   :  { %4468 = vmatpush2.bf16.msra.mxu0 %v12366_v44  ;;  %v12462_v44 = vld [vmem:[%s17692_s1 + $0x4f0] ss:$8 sps:$4 sm:$0xff]  }
  0x68   :  { %4469 = vmatprep.subr.bf16.mxu0 %v12374_v45  ;;  %4511 = vmatpush2.bf16.msra.mxu1 %v12369_v46  ;;  %v12470_v45 = vld [vmem:[%s17692_s1 + $0x4e4] ss:$8 sps:$4 sm:$0xff]   ;;  %v12465_v46 = vld [vmem:[%s17692_s1 + $0x5f0] ss:$8 sps:$4 sm:$0xff]  }
  0x69   :  { %4512 = vmatprep.subr.bf16.mxu1 %v12377_v47  ;;  %v12473_v47 = vld [vmem:[%s17692_s1 + $0x5e4] ss:$8 sps:$4 sm:$0xff]  }
  0x6b   :  { %4470 = vmatpush2.bf16.msra.mxu0 %v12372_v48  ;;  %v12468_v48 = vld [vmem:[%s17692_s1 + $0x4e0] ss:$8 sps:$4 sm:$0xff]  }
  0x6c   :  { %4471 = vmatprep.subr.bf16.mxu0 %v12380_v49  ;;  %4513 = vmatpush2.bf16.msra.mxu1 %v12375_v50  ;;  %v12476_v49 = vld [vmem:[%s17692_s1 + $0x4d4] ss:$8 sps:$4 sm:$0xff]   ;;  %v12471_v50 = vld [vmem:[%s17692_s1 + $0x5e0] ss:$8 sps:$4 sm:$0xff]  }
  0x6d   :  { %4514 = vmatprep.subr.bf16.mxu1 %v12383_v51  ;;  %v12479_v51 = vld [vmem:[%s17692_s1 + $0x5d4] ss:$8 sps:$4 sm:$0xff]  }
  0x6f   :  { %4472 = vmatpush2.bf16.msra.mxu0 %v12378_v52  ;;  %v12474_v52 = vld [vmem:[%s17692_s1 + $0x4d0] ss:$8 sps:$4 sm:$0xff]  }
  0x70   :  { %4473 = vmatprep.subr.bf16.mxu0 %v12386_v53  ;;  %4515 = vmatpush2.bf16.msra.mxu1 %v12381_v54  ;;  %v12482_v53 = vld [vmem:[%s17692_s1 + $0x4c4] ss:$8 sps:$4 sm:$0xff]   ;;  %v12477_v54 = vld [vmem:[%s17692_s1 + $0x5d0] ss:$8 sps:$4 sm:$0xff]  }
  0x71   :  { %4516 = vmatprep.subr.bf16.mxu1 %v12389_v55  ;;  %v12485_v55 = vld [vmem:[%s17692_s1 + $0x5c4] ss:$8 sps:$4 sm:$0xff]  }
  0x73   :  { %4474 = vmatpush2.bf16.msra.mxu0 %v12384_v56  ;;  %v12480_v56 = vld [vmem:[%s17692_s1 + $0x4c0] ss:$8 sps:$4 sm:$0xff]  }
  0x74   :  { %4475 = vmatprep.subr.bf16.mxu0 %v12392_v57  ;;  %4517 = vmatpush2.bf16.msra.mxu1 %v12387_v58  ;;  %v12488_v57 = vld [vmem:[%s17692_s1 + $0x4b4] ss:$8 sps:$4 sm:$0xff]   ;;  %v12483_v58 = vld [vmem:[%s17692_s1 + $0x5c0] ss:$8 sps:$4 sm:$0xff]  }
  0x75   :  { %4518 = vmatprep.subr.bf16.mxu1 %v12395_v59  ;;  %v12491_v59 = vld [vmem:[%s17692_s1 + $0x5b4] ss:$8 sps:$4 sm:$0xff]  }
  0x77   :  { %4476 = vmatpush2.bf16.msra.mxu0 %v12390_v60  ;;  %v12486_v60 = vld [vmem:[%s17692_s1 + $0x4b0] ss:$8 sps:$4 sm:$0xff]  }
  0x78   :  { %4477 = vmatprep.subr.bf16.mxu0 %v12398_v61  ;;  %4519 = vmatpush2.bf16.msra.mxu1 %v12393_v62  ;;  %v12494_v61 = vld [vmem:[%s17692_s1 + $0x4a4] ss:$8 sps:$4 sm:$0xff]   ;;  %v12489_v62 = vld [vmem:[%s17692_s1 + $0x5b0] ss:$8 sps:$4 sm:$0xff]  }
  0x79   :  { %4520 = vmatprep.subr.bf16.mxu1 %v12401_v63  ;;  %v12497_v63 = vld [vmem:[%s17692_s1 + $0x5a4] ss:$8 sps:$4 sm:$0xff]  }
  0x7b   :  { %4478 = vmatpush2.bf16.msra.mxu0 %v12396_v0  ;;  %v12492_v0 = vld [vmem:[%s17692_s1 + $0x4a0] ss:$8 sps:$4 sm:$0xff]  }
  0x7c   :  { %4479 = vmatprep.subr.bf16.mxu0 %v12404_v1  ;;  %4521 = vmatpush2.bf16.msra.mxu1 %v12399_v2  ;;  %v12500_v1 = vld [vmem:[%s17692_s1 + $0x494] ss:$8 sps:$4 sm:$0xff]   ;;  %v12495_v2 = vld [vmem:[%s17692_s1 + $0x5a0] ss:$8 sps:$4 sm:$0xff]  }
  0x7d   :  { %4522 = vmatprep.subr.bf16.mxu1 %v12407_v3  ;;  %v12503_v3 = vld [vmem:[%s17692_s1 + $0x594] ss:$8 sps:$4 sm:$0xff]  }
  0x7f   :  { %4480 = vmatpush2.bf16.msra.mxu0 %v12402_v4  ;;  %v12498_v4 = vld [vmem:[%s17692_s1 + $0x490] ss:$8 sps:$4 sm:$0xff]  }
  0x80   :  { %4535 = vmatprep.subr.bf16.mxu0 %v12413_v5  ;;  %4523 = vmatpush2.bf16.msra.mxu1 %v12405_v6  ;;  %v12506_v5 = vld [vmem:[%s17692_s1 + $0x484] ss:$8 sps:$4 sm:$0xff]   ;;  %v12501_v6 = vld [vmem:[%s17692_s1 + $0x590] ss:$8 sps:$4 sm:$0xff]  }
  0x81   :  { %4578 = vmatprep.subr.bf16.mxu1 %v12419_v8  ;;  %v12509_v8 = vld [vmem:[%s17692_s1 + $0x584] ss:$8 sps:$4 sm:$0xff]  }
  0x82   :  { %4482 = vmatmul.mubr.bf16.vlgmr.msra.gmra.mxu0 %v12408_v7  ;;  %v12504_v7 = vld [vmem:[%s17692_s1 + $0x480] ss:$8 sps:$4 sm:$0xff]  }
  0x83   :  { %4536 = vmatpush1.bf16.msra.mxu0 %v12411_v9  ;;  %4525 = vmatmul.mubr.bf16.vlgmr.msra.gmra.mxu1 %v12414_v10  ;;  %v12507_v9 = vld [vmem:[%s17692_s1 + $0x580] ss:$8 sps:$4 sm:$0xff]   ;;  %v12515_v10 = vld [vmem:[%s17692_s1 + $0x674] ss:$8 sps:$4 sm:$0xff]  }
  0x84   :  { %4537 = vmatprep.subr.bf16.mxu0 %v12422_v11  ;;  %4579 = vmatpush1.bf16.msra.mxu1 %v12417_v12  ;;  %v12510_v11 = vld [vmem:[%s17693_s0 + $0x20] ss:$172 sps:$4 sm:$0xff]   ;;  %v12513_v12 = vld [vmem:[%s17692_s1 + $0x670] ss:$8 sps:$4 sm:$0xff]  }
  0x85   :  { %4580 = vmatprep.subr.bf16.mxu1 %v12425_v13  ;;  %4567 = vmatprep.mubr.bf16.mxu0 %v12512_v18  ;;  %v12516_v13 = vld [vmem:[%s17693_s0 + $0x28] ss:$172 sps:$4 sm:$0xff]  }
  0x86   :  { %4610 = vmatprep.mubr.bf16.mxu1 %v12518_v22  ;;  %v12620_v18 = vld [vmem:[%s17693_s0 + $0x3c] ss:$172 sps:$4 sm:$0xff]  }
  0x87   :  { %4538 = vmatpush1.bf16.msra.mxu0 %v12420_v14  ;;  %v12521_v14 = vld [vmem:[%s17692_s1 + $0x774] ss:$8 sps:$4 sm:$0xff]   ;;  %v12525_v22 = vld [vmem:[%s17692_s1 + $0x760] ss:$8 sps:$4 sm:$0xff]  }
  0x88   :  { %4539 = vmatprep.subr.bf16.mxu0 %v12428_v15  ;;  %4581 = vmatpush1.bf16.msra.mxu1 %v12423_v16  ;;  %v12614_v15 = vld [vmem:[%s17693_s0 + $0x34] ss:$172 sps:$4 sm:$0xff]   ;;  %v12524_v16 = vld [vmem:[%s17692_s1 + $0x664] ss:$8 sps:$4 sm:$0xff]  }
  0x89   :  { %4582 = vmatprep.subr.bf16.mxu1 %v12431_v17  ;;  %v12519_v17 = vld [vmem:[%s17692_s1 + $0x770] ss:$8 sps:$4 sm:$0xff]  }
  0x8b   :  { %4540 = vmatpush1.bf16.msra.mxu0 %v12426_v19  ;;  %v12527_v19 = vld [vmem:[%s17692_s1 + $0x764] ss:$8 sps:$4 sm:$0xff]  }
  0x8c   :  { %4541 = vmatprep.subr.bf16.mxu0 %v12434_v21  ;;  %4583 = vmatpush1.bf16.msra.mxu1 %v12429_v20  ;;  %v12522_v20 = vld [vmem:[%s17692_s1 + $0x660] ss:$8 sps:$4 sm:$0xff]   ;;  %v12530_v21 = vld [vmem:[%s17692_s1 + $0x654] ss:$8 sps:$4 sm:$0xff]  }
  0x8d   :  { %4584 = vmatprep.subr.bf16.mxu1 %v12437_v23  ;;  %v12533_v23 = vld [vmem:[%s17692_s1 + $0x754] ss:$8 sps:$4 sm:$0xff]  }
  0x8f   :  { %4542 = vmatpush1.bf16.msra.mxu0 %v12432_v24  ;;  %v12528_v24 = vld [vmem:[%s17692_s1 + $0x650] ss:$8 sps:$4 sm:$0xff]  }
  0x90   :  { %4543 = vmatprep.subr.bf16.mxu0 %v12440_v25  ;;  %4585 = vmatpush1.bf16.msra.mxu1 %v12435_v26  ;;  %v12536_v25 = vld [vmem:[%s17692_s1 + $0x644] ss:$8 sps:$4 sm:$0xff]   ;;  %v12531_v26 = vld [vmem:[%s17692_s1 + $0x750] ss:$8 sps:$4 sm:$0xff]  }
  0x91   :  { %4586 = vmatprep.subr.bf16.mxu1 %v12443_v27  ;;  %v12539_v27 = vld [vmem:[%s17692_s1 + $0x744] ss:$8 sps:$4 sm:$0xff]  }
  0x93   :  { %4544 = vmatpush1.bf16.msra.mxu0 %v12438_v28  ;;  %v12534_v28 = vld [vmem:[%s17692_s1 + $0x640] ss:$8 sps:$4 sm:$0xff]  }
  0x94   :  { %4545 = vmatprep.subr.bf16.mxu0 %v12446_v29  ;;  %4587 = vmatpush1.bf16.msra.mxu1 %v12441_v30  ;;  %v12542_v29 = vld [vmem:[%s17692_s1 + $0x634] ss:$8 sps:$4 sm:$0xff]   ;;  %v12537_v30 = vld [vmem:[%s17692_s1 + $0x740] ss:$8 sps:$4 sm:$0xff]  }
  0x95   :  { %4588 = vmatprep.subr.bf16.mxu1 %v12449_v31  ;;  %v12545_v31 = vld [vmem:[%s17692_s1 + $0x734] ss:$8 sps:$4 sm:$0xff]  }
  0x97   :  { %4546 = vmatpush1.bf16.msra.mxu0 %v12444_v32  ;;  %v12540_v32 = vld [vmem:[%s17692_s1 + $0x630] ss:$8 sps:$4 sm:$0xff]  }
  0x98   :  { %4547 = vmatprep.subr.bf16.mxu0 %v12452_v33  ;;  %4589 = vmatpush1.bf16.msra.mxu1 %v12447_v34  ;;  %v12548_v33 = vld [vmem:[%s17692_s1 + $0x624] ss:$8 sps:$4 sm:$0xff]   ;;  %v12543_v34 = vld [vmem:[%s17692_s1 + $0x730] ss:$8 sps:$4 sm:$0xff]  }
  0x99   :  { %4590 = vmatprep.subr.bf16.mxu1 %v12455_v35  ;;  %v12551_v35 = vld [vmem:[%s17692_s1 + $0x724] ss:$8 sps:$4 sm:$0xff]  }
  0x9b   :  { %4548 = vmatpush1.bf16.msra.mxu0 %v12450_v36  ;;  %v12546_v36 = vld [vmem:[%s17692_s1 + $0x620] ss:$8 sps:$4 sm:$0xff]  }
  0x9c   :  { %4549 = vmatprep.subr.bf16.mxu0 %v12458_v37  ;;  %4591 = vmatpush1.bf16.msra.mxu1 %v12453_v38  ;;  %v12554_v37 = vld [vmem:[%s17692_s1 + $0x614] ss:$8 sps:$4 sm:$0xff]   ;;  %v12549_v38 = vld [vmem:[%s17692_s1 + $0x720] ss:$8 sps:$4 sm:$0xff]  }
  0x9d   :  { %4592 = vmatprep.subr.bf16.mxu1 %v12461_v39  ;;  %v12557_v39 = vld [vmem:[%s17692_s1 + $0x714] ss:$8 sps:$4 sm:$0xff]  }
  0x9f   :  { %4550 = vmatpush1.bf16.msra.mxu0 %v12456_v40  ;;  %v12552_v40 = vld [vmem:[%s17692_s1 + $0x610] ss:$8 sps:$4 sm:$0xff]  }
  0xa0   :  { %4551 = vmatprep.subr.bf16.mxu0 %v12464_v41  ;;  %4593 = vmatpush1.bf16.msra.mxu1 %v12459_v42  ;;  %v12560_v41 = vld [vmem:[%s17692_s1 + $0x604] ss:$8 sps:$4 sm:$0xff]   ;;  %v12555_v42 = vld [vmem:[%s17692_s1 + $0x710] ss:$8 sps:$4 sm:$0xff]  }
  0xa1   :  { %4594 = vmatprep.subr.bf16.mxu1 %v12467_v43  ;;  %v12563_v43 = vld [vmem:[%s17692_s1 + $0x704] ss:$8 sps:$4 sm:$0xff]  }
  0xa3   :  { %4552 = vmatpush2.bf16.msra.mxu0 %v12462_v44  ;;  %v12558_v44 = vld [vmem:[%s17692_s1 + $0x600] ss:$8 sps:$4 sm:$0xff]  }
  0xa4   :  { %4553 = vmatprep.subr.bf16.mxu0 %v12470_v45  ;;  %4595 = vmatpush2.bf16.msra.mxu1 %v12465_v46  ;;  %v12566_v45 = vld [vmem:[%s17692_s1 + $0x6f4] ss:$8 sps:$4 sm:$0xff]   ;;  %v12561_v46 = vld [vmem:[%s17692_s1 + $0x700] ss:$8 sps:$4 sm:$0xff]  }
  0xa5   :  { %4596 = vmatprep.subr.bf16.mxu1 %v12473_v47  ;;  %v12569_v47 = vld [vmem:[%s17692_s1 + $0x7f4] ss:$8 sps:$4 sm:$0xff]  }
  0xa7   :  { %4554 = vmatpush2.bf16.msra.mxu0 %v12468_v48  ;;  %v12564_v48 = vld [vmem:[%s17692_s1 + $0x6f0] ss:$8 sps:$4 sm:$0xff]  }
  0xa8   :  { %4555 = vmatprep.subr.bf16.mxu0 %v12476_v49  ;;  %4597 = vmatpush2.bf16.msra.mxu1 %v12471_v50  ;;  %v12572_v49 = vld [vmem:[%s17692_s1 + $0x6e4] ss:$8 sps:$4 sm:$0xff]   ;;  %v12567_v50 = vld [vmem:[%s17692_s1 + $0x7f0] ss:$8 sps:$4 sm:$0xff]  }
  0xa9   :  { %4598 = vmatprep.subr.bf16.mxu1 %v12479_v51  ;;  %v12575_v51 = vld [vmem:[%s17692_s1 + $0x7e4] ss:$8 sps:$4 sm:$0xff]  }
  0xab   :  { %4556 = vmatpush2.bf16.msra.mxu0 %v12474_v52  ;;  %v12570_v52 = vld [vmem:[%s17692_s1 + $0x6e0] ss:$8 sps:$4 sm:$0xff]  }
  0xac   :  { %4557 = vmatprep.subr.bf16.mxu0 %v12482_v53  ;;  %4599 = vmatpush2.bf16.msra.mxu1 %v12477_v54  ;;  %v12578_v53 = vld [vmem:[%s17692_s1 + $0x6d4] ss:$8 sps:$4 sm:$0xff]   ;;  %v12573_v54 = vld [vmem:[%s17692_s1 + $0x7e0] ss:$8 sps:$4 sm:$0xff]  }
  0xad   :  { %4600 = vmatprep.subr.bf16.mxu1 %v12485_v55  ;;  %v12581_v55 = vld [vmem:[%s17692_s1 + $0x7d4] ss:$8 sps:$4 sm:$0xff]  }
  0xaf   :  { %4558 = vmatpush2.bf16.msra.mxu0 %v12480_v56  ;;  %v12576_v56 = vld [vmem:[%s17692_s1 + $0x6d0] ss:$8 sps:$4 sm:$0xff]  }
  0xb0   :  { %4559 = vmatprep.subr.bf16.mxu0 %v12488_v57  ;;  %4601 = vmatpush2.bf16.msra.mxu1 %v12483_v58  ;;  %v12584_v57 = vld [vmem:[%s17692_s1 + $0x6c4] ss:$8 sps:$4 sm:$0xff]   ;;  %v12579_v58 = vld [vmem:[%s17692_s1 + $0x7d0] ss:$8 sps:$4 sm:$0xff]  }
  0xb1   :  { %4602 = vmatprep.subr.bf16.mxu1 %v12491_v59  ;;  %v12587_v59 = vld [vmem:[%s17692_s1 + $0x7c4] ss:$8 sps:$4 sm:$0xff]  }
  0xb3   :  { %4560 = vmatpush2.bf16.msra.mxu0 %v12486_v60  ;;  %v12582_v60 = vld [vmem:[%s17692_s1 + $0x6c0] ss:$8 sps:$4 sm:$0xff]  }
  0xb4   :  { %4561 = vmatprep.subr.bf16.mxu0 %v12494_v61  ;;  %4603 = vmatpush2.bf16.msra.mxu1 %v12489_v62  ;;  %v12590_v61 = vld [vmem:[%s17692_s1 + $0x6b4] ss:$8 sps:$4 sm:$0xff]   ;;  %v12585_v62 = vld [vmem:[%s17692_s1 + $0x7c0] ss:$8 sps:$4 sm:$0xff]  }
  0xb5   :  { %4604 = vmatprep.subr.bf16.mxu1 %v12497_v63  ;;  %v12593_v63 = vld [vmem:[%s17692_s1 + $0x7b4] ss:$8 sps:$4 sm:$0xff]  }
  0xb7   :  { %4562 = vmatpush2.bf16.msra.mxu0 %v12492_v0  ;;  %v12588_v0 = vld [vmem:[%s17692_s1 + $0x6b0] ss:$8 sps:$4 sm:$0xff]  }
  0xb8   :  { %4563 = vmatprep.subr.bf16.mxu0 %v12500_v1  ;;  %4605 = vmatpush2.bf16.msra.mxu1 %v12495_v2  ;;  %v12596_v1 = vld [vmem:[%s17692_s1 + $0x6a4] ss:$8 sps:$4 sm:$0xff]   ;;  %v12591_v2 = vld [vmem:[%s17692_s1 + $0x7b0] ss:$8 sps:$4 sm:$0xff]  }
  0xb9   :  { %4606 = vmatprep.subr.bf16.mxu1 %v12503_v3  ;;  %v12599_v3 = vld [vmem:[%s17692_s1 + $0x7a4] ss:$8 sps:$4 sm:$0xff]  }
  0xbb   :  { %4564 = vmatpush2.bf16.msra.mxu0 %v12498_v4  ;;  %v12594_v4 = vld [vmem:[%s17692_s1 + $0x6a0] ss:$8 sps:$4 sm:$0xff]  }
  0xbc   :  { %4565 = vmatprep.subr.bf16.mxu0 %v12506_v5  ;;  %4607 = vmatpush2.bf16.msra.mxu1 %v12501_v6  ;;  %v12602_v5 = vld [vmem:[%s17692_s1 + $0x694] ss:$8 sps:$4 sm:$0xff]   ;;  %v12597_v6 = vld [vmem:[%s17692_s1 + $0x7a0] ss:$8 sps:$4 sm:$0xff]  }
  0xbd   :  { %4608 = vmatprep.subr.bf16.mxu1 %v12509_v8  ;;  %v12600_v8 = vld [vmem:[%s17692_s1 + $0x690] ss:$8 sps:$4 sm:$0xff]  }
  0xbf   :  { %4566 = vmatpush2.bf16.msra.mxu0 %v12504_v7  ;;  %v12605_v7 = vld [vmem:[%s17692_s1 + $0x794] ss:$8 sps:$4 sm:$0xff]  }
  0xc0   :  { %4621 = vmatprep.subr.bf16.mxu0 %v12515_v10  ;;  %4609 = vmatpush2.bf16.msra.mxu1 %v12507_v9  ;;  %v12608_v9 = vld [vmem:[%s17692_s1 + $0x684] ss:$8 sps:$4 sm:$0xff]   ;;  %v12603_v10 = vld [vmem:[%s17692_s1 + $0x790] ss:$8 sps:$4 sm:$0xff]  }
  0xc1   :  { %4664 = vmatprep.subr.bf16.mxu1 %v12521_v14  ;;  %v12617_v14 = vld [vmem:[%s17692_s1 + $0x874] ss:$8 sps:$4 sm:$0xff]  }
  0xc2   :  { %4568 = vmatmul.mubr.bf16.vlgmr.msra.gmra.mxu0 %v12510_v11  ;;  %v12606_v11 = vld [vmem:[%s17692_s1 + $0x680] ss:$8 sps:$4 sm:$0xff]  }
  0xc3   :  { %4622 = vmatpush1.bf16.msra.mxu0 %v12513_v12  ;;  %4653 = vmatprep.mubr.bf16.mxu0 %v12614_v15  ;;  %v12611_v12 = vld [vmem:[%s17692_s1 + $0x784] ss:$8 sps:$4 sm:$0xff]   ;;  %v12612_v15 = vld [vmem:[%s17693_s0 + $0x30] ss:$172 sps:$4 sm:$0xff]  }
  0xc4   :  { %4611 = vmatmul.mubr.bf16.vlgmr.msra.gmra.mxu1 %v12516_v13  ;;  %4623 = vmatprep.subr.bf16.mxu0 %v12524_v16  ;;  %v12609_v13 = vld [vmem:[%s17692_s1 + $0x780] ss:$8 sps:$4 sm:$0xff]   ;;  %v12615_v16 = vld [vmem:[%s17692_s1 + $0x870] ss:$8 sps:$4 sm:$0xff]  }
  0xc5   :  { %4665 = vmatpush1.bf16.msra.mxu1 %v12519_v17  ;;  %4696 = vmatprep.mubr.bf16.mxu1 %v12620_v18  ;;  %v12618_v17 = vld [vmem:[%s17693_s0 + $0x38] ss:$172 sps:$4 sm:$0xff]   ;;  %v12623_v18 = vld [vmem:[%s17692_s1 + $0x974] ss:$8 sps:$4 sm:$0xff]  }
  0xc6   :  { %4666 = vmatprep.subr.bf16.mxu1 %v12527_v19  ;;  %v12716_v19 = vld [vmem:[%s17693_s0 + $0x44] ss:$172 sps:$4 sm:$0xff]  }
  0xc7   :  { %4624 = vmatpush1.bf16.msra.mxu0 %v12522_v20  ;;  %v12626_v20 = vld [vmem:[%s17692_s1 + $0x864] ss:$8 sps:$4 sm:$0xff]  }
  0xc8   :  { %4625 = vmatprep.subr.bf16.mxu0 %v12530_v21  ;;  %v12621_v21 = vld [vmem:[%s17692_s1 + $0x970] ss:$8 sps:$4 sm:$0xff]  }
  0xc9   :  { %4667 = vmatpush1.bf16.msra.mxu1 %v12525_v22  ;;  %v12722_v22 = vld [vmem:[%s17693_s0 + $0x4c] ss:$172 sps:$4 sm:$0xff]  }
  0xca   :  { %4668 = vmatprep.subr.bf16.mxu1 %v12533_v23  ;;  %v12629_v23 = vld [vmem:[%s17692_s1 + $0x964] ss:$8 sps:$4 sm:$0xff]  }
  0xcb   :  { %4626 = vmatpush1.bf16.msra.mxu0 %v12528_v24  ;;  %v12624_v24 = vld [vmem:[%s17692_s1 + $0x860] ss:$8 sps:$4 sm:$0xff]  }
  0xcc   :  { %4627 = vmatprep.subr.bf16.mxu0 %v12536_v25  ;;  %v12632_v25 = vld [vmem:[%s17692_s1 + $0x854] ss:$8 sps:$4 sm:$0xff]  }
  0xcd   :  { %4669 = vmatpush1.bf16.msra.mxu1 %v12531_v26  ;;  %v12627_v26 = vld [vmem:[%s17692_s1 + $0x960] ss:$8 sps:$4 sm:$0xff]  }
  0xce   :  { %4670 = vmatprep.subr.bf16.mxu1 %v12539_v27  ;;  %v12635_v27 = vld [vmem:[%s17692_s1 + $0x954] ss:$8 sps:$4 sm:$0xff]  }
  0xcf   :  { %4628 = vmatpush1.bf16.msra.mxu0 %v12534_v28  ;;  %v12630_v28 = vld [vmem:[%s17692_s1 + $0x850] ss:$8 sps:$4 sm:$0xff]  }
  0xd0   :  { %4629 = vmatprep.subr.bf16.mxu0 %v12542_v29  ;;  %v12638_v29 = vld [vmem:[%s17692_s1 + $0x844] ss:$8 sps:$4 sm:$0xff]  }
  0xd1   :  { %4671 = vmatpush1.bf16.msra.mxu1 %v12537_v30  ;;  %v12633_v30 = vld [vmem:[%s17692_s1 + $0x950] ss:$8 sps:$4 sm:$0xff]  }
  0xd2   :  { %4672 = vmatprep.subr.bf16.mxu1 %v12545_v31  ;;  %v12641_v31 = vld [vmem:[%s17692_s1 + $0x944] ss:$8 sps:$4 sm:$0xff]  }
  0xd3   :  { %4630 = vmatpush1.bf16.msra.mxu0 %v12540_v32  ;;  %v12636_v32 = vld [vmem:[%s17692_s1 + $0x840] ss:$8 sps:$4 sm:$0xff]  }
  0xd4   :  { %4631 = vmatprep.subr.bf16.mxu0 %v12548_v33  ;;  %v12644_v33 = vld [vmem:[%s17692_s1 + $0x834] ss:$8 sps:$4 sm:$0xff]  }
  0xd5   :  { %4673 = vmatpush1.bf16.msra.mxu1 %v12543_v34  ;;  %v12639_v34 = vld [vmem:[%s17692_s1 + $0x940] ss:$8 sps:$4 sm:$0xff]  }
  0xd6   :  { %4674 = vmatprep.subr.bf16.mxu1 %v12551_v35  ;;  %v12647_v35 = vld [vmem:[%s17692_s1 + $0x934] ss:$8 sps:$4 sm:$0xff]  }
  0xd7   :  { %4632 = vmatpush1.bf16.msra.mxu0 %v12546_v36  ;;  %v12642_v36 = vld [vmem:[%s17692_s1 + $0x830] ss:$8 sps:$4 sm:$0xff]  }
  0xd8   :  { %4633 = vmatprep.subr.bf16.mxu0 %v12554_v37  ;;  %v12650_v37 = vld [vmem:[%s17692_s1 + $0x824] ss:$8 sps:$4 sm:$0xff]  }
  0xd9   :  { %4675 = vmatpush1.bf16.msra.mxu1 %v12549_v38  ;;  %v12645_v38 = vld [vmem:[%s17692_s1 + $0x930] ss:$8 sps:$4 sm:$0xff]  }
  0xda   :  { %4676 = vmatprep.subr.bf16.mxu1 %v12557_v39  ;;  %v12653_v39 = vld [vmem:[%s17692_s1 + $0x924] ss:$8 sps:$4 sm:$0xff]  }
  0xdb   :  { %4634 = vmatpush1.bf16.msra.mxu0 %v12552_v40  ;;  %v12648_v40 = vld [vmem:[%s17692_s1 + $0x820] ss:$8 sps:$4 sm:$0xff]  }
  0xdc   :  { %4635 = vmatprep.subr.bf16.mxu0 %v12560_v41  ;;  %v12656_v41 = vld [vmem:[%s17692_s1 + $0x814] ss:$8 sps:$4 sm:$0xff]  }
  0xdd   :  { %4677 = vmatpush1.bf16.msra.mxu1 %v12555_v42  ;;  %v12651_v42 = vld [vmem:[%s17692_s1 + $0x920] ss:$8 sps:$4 sm:$0xff]  }
  0xde   :  { %4678 = vmatprep.subr.bf16.mxu1 %v12563_v43  ;;  %v12659_v43 = vld [vmem:[%s17692_s1 + $0x914] ss:$8 sps:$4 sm:$0xff]  }
  0xdf   :  { %4636 = vmatpush1.bf16.msra.mxu0 %v12558_v44  ;;  %v12654_v44 = vld [vmem:[%s17692_s1 + $0x810] ss:$8 sps:$4 sm:$0xff]  }
  0xe0   :  { %4637 = vmatprep.subr.bf16.mxu0 %v12566_v45  ;;  %v12662_v45 = vld [vmem:[%s17692_s1 + $0x804] ss:$8 sps:$4 sm:$0xff]  }
  0xe1   :  { %4679 = vmatpush1.bf16.msra.mxu1 %v12561_v46  ;;  %v12657_v46 = vld [vmem:[%s17692_s1 + $0x910] ss:$8 sps:$4 sm:$0xff]  }
  0xe2   :  { %4680 = vmatprep.subr.bf16.mxu1 %v12569_v47  ;;  %v12665_v47 = vld [vmem:[%s17692_s1 + $0x904] ss:$8 sps:$4 sm:$0xff]  }
  0xe3   :  { %4638 = vmatpush2.bf16.msra.mxu0 %v12564_v48  ;;  %v12660_v48 = vld [vmem:[%s17692_s1 + $0x800] ss:$8 sps:$4 sm:$0xff]  }
  0xe4   :  { %4639 = vmatprep.subr.bf16.mxu0 %v12572_v49  ;;  %v12668_v49 = vld [vmem:[%s17692_s1 + $0x8f4] ss:$8 sps:$4 sm:$0xff]  }
  0xe5   :  { %4681 = vmatpush2.bf16.msra.mxu1 %v12567_v50  ;;  %v12663_v50 = vld [vmem:[%s17692_s1 + $0x900] ss:$8 sps:$4 sm:$0xff]  }
  0xe6   :  { %4682 = vmatprep.subr.bf16.mxu1 %v12575_v51  ;;  %v12671_v51 = vld [vmem:[%s17692_s1 + $0x9f4] ss:$8 sps:$4 sm:$0xff]  }
  0xe7   :  { %4640 = vmatpush2.bf16.msra.mxu0 %v12570_v52  ;;  %v12666_v52 = vld [vmem:[%s17692_s1 + $0x8f0] ss:$8 sps:$4 sm:$0xff]  }
  0xe8   :  { %4641 = vmatprep.subr.bf16.mxu0 %v12578_v53  ;;  %v12674_v53 = vld [vmem:[%s17692_s1 + $0x8e4] ss:$8 sps:$4 sm:$0xff]  }
  0xe9   :  { %4683 = vmatpush2.bf16.msra.mxu1 %v12573_v54  ;;  %v12669_v54 = vld [vmem:[%s17692_s1 + $0x9f0] ss:$8 sps:$4 sm:$0xff]  }
  0xea   :  { %4684 = vmatprep.subr.bf16.mxu1 %v12581_v55  ;;  %v12677_v55 = vld [vmem:[%s17692_s1 + $0x9e4] ss:$8 sps:$4 sm:$0xff]  }
  0xeb   :  { %4642 = vmatpush2.bf16.msra.mxu0 %v12576_v56  ;;  %v12672_v56 = vld [vmem:[%s17692_s1 + $0x8e0] ss:$8 sps:$4 sm:$0xff]  }
  0xec   :  { %4643 = vmatprep.subr.bf16.mxu0 %v12584_v57  ;;  %v12680_v57 = vld [vmem:[%s17692_s1 + $0x8d4] ss:$8 sps:$4 sm:$0xff]  }
  0xed   :  { %4685 = vmatpush2.bf16.msra.mxu1 %v12579_v58  ;;  %v12675_v58 = vld [vmem:[%s17692_s1 + $0x9e0] ss:$8 sps:$4 sm:$0xff]  }
  0xee   :  { %4686 = vmatprep.subr.bf16.mxu1 %v12587_v59  ;;  %v12683_v59 = vld [vmem:[%s17692_s1 + $0x9d4] ss:$8 sps:$4 sm:$0xff]  }
  0xef   :  { %4644 = vmatpush2.bf16.msra.mxu0 %v12582_v60  ;;  %v12678_v60 = vld [vmem:[%s17692_s1 + $0x8d0] ss:$8 sps:$4 sm:$0xff]  }
  0xf0   :  { %4645 = vmatprep.subr.bf16.mxu0 %v12590_v61  ;;  %v12686_v61 = vld [vmem:[%s17692_s1 + $0x8c4] ss:$8 sps:$4 sm:$0xff]  }
  0xf1   :  { %4687 = vmatpush2.bf16.msra.mxu1 %v12585_v62  ;;  %v12681_v62 = vld [vmem:[%s17692_s1 + $0x9d0] ss:$8 sps:$4 sm:$0xff]  }
  0xf2   :  { %4688 = vmatprep.subr.bf16.mxu1 %v12593_v63  ;;  %v12689_v63 = vld [vmem:[%s17692_s1 + $0x9c4] ss:$8 sps:$4 sm:$0xff]  }
  0xf3   :  { %4646 = vmatpush2.bf16.msra.mxu0 %v12588_v0  ;;  %v12684_v0 = vld [vmem:[%s17692_s1 + $0x8c0] ss:$8 sps:$4 sm:$0xff]  }
  0xf4   :  { %4647 = vmatprep.subr.bf16.mxu0 %v12596_v1  ;;  %v12692_v1 = vld [vmem:[%s17692_s1 + $0x8b4] ss:$8 sps:$4 sm:$0xff]  }
  0xf5   :  { %4689 = vmatpush2.bf16.msra.mxu1 %v12591_v2  ;;  %v12687_v2 = vld [vmem:[%s17692_s1 + $0x9c0] ss:$8 sps:$4 sm:$0xff]  }
  0xf6   :  { %4690 = vmatprep.subr.bf16.mxu1 %v12599_v3  ;;  %v12695_v3 = vld [vmem:[%s17692_s1 + $0x9b4] ss:$8 sps:$4 sm:$0xff]  }
  0xf7   :  { %4648 = vmatpush2.bf16.msra.mxu0 %v12594_v4  ;;  %v12690_v4 = vld [vmem:[%s17692_s1 + $0x8b0] ss:$8 sps:$4 sm:$0xff]  }
  0xf8   :  { %4649 = vmatprep.subr.bf16.mxu0 %v12602_v5  ;;  %v12698_v5 = vld [vmem:[%s17692_s1 + $0x8a4] ss:$8 sps:$4 sm:$0xff]  }
  0xf9   :  { %4691 = vmatpush2.bf16.msra.mxu1 %v12597_v6  ;;  %v12693_v6 = vld [vmem:[%s17692_s1 + $0x9b0] ss:$8 sps:$4 sm:$0xff]  }
  0xfa   :  { %4692 = vmatprep.subr.bf16.mxu1 %v12605_v7  ;;  %v12696_v7 = vld [vmem:[%s17692_s1 + $0x8a0] ss:$8 sps:$4 sm:$0xff]  }
  0xfb   :  { %4650 = vmatpush2.bf16.msra.mxu0 %v12600_v8  ;;  %v12701_v8 = vld [vmem:[%s17692_s1 + $0x9a4] ss:$8 sps:$4 sm:$0xff]  }
  0xfc   :  { %4651 = vmatprep.subr.bf16.mxu0 %v12608_v9  ;;  %v12699_v9 = vld [vmem:[%s17692_s1 + $0x9a0] ss:$8 sps:$4 sm:$0xff]  }
  0xfd   :  { %4693 = vmatpush2.bf16.msra.mxu1 %v12603_v10  ;;  %v12704_v10 = vld [vmem:[%s17692_s1 + $0x894] ss:$8 sps:$4 sm:$0xff]  }
  0xfe   :  { %4694 = vmatprep.subr.bf16.mxu1 %v12611_v12  ;;  %v12707_v12 = vld [vmem:[%s17692_s1 + $0x994] ss:$8 sps:$4 sm:$0xff]  }
  0xff   :  { %4652 = vmatpush2.bf16.msra.mxu0 %v12606_v11  ;;  %v12702_v11 = vld [vmem:[%s17692_s1 + $0x890] ss:$8 sps:$4 sm:$0xff]  }
 0x100   :  { %4707 = vmatprep.subr.bf16.mxu0 %v12617_v14  ;;  %v12710_v14 = vld [vmem:[%s17692_s1 + $0x884] ss:$8 sps:$4 sm:$0xff]  }
 0x101   :  { %4695 = vmatpush2.bf16.msra.mxu1 %v12609_v13  ;;  %v12705_v13 = vld [vmem:[%s17692_s1 + $0x990] ss:$8 sps:$4 sm:$0xff]  }
 0x102   :  { %4654 = vmatmul.mubr.bf16.vlgmr.msra.gmra.mxu0 %v12612_v15  ;;  %4750 = vmatprep.subr.bf16.mxu1 %v12623_v18  ;;  %v12708_v15 = vld [vmem:[%s17692_s1 + $0x880] ss:$8 sps:$4 sm:$0xff]   ;;  %v12719_v18 = vld [vmem:[%s17692_s1 + $0xa74] ss:$8 sps:$4 sm:$0xff]  }
 0x103   :  { %4708 = vmatpush1.bf16.msra.mxu0 %v12615_v16  ;;  %4739 = vmatprep.mubr.bf16.mxu0 %v12716_v19  ;;  %v12713_v16 = vld [vmem:[%s17692_s1 + $0x984] ss:$8 sps:$4 sm:$0xff]  }
 0x104   :  { %4697 = vmatmul.mubr.bf16.vlgmr.msra.gmra.mxu1 %v12618_v17  ;;  %4709 = vmatprep.subr.bf16.mxu0 %v12626_v20  ;;  %v12711_v17 = vld [vmem:[%s17692_s1 + $0x980] ss:$8 sps:$4 sm:$0xff]   ;;  %v12725_v20 = vld [vmem:[%s17692_s1 + $0xb74] ss:$8 sps:$4 sm:$0xff]  }
 0x105   :  { %4751 = vmatpush1.bf16.msra.mxu1 %v12621_v21  ;;  %4782 = vmatprep.mubr.bf16.mxu1 %v12722_v22  ;;  %v12714_v19 = vld [vmem:[%s17693_s0 + $0x40] ss:$172 sps:$4 sm:$0xff]   ;;  %v12717_v21 = vld [vmem:[%s17692_s1 + $0xa70] ss:$8 sps:$4 sm:$0xff]   ;;  %v12720_v22 = vld [vmem:[%s17693_s0 + $0x48] ss:$172 sps:$4 sm:$0xff]  }
 0x106   :  { %4752 = vmatprep.subr.bf16.mxu1 %v12629_v23  ;;  %v12818_v23 = vld [vmem:[%s17693_s0 + $0x54] ss:$172 sps:$4 sm:$0xff]  }
 0x107   :  { %4710 = vmatpush1.bf16.msra.mxu0 %v12624_v24  ;;  %v12728_v24 = vld [vmem:[%s17692_s1 + $0xa64] ss:$8 sps:$4 sm:$0xff]  }
 0x108   :  { %4711 = vmatprep.subr.bf16.mxu0 %v12632_v25  ;;  %v12723_v25 = vld [vmem:[%s17692_s1 + $0xb70] ss:$8 sps:$4 sm:$0xff]  }
 0x109   :  { %4753 = vmatpush1.bf16.msra.mxu1 %v12627_v26  ;;  %v12824_v26 = vld [vmem:[%s17693_s0 + $0x5c] ss:$172 sps:$4 sm:$0xff]  }
 0x10a   :  { %4754 = vmatprep.subr.bf16.mxu1 %v12635_v27  ;;  %v12726_v27 = vld [vmem:[%s17692_s1 + $0xa60] ss:$8 sps:$4 sm:$0xff]  }
 0x10b   :  { %4712 = vmatpush1.bf16.msra.mxu0 %v12630_v28  ;;  %v12731_v28 = vld [vmem:[%s17692_s1 + $0xb64] ss:$8 sps:$4 sm:$0xff]  }
 0x10c   :  { %4713 = vmatprep.subr.bf16.mxu0 %v12638_v29  ;;  %v12729_v29 = vld [vmem:[%s17692_s1 + $0xb60] ss:$8 sps:$4 sm:$0xff]  }
 0x10d   :  { %4755 = vmatpush1.bf16.msra.mxu1 %v12633_v30  ;;  %v12734_v30 = vld [vmem:[%s17692_s1 + $0xa54] ss:$8 sps:$4 sm:$0xff]  }
 0x10e   :  { %4756 = vmatprep.subr.bf16.mxu1 %v12641_v31  ;;  %v12732_v31 = vld [vmem:[%s17692_s1 + $0xa50] ss:$8 sps:$4 sm:$0xff]  }
 0x10f   :  { %4714 = vmatpush1.bf16.msra.mxu0 %v12636_v32  ;;  %v12737_v32 = vld [vmem:[%s17692_s1 + $0xb54] ss:$8 sps:$4 sm:$0xff]  }
 0x110   :  { %4715 = vmatprep.subr.bf16.mxu0 %v12644_v33  ;;  %v12735_v33 = vld [vmem:[%s17692_s1 + $0xb50] ss:$8 sps:$4 sm:$0xff]  }
 0x111   :  { %4757 = vmatpush1.bf16.msra.mxu1 %v12639_v34  ;;  %v12740_v34 = vld [vmem:[%s17692_s1 + $0xa44] ss:$8 sps:$4 sm:$0xff]  }
 0x112   :  { %4758 = vmatprep.subr.bf16.mxu1 %v12647_v35  ;;  %v12738_v35 = vld [vmem:[%s17692_s1 + $0xa40] ss:$8 sps:$4 sm:$0xff]  }
 0x113   :  { %4716 = vmatpush1.bf16.msra.mxu0 %v12642_v36  ;;  %v12743_v36 = vld [vmem:[%s17692_s1 + $0xb44] ss:$8 sps:$4 sm:$0xff]  }
 0x114   :  { %4717 = vmatprep.subr.bf16.mxu0 %v12650_v37  ;;  %v12741_v37 = vld [vmem:[%s17692_s1 + $0xb40] ss:$8 sps:$4 sm:$0xff]  }
 0x115   :  { %4759 = vmatpush1.bf16.msra.mxu1 %v12645_v38  ;;  %v12746_v38 = vld [vmem:[%s17692_s1 + $0xa34] ss:$8 sps:$4 sm:$0xff]  }
 0x116   :  { %4760 = vmatprep.subr.bf16.mxu1 %v12653_v39  ;;  %v12744_v39 = vld [vmem:[%s17692_s1 + $0xa30] ss:$8 sps:$4 sm:$0xff]  }
 0x117   :  { %4718 = vmatpush1.bf16.msra.mxu0 %v12648_v40  ;;  %v12749_v40 = vld [vmem:[%s17692_s1 + $0xb34] ss:$8 sps:$4 sm:$0xff]  }
 0x118   :  { %4719 = vmatprep.subr.bf16.mxu0 %v12656_v41  ;;  %v12747_v41 = vld [vmem:[%s17692_s1 + $0xb30] ss:$8 sps:$4 sm:$0xff]  }
 0x119   :  { %4761 = vmatpush1.bf16.msra.mxu1 %v12651_v42  ;;  %v12752_v42 = vld [vmem:[%s17692_s1 + $0xa24] ss:$8 sps:$4 sm:$0xff]  }
 0x11a   :  { %4762 = vmatprep.subr.bf16.mxu1 %v12659_v43  ;;  %v12750_v43 = vld [vmem:[%s17692_s1 + $0xa20] ss:$8 sps:$4 sm:$0xff]  }
 0x11b   :  { %4720 = vmatpush1.bf16.msra.mxu0 %v12654_v44  ;;  %v12755_v44 = vld [vmem:[%s17692_s1 + $0xb24] ss:$8 sps:$4 sm:$0xff]  }
 0x11c   :  { %4721 = vmatprep.subr.bf16.mxu0 %v12662_v45  ;;  %v12753_v45 = vld [vmem:[%s17692_s1 + $0xb20] ss:$8 sps:$4 sm:$0xff]  }
 0x11d   :  { %4763 = vmatpush1.bf16.msra.mxu1 %v12657_v46  ;;  %v12758_v46 = vld [vmem:[%s17692_s1 + $0xa14] ss:$8 sps:$4 sm:$0xff]  }
 0x11e   :  { %4764 = vmatprep.subr.bf16.mxu1 %v12665_v47  ;;  %v12756_v47 = vld [vmem:[%s17692_s1 + $0xa10] ss:$8 sps:$4 sm:$0xff]  }
 0x11f   :  { %4722 = vmatpush1.bf16.msra.mxu0 %v12660_v48  ;;  %v12761_v48 = vld [vmem:[%s17692_s1 + $0xb14] ss:$8 sps:$4 sm:$0xff]  }
 0x120   :  { %4723 = vmatprep.subr.bf16.mxu0 %v12668_v49  ;;  %v12759_v49 = vld [vmem:[%s17692_s1 + $0xb10] ss:$8 sps:$4 sm:$0xff]  }
 0x121   :  { %4765 = vmatpush1.bf16.msra.mxu1 %v12663_v50  ;;  %v12764_v50 = vld [vmem:[%s17692_s1 + $0xa04] ss:$8 sps:$4 sm:$0xff]  }
 0x122   :  { %4766 = vmatprep.subr.bf16.mxu1 %v12671_v51  ;;  %v12762_v51 = vld [vmem:[%s17692_s1 + $0xa00] ss:$8 sps:$4 sm:$0xff]  }
 0x123   :  { %4724 = vmatpush2.bf16.msra.mxu0 %v12666_v52  ;;  %v12767_v52 = vld [vmem:[%s17692_s1 + $0xb04] ss:$8 sps:$4 sm:$0xff]  }
 0x124   :  { %4725 = vmatprep.subr.bf16.mxu0 %v12674_v53  ;;  %v12765_v53 = vld [vmem:[%s17692_s1 + $0xb00] ss:$8 sps:$4 sm:$0xff]  }
 0x125   :  { %4767 = vmatpush2.bf16.msra.mxu1 %v12669_v54  ;;  %v12770_v54 = vld [vmem:[%s17692_s1 + $0xaf4] ss:$8 sps:$4 sm:$0xff]  }
 0x126   :  { %4768 = vmatprep.subr.bf16.mxu1 %v12677_v55  ;;  %v12768_v55 = vld [vmem:[%s17692_s1 + $0xaf0] ss:$8 sps:$4 sm:$0xff]  }
 0x127   :  { %4726 = vmatpush2.bf16.msra.mxu0 %v12672_v56  ;;  %v12773_v56 = vld [vmem:[%s17692_s1 + $0xbf4] ss:$8 sps:$4 sm:$0xff]  }
 0x128   :  { %4727 = vmatprep.subr.bf16.mxu0 %v12680_v57  ;;  %v12771_v57 = vld [vmem:[%s17692_s1 + $0xbf0] ss:$8 sps:$4 sm:$0xff]  }
 0x129   :  { %4769 = vmatpush2.bf16.msra.mxu1 %v12675_v58  ;;  %v12776_v58 = vld [vmem:[%s17692_s1 + $0xae4] ss:$8 sps:$4 sm:$0xff]  }
 0x12a   :  { %4770 = vmatprep.subr.bf16.mxu1 %v12683_v59  ;;  %v12774_v59 = vld [vmem:[%s17692_s1 + $0xae0] ss:$8 sps:$4 sm:$0xff]  }
 0x12b   :  { %4728 = vmatpush2.bf16.msra.mxu0 %v12678_v60  ;;  %v12779_v60 = vld [vmem:[%s17692_s1 + $0xbe4] ss:$8 sps:$4 sm:$0xff]  }
 0x12c   :  { %4729 = vmatprep.subr.bf16.mxu0 %v12686_v61  ;;  %v12777_v61 = vld [vmem:[%s17692_s1 + $0xbe0] ss:$8 sps:$4 sm:$0xff]  }
 0x12d   :  { %4771 = vmatpush2.bf16.msra.mxu1 %v12681_v62  ;;  %v12782_v62 = vld [vmem:[%s17692_s1 + $0xad4] ss:$8 sps:$4 sm:$0xff]  }
 0x12e   :  { %4772 = vmatprep.subr.bf16.mxu1 %v12689_v63  ;;  %v12780_v63 = vld [vmem:[%s17692_s1 + $0xad0] ss:$8 sps:$4 sm:$0xff]  }
 0x12f   :  { %4730 = vmatpush2.bf16.msra.mxu0 %v12684_v0  ;;  %v12785_v0 = vld [vmem:[%s17692_s1 + $0xbd4] ss:$8 sps:$4 sm:$0xff]  }
 0x130   :  { %4731 = vmatprep.subr.bf16.mxu0 %v12692_v1  ;;  %v12783_v1 = vld [vmem:[%s17692_s1 + $0xbd0] ss:$8 sps:$4 sm:$0xff]  }
 0x131   :  { %4773 = vmatpush2.bf16.msra.mxu1 %v12687_v2  ;;  %v12788_v2 = vld [vmem:[%s17692_s1 + $0xac4] ss:$8 sps:$4 sm:$0xff]  }
 0x132   :  { %4774 = vmatprep.subr.bf16.mxu1 %v12695_v3  ;;  %v12786_v3 = vld [vmem:[%s17692_s1 + $0xac0] ss:$8 sps:$4 sm:$0xff]  }
 0x133   :  { %4732 = vmatpush2.bf16.msra.mxu0 %v12690_v4  ;;  %v12791_v4 = vld [vmem:[%s17692_s1 + $0xbc4] ss:$8 sps:$4 sm:$0xff]  }
 0x134   :  { %4733 = vmatprep.subr.bf16.mxu0 %v12698_v5  ;;  %v12789_v5 = vld [vmem:[%s17692_s1 + $0xbc0] ss:$8 sps:$4 sm:$0xff]  }
 0x135   :  { %4775 = vmatpush2.bf16.msra.mxu1 %v12693_v6  ;;  %v12794_v6 = vld [vmem:[%s17692_s1 + $0xab4] ss:$8 sps:$4 sm:$0xff]  }
 0x136   :  { %4776 = vmatprep.subr.bf16.mxu1 %v12701_v8  ;;  %v12797_v8 = vld [vmem:[%s17692_s1 + $0xbb4] ss:$8 sps:$4 sm:$0xff]  }
 0x137   :  { %4734 = vmatpush2.bf16.msra.mxu0 %v12696_v7  ;;  %v12792_v7 = vld [vmem:[%s17692_s1 + $0xab0] ss:$8 sps:$4 sm:$0xff]  }
 0x138   :  { %4735 = vmatprep.subr.bf16.mxu0 %v12704_v10  ;;  %v12800_v10 = vld [vmem:[%s17692_s1 + $0xaa4] ss:$8 sps:$4 sm:$0xff]  }
 0x139   :  { %4777 = vmatpush2.bf16.msra.mxu1 %v12699_v9  ;;  %v12795_v9 = vld [vmem:[%s17692_s1 + $0xbb0] ss:$8 sps:$4 sm:$0xff]  }
 0x13a   :  { %4778 = vmatprep.subr.bf16.mxu1 %v12707_v12  ;;  %v12803_v12 = vld [vmem:[%s17692_s1 + $0xba4] ss:$8 sps:$4 sm:$0xff]  }
 0x13b   :  { %4736 = vmatpush2.bf16.msra.mxu0 %v12702_v11  ;;  %v12798_v11 = vld [vmem:[%s17692_s1 + $0xaa0] ss:$8 sps:$4 sm:$0xff]  }
 0x13c   :  { %4737 = vmatprep.subr.bf16.mxu0 %v12710_v14  ;;  %v12806_v14 = vld [vmem:[%s17692_s1 + $0xa94] ss:$8 sps:$4 sm:$0xff]  }
 0x13d   :  { %4779 = vmatpush2.bf16.msra.mxu1 %v12705_v13  ;;  %v12801_v13 = vld [vmem:[%s17692_s1 + $0xba0] ss:$8 sps:$4 sm:$0xff]  }
 0x13e   :  { %4780 = vmatprep.subr.bf16.mxu1 %v12713_v16  ;;  %v12809_v16 = vld [vmem:[%s17692_s1 + $0xb94] ss:$8 sps:$4 sm:$0xff]  }
 0x13f   :  { %4738 = vmatpush2.bf16.msra.mxu0 %v12708_v15  ;;  %v12804_v15 = vld [vmem:[%s17692_s1 + $0xa90] ss:$8 sps:$4 sm:$0xff]  }
 0x140   :  { %4793 = vmatprep.subr.bf16.mxu0 %v12719_v18  ;;  %v12812_v18 = vld [vmem:[%s17692_s1 + $0xa84] ss:$8 sps:$4 sm:$0xff]  }
 0x141   :  { %4781 = vmatpush2.bf16.msra.mxu1 %v12711_v17  ;;  %v12807_v17 = vld [vmem:[%s17692_s1 + $0xb90] ss:$8 sps:$4 sm:$0xff]  }
 0x142   :  { %4740 = vmatmul.mubr.bf16.vlgmr.msra.gmra.mxu0 %v12714_v19  ;;  %4836 = vmatprep.subr.bf16.mxu1 %v12725_v20  ;;  %v12810_v19 = vld [vmem:[%s17692_s1 + $0xa80] ss:$8 sps:$4 sm:$0xff]   ;;  %v12815_v20 = vld [vmem:[%s17692_s1 + $0xb84] ss:$8 sps:$4 sm:$0xff]  }
 0x143   :  { %4794 = vmatpush1.bf16.msra.mxu0 %v12717_v21  ;;  %4825 = vmatprep.mubr.bf16.mxu0 %v12818_v23  ;;  %v12813_v21 = vld [vmem:[%s17692_s1 + $0xb80] ss:$8 sps:$4 sm:$0xff]   ;;  %v12816_v23 = vld [vmem:[%s17693_s0 + $0x50] ss:$172 sps:$4 sm:$0xff]  }
 0x144   :  { %4783 = vmatmul.mubr.bf16.vlgmr.msra.gmra.mxu1 %v12720_v22  ;;  %4795 = vmatprep.subr.bf16.mxu0 %v12728_v24  ;;  %v12821_v22 = vld [vmem:[%s17692_s1 + $0xc74] ss:$8 sps:$4 sm:$0xff]  }
 0x145   :  { %4837 = vmatpush1.bf16.msra.mxu1 %v12723_v25  ;;  %4868 = vmatprep.mubr.bf16.mxu1 %v12824_v26  ;;  %v12827_v24 = vld [vmem:[%s17692_s1 + $0xd74] ss:$8 sps:$4 sm:$0xff]   ;;  %v12819_v25 = vld [vmem:[%s17692_s1 + $0xc70] ss:$8 sps:$4 sm:$0xff]  }
 0x146   :  { %4838 = vmatprep.subr.bf16.mxu1 %v12731_v28  ;;  %v12822_v26 = vld [vmem:[%s17693_s0 + $0x58] ss:$172 sps:$4 sm:$0xff]  }
 0x147   :  { %4796 = vmatpush1.bf16.msra.mxu0 %v12726_v27  ;;  %v12920_v27 = vld [vmem:[%s17693_s0 + $0x64] ss:$172 sps:$4 sm:$0xff]  }
 0x148   :  { %4797 = vmatprep.subr.bf16.mxu0 %v12734_v30  ;;  %v12830_v28 = vld [vmem:[%s17692_s1 + $0xc64] ss:$8 sps:$4 sm:$0xff]  }
 0x149   :  { %4839 = vmatpush1.bf16.msra.mxu1 %v12729_v29  ;;  %v12825_v29 = vld [vmem:[%s17692_s1 + $0xd70] ss:$8 sps:$4 sm:$0xff]  }
 0x14a   :  { %4840 = vmatprep.subr.bf16.mxu1 %v12737_v32  ;;  %v12926_v30 = vld [vmem:[%s17693_s0 + $0x6c] ss:$172 sps:$4 sm:$0xff]   ;;  %v12828_v32 = vld [vmem:[%s17692_s1 + $0xc60] ss:$8 sps:$4 sm:$0xff]  }
 0x14b   :  { %4798 = vmatpush1.bf16.msra.mxu0 %v12732_v31  ;;  %v12833_v31 = vld [vmem:[%s17692_s1 + $0xd64] ss:$8 sps:$4 sm:$0xff]  }
 0x14c   :  { %4799 = vmatprep.subr.bf16.mxu0 %v12740_v34  ;;  %v12831_v34 = vld [vmem:[%s17692_s1 + $0xd60] ss:$8 sps:$4 sm:$0xff]  }
 0x14d   :  { %4841 = vmatpush1.bf16.msra.mxu1 %v12735_v33  ;;  %v12836_v33 = vld [vmem:[%s17692_s1 + $0xc54] ss:$8 sps:$4 sm:$0xff]  }
 0x14e   :  { %4842 = vmatprep.subr.bf16.mxu1 %v12743_v36  ;;  %v12834_v36 = vld [vmem:[%s17692_s1 + $0xc50] ss:$8 sps:$4 sm:$0xff]  }
 0x14f   :  { %4800 = vmatpush1.bf16.msra.mxu0 %v12738_v35  ;;  %v12839_v35 = vld [vmem:[%s17692_s1 + $0xd54] ss:$8 sps:$4 sm:$0xff]  }
 0x150   :  { %4801 = vmatprep.subr.bf16.mxu0 %v12746_v38  ;;  %v12837_v38 = vld [vmem:[%s17692_s1 + $0xd50] ss:$8 sps:$4 sm:$0xff]  }
 0x151   :  { %4843 = vmatpush1.bf16.msra.mxu1 %v12741_v37  ;;  %v12842_v37 = vld [vmem:[%s17692_s1 + $0xc44] ss:$8 sps:$4 sm:$0xff]  }
 0x152   :  { %4844 = vmatprep.subr.bf16.mxu1 %v12749_v40  ;;  %v12840_v40 = vld [vmem:[%s17692_s1 + $0xc40] ss:$8 sps:$4 sm:$0xff]  }
 0x153   :  { %4802 = vmatpush1.bf16.msra.mxu0 %v12744_v39  ;;  %v12845_v39 = vld [vmem:[%s17692_s1 + $0xd44] ss:$8 sps:$4 sm:$0xff]  }
 0x154   :  { %4803 = vmatprep.subr.bf16.mxu0 %v12752_v42  ;;  %v12843_v42 = vld [vmem:[%s17692_s1 + $0xd40] ss:$8 sps:$4 sm:$0xff]  }
 0x155   :  { %4845 = vmatpush1.bf16.msra.mxu1 %v12747_v41  ;;  %v12848_v41 = vld [vmem:[%s17692_s1 + $0xc34] ss:$8 sps:$4 sm:$0xff]  }
 0x156   :  { %4846 = vmatprep.subr.bf16.mxu1 %v12755_v44  ;;  %v12846_v44 = vld [vmem:[%s17692_s1 + $0xc30] ss:$8 sps:$4 sm:$0xff]  }
 0x157   :  { %4804 = vmatpush1.bf16.msra.mxu0 %v12750_v43  ;;  %v12851_v43 = vld [vmem:[%s17692_s1 + $0xd34] ss:$8 sps:$4 sm:$0xff]  }
 0x158   :  { %4805 = vmatprep.subr.bf16.mxu0 %v12758_v46  ;;  %v12849_v46 = vld [vmem:[%s17692_s1 + $0xd30] ss:$8 sps:$4 sm:$0xff]  }
 0x159   :  { %4847 = vmatpush1.bf16.msra.mxu1 %v12753_v45  ;;  %v12854_v45 = vld [vmem:[%s17692_s1 + $0xc24] ss:$8 sps:$4 sm:$0xff]  }
 0x15a   :  { %4848 = vmatprep.subr.bf16.mxu1 %v12761_v48  ;;  %v12852_v48 = vld [vmem:[%s17692_s1 + $0xc20] ss:$8 sps:$4 sm:$0xff]  }
 0x15b   :  { %4806 = vmatpush1.bf16.msra.mxu0 %v12756_v47  ;;  %v12857_v47 = vld [vmem:[%s17692_s1 + $0xd24] ss:$8 sps:$4 sm:$0xff]  }
 0x15c   :  { %4807 = vmatprep.subr.bf16.mxu0 %v12764_v50  ;;  %v12855_v50 = vld [vmem:[%s17692_s1 + $0xd20] ss:$8 sps:$4 sm:$0xff]  }
 0x15d   :  { %4849 = vmatpush1.bf16.msra.mxu1 %v12759_v49  ;;  %v12860_v49 = vld [vmem:[%s17692_s1 + $0xc14] ss:$8 sps:$4 sm:$0xff]  }
 0x15e   :  { %4850 = vmatprep.subr.bf16.mxu1 %v12767_v52  ;;  %v12858_v52 = vld [vmem:[%s17692_s1 + $0xc10] ss:$8 sps:$4 sm:$0xff]  }
 0x15f   :  { %4808 = vmatpush1.bf16.msra.mxu0 %v12762_v51  ;;  %v12863_v51 = vld [vmem:[%s17692_s1 + $0xd14] ss:$8 sps:$4 sm:$0xff]  }
 0x160   :  { %4809 = vmatprep.subr.bf16.mxu0 %v12770_v54  ;;  %v12861_v54 = vld [vmem:[%s17692_s1 + $0xd10] ss:$8 sps:$4 sm:$0xff]  }
 0x161   :  { %4851 = vmatpush1.bf16.msra.mxu1 %v12765_v53  ;;  %v12866_v53 = vld [vmem:[%s17692_s1 + $0xc04] ss:$8 sps:$4 sm:$0xff]  }
 0x162   :  { %4852 = vmatprep.subr.bf16.mxu1 %v12773_v56  ;;  %v12864_v56 = vld [vmem:[%s17692_s1 + $0xc00] ss:$8 sps:$4 sm:$0xff]  }
 0x163   :  { %4810 = vmatpush2.bf16.msra.mxu0 %v12768_v55  ;;  %v12869_v55 = vld [vmem:[%s17692_s1 + $0xd04] ss:$8 sps:$4 sm:$0xff]  }
 0x164   :  { %4811 = vmatprep.subr.bf16.mxu0 %v12776_v58  ;;  %v12867_v58 = vld [vmem:[%s17692_s1 + $0xd00] ss:$8 sps:$4 sm:$0xff]  }
 0x165   :  { %4853 = vmatpush2.bf16.msra.mxu1 %v12771_v57  ;;  %v12872_v57 = vld [vmem:[%s17692_s1 + $0xcf4] ss:$8 sps:$4 sm:$0xff]  }
 0x166   :  { %4854 = vmatprep.subr.bf16.mxu1 %v12779_v60  ;;  %v12870_v60 = vld [vmem:[%s17692_s1 + $0xcf0] ss:$8 sps:$4 sm:$0xff]  }
 0x167   :  { %4812 = vmatpush2.bf16.msra.mxu0 %v12774_v59  ;;  %v12875_v59 = vld [vmem:[%s17692_s1 + $0xdf4] ss:$8 sps:$4 sm:$0xff]  }
 0x168   :  { %4813 = vmatprep.subr.bf16.mxu0 %v12782_v62  ;;  %v12873_v62 = vld [vmem:[%s17692_s1 + $0xdf0] ss:$8 sps:$4 sm:$0xff]  }
 0x169   :  { %4855 = vmatpush2.bf16.msra.mxu1 %v12777_v61  ;;  %v12878_v61 = vld [vmem:[%s17692_s1 + $0xce4] ss:$8 sps:$4 sm:$0xff]  }
 0x16a   :  { %4856 = vmatprep.subr.bf16.mxu1 %v12785_v0  ;;  %v12876_v0 = vld [vmem:[%s17692_s1 + $0xce0] ss:$8 sps:$4 sm:$0xff]  }
 0x16b   :  { %4814 = vmatpush2.bf16.msra.mxu0 %v12780_v63  ;;  %v12881_v63 = vld [vmem:[%s17692_s1 + $0xde4] ss:$8 sps:$4 sm:$0xff]  }
 0x16c   :  { %4815 = vmatprep.subr.bf16.mxu0 %v12788_v2  ;;  %v12879_v2 = vld [vmem:[%s17692_s1 + $0xde0] ss:$8 sps:$4 sm:$0xff]  }
 0x16d   :  { %4857 = vmatpush2.bf16.msra.mxu1 %v12783_v1  ;;  %v12884_v1 = vld [vmem:[%s17692_s1 + $0xcd4] ss:$8 sps:$4 sm:$0xff]  }
 0x16e   :  { %4858 = vmatprep.subr.bf16.mxu1 %v12791_v4  ;;  %v12882_v4 = vld [vmem:[%s17692_s1 + $0xcd0] ss:$8 sps:$4 sm:$0xff]  }
 0x16f   :  { %4816 = vmatpush2.bf16.msra.mxu0 %v12786_v3  ;;  %v12887_v3 = vld [vmem:[%s17692_s1 + $0xdd4] ss:$8 sps:$4 sm:$0xff]  }
 0x170   :  { %4817 = vmatprep.subr.bf16.mxu0 %v12794_v6  ;;  %v12885_v6 = vld [vmem:[%s17692_s1 + $0xdd0] ss:$8 sps:$4 sm:$0xff]  }
 0x171   :  { %4859 = vmatpush2.bf16.msra.mxu1 %v12789_v5  ;;  %v12890_v5 = vld [vmem:[%s17692_s1 + $0xcc4] ss:$8 sps:$4 sm:$0xff]  }
 0x172   :  { %4860 = vmatprep.subr.bf16.mxu1 %v12797_v8  ;;  %v12888_v8 = vld [vmem:[%s17692_s1 + $0xcc0] ss:$8 sps:$4 sm:$0xff]  }
 0x173   :  { %4818 = vmatpush2.bf16.msra.mxu0 %v12792_v7  ;;  %v12893_v7 = vld [vmem:[%s17692_s1 + $0xdc4] ss:$8 sps:$4 sm:$0xff]  }
 0x174   :  { %4819 = vmatprep.subr.bf16.mxu0 %v12800_v10  ;;  %v12891_v10 = vld [vmem:[%s17692_s1 + $0xdc0] ss:$8 sps:$4 sm:$0xff]  }
 0x175   :  { %4861 = vmatpush2.bf16.msra.mxu1 %v12795_v9  ;;  %v12896_v9 = vld [vmem:[%s17692_s1 + $0xcb4] ss:$8 sps:$4 sm:$0xff]  }
 0x176   :  { %4862 = vmatprep.subr.bf16.mxu1 %v12803_v12  ;;  %v12894_v12 = vld [vmem:[%s17692_s1 + $0xcb0] ss:$8 sps:$4 sm:$0xff]  }
 0x177   :  { %4820 = vmatpush2.bf16.msra.mxu0 %v12798_v11  ;;  %v12899_v11 = vld [vmem:[%s17692_s1 + $0xdb4] ss:$8 sps:$4 sm:$0xff]  }
 0x178   :  { %4821 = vmatprep.subr.bf16.mxu0 %v12806_v14  ;;  %v12897_v14 = vld [vmem:[%s17692_s1 + $0xdb0] ss:$8 sps:$4 sm:$0xff]  }
 0x179   :  { %4863 = vmatpush2.bf16.msra.mxu1 %v12801_v13  ;;  %v12902_v13 = vld [vmem:[%s17692_s1 + $0xca4] ss:$8 sps:$4 sm:$0xff]  }
 0x17a   :  { %4864 = vmatprep.subr.bf16.mxu1 %v12809_v16  ;;  %v12900_v16 = vld [vmem:[%s17692_s1 + $0xca0] ss:$8 sps:$4 sm:$0xff]  }
 0x17b   :  { %4822 = vmatpush2.bf16.msra.mxu0 %v12804_v15  ;;  %v12905_v15 = vld [vmem:[%s17692_s1 + $0xda4] ss:$8 sps:$4 sm:$0xff]  }
 0x17c   :  { %4823 = vmatprep.subr.bf16.mxu0 %v12812_v18  ;;  %v12903_v18 = vld [vmem:[%s17692_s1 + $0xda0] ss:$8 sps:$4 sm:$0xff]  }
 0x17d   :  { %4865 = vmatpush2.bf16.msra.mxu1 %v12807_v17  ;;  %v12908_v17 = vld [vmem:[%s17692_s1 + $0xc94] ss:$8 sps:$4 sm:$0xff]  }
 0x17e   :  { %4866 = vmatprep.subr.bf16.mxu1 %v12815_v20  ;;  %v12906_v20 = vld [vmem:[%s17692_s1 + $0xc90] ss:$8 sps:$4 sm:$0xff]  }
 0x17f   :  { %4824 = vmatpush2.bf16.msra.mxu0 %v12810_v19  ;;  %v12911_v19 = vld [vmem:[%s17692_s1 + $0xd94] ss:$8 sps:$4 sm:$0xff]  }
 0x180   :  { %4879 = vmatprep.subr.bf16.mxu0 %v12821_v22  ;;  %v12909_v22 = vld [vmem:[%s17692_s1 + $0xd90] ss:$8 sps:$4 sm:$0xff]  }
 0x181   :  { %4867 = vmatpush2.bf16.msra.mxu1 %v12813_v21  ;;  %v12914_v21 = vld [vmem:[%s17692_s1 + $0xc84] ss:$8 sps:$4 sm:$0xff]  }
 0x182   :  { %4826 = vmatmul.mubr.bf16.vlgmr.msra.gmra.mxu0 %v12816_v23  ;;  %4922 = vmatprep.subr.bf16.mxu1 %v12827_v24  ;;  %v12917_v23 = vld [vmem:[%s17692_s1 + $0xd84] ss:$8 sps:$4 sm:$0xff]   ;;  %v12912_v24 = vld [vmem:[%s17692_s1 + $0xc80] ss:$8 sps:$4 sm:$0xff]  }
 0x183   :  { %4880 = vmatpush1.bf16.msra.mxu0 %v12819_v25  ;;  %4911 = vmatprep.mubr.bf16.mxu0 %v12920_v27  ;;  %v12923_v25 = vld [vmem:[%s17692_s1 + $0xe74] ss:$8 sps:$4 sm:$0xff]   ;;  %v12918_v27 = vld [vmem:[%s17693_s0 + $0x60] ss:$172 sps:$4 sm:$0xff]  }
 0x184   :  { %4869 = vmatmul.mubr.bf16.vlgmr.msra.gmra.mxu1 %v12822_v26  ;;  %4881 = vmatprep.subr.bf16.mxu0 %v12830_v28  ;;  %v12915_v26 = vld [vmem:[%s17692_s1 + $0xd80] ss:$8 sps:$4 sm:$0xff]   ;;  %v12929_v28 = vld [vmem:[%s17692_s1 + $0xf74] ss:$8 sps:$4 sm:$0xff]  }
 0x185   :  { %4923 = vmatpush1.bf16.msra.mxu1 %v12825_v29  ;;  %4954 = vmatprep.mubr.bf16.mxu1 %v12926_v30  ;;  %v12921_v29 = vld [vmem:[%s17692_s1 + $0xe70] ss:$8 sps:$4 sm:$0xff]   ;;  %v13022_v30 = vld [vmem:[%s17693_s0 + $0x74] ss:$172 sps:$4 sm:$0xff]  }
 0x186   :  { %4924 = vmatprep.subr.bf16.mxu1 %v12833_v31  ;;  %v12924_v31 = vld [vmem:[%s17693_s0 + $0x68] ss:$172 sps:$4 sm:$0xff]  }
 0x187   :  { %4882 = vmatpush1.bf16.msra.mxu0 %v12828_v32  ;;  %v12932_v32 = vld [vmem:[%s17692_s1 + $0xe64] ss:$8 sps:$4 sm:$0xff]  }
 0x188   :  { %4883 = vmatprep.subr.bf16.mxu0 %v12836_v33  ;;  %v12927_v33 = vld [vmem:[%s17692_s1 + $0xf70] ss:$8 sps:$4 sm:$0xff]  }
 0x189   :  { %4925 = vmatpush1.bf16.msra.mxu1 %v12831_v34  ;;  %v13028_v34 = vld [vmem:[%s17693_s0 + $0x7c] ss:$172 sps:$4 sm:$0xff]  }
 0x18a   :  { %4926 = vmatprep.subr.bf16.mxu1 %v12839_v35  ;;  %v12935_v35 = vld [vmem:[%s17692_s1 + $0xf64] ss:$8 sps:$4 sm:$0xff]  }
 0x18b   :  { %4884 = vmatpush1.bf16.msra.mxu0 %v12834_v36  ;;  %v12930_v36 = vld [vmem:[%s17692_s1 + $0xe60] ss:$8 sps:$4 sm:$0xff]  }
 0x18c   :  { %4885 = vmatprep.subr.bf16.mxu0 %v12842_v37  ;;  %v12938_v37 = vld [vmem:[%s17692_s1 + $0xe54] ss:$8 sps:$4 sm:$0xff]  }
 0x18d   :  { %4927 = vmatpush1.bf16.msra.mxu1 %v12837_v38  ;;  %v12933_v38 = vld [vmem:[%s17692_s1 + $0xf60] ss:$8 sps:$4 sm:$0xff]  }
 0x18e   :  { %4928 = vmatprep.subr.bf16.mxu1 %v12845_v39  ;;  %v12941_v39 = vld [vmem:[%s17692_s1 + $0xf54] ss:$8 sps:$4 sm:$0xff]  }
 0x18f   :  { %4886 = vmatpush1.bf16.msra.mxu0 %v12840_v40  ;;  %v12936_v40 = vld [vmem:[%s17692_s1 + $0xe50] ss:$8 sps:$4 sm:$0xff]  }
 0x190   :  { %4887 = vmatprep.subr.bf16.mxu0 %v12848_v41  ;;  %v12944_v41 = vld [vmem:[%s17692_s1 + $0xe44] ss:$8 sps:$4 sm:$0xff]  }
 0x191   :  { %4929 = vmatpush1.bf16.msra.mxu1 %v12843_v42  ;;  %v12939_v42 = vld [vmem:[%s17692_s1 + $0xf50] ss:$8 sps:$4 sm:$0xff]  }
 0x192   :  { %4930 = vmatprep.subr.bf16.mxu1 %v12851_v43  ;;  %v12947_v43 = vld [vmem:[%s17692_s1 + $0xf44] ss:$8 sps:$4 sm:$0xff]  }
 0x193   :  { %4888 = vmatpush1.bf16.msra.mxu0 %v12846_v44  ;;  %v12942_v44 = vld [vmem:[%s17692_s1 + $0xe40] ss:$8 sps:$4 sm:$0xff]  }
 0x194   :  { %4889 = vmatprep.subr.bf16.mxu0 %v12854_v45  ;;  %v12950_v45 = vld [vmem:[%s17692_s1 + $0xe34] ss:$8 sps:$4 sm:$0xff]  }
 0x195   :  { %4931 = vmatpush1.bf16.msra.mxu1 %v12849_v46  ;;  %v12945_v46 = vld [vmem:[%s17692_s1 + $0xf40] ss:$8 sps:$4 sm:$0xff]  }
 0x196   :  { %4932 = vmatprep.subr.bf16.mxu1 %v12857_v47  ;;  %v12953_v47 = vld [vmem:[%s17692_s1 + $0xf34] ss:$8 sps:$4 sm:$0xff]  }
 0x197   :  { %4890 = vmatpush1.bf16.msra.mxu0 %v12852_v48  ;;  %v12948_v48 = vld [vmem:[%s17692_s1 + $0xe30] ss:$8 sps:$4 sm:$0xff]  }
 0x198   :  { %4891 = vmatprep.subr.bf16.mxu0 %v12860_v49  ;;  %v12956_v49 = vld [vmem:[%s17692_s1 + $0xe24] ss:$8 sps:$4 sm:$0xff]  }
 0x199   :  { %4933 = vmatpush1.bf16.msra.mxu1 %v12855_v50  ;;  %v12951_v50 = vld [vmem:[%s17692_s1 + $0xf30] ss:$8 sps:$4 sm:$0xff]  }
 0x19a   :  { %4934 = vmatprep.subr.bf16.mxu1 %v12863_v51  ;;  %v12959_v51 = vld [vmem:[%s17692_s1 + $0xf24] ss:$8 sps:$4 sm:$0xff]  }
 0x19b   :  { %4892 = vmatpush1.bf16.msra.mxu0 %v12858_v52  ;;  %v12954_v52 = vld [vmem:[%s17692_s1 + $0xe20] ss:$8 sps:$4 sm:$0xff]  }
 0x19c   :  { %4893 = vmatprep.subr.bf16.mxu0 %v12866_v53  ;;  %v12962_v53 = vld [vmem:[%s17692_s1 + $0xe14] ss:$8 sps:$4 sm:$0xff]  }
 0x19d   :  { %4935 = vmatpush1.bf16.msra.mxu1 %v12861_v54  ;;  %v12957_v54 = vld [vmem:[%s17692_s1 + $0xf20] ss:$8 sps:$4 sm:$0xff]  }
 0x19e   :  { %4936 = vmatprep.subr.bf16.mxu1 %v12869_v55  ;;  %v12965_v55 = vld [vmem:[%s17692_s1 + $0xf14] ss:$8 sps:$4 sm:$0xff]  }
 0x19f   :  { %4894 = vmatpush1.bf16.msra.mxu0 %v12864_v56  ;;  %v12960_v56 = vld [vmem:[%s17692_s1 + $0xe10] ss:$8 sps:$4 sm:$0xff]  }
 0x1a0   :  { %4895 = vmatprep.subr.bf16.mxu0 %v12872_v57  ;;  %v12968_v57 = vld [vmem:[%s17692_s1 + $0xe04] ss:$8 sps:$4 sm:$0xff]  }
 0x1a1   :  { %4937 = vmatpush1.bf16.msra.mxu1 %v12867_v58  ;;  %v12963_v58 = vld [vmem:[%s17692_s1 + $0xf10] ss:$8 sps:$4 sm:$0xff]  }
 0x1a2   :  { %4938 = vmatprep.subr.bf16.mxu1 %v12875_v59  ;;  %v12971_v59 = vld [vmem:[%s17692_s1 + $0xf04] ss:$8 sps:$4 sm:$0xff]  }
 0x1a3   :  { %4896 = vmatpush2.bf16.msra.mxu0 %v12870_v60  ;;  %v12966_v60 = vld [vmem:[%s17692_s1 + $0xe00] ss:$8 sps:$4 sm:$0xff]  }
 0x1a4   :  { %4897 = vmatprep.subr.bf16.mxu0 %v12878_v61  ;;  %v12974_v61 = vld [vmem:[%s17692_s1 + $0xef4] ss:$8 sps:$4 sm:$0xff]  }
 0x1a5   :  { %4939 = vmatpush2.bf16.msra.mxu1 %v12873_v62  ;;  %v12969_v62 = vld [vmem:[%s17692_s1 + $0xf00] ss:$8 sps:$4 sm:$0xff]  }
 0x1a6   :  { %4940 = vmatprep.subr.bf16.mxu1 %v12881_v63  ;;  %v12977_v63 = vld [vmem:[%s17692_s1 + $0xff4] ss:$8 sps:$4 sm:$0xff]  }
 0x1a7   :  { %4898 = vmatpush2.bf16.msra.mxu0 %v12876_v0  ;;  %v12972_v0 = vld [vmem:[%s17692_s1 + $0xef0] ss:$8 sps:$4 sm:$0xff]  }
 0x1a8   :  { %4899 = vmatprep.subr.bf16.mxu0 %v12884_v1  ;;  %v12980_v1 = vld [vmem:[%s17692_s1 + $0xee4] ss:$8 sps:$4 sm:$0xff]  }
 0x1a9   :  { %4941 = vmatpush2.bf16.msra.mxu1 %v12879_v2  ;;  %v12975_v2 = vld [vmem:[%s17692_s1 + $0xff0] ss:$8 sps:$4 sm:$0xff]  }
 0x1aa   :  { %4942 = vmatprep.subr.bf16.mxu1 %v12887_v3  ;;  %v12983_v3 = vld [vmem:[%s17692_s1 + $0xfe4] ss:$8 sps:$4 sm:$0xff]  }
 0x1ab   :  { %4900 = vmatpush2.bf16.msra.mxu0 %v12882_v4  ;;  %v12978_v4 = vld [vmem:[%s17692_s1 + $0xee0] ss:$8 sps:$4 sm:$0xff]  }
 0x1ac   :  { %4901 = vmatprep.subr.bf16.mxu0 %v12890_v5  ;;  %v12986_v5 = vld [vmem:[%s17692_s1 + $0xed4] ss:$8 sps:$4 sm:$0xff]  }
 0x1ad   :  { %4943 = vmatpush2.bf16.msra.mxu1 %v12885_v6  ;;  %v12981_v6 = vld [vmem:[%s17692_s1 + $0xfe0] ss:$8 sps:$4 sm:$0xff]  }
 0x1ae   :  { %4944 = vmatprep.subr.bf16.mxu1 %v12893_v7  ;;  %v12989_v7 = vld [vmem:[%s17692_s1 + $0xfd4] ss:$8 sps:$4 sm:$0xff]  }
 0x1af   :  { %4902 = vmatpush2.bf16.msra.mxu0 %v12888_v8  ;;  %v12984_v8 = vld [vmem:[%s17692_s1 + $0xed0] ss:$8 sps:$4 sm:$0xff]  }
 0x1b0   :  { %4903 = vmatprep.subr.bf16.mxu0 %v12896_v9  ;;  %v12992_v9 = vld [vmem:[%s17692_s1 + $0xec4] ss:$8 sps:$4 sm:$0xff]  }
 0x1b1   :  { %4945 = vmatpush2.bf16.msra.mxu1 %v12891_v10  ;;  %v12987_v10 = vld [vmem:[%s17692_s1 + $0xfd0] ss:$8 sps:$4 sm:$0xff]  }
 0x1b2   :  { %4946 = vmatprep.subr.bf16.mxu1 %v12899_v11  ;;  %v12995_v11 = vld [vmem:[%s17692_s1 + $0xfc4] ss:$8 sps:$4 sm:$0xff]  }
 0x1b3   :  { %4904 = vmatpush2.bf16.msra.mxu0 %v12894_v12  ;;  %v12990_v12 = vld [vmem:[%s17692_s1 + $0xec0] ss:$8 sps:$4 sm:$0xff]  }
 0x1b4   :  { %4905 = vmatprep.subr.bf16.mxu0 %v12902_v13  ;;  %v12998_v13 = vld [vmem:[%s17692_s1 + $0xeb4] ss:$8 sps:$4 sm:$0xff]  }
 0x1b5   :  { %4947 = vmatpush2.bf16.msra.mxu1 %v12897_v14  ;;  %v12993_v14 = vld [vmem:[%s17692_s1 + $0xfc0] ss:$8 sps:$4 sm:$0xff]  }
 0x1b6   :  { %4948 = vmatprep.subr.bf16.mxu1 %v12905_v15  ;;  %v13001_v15 = vld [vmem:[%s17692_s1 + $0xfb4] ss:$8 sps:$4 sm:$0xff]  }
 0x1b7   :  { %4906 = vmatpush2.bf16.msra.mxu0 %v12900_v16  ;;  %v12996_v16 = vld [vmem:[%s17692_s1 + $0xeb0] ss:$8 sps:$4 sm:$0xff]  }
 0x1b8   :  { %4907 = vmatprep.subr.bf16.mxu0 %v12908_v17  ;;  %v13004_v17 = vld [vmem:[%s17692_s1 + $0xea4] ss:$8 sps:$4 sm:$0xff]  }
 0x1b9   :  { %4949 = vmatpush2.bf16.msra.mxu1 %v12903_v18  ;;  %v12999_v18 = vld [vmem:[%s17692_s1 + $0xfb0] ss:$8 sps:$4 sm:$0xff]  }
 0x1ba   :  { %4950 = vmatprep.subr.bf16.mxu1 %v12911_v19  ;;  %v13007_v19 = vld [vmem:[%s17692_s1 + $0xfa4] ss:$8 sps:$4 sm:$0xff]  }
 0x1bb   :  { %4908 = vmatpush2.bf16.msra.mxu0 %v12906_v20  ;;  %v13002_v20 = vld [vmem:[%s17692_s1 + $0xea0] ss:$8 sps:$4 sm:$0xff]  }
 0x1bc   :  { %4909 = vmatprep.subr.bf16.mxu0 %v12914_v21  ;;  %v13010_v21 = vld [vmem:[%s17692_s1 + $0xe94] ss:$8 sps:$4 sm:$0xff]  }
 0x1bd   :  { %4951 = vmatpush2.bf16.msra.mxu1 %v12909_v22  ;;  %v13005_v22 = vld [vmem:[%s17692_s1 + $0xfa0] ss:$8 sps:$4 sm:$0xff]  }
 0x1be   :  { %4952 = vmatprep.subr.bf16.mxu1 %v12917_v23  ;;  %v13013_v23 = vld [vmem:[%s17692_s1 + $0xf94] ss:$8 sps:$4 sm:$0xff]  }
 0x1bf   :  { %4910 = vmatpush2.bf16.msra.mxu0 %v12912_v24  ;;  %v13008_v24 = vld [vmem:[%s17692_s1 + $0xe90] ss:$8 sps:$4 sm:$0xff]  }
 0x1c0   :  { %4965 = vmatprep.subr.bf16.mxu0 %v12923_v25  ;;  %v13016_v25 = vld [vmem:[%s17692_s1 + $0xe84] ss:$8 sps:$4 sm:$0xff]  }
 0x1c1   :  { %4953 = vmatpush2.bf16.msra.mxu1 %v12915_v26  ;;  %v13011_v26 = vld [vmem:[%s17692_s1 + $0xf90] ss:$8 sps:$4 sm:$0xff]  }
 0x1c2   :  { %4912 = vmatmul.mubr.bf16.vlgmr.msra.gmra.mxu0 %v12918_v27  ;;  %5008 = vmatprep.subr.bf16.mxu1 %v12929_v28  ;;  %v13019_v27 = vld [vmem:[%s17692_s1 + $0xf84] ss:$8 sps:$4 sm:$0xff]   ;;  %v13014_v28 = vld [vmem:[%s17692_s1 + $0xe80] ss:$8 sps:$4 sm:$0xff]  }
 0x1c3   :  { %4966 = vmatpush1.bf16.msra.mxu0 %v12921_v29  ;;  %4997 = vmatprep.mubr.bf16.mxu0 %v13022_v30  ;;  %v13025_v29 = vld [vmem:[%s17692_s1 + $0x1074] ss:$8 sps:$4 sm:$0xff]   ;;  %v13017_v30 = vld [vmem:[%s17692_s1 + $0xf80] ss:$8 sps:$4 sm:$0xff]  }
 0x1c4   :  { %4955 = vmatmul.mubr.bf16.vlgmr.msra.gmra.mxu1 %v12924_v31  ;;  %4967 = vmatprep.subr.bf16.mxu0 %v12932_v32  ;;  %v13020_v31 = vld [vmem:[%s17693_s0 + $0x70] ss:$172 sps:$4 sm:$0xff]  }
 0x1c5   :  { %5009 = vmatpush1.bf16.msra.mxu1 %v12927_v33  ;;  %5040 = vmatprep.mubr.bf16.mxu1 %v13028_v34  ;;  %v13031_v32 = vld [vmem:[%s17692_s1 + $0x1174] ss:$8 sps:$4 sm:$0xff]   ;;  %v13023_v33 = vld [vmem:[%s17692_s1 + $0x1070] ss:$8 sps:$4 sm:$0xff]  }
 0x1c6   :  { %5010 = vmatprep.subr.bf16.mxu1 %v12935_v35  ;;  %v13124_v34 = vld [vmem:[%s17693_s0 + $0x84] ss:$172 sps:$4 sm:$0xff]  }
 0x1c7   :  { %4968 = vmatpush1.bf16.msra.mxu0 %v12930_v36  ;;  %v13026_v35 = vld [vmem:[%s17693_s0 + $0x78] ss:$172 sps:$4 sm:$0xff]  }
 0x1c8   :  { %4969 = vmatprep.subr.bf16.mxu0 %v12938_v37  ;;  %v13034_v36 = vld [vmem:[%s17692_s1 + $0x1064] ss:$8 sps:$4 sm:$0xff]   ;;  %v13029_v37 = vld [vmem:[%s17692_s1 + $0x1170] ss:$8 sps:$4 sm:$0xff]  }
 0x1c9   :  { %5011 = vmatpush1.bf16.msra.mxu1 %v12933_v38  ;;  %v13130_v38 = vld [vmem:[%s17693_s0 + $0x8c] ss:$172 sps:$4 sm:$0xff]  }
 0x1ca   :  { %5012 = vmatprep.subr.bf16.mxu1 %v12941_v39  ;;  %v13037_v39 = vld [vmem:[%s17692_s1 + $0x1164] ss:$8 sps:$4 sm:$0xff]  }
 0x1cb   :  { %4970 = vmatpush1.bf16.msra.mxu0 %v12936_v40  ;;  %v13032_v40 = vld [vmem:[%s17692_s1 + $0x1060] ss:$8 sps:$4 sm:$0xff]  }
 0x1cc   :  { %4971 = vmatprep.subr.bf16.mxu0 %v12944_v41  ;;  %v13040_v41 = vld [vmem:[%s17692_s1 + $0x1054] ss:$8 sps:$4 sm:$0xff]  }
 0x1cd   :  { %5013 = vmatpush1.bf16.msra.mxu1 %v12939_v42  ;;  %v13035_v42 = vld [vmem:[%s17692_s1 + $0x1160] ss:$8 sps:$4 sm:$0xff]  }
 0x1ce   :  { %5014 = vmatprep.subr.bf16.mxu1 %v12947_v43  ;;  %v13043_v43 = vld [vmem:[%s17692_s1 + $0x1154] ss:$8 sps:$4 sm:$0xff]  }
 0x1cf   :  { %4972 = vmatpush1.bf16.msra.mxu0 %v12942_v44  ;;  %v13038_v44 = vld [vmem:[%s17692_s1 + $0x1050] ss:$8 sps:$4 sm:$0xff]  }
 0x1d0   :  { %4973 = vmatprep.subr.bf16.mxu0 %v12950_v45  ;;  %v13046_v45 = vld [vmem:[%s17692_s1 + $0x1044] ss:$8 sps:$4 sm:$0xff]  }
 0x1d1   :  { %5015 = vmatpush1.bf16.msra.mxu1 %v12945_v46  ;;  %v13041_v46 = vld [vmem:[%s17692_s1 + $0x1150] ss:$8 sps:$4 sm:$0xff]  }
 0x1d2   :  { %5016 = vmatprep.subr.bf16.mxu1 %v12953_v47  ;;  %v13049_v47 = vld [vmem:[%s17692_s1 + $0x1144] ss:$8 sps:$4 sm:$0xff]  }
 0x1d3   :  { %4974 = vmatpush1.bf16.msra.mxu0 %v12948_v48  ;;  %v13044_v48 = vld [vmem:[%s17692_s1 + $0x1040] ss:$8 sps:$4 sm:$0xff]  }
 0x1d4   :  { %4975 = vmatprep.subr.bf16.mxu0 %v12956_v49  ;;  %v13052_v49 = vld [vmem:[%s17692_s1 + $0x1034] ss:$8 sps:$4 sm:$0xff]  }
 0x1d5   :  { %5017 = vmatpush1.bf16.msra.mxu1 %v12951_v50  ;;  %v13047_v50 = vld [vmem:[%s17692_s1 + $0x1140] ss:$8 sps:$4 sm:$0xff]  }
 0x1d6   :  { %5018 = vmatprep.subr.bf16.mxu1 %v12959_v51  ;;  %v13055_v51 = vld [vmem:[%s17692_s1 + $0x1134] ss:$8 sps:$4 sm:$0xff]  }
 0x1d7   :  { %4976 = vmatpush1.bf16.msra.mxu0 %v12954_v52  ;;  %v13050_v52 = vld [vmem:[%s17692_s1 + $0x1030] ss:$8 sps:$4 sm:$0xff]  }
 0x1d8   :  { %4977 = vmatprep.subr.bf16.mxu0 %v12962_v53  ;;  %v13058_v53 = vld [vmem:[%s17692_s1 + $0x1024] ss:$8 sps:$4 sm:$0xff]  }
 0x1d9   :  { %5019 = vmatpush1.bf16.msra.mxu1 %v12957_v54  ;;  %v13053_v54 = vld [vmem:[%s17692_s1 + $0x1130] ss:$8 sps:$4 sm:$0xff]  }
 0x1da   :  { %5020 = vmatprep.subr.bf16.mxu1 %v12965_v55  ;;  %v13061_v55 = vld [vmem:[%s17692_s1 + $0x1124] ss:$8 sps:$4 sm:$0xff]  }
 0x1db   :  { %4978 = vmatpush1.bf16.msra.mxu0 %v12960_v56  ;;  %v13056_v56 = vld [vmem:[%s17692_s1 + $0x1020] ss:$8 sps:$4 sm:$0xff]  }
 0x1dc   :  { %4979 = vmatprep.subr.bf16.mxu0 %v12968_v57  ;;  %v13064_v57 = vld [vmem:[%s17692_s1 + $0x1014] ss:$8 sps:$4 sm:$0xff]  }
 0x1dd   :  { %5021 = vmatpush1.bf16.msra.mxu1 %v12963_v58  ;;  %v13059_v58 = vld [vmem:[%s17692_s1 + $0x1120] ss:$8 sps:$4 sm:$0xff]  }
 0x1de   :  { %5022 = vmatprep.subr.bf16.mxu1 %v12971_v59  ;;  %v13067_v59 = vld [vmem:[%s17692_s1 + $0x1114] ss:$8 sps:$4 sm:$0xff]  }
 0x1df   :  { %4980 = vmatpush1.bf16.msra.mxu0 %v12966_v60  ;;  %v13062_v60 = vld [vmem:[%s17692_s1 + $0x1010] ss:$8 sps:$4 sm:$0xff]  }
 0x1e0   :  { %4981 = vmatprep.subr.bf16.mxu0 %v12974_v61  ;;  %v13070_v61 = vld [vmem:[%s17692_s1 + $0x1004] ss:$8 sps:$4 sm:$0xff]  }
 0x1e1   :  { %5023 = vmatpush1.bf16.msra.mxu1 %v12969_v62  ;;  %v13065_v62 = vld [vmem:[%s17692_s1 + $0x1110] ss:$8 sps:$4 sm:$0xff]  }
 0x1e2   :  { %5024 = vmatprep.subr.bf16.mxu1 %v12977_v63  ;;  %v13073_v63 = vld [vmem:[%s17692_s1 + $0x1104] ss:$8 sps:$4 sm:$0xff]  }
 0x1e3   :  { %4982 = vmatpush2.bf16.msra.mxu0 %v12972_v0  ;;  %v13068_v0 = vld [vmem:[%s17692_s1 + $0x1000] ss:$8 sps:$4 sm:$0xff]  }
 0x1e4   :  { %4983 = vmatprep.subr.bf16.mxu0 %v12980_v1  ;;  %v13076_v1 = vld [vmem:[%s17692_s1 + $0x10f4] ss:$8 sps:$4 sm:$0xff]  }
 0x1e5   :  { %5025 = vmatpush2.bf16.msra.mxu1 %v12975_v2  ;;  %v13071_v2 = vld [vmem:[%s17692_s1 + $0x1100] ss:$8 sps:$4 sm:$0xff]  }
 0x1e6   :  { %5026 = vmatprep.subr.bf16.mxu1 %v12983_v3  ;;  %v13079_v3 = vld [vmem:[%s17692_s1 + $0x11f4] ss:$8 sps:$4 sm:$0xff]  }
 0x1e7   :  { %4984 = vmatpush2.bf16.msra.mxu0 %v12978_v4  ;;  %v13074_v4 = vld [vmem:[%s17692_s1 + $0x10f0] ss:$8 sps:$4 sm:$0xff]  }
 0x1e8   :  { %4985 = vmatprep.subr.bf16.mxu0 %v12986_v5  ;;  %v13082_v5 = vld [vmem:[%s17692_s1 + $0x10e4] ss:$8 sps:$4 sm:$0xff]  }
 0x1e9   :  { %5027 = vmatpush2.bf16.msra.mxu1 %v12981_v6  ;;  %v13077_v6 = vld [vmem:[%s17692_s1 + $0x11f0] ss:$8 sps:$4 sm:$0xff]  }
 0x1ea   :  { %5028 = vmatprep.subr.bf16.mxu1 %v12989_v7  ;;  %v13085_v7 = vld [vmem:[%s17692_s1 + $0x11e4] ss:$8 sps:$4 sm:$0xff]  }
 0x1eb   :  { %4986 = vmatpush2.bf16.msra.mxu0 %v12984_v8  ;;  %v13080_v8 = vld [vmem:[%s17692_s1 + $0x10e0] ss:$8 sps:$4 sm:$0xff]  }
 0x1ec   :  { %4987 = vmatprep.subr.bf16.mxu0 %v12992_v9  ;;  %v13088_v9 = vld [vmem:[%s17692_s1 + $0x10d4] ss:$8 sps:$4 sm:$0xff]  }
 0x1ed   :  { %5029 = vmatpush2.bf16.msra.mxu1 %v12987_v10  ;;  %v13083_v10 = vld [vmem:[%s17692_s1 + $0x11e0] ss:$8 sps:$4 sm:$0xff]  }
 0x1ee   :  { %5030 = vmatprep.subr.bf16.mxu1 %v12995_v11  ;;  %v13091_v11 = vld [vmem:[%s17692_s1 + $0x11d4] ss:$8 sps:$4 sm:$0xff]  }
 0x1ef   :  { %4988 = vmatpush2.bf16.msra.mxu0 %v12990_v12  ;;  %v13086_v12 = vld [vmem:[%s17692_s1 + $0x10d0] ss:$8 sps:$4 sm:$0xff]  }
 0x1f0   :  { %4989 = vmatprep.subr.bf16.mxu0 %v12998_v13  ;;  %v13094_v13 = vld [vmem:[%s17692_s1 + $0x10c4] ss:$8 sps:$4 sm:$0xff]  }
 0x1f1   :  { %5031 = vmatpush2.bf16.msra.mxu1 %v12993_v14  ;;  %v13089_v14 = vld [vmem:[%s17692_s1 + $0x11d0] ss:$8 sps:$4 sm:$0xff]  }
 0x1f2   :  { %5032 = vmatprep.subr.bf16.mxu1 %v13001_v15  ;;  %v13097_v15 = vld [vmem:[%s17692_s1 + $0x11c4] ss:$8 sps:$4 sm:$0xff]  }
 0x1f3   :  { %4990 = vmatpush2.bf16.msra.mxu0 %v12996_v16  ;;  %v13092_v16 = vld [vmem:[%s17692_s1 + $0x10c0] ss:$8 sps:$4 sm:$0xff]  }
 0x1f4   :  { %4991 = vmatprep.subr.bf16.mxu0 %v13004_v17  ;;  %v13100_v17 = vld [vmem:[%s17692_s1 + $0x10b4] ss:$8 sps:$4 sm:$0xff]  }
 0x1f5   :  { %5033 = vmatpush2.bf16.msra.mxu1 %v12999_v18  ;;  %v13095_v18 = vld [vmem:[%s17692_s1 + $0x11c0] ss:$8 sps:$4 sm:$0xff]  }
 0x1f6   :  { %5034 = vmatprep.subr.bf16.mxu1 %v13007_v19  ;;  %v13103_v19 = vld [vmem:[%s17692_s1 + $0x11b4] ss:$8 sps:$4 sm:$0xff]  }
 0x1f7   :  { %4992 = vmatpush2.bf16.msra.mxu0 %v13002_v20  ;;  %v13098_v20 = vld [vmem:[%s17692_s1 + $0x10b0] ss:$8 sps:$4 sm:$0xff]  }
 0x1f8   :  { %4993 = vmatprep.subr.bf16.mxu0 %v13010_v21  ;;  %v13106_v21 = vld [vmem:[%s17692_s1 + $0x10a4] ss:$8 sps:$4 sm:$0xff]  }
 0x1f9   :  { %5035 = vmatpush2.bf16.msra.mxu1 %v13005_v22  ;;  %v13101_v22 = vld [vmem:[%s17692_s1 + $0x11b0] ss:$8 sps:$4 sm:$0xff]  }
 0x1fa   :  { %5036 = vmatprep.subr.bf16.mxu1 %v13013_v23  ;;  %v13109_v23 = vld [vmem:[%s17692_s1 + $0x11a4] ss:$8 sps:$4 sm:$0xff]  }
 0x1fb   :  { %4994 = vmatpush2.bf16.msra.mxu0 %v13008_v24  ;;  %v13104_v24 = vld [vmem:[%s17692_s1 + $0x10a0] ss:$8 sps:$4 sm:$0xff]  }
 0x1fc   :  { %4995 = vmatprep.subr.bf16.mxu0 %v13016_v25  ;;  %v13112_v25 = vld [vmem:[%s17692_s1 + $0x1094] ss:$8 sps:$4 sm:$0xff]  }
 0x1fd   :  { %5037 = vmatpush2.bf16.msra.mxu1 %v13011_v26  ;;  %v13107_v26 = vld [vmem:[%s17692_s1 + $0x11a0] ss:$8 sps:$4 sm:$0xff]  }
 0x1fe   :  { %5038 = vmatprep.subr.bf16.mxu1 %v13019_v27  ;;  %v13115_v27 = vld [vmem:[%s17692_s1 + $0x1194] ss:$8 sps:$4 sm:$0xff]  }
 0x1ff   :  { %4996 = vmatpush2.bf16.msra.mxu0 %v13014_v28  ;;  %v13110_v28 = vld [vmem:[%s17692_s1 + $0x1090] ss:$8 sps:$4 sm:$0xff]  }
 0x200   :  { %5051 = vmatprep.subr.bf16.mxu0 %v13025_v29  ;;  %v13118_v29 = vld [vmem:[%s17692_s1 + $0x1084] ss:$8 sps:$4 sm:$0xff]  }
 0x201   :  { %5039 = vmatpush2.bf16.msra.mxu1 %v13017_v30  ;;  %v13113_v30 = vld [vmem:[%s17692_s1 + $0x1190] ss:$8 sps:$4 sm:$0xff]  }
 0x202   :  { %4998 = vmatmul.mubr.bf16.vlgmr.msra.gmra.mxu0 %v13020_v31  ;;  %5094 = vmatprep.subr.bf16.mxu1 %v13031_v32  ;;  %v13121_v31 = vld [vmem:[%s17692_s1 + $0x1184] ss:$8 sps:$4 sm:$0xff]   ;;  %v13116_v32 = vld [vmem:[%s17692_s1 + $0x1080] ss:$8 sps:$4 sm:$0xff]  }
 0x203   :  { %5052 = vmatpush1.bf16.msra.mxu0 %v13023_v33  ;;  %5083 = vmatprep.mubr.bf16.mxu0 %v13124_v34  ;;  %v13127_v33 = vld [vmem:[%s17692_s1 + $0x1274] ss:$8 sps:$4 sm:$0xff]   ;;  %v13119_v34 = vld [vmem:[%s17692_s1 + $0x1180] ss:$8 sps:$4 sm:$0xff]  }
 0x204   :  { %5041 = vmatmul.mubr.bf16.vlgmr.msra.gmra.mxu1 %v13026_v35  ;;  %5053 = vmatprep.subr.bf16.mxu0 %v13034_v36  ;;  %v13122_v35 = vld [vmem:[%s17693_s0 + $0x80] ss:$172 sps:$4 sm:$0xff]   ;;  %v13133_v36 = vld [vmem:[%s17692_s1 + $0x1374] ss:$8 sps:$4 sm:$0xff]  }
 0x205   :  { %5095 = vmatpush1.bf16.msra.mxu1 %v13029_v37  ;;  %5126 = vmatprep.mubr.bf16.mxu1 %v13130_v38  ;;  %v13125_v37 = vld [vmem:[%s17692_s1 + $0x1270] ss:$8 sps:$4 sm:$0xff]   ;;  %v13226_v38 = vld [vmem:[%s17693_s0 + $0x94] ss:$172 sps:$4 sm:$0xff]  }
 0x206   :  { %5096 = vmatprep.subr.bf16.mxu1 %v13037_v39  ;;  %v13128_v39 = vld [vmem:[%s17693_s0 + $0x88] ss:$172 sps:$4 sm:$0xff]  }
 0x207   :  { %5054 = vmatpush1.bf16.msra.mxu0 %v13032_v40  ;;  %v13136_v40 = vld [vmem:[%s17692_s1 + $0x1264] ss:$8 sps:$4 sm:$0xff]  }
 0x208   :  { %5055 = vmatprep.subr.bf16.mxu0 %v13040_v41  ;;  %v13131_v41 = vld [vmem:[%s17692_s1 + $0x1370] ss:$8 sps:$4 sm:$0xff]  }
 0x209   :  { %5097 = vmatpush1.bf16.msra.mxu1 %v13035_v42  ;;  %v13232_v42 = vld [vmem:[%s17693_s0 + $0x9c] ss:$172 sps:$4 sm:$0xff]  }
 0x20a   :  { %5098 = vmatprep.subr.bf16.mxu1 %v13043_v43  ;;  %v13139_v43 = vld [vmem:[%s17692_s1 + $0x1364] ss:$8 sps:$4 sm:$0xff]  }
 0x20b   :  { %5056 = vmatpush1.bf16.msra.mxu0 %v13038_v44  ;;  %v13134_v44 = vld [vmem:[%s17692_s1 + $0x1260] ss:$8 sps:$4 sm:$0xff]  }
 0x20c   :  { %5057 = vmatprep.subr.bf16.mxu0 %v13046_v45  ;;  %v13142_v45 = vld [vmem:[%s17692_s1 + $0x1254] ss:$8 sps:$4 sm:$0xff]  }
 0x20d   :  { %5099 = vmatpush1.bf16.msra.mxu1 %v13041_v46  ;;  %v13137_v46 = vld [vmem:[%s17692_s1 + $0x1360] ss:$8 sps:$4 sm:$0xff]  }
 0x20e   :  { %5100 = vmatprep.subr.bf16.mxu1 %v13049_v47  ;;  %v13145_v47 = vld [vmem:[%s17692_s1 + $0x1354] ss:$8 sps:$4 sm:$0xff]  }
 0x20f   :  { %5058 = vmatpush1.bf16.msra.mxu0 %v13044_v48  ;;  %v13140_v48 = vld [vmem:[%s17692_s1 + $0x1250] ss:$8 sps:$4 sm:$0xff]  }
 0x210   :  { %5059 = vmatprep.subr.bf16.mxu0 %v13052_v49  ;;  %v13148_v49 = vld [vmem:[%s17692_s1 + $0x1244] ss:$8 sps:$4 sm:$0xff]  }
 0x211   :  { %5101 = vmatpush1.bf16.msra.mxu1 %v13047_v50  ;;  %v13143_v50 = vld [vmem:[%s17692_s1 + $0x1350] ss:$8 sps:$4 sm:$0xff]  }
 0x212   :  { %5102 = vmatprep.subr.bf16.mxu1 %v13055_v51  ;;  %v13151_v51 = vld [vmem:[%s17692_s1 + $0x1344] ss:$8 sps:$4 sm:$0xff]  }
 0x213   :  { %5060 = vmatpush1.bf16.msra.mxu0 %v13050_v52  ;;  %v13146_v52 = vld [vmem:[%s17692_s1 + $0x1240] ss:$8 sps:$4 sm:$0xff]  }
 0x214   :  { %5061 = vmatprep.subr.bf16.mxu0 %v13058_v53  ;;  %v13154_v53 = vld [vmem:[%s17692_s1 + $0x1234] ss:$8 sps:$4 sm:$0xff]  }
 0x215   :  { %5103 = vmatpush1.bf16.msra.mxu1 %v13053_v54  ;;  %v13149_v54 = vld [vmem:[%s17692_s1 + $0x1340] ss:$8 sps:$4 sm:$0xff]  }
 0x216   :  { %5104 = vmatprep.subr.bf16.mxu1 %v13061_v55  ;;  %v13157_v55 = vld [vmem:[%s17692_s1 + $0x1334] ss:$8 sps:$4 sm:$0xff]  }
 0x217   :  { %5062 = vmatpush1.bf16.msra.mxu0 %v13056_v56  ;;  %v13152_v56 = vld [vmem:[%s17692_s1 + $0x1230] ss:$8 sps:$4 sm:$0xff]  }
 0x218   :  { %5063 = vmatprep.subr.bf16.mxu0 %v13064_v57  ;;  %v13160_v57 = vld [vmem:[%s17692_s1 + $0x1224] ss:$8 sps:$4 sm:$0xff]  }
 0x219   :  { %5105 = vmatpush1.bf16.msra.mxu1 %v13059_v58  ;;  %v13155_v58 = vld [vmem:[%s17692_s1 + $0x1330] ss:$8 sps:$4 sm:$0xff]  }
 0x21a   :  { %5106 = vmatprep.subr.bf16.mxu1 %v13067_v59  ;;  %v13163_v59 = vld [vmem:[%s17692_s1 + $0x1324] ss:$8 sps:$4 sm:$0xff]  }
 0x21b   :  { %5064 = vmatpush1.bf16.msra.mxu0 %v13062_v60  ;;  %v13158_v60 = vld [vmem:[%s17692_s1 + $0x1220] ss:$8 sps:$4 sm:$0xff]  }
 0x21c   :  { %5065 = vmatprep.subr.bf16.mxu0 %v13070_v61  ;;  %v13166_v61 = vld [vmem:[%s17692_s1 + $0x1214] ss:$8 sps:$4 sm:$0xff]  }
 0x21d   :  { %5107 = vmatpush1.bf16.msra.mxu1 %v13065_v62  ;;  %v13161_v62 = vld [vmem:[%s17692_s1 + $0x1320] ss:$8 sps:$4 sm:$0xff]  }
 0x21e   :  { %5108 = vmatprep.subr.bf16.mxu1 %v13073_v63  ;;  %v13169_v63 = vld [vmem:[%s17692_s1 + $0x1314] ss:$8 sps:$4 sm:$0xff]  }
 0x21f   :  { %5066 = vmatpush1.bf16.msra.mxu0 %v13068_v0  ;;  %v13164_v0 = vld [vmem:[%s17692_s1 + $0x1210] ss:$8 sps:$4 sm:$0xff]  }
 0x220   :  { %5067 = vmatprep.subr.bf16.mxu0 %v13076_v1  ;;  %v13172_v1 = vld [vmem:[%s17692_s1 + $0x1204] ss:$8 sps:$4 sm:$0xff]  }
 0x221   :  { %5109 = vmatpush1.bf16.msra.mxu1 %v13071_v2  ;;  %v13167_v2 = vld [vmem:[%s17692_s1 + $0x1310] ss:$8 sps:$4 sm:$0xff]  }
 0x222   :  { %5110 = vmatprep.subr.bf16.mxu1 %v13079_v3  ;;  %v13175_v3 = vld [vmem:[%s17692_s1 + $0x1304] ss:$8 sps:$4 sm:$0xff]  }
 0x223   :  { %5068 = vmatpush2.bf16.msra.mxu0 %v13074_v4  ;;  %v13170_v4 = vld [vmem:[%s17692_s1 + $0x1200] ss:$8 sps:$4 sm:$0xff]  }
 0x224   :  { %5069 = vmatprep.subr.bf16.mxu0 %v13082_v5  ;;  %v13178_v5 = vld [vmem:[%s17692_s1 + $0x12f4] ss:$8 sps:$4 sm:$0xff]  }
 0x225   :  { %5111 = vmatpush2.bf16.msra.mxu1 %v13077_v6  ;;  %v13173_v6 = vld [vmem:[%s17692_s1 + $0x1300] ss:$8 sps:$4 sm:$0xff]  }
 0x226   :  { %5112 = vmatprep.subr.bf16.mxu1 %v13085_v7  ;;  %v13181_v7 = vld [vmem:[%s17692_s1 + $0x13f4] ss:$8 sps:$4 sm:$0xff]  }
 0x227   :  { %5070 = vmatpush2.bf16.msra.mxu0 %v13080_v8  ;;  %v13176_v8 = vld [vmem:[%s17692_s1 + $0x12f0] ss:$8 sps:$4 sm:$0xff]  }
 0x228   :  { %5071 = vmatprep.subr.bf16.mxu0 %v13088_v9  ;;  %v13184_v9 = vld [vmem:[%s17692_s1 + $0x12e4] ss:$8 sps:$4 sm:$0xff]  }
 0x229   :  { %5113 = vmatpush2.bf16.msra.mxu1 %v13083_v10  ;;  %v13179_v10 = vld [vmem:[%s17692_s1 + $0x13f0] ss:$8 sps:$4 sm:$0xff]  }
 0x22a   :  { %5114 = vmatprep.subr.bf16.mxu1 %v13091_v11  ;;  %v13187_v11 = vld [vmem:[%s17692_s1 + $0x13e4] ss:$8 sps:$4 sm:$0xff]  }
 0x22b   :  { %5072 = vmatpush2.bf16.msra.mxu0 %v13086_v12  ;;  %v13182_v12 = vld [vmem:[%s17692_s1 + $0x12e0] ss:$8 sps:$4 sm:$0xff]  }
 0x22c   :  { %5073 = vmatprep.subr.bf16.mxu0 %v13094_v13  ;;  %v13190_v13 = vld [vmem:[%s17692_s1 + $0x12d4] ss:$8 sps:$4 sm:$0xff]  }
 0x22d   :  { %5115 = vmatpush2.bf16.msra.mxu1 %v13089_v14  ;;  %v13185_v14 = vld [vmem:[%s17692_s1 + $0x13e0] ss:$8 sps:$4 sm:$0xff]  }
 0x22e   :  { %5116 = vmatprep.subr.bf16.mxu1 %v13097_v15  ;;  %v13193_v15 = vld [vmem:[%s17692_s1 + $0x13d4] ss:$8 sps:$4 sm:$0xff]  }
 0x22f   :  { %5074 = vmatpush2.bf16.msra.mxu0 %v13092_v16  ;;  %v13188_v16 = vld [vmem:[%s17692_s1 + $0x12d0] ss:$8 sps:$4 sm:$0xff]  }
 0x230   :  { %5075 = vmatprep.subr.bf16.mxu0 %v13100_v17  ;;  %v13196_v17 = vld [vmem:[%s17692_s1 + $0x12c4] ss:$8 sps:$4 sm:$0xff]  }
 0x231   :  { %5117 = vmatpush2.bf16.msra.mxu1 %v13095_v18  ;;  %v13191_v18 = vld [vmem:[%s17692_s1 + $0x13d0] ss:$8 sps:$4 sm:$0xff]  }
 0x232   :  { %5118 = vmatprep.subr.bf16.mxu1 %v13103_v19  ;;  %v13199_v19 = vld [vmem:[%s17692_s1 + $0x13c4] ss:$8 sps:$4 sm:$0xff]  }
 0x233   :  { %5076 = vmatpush2.bf16.msra.mxu0 %v13098_v20  ;;  %v13194_v20 = vld [vmem:[%s17692_s1 + $0x12c0] ss:$8 sps:$4 sm:$0xff]  }
 0x234   :  { %5077 = vmatprep.subr.bf16.mxu0 %v13106_v21  ;;  %v13202_v21 = vld [vmem:[%s17692_s1 + $0x12b4] ss:$8 sps:$4 sm:$0xff]  }
 0x235   :  { %5119 = vmatpush2.bf16.msra.mxu1 %v13101_v22  ;;  %v13197_v22 = vld [vmem:[%s17692_s1 + $0x13c0] ss:$8 sps:$4 sm:$0xff]  }
 0x236   :  { %5120 = vmatprep.subr.bf16.mxu1 %v13109_v23  ;;  %v13205_v23 = vld [vmem:[%s17692_s1 + $0x13b4] ss:$8 sps:$4 sm:$0xff]  }
 0x237   :  { %5078 = vmatpush2.bf16.msra.mxu0 %v13104_v24  ;;  %v13200_v24 = vld [vmem:[%s17692_s1 + $0x12b0] ss:$8 sps:$4 sm:$0xff]  }
 0x238   :  { %5079 = vmatprep.subr.bf16.mxu0 %v13112_v25  ;;  %v13208_v25 = vld [vmem:[%s17692_s1 + $0x12a4] ss:$8 sps:$4 sm:$0xff]  }
 0x239   :  { %5121 = vmatpush2.bf16.msra.mxu1 %v13107_v26  ;;  %v13203_v26 = vld [vmem:[%s17692_s1 + $0x13b0] ss:$8 sps:$4 sm:$0xff]  }
 0x23a   :  { %5122 = vmatprep.subr.bf16.mxu1 %v13115_v27  ;;  %v13211_v27 = vld [vmem:[%s17692_s1 + $0x13a4] ss:$8 sps:$4 sm:$0xff]  }
 0x23b   :  { %5080 = vmatpush2.bf16.msra.mxu0 %v13110_v28  ;;  %v13206_v28 = vld [vmem:[%s17692_s1 + $0x12a0] ss:$8 sps:$4 sm:$0xff]  }
 0x23c   :  { %5081 = vmatprep.subr.bf16.mxu0 %v13118_v29  ;;  %v13214_v29 = vld [vmem:[%s17692_s1 + $0x1294] ss:$8 sps:$4 sm:$0xff]  }
 0x23d   :  { %5123 = vmatpush2.bf16.msra.mxu1 %v13113_v30  ;;  %v13209_v30 = vld [vmem:[%s17692_s1 + $0x13a0] ss:$8 sps:$4 sm:$0xff]  }
 0x23e   :  { %5124 = vmatprep.subr.bf16.mxu1 %v13121_v31  ;;  %v13217_v31 = vld [vmem:[%s17692_s1 + $0x1394] ss:$8 sps:$4 sm:$0xff]  }
 0x23f   :  { %5082 = vmatpush2.bf16.msra.mxu0 %v13116_v32  ;;  %v13212_v32 = vld [vmem:[%s17692_s1 + $0x1290] ss:$8 sps:$4 sm:$0xff]  }
 0x240   :  { %5137 = vmatprep.subr.bf16.mxu0 %v13127_v33  ;;  %v13220_v33 = vld [vmem:[%s17692_s1 + $0x1284] ss:$8 sps:$4 sm:$0xff]  }
 0x241   :  { %5125 = vmatpush2.bf16.msra.mxu1 %v13119_v34  ;;  %v13215_v34 = vld [vmem:[%s17692_s1 + $0x1390] ss:$8 sps:$4 sm:$0xff]  }
 0x242   :  { %5084 = vmatmul.mubr.bf16.vlgmr.msra.gmra.mxu0 %v13122_v35  ;;  %5180 = vmatprep.subr.bf16.mxu1 %v13133_v36  ;;  %v13223_v35 = vld [vmem:[%s17692_s1 + $0x1384] ss:$8 sps:$4 sm:$0xff]   ;;  %v13218_v36 = vld [vmem:[%s17692_s1 + $0x1280] ss:$8 sps:$4 sm:$0xff]  }
 0x243   :  { %5138 = vmatpush1.bf16.msra.mxu0 %v13125_v37  ;;  %5169 = vmatprep.mubr.bf16.mxu0 %v13226_v38  ;;  %v13229_v37 = vld [vmem:[%s17692_s1 + $0x1474] ss:$8 sps:$4 sm:$0xff]   ;;  %v13221_v38 = vld [vmem:[%s17692_s1 + $0x1380] ss:$8 sps:$4 sm:$0xff]  }
 0x244   :  { %5127 = vmatmul.mubr.bf16.vlgmr.msra.gmra.mxu1 %v13128_v39  ;;  %5139 = vmatprep.subr.bf16.mxu0 %v13136_v40  ;;  %v13224_v39 = vld [vmem:[%s17693_s0 + $0x90] ss:$172 sps:$4 sm:$0xff]  }
 0x245   :  { %5181 = vmatpush1.bf16.msra.mxu1 %v13131_v41  ;;  %5212 = vmatprep.mubr.bf16.mxu1 %v13232_v42  ;;  %v13274_v40 = vld [vmem:[%s17692_s1 + $0x1514] ss:$8 sps:$4 sm:$0xff]   ;;  %v13227_v41 = vld [vmem:[%s17692_s1 + $0x1470] ss:$8 sps:$4 sm:$0xff]  }
 0x246   :  { %5182 = vmatprep.subr.bf16.mxu1 %v13139_v43  ;;  %v13287_v42 = vld [vmem:[%s17693_s0 + $0xa4] ss:$172 sps:$4 sm:$0xff]  }
 0x247   :  { %5140 = vmatpush1.bf16.msra.mxu0 %v13134_v44  ;;  %v13230_v43 = vld [vmem:[%s17693_s0 + $0x98] ss:$172 sps:$4 sm:$0xff]  }
 0x248   :  { %5141 = vmatprep.subr.bf16.mxu0 %v13142_v45  ;;  %v13235_v44 = vld [vmem:[%s17692_s1 + $0x1464] ss:$8 sps:$4 sm:$0xff]   ;;  %v13272_v45 = vld [vmem:[%s17692_s1 + $0x1510] ss:$8 sps:$4 sm:$0xff]  }
 0x249   :  { %5183 = vmatpush1.bf16.msra.mxu1 %v13137_v46  ;;  %v13280_v46 = vld [vmem:[%s17692_s1 + $0x1504] ss:$8 sps:$4 sm:$0xff]  }
 0x24a   :  { %5184 = vmatprep.subr.bf16.mxu1 %v13145_v47  ;;  %v13233_v47 = vld [vmem:[%s17692_s1 + $0x1460] ss:$8 sps:$4 sm:$0xff]  }
 0x24b   :  { %5142 = vmatpush1.bf16.msra.mxu0 %v13140_v48  ;;  %v13238_v48 = vld [vmem:[%s17692_s1 + $0x1454] ss:$8 sps:$4 sm:$0xff]  }
 0x24c   :  { %5143 = vmatprep.subr.bf16.mxu0 %v13148_v49  ;;  %v13278_v49 = vld [vmem:[%s17692_s1 + $0x1500] ss:$8 sps:$4 sm:$0xff]  }
 0x24d   :  { %5185 = vmatpush1.bf16.msra.mxu1 %v13143_v50  ;;  %v17702_v50 = vmov 0  }
 0x24e   :  { %5186 = vmatprep.subr.bf16.mxu1 %v13151_v51  ;;  %v13236_v51 = vld [vmem:[%s17692_s1 + $0x1450] ss:$8 sps:$4 sm:$0xff]  }
 0x24f   :  { %5144 = vmatpush1.bf16.msra.mxu0 %v13146_v52  ;;  %v13241_v52 = vld [vmem:[%s17692_s1 + $0x1444] ss:$8 sps:$4 sm:$0xff]  }
 0x250   :  { %5145 = vmatprep.subr.bf16.mxu0 %v13154_v53  ;;  %v13284_v53 = vld [vmem:[%s17693_s0 + $0xa8] ss:$172 sps:$4 sm:$0xff]  }
 0x251   :  { %5187 = vmatpush1.bf16.msra.mxu1 %v13149_v54  ;;  %v13239_v54 = vld [vmem:[%s17692_s1 + $0x1440] ss:$8 sps:$4 sm:$0xff]  }
 0x252   :  { %5188 = vmatprep.subr.bf16.mxu1 %v13157_v55  ;;  %v13244_v55 = vld [vmem:[%s17692_s1 + $0x1434] ss:$8 sps:$4 sm:$0xff]  }
 0x253   :  { %5146 = vmatpush1.bf16.msra.mxu0 %v13152_v56  ;;  %v13242_v56 = vld [vmem:[%s17692_s1 + $0x1430] ss:$8 sps:$4 sm:$0xff]  }
 0x254   :  { %5147 = vmatprep.subr.bf16.mxu0 %v13160_v57  ;;  %v13247_v57 = vld [vmem:[%s17692_s1 + $0x1424] ss:$8 sps:$4 sm:$0xff]  }
 0x255   :  { %5189 = vmatpush1.bf16.msra.mxu1 %v13155_v58  ;;  %v13245_v58 = vld [vmem:[%s17692_s1 + $0x1420] ss:$8 sps:$4 sm:$0xff]  }
 0x256   :  { %5190 = vmatprep.subr.bf16.mxu1 %v13163_v59  ;;  %v13250_v59 = vld [vmem:[%s17692_s1 + $0x1414] ss:$8 sps:$4 sm:$0xff]  }
 0x257   :  { %5148 = vmatpush1.bf16.msra.mxu0 %v13158_v60  ;;  %v13248_v60 = vld [vmem:[%s17692_s1 + $0x1410] ss:$8 sps:$4 sm:$0xff]  }
 0x258   :  { %5149 = vmatprep.subr.bf16.mxu0 %v13166_v61  ;;  %v13253_v61 = vld [vmem:[%s17692_s1 + $0x1404] ss:$8 sps:$4 sm:$0xff]  }
 0x259   :  { %5191 = vmatpush1.bf16.msra.mxu1 %v13161_v62  ;;  %v13251_v62 = vld [vmem:[%s17692_s1 + $0x1400] ss:$8 sps:$4 sm:$0xff]  }
 0x25a   :  { %5192 = vmatprep.subr.bf16.mxu1 %v13169_v63  ;;  %v13256_v63 = vld [vmem:[%s17692_s1 + $0x14f4] ss:$8 sps:$4 sm:$0xff]  }
 0x25b   :  { %5150 = vmatpush1.bf16.msra.mxu0 %v13164_v0  ;;  %v13254_v0 = vld [vmem:[%s17692_s1 + $0x14f0] ss:$8 sps:$4 sm:$0xff]  }
 0x25c   :  { %5151 = vmatprep.subr.bf16.mxu0 %v13172_v1  ;;  %v13259_v1 = vld [vmem:[%s17692_s1 + $0x14e4] ss:$8 sps:$4 sm:$0xff]  }
 0x25d   :  { %5193 = vmatpush1.bf16.msra.mxu1 %v13167_v2  ;;  %v13257_v2 = vld [vmem:[%s17692_s1 + $0x14e0] ss:$8 sps:$4 sm:$0xff]  }
 0x25e   :  { %5194 = vmatprep.subr.bf16.mxu1 %v13175_v3  ;;  %v13262_v3 = vld [vmem:[%s17692_s1 + $0x14d4] ss:$8 sps:$4 sm:$0xff]  }
 0x25f   :  { %5152 = vmatpush1.bf16.msra.mxu0 %v13170_v4  ;;  %v13260_v4 = vld [vmem:[%s17692_s1 + $0x14d0] ss:$8 sps:$4 sm:$0xff]  }
 0x260   :  { %5153 = vmatprep.subr.bf16.mxu0 %v13178_v5  ;;  %v13265_v5 = vld [vmem:[%s17692_s1 + $0x14c4] ss:$8 sps:$4 sm:$0xff]  }
 0x261   :  { %5195 = vmatpush1.bf16.msra.mxu1 %v13173_v6  ;;  %v13263_v6 = vld [vmem:[%s17692_s1 + $0x14c0] ss:$8 sps:$4 sm:$0xff]  }
 0x262   :  { %5196 = vmatprep.subr.bf16.mxu1 %v13181_v7  ;;  %v13268_v7 = vld [vmem:[%s17692_s1 + $0x14b4] ss:$8 sps:$4 sm:$0xff]  }
 0x263   :  { %5154 = vmatpush2.bf16.msra.mxu0 %v13176_v8  ;;  %v13266_v8 = vld [vmem:[%s17692_s1 + $0x14b0] ss:$8 sps:$4 sm:$0xff]  }
 0x264   :  { %5155 = vmatprep.subr.bf16.mxu0 %v13184_v9  ;;  %v13271_v9 = vld [vmem:[%s17692_s1 + $0x14a4] ss:$8 sps:$4 sm:$0xff]  }
 0x265   :  { %5197 = vmatpush2.bf16.msra.mxu1 %v13179_v10  ;;  %v13269_v10 = vld [vmem:[%s17692_s1 + $0x14a0] ss:$8 sps:$4 sm:$0xff]  }
 0x266   :  { %5198 = vmatprep.subr.bf16.mxu1 %v13187_v11  ;;  %v13277_v11 = vld [vmem:[%s17692_s1 + $0x1494] ss:$8 sps:$4 sm:$0xff]  }
 0x267   :  { %5156 = vmatpush2.bf16.msra.mxu0 %v13182_v12  ;;  %v13275_v12 = vld [vmem:[%s17692_s1 + $0x1490] ss:$8 sps:$4 sm:$0xff]  }
 0x268   :  { %5157 = vmatprep.subr.bf16.mxu0 %v13190_v13  ;;  %v13283_v13 = vld [vmem:[%s17692_s1 + $0x1484] ss:$8 sps:$4 sm:$0xff]  }
 0x269   :  { %5199 = vmatpush2.bf16.msra.mxu1 %v13185_v14  ;;  %v13281_v14 = vld [vmem:[%s17692_s1 + $0x1480] ss:$8 sps:$4 sm:$0xff]  }
 0x26a   :  { %5200 = vmatprep.subr.bf16.mxu1 %v13193_v15  ;;  %v13285_v15 = vld [vmem:[%s17693_s0 + $0xa0] ss:$172 sps:$4 sm:$0xff]  }
 0x26b   :  { %5158 = vmatpush2.bf16.msra.mxu0 %v13188_v16  ;;  %v15512_v16 = vpop.f32.mrf.mxu1 }
 0x26c   :  { %5159 = vmatprep.subr.bf16.mxu0 %v13196_v17  ;;  %v15514_v17 = vpop.f32.mrf.mxu0 }
 0x26d   :  { %5201 = vmatpush2.bf16.msra.mxu1 %v13191_v18  ;;  %v15516_v18 = vpop.f32.mrf.mxu1 }
 0x26e   :  { %5202 = vmatprep.subr.bf16.mxu1 %v13199_v19  ;;  %v15518_v19 = vpop.f32.mrf.mxu0 }
 0x26f   :  { %5160 = vmatpush2.bf16.msra.mxu0 %v13194_v20  ;;  %v15520_v20 = vpop.f32.mrf.mxu1 }
 0x270   :  { %5161 = vmatprep.subr.bf16.mxu0 %v13202_v21  ;;  %v15522_v21 = vpop.f32.mrf.mxu0 }
 0x271   :  { %5203 = vmatpush2.bf16.msra.mxu1 %v13197_v22  ;;  %v15524_v22 = vpop.f32.mrf.mxu1 }
 0x272   :  { %5204 = vmatprep.subr.bf16.mxu1 %v13205_v23 }
 0x273   :  { %5162 = vmatpush2.bf16.msra.mxu0 %v13200_v24  ;;  %v15526_v23 = vpop.f32.mrf.mxu1  ;;  %v15528_v24 = vpop.f32.mrf.mxu0 }
 0x274   :  { %5163 = vmatprep.subr.bf16.mxu0 %v13208_v25 }
 0x275   :  { %5205 = vmatpush2.bf16.msra.mxu1 %v13203_v26  ;;  %v15530_v25 = vpop.f32.mrf.mxu0  ;;  %v15532_v26 = vpop.f32.mrf.mxu1 }
 0x276   :  { %5206 = vmatprep.subr.bf16.mxu1 %v13211_v27  ;;  %v13288_v27 = vld [vmem:[%s17694_s4 + $0x38] sm:$0xff]  }
 0x277   :  { %5164 = vmatpush2.bf16.msra.mxu0 %v13206_v28  ;;  %v13301_v28 = vmov 0.0  }
 0x278   :  { %5165 = vmatprep.subr.bf16.mxu0 %v13214_v29  ;;  %v15537_v29 = vpop.f32.mrf.mxu0 }
 0x279   :  { %5207 = vmatpush2.bf16.msra.mxu1 %v13209_v30  ;;  %v15539_v30 = vpop.f32.mrf.mxu1 }
 0x27a   :  { %5208 = vmatprep.subr.bf16.mxu1 %v13217_v31  ;;  %v13289_v31 = vld [vmem:[%s17694_s4 + $0x30] sm:$0xff]  }
 0x27b   :  { %5166 = vmatpush2.bf16.msra.mxu0 %v13212_v32  ;;  %v15544_v32 = vpop.f32.mrf.mxu0 }
 0x27c   :  { %5167 = vmatprep.subr.bf16.mxu0 %v13220_v33  ;;  %v15546_v33 = vpop.f32.mrf.mxu1 }
 0x27d   :  { %5209 = vmatpush2.bf16.msra.mxu1 %v13215_v34  ;;  %v13290_v34 = vld [vmem:[%s17694_s4 + $0x28] sm:$0xff]  }
 0x27e   :  { %5210 = vmatprep.subr.bf16.mxu1 %v13223_v35  ;;  %v15551_v35 = vpop.f32.mrf.mxu1 }
 0x27f   :  { %5168 = vmatpush2.bf16.msra.mxu0 %v13218_v36  ;;  %v15553_v36 = vpop.f32.mrf.mxu0 }
 0x280   :  { %5223 = vmatprep.subr.bf16.mxu0 %v13229_v37  ;;  %v13291_v37 = vld [vmem:[%s17694_s4 + $0x20] sm:$0xff]  }
 0x281   :  { %5211 = vmatpush2.bf16.msra.mxu1 %v13221_v38  ;;  %v15558_v38 = vpop.f32.mrf.mxu0 }
 0x282   :  { %5170 = vmatmul.mubr.bf16.vlgmr.msra.gmra.mxu0 %v13224_v39  ;;  %5278 = vmatprep.subr.bf16.mxu1 %v13274_v40  ;;  %v15560_v39 = vpop.f32.mrf.mxu1  ;;  %v13292_v40 = vld [vmem:[%s17694_s4 + $0x18] sm:$0xff]  }
 0x283   :  { %5224 = vmatpush1.bf16.msra.mxu0 %v13227_v41  ;;  %5255 = vmatprep.mubr.bf16.mxu0 %v13287_v42  ;;  %v15565_v41 = vpop.f32.mrf.mxu0 }
 0x284   :  { %5213 = vmatmul.mubr.bf16.vlgmr.msra.gmra.mxu1 %v13230_v43  ;;  %5225 = vmatprep.subr.bf16.mxu0 %v13235_v44  ;;  %v15567_v42 = vpop.f32.mrf.mxu1  ;;  %v13293_v43 = vld [vmem:[%s17694_s4 + $0x10] sm:$0xff]  }
 0x285   :  { %5279 = vmatpush1.bf16.msra.mxu1 %v13272_v45  ;;  %5298 = vmatprep.mubr.bf16.mxu1 %v17702_v50  ;;  %v15572_v44 = vpop.f32.mrf.mxu0 }
 0x286   :  { %5280 = vmatprep.subr.bf16.mxu1 %v13280_v46  ;;  %v15574_v45 = vpop.f32.mrf.mxu1  ;;  %v13294_v46 = vld [vmem:[%s17694_s4 + $0x8] sm:$0xff]  }
 0x287   :  { %5226 = vmatpush1.bf16.msra.mxu0 %v13233_v47 }
 0x288   :  { %5227 = vmatprep.subr.bf16.mxu0 %v13238_v48  ;;  %v15579_v47 = vpop.f32.mrf.mxu1  ;;  %v15581_v48 = vpop.f32.mrf.mxu0 }
 0x289   :  { %5281 = vmatpush1.bf16.msra.mxu1 %v13278_v49  ;;  %v13295_v49 = vld [vmem:[%s17694_s4] sm:$0xff]  }
 0x28a   :  { %12187 = vmatprep.subr.bf16.mxu1 %v13301_v28 }
 0x28b   :  { %5228 = vmatpush1.bf16.msra.mxu0 %v13236_v51  ;;  %v15586_v51 = vpop.f32.mrf.mxu0 }
 0x28c   :  { %5229 = vmatprep.subr.bf16.mxu0 %v13241_v52  ;;  %11528 = vmatmul.mubr.msk.bf16.vlgmr.msra.gmra.mxu1 %vm4359_vm0, %v13284_v53  ;;  %v15588_v52 = vpop.f32.mrf.mxu1 }
 0x28d   :  { %12188 = vmatpush3.bf16.msra.mxu1 %v13288_v27  ;;  %12203 = vmatprep.mubr.msk.bf16.mxu1 %vm13302_vm1, %v13301_v28  ;;  %v15590_v53 = vpop.f32.mrf.mxu0 }
 0x28e   :  { %12189 = vmatprep.subr.bf16.mxu1 %v13301_v28 }
 0x28f   :  { %5230 = vmatpush1.bf16.msra.mxu0 %v13239_v54  ;;  %v15592_v54 = vpop.f32.mrf.mxu1 }
 0x290   :  { %5231 = vmatprep.subr.bf16.mxu0 %v13244_v55  ;;  %v15597_v55 = vld [vmem:[%s17695_s6 + $0xe00] sm:$0xff] }
 0x291   :  { %12190 = vmatpush3.bf16.msra.mxu1 %v13289_v31  ;;  %17712 = vst [vmem:[#allocation2_spill] sm:$0xff] %v15597_v55 }
 0x292   :  { %12191 = vmatprep.subr.bf16.mxu1 %v13301_v28 }
 0x293   :  { %5232 = vmatpush1.bf16.msra.mxu0 %v13242_v56  ;;  %v15602_v56 = vld [vmem:[%s17695_s6 + $0xf00] sm:$0xff] }
 0x294   :  { %5233 = vmatprep.subr.bf16.mxu0 %v13247_v57  ;;  %17713 = vst [vmem:[#allocation3_spill] sm:$0xff] %v15602_v56  ;;  %v5890_v57 = vld [vmem:[%s17695_s6 + $0xe08] sm:$0xff] }
 0x295   :  { %12192 = vmatpush3.bf16.msra.mxu1 %v13290_v34  ;;  %v5634_v34 = vld [vmem:[%s17695_s6 + $0x608] sm:$0xff] }
 0x296   :  { %12193 = vmatprep.subr.bf16.mxu1 %v13301_v28 }
 0x297   :  { %5234 = vmatpush1.bf16.msra.mxu0 %v13245_v58 }
 0x298   :  { %5235 = vmatprep.subr.bf16.mxu0 %v13250_v59  ;;  %v11987_v59 = vcombine.high %v15597_v55, %v15602_v56 }
 0x299   :  { %12194 = vmatpush3.bf16.msra.mxu1 %v13291_v37  ;;  %v5666_v37 = vld [vmem:[%s17695_s6 + $0x708] sm:$0xff] }
 0x29a   :  { %12195 = vmatprep.subr.bf16.mxu1 %v13301_v28 }
 0x29b   :  { %5236 = vmatpush1.bf16.msra.mxu0 %v13248_v60  ;;  %v5922_v60 = vld [vmem:[%s17695_s6 + $0xf08] sm:$0xff] }
 0x29c   :  { %5237 = vmatprep.subr.bf16.mxu0 %v13253_v61  ;;  %v15614_v61 = vpop.f32.mrf.mxu0 }
 0x29d   :  { %12196 = vmatpush3.bf16.msra.mxu1 %v13292_v40  ;;  %v11733_v40 = vcombine.high %v5634_v34, %v5666_v37 }
 0x29e   :  { %12197 = vmatprep.subr.bf16.mxu1 %v13301_v28 }
 0x29f   :  { %5238 = vmatpush1.bf16.msra.mxu0 %v13251_v62  ;;  %v15616_v62 = vpop.f32.mrf.mxu1 }
 0x2a0   :  { %5239 = vmatprep.subr.bf16.mxu0 %v13256_v63  ;;  %v11988_v63 = vcombine.low %v5890_v57, %v5922_v60 }
 0x2a1   :  { %12198 = vmatpush3.bf16.msra.mxu1 %v13293_v43 }
 0x2a2   :  { %12199 = vmatprep.subr.bf16.mxu1 %v13301_v28 }
 0x2a3   :  { %5240 = vmatpush2.bf16.msra.mxu0 %v13254_v0  ;;  %v11989_v0 = vcombine.high %v5890_v57, %v5922_v60  ;;  %v11732_v57 = vcombine.low %v5634_v34, %v5666_v37  ;;  %v5602_v60 = vld [vmem:[%s17695_s6 + $0x508] sm:$0xff] }
 0x2a4   :  { %5241 = vmatprep.subr.bf16.mxu0 %v13259_v1  ;;  %v5826_v1 = vld [vmem:[%s17695_s6 + $0xc08] sm:$0xff] }
 0x2a5   :  { %12200 = vmatpush3.bf16.msra.mxu1 %v13294_v46 }
 0x2a6   :  { %12201 = vmatprep.subr.bf16.mxu1 %v13301_v28 }
 0x2a7   :  { %5242 = vmatpush2.bf16.msra.mxu0 %v13257_v2  ;;  %v5858_v2 = vld [vmem:[%s17695_s6 + $0xd08] sm:$0xff] }
 0x2a8   :  { %5243 = vmatprep.subr.bf16.mxu0 %v13262_v3  ;;  %v11925_v3 = vcombine.high %v5826_v1, %v5858_v2 }
 0x2a9   :  { %12202 = vmatpush3.bf16.msra.mxu1 %v13295_v49  ;;  %v754_v49 = vlaneseq }
 0x2aa   :  { %8849 = vmatprep.subr.bf16.mxu1 %v11987_v59  ;;  %v5570_v59 = vld [vmem:[%s17695_s6 + $0x408] sm:$0xff] }
 0x2ab   :  { %5244 = vmatpush2.bf16.msra.mxu0 %v13260_v4  ;;  %v15624_v4 = vpop.f32.mrf.mxu1 }
 0x2ac   :  { %5245 = vmatprep.subr.bf16.mxu0 %v13265_v5  ;;  %v11924_v5 = vcombine.low %v5826_v1, %v5858_v2  ;;  %v15668_v2 = vshrl.u32 %v754_v49, 7 }
 0x2ae   :  { %17714 = vst [vmem:[#allocation4_spill] sm:$0xff] %v15668_v2 }
 0x2af   :  { %5246 = vmatpush2.bf16.msra.mxu0 %v13263_v6  ;;  %v5762_v6 = vld [vmem:[%s17695_s6 + $0xa08] sm:$0xff] }
 0x2b0   :  { %5247 = vmatprep.subr.bf16.mxu0 %v13268_v7  ;;  %v5794_v7 = vld [vmem:[%s17695_s6 + $0xb08] sm:$0xff] }
 0x2b3   :  { %5248 = vmatpush2.bf16.msra.mxu0 %v13266_v8  ;;  %v15632_v8 = vpop.f32.mrf.mxu0 }
 0x2b4   :  { %5249 = vmatprep.subr.bf16.mxu0 %v13271_v9  ;;  %v11861_v9 = vcombine.high %v5762_v6, %v5794_v7 }
 0x2b7   :  { %5250 = vmatpush2.bf16.msra.mxu0 %v13269_v10  ;;  %v15634_v10 = vpop.f32.mrf.mxu0 }
 0x2b8   :  { %5251 = vmatprep.subr.bf16.mxu0 %v13277_v11  ;;  %v15636_v11 = vpop.f32.mrf.mxu1 }
 0x2b9   :  { %v15644_v27 = vpop.f32.mrf.mxu0 }
 0x2ba   :  { %v15646_v28 = vpop.f32.mrf.mxu1 }
 0x2bb   :  { %5252 = vmatpush2.bf16.msra.mxu0 %v13275_v12  ;;  %v11860_v12 = vcombine.low %v5762_v6, %v5794_v7  ;;  %v15654_v43 = vpop.f32.mrf.mxu0  ;;  %v15675_v7 = vsub.s32 0, %v15668_v2 }
 0x2bc   :  { %5253 = vmatprep.subr.bf16.mxu0 %v13283_v13  ;;  %v5698_v13 = vld [vmem:[%s17695_s6 + $0x808] sm:$0xff]  ;;  %v15656_v46 = vpop.f32.mrf.mxu1 }
 0x2bd   :  { %v15666_v1 = vpop.f32.mrf.mxu0  ;;  %17715 = vst [vmem:[#allocation5_spill] sm:$0xff] %v15675_v7 }
 0x2bf   :  { %5254 = vmatpush2.bf16.msra.mxu0 %v13281_v14  ;;  %v5730_v14 = vld [vmem:[%s17695_s6 + $0x908] sm:$0xff] }
 0x2c0   :  { %8892 = vmatprep.subr.bf16.mxu0 %v11989_v0  ;;  %v11796_v31 = vcombine.low %v5698_v13, %v5730_v14  ;;  %v11669_v0 = vcombine.high %v5570_v59, %v5602_v60 }
 0x2c2   :  { %5256 = vmatmul.mubr.bf16.vlgmr.msra.gmra.mxu0 %v13285_v15  ;;  %v11797_v15 = vcombine.high %v5698_v13, %v5730_v14  ;;  %v15685_v14 = vsub.s32 1, %v15668_v2 }
 0x2c3   :  { %8924 = vmatprep.mubr.bf16.mxu0 %v17702_v50  ;;  %8893 = vmatpush1.bf16.msra.mxu0 %v11988_v63  ;;  %v15664_v63 = vpop.f32.mrf.mxu1 }
 0x2c4   :  { %8894 = vmatprep.subr.bf16.mxu0 %v11925_v3  ;;  %v11668_v3 = vcombine.low %v5570_v59, %v5602_v60  ;;  %17716 = vst [vmem:[#allocation6_spill] sm:$0xff] %v15685_v14 }
 0x2c5   :  { %v15672_v6 = vpop.f32.mrf.mxu1 }
 0x2c7   :  { %8895 = vmatpush1.bf16.msra.mxu0 %v11924_v5  ;;  %v15670_v5 = vpop.f32.mrf.mxu0  ;;  %v15682_v13 = vpop.f32.mrf.mxu1 }
 0x2c8   :  { %8896 = vmatprep.subr.bf16.mxu0 %v11861_v9  ;;  %v752_v9 = vld [vmem:[%s17696_s2] sm:$0x3] }
 0x2c9   :  { %v15690_v34 = vpop.f32.mrf.mxu1  ;;  %v761_v37 = vrot.slane %v752_v9, %v15685_v14 }
 0x2cb   :  { %8897 = vmatpush1.bf16.msra.mxu0 %v11860_v12  ;;  %v15680_v12 = vpop.f32.mrf.mxu0  ;;  %v4400_v59 = vadd.f32 %v15518_v19, %v761_v37 }
 0x2cc   :  { %8898 = vmatprep.subr.bf16.mxu0 %v11797_v15  ;;  %v757_v15 = vrot.slane %v752_v9, %v15675_v7  ;;  %v4404_v9 = vadd.f32 %v15528_v24, %v761_v37 }
 0x2cd   :  { %v4443_v58 = vadd.f32 %v15516_v18, %v4400_v59 }
 0x2ce   :  { %v4398_v49 = vadd.f32 %v15514_v17, %v757_v15  ;;  %v4402_v50 = vadd.f32 %v15522_v21, %v757_v15  ;;  %v4447_v56 = vadd.f32 %v15524_v22, %v4404_v9 }
 0x2cf   :  { %8899 = vmatpush1.bf16.msra.mxu0 %v11796_v31  ;;  %v15688_v31 = vpop.f32.mrf.mxu0  ;;  %v4486_v19 = vadd.f32 %v15537_v29, %v4443_v58 }
 0x2d0   :  { %8900 = vmatprep.subr.bf16.mxu0 %v11733_v40  ;;  %v15693_v40 = vpop.f32.mrf.mxu1  ;;  %v4445_v2 = vadd.f32 %v15520_v20, %v4402_v50  ;;  %v4490_v24 = vadd.f32 %v15553_v36, %v4447_v56 }
 0x2d1   :  { %v4529_v18 = vadd.f32 %v15532_v26, %v4486_v19 }
 0x2d3   :  { %8901 = vmatpush1.bf16.msra.mxu0 %v11732_v57  ;;  %v15696_v57 = vpop.f32.mrf.mxu0  ;;  %v4572_v20 = vadd.f32 %v15565_v41, %v4529_v18 }
 0x2d4   :  { %8902 = vmatprep.subr.bf16.mxu0 %v11669_v0  ;;  %v15701_v0 = vpop.f32.mrf.mxu1 }
 0x2d5   :  { %v15699_v60 = vpop.f32.mrf.mxu0  ;;  %v4615_v26 = vadd.f32 %v15560_v39, %v4572_v20 }
 0x2d6   :  { %v15708_v17 = vpop.f32.mrf.mxu1 }
 0x2d7   :  { %8903 = vmatpush1.bf16.msra.mxu0 %v11668_v3  ;;  %v4441_v3 = vadd.f32 %v15512_v16, %v4398_v49  ;;  %v4915_v7 = vpop.f32.mrf.mxu0  ;;  %v4488_v16 = vadd.f32 %v15544_v32, %v4445_v2 }
 0x2d8   :  { %v15715_v15 = vpop.f32.mrf.mxu1 }
 0x2d9   :  { %v4484_v14 = vadd.f32 %v15530_v25, %v4441_v3  ;;  %v4917_v21 = vpop.f32.mrf.mxu0  ;;  %v4531_v50 = vadd.f32 %v15539_v30, %v4488_v16  ;;  %v4658_v30 = vadd.f32 %v15590_v53, %v4615_v26 }
 0x2da   :  { %v15720_v37 = vpop.f32.mrf.mxu1 }
 0x2db   :  { %v4527_v55 = vadd.f32 %v15526_v23, %v4484_v14  ;;  %v4919_v22 = vpop.f32.mrf.mxu0  ;;  %v4533_v23 = vadd.f32 %v15546_v33, %v4490_v24  ;;  %v4574_v32 = vadd.f32 %v15572_v44, %v4531_v50  ;;  %v4701_v14 = vadd.f32 %v15588_v52, %v4658_v30 }
 0x2dc   :  { %v5044_v2 = vpop.f32.mrf.mxu1 }
 0x2dd   :  { %v4570_v25 = vadd.f32 %v15558_v38, %v4527_v55  ;;  %v4999_v58 = vpop.f32.mrf.mxu0  ;;  %v4576_v36 = vadd.f32 %v15581_v48, %v4533_v23  ;;  %v4617_v55 = vadd.f32 %v15567_v42, %v4574_v32  ;;  %v4744_v53 = vadd.f32 %v15644_v27, %v4701_v14 }
 0x2de   :  { %v5046_v56 = vpop.f32.mrf.mxu1 }
 0x2df   :  { %v4613_v29 = vadd.f32 %v15551_v35, %v4570_v25  ;;  %v5001_v41 = vpop.f32.mrf.mxu0  ;;  %v4619_v33 = vadd.f32 %v15574_v45, %v4576_v36  ;;  %v4660_v44 = vadd.f32 %v15614_v61, %v4617_v55  ;;  %v4787_v52 = vadd.f32 %v15636_v11, %v4744_v53 }
 0x2e1   :  { %v4656_v38 = vadd.f32 %v15586_v51, %v4613_v29  ;;  %v4662_v39 = vadd.f32 %v15632_v8, %v4619_v33  ;;  %v5003_v49 = vpop.f32.mrf.mxu0  ;;  %v5048_v51 = vpop.f32.mrf.mxu1  ;;  %v4703_v42 = vadd.f32 %v15592_v54, %v4660_v44  ;;  %v4830_v27 = vadd.f32 %v15680_v12, %v4787_v52 }
 0x2e3   :  { %v4699_v35 = vadd.f32 %v15579_v47, %v4656_v38  ;;  %v4705_v3 = vadd.f32 %v15616_v62, %v4662_v39  ;;  %v4746_v47 = vadd.f32 %v15654_v43, %v4703_v42  ;;  %v5005_v61 = vpop.f32.mrf.mxu0  ;;  %v4873_v11 = vadd.f32 %v15672_v6, %v4830_v27 }
 0x2e5   :  { %v4742_v48 = vadd.f32 %v15634_v10, %v4699_v35  ;;  %v4748_v8 = vadd.f32 %v15666_v1, %v4705_v3  ;;  %v4789_v54 = vadd.f32 %v15646_v28, %v4746_v47  ;;  %v4916_v25 = vadd.f32 %v4915_v7, %v4873_v11 }
 0x2e7   :  { %v4785_v45 = vadd.f32 %v15624_v4, %v4742_v48  ;;  %v4791_v16 = vadd.f32 %v15656_v46, %v4748_v8  ;;  %v4832_v4 = vadd.f32 %v15688_v31, %v4789_v54  ;;  %v4959_v31 = vadd.f32 %v15701_v0, %v4916_v25  ;;  %v5313_v25 = vld [vmem:[%s17698_s3] sm:$0xff] }
 0x2e9   :  { %v4828_v10 = vadd.f32 %v15670_v5, %v4785_v45  ;;  %v4834_v1 = vadd.f32 %v15696_v57, %v4791_v16  ;;  %v4875_v24 = vadd.f32 %v15682_v13, %v4832_v4  ;;  %v5002_v32 = vadd.f32 %v5001_v41, %v4959_v31 }
 0x2eb   :  { %v4871_v62 = vadd.f32 %v15664_v63, %v4828_v10  ;;  %v4877_v12 = vadd.f32 %v15690_v34, %v4834_v1  ;;  %v4918_v63 = vadd.f32 %v4917_v21, %v4875_v24  ;;  %v5045_v34 = vadd.f32 %v5044_v2, %v5002_v32  ;;  %v5793_v32 = vld [vmem:[%s17695_s6 + $0xb00] sm:$0xff] }
 0x2ed   :  { %v4914_v5 = vadd.f32 %v15699_v60, %v4871_v62  ;;  %v4920_v23 = vadd.f32 %v4919_v22, %v4877_v12  ;;  %v4961_v57 = vadd.f32 %v15708_v17, %v4918_v63  ;;  %v5825_v63 = vld [vmem:[%s17695_s6 + $0xc00] sm:$0xff] }
 0x2ef   :  { %v4957_v46 = vadd.f32 %v15693_v40, %v4914_v5  ;;  %v4963_v7 = vadd.f32 %v15715_v15, %v4920_v23  ;;  %v5004_v36 = vadd.f32 %v5003_v49, %v4961_v57  ;;  %v5761_v57 = vld [vmem:[%s17695_s6 + $0xa00] sm:$0xff] }
 0x2f1   :  { %v5000_v29 = vadd.f32 %v4999_v58, %v4957_v46  ;;  %v5006_v38 = vadd.f32 %v5005_v61, %v4963_v7  ;;  %v5047_v30 = vadd.f32 %v5046_v56, %v5004_v36  ;;  %v17720_v36 = vmov 0  }
 0x2f3   :  { %v5043_v13 = vadd.f32 %v15720_v37, %v5000_v29  ;;  %v5049_v22 = vadd.f32 %v5048_v51, %v5006_v38  ;;  %v5697_v38 = vld [vmem:[%s17695_s6 + $0x800] sm:$0xff] }
 0x302   :  { %v5085_v9 = vpop.f32.mrf.mxu0 }
 0x303   :  { %v5086_v40 = vadd.f32 %v5085_v9, %v5043_v13 }
 0x304   :  { %v5128_v59 = vpop.f32.mrf.mxu1  ;;  %v5087_v43 = vpop.f32.mrf.mxu0 }
 0x305   :  { %v5088_v0 = vadd.f32 %v5087_v43, %v5045_v34  ;;  %v5129_v58 = vadd.f32 %v5128_v59, %v5086_v40  ;;  %v11859_v34 = vcombine.high %v5761_v57, %v5793_v32  ;;  %v5729_v40 = vld [vmem:[%s17695_s6 + $0x900] sm:$0xff] }
 0x306   :  { %v5130_v19 = vpop.f32.mrf.mxu1  ;;  %v5089_v28 = vpop.f32.mrf.mxu0 }
 0x307   :  { %v5090_v33 = vadd.f32 %v5089_v28, %v5047_v30  ;;  %v5131_v41 = vadd.f32 %v5130_v19, %v5088_v0  ;;  %v5314_v28 = vld [vmem:[%s17698_s3 + $0x8] sm:$0xff]  ;;  %v5633_v30 = vld [vmem:[%s17695_s6 + $0x600] sm:$0xff] }
 0x308   :  { %v5132_v18 = vpop.f32.mrf.mxu1  ;;  %v5091_v6 = vpop.f32.mrf.mxu0  ;;  %v5665_v0 = vld [vmem:[%s17695_s6 + $0x700] sm:$0xff] }
 0x309   :  { %v5092_v44 = vadd.f32 %v5091_v6, %v5049_v22  ;;  %v5133_v15 = vadd.f32 %v5132_v18, %v5090_v33  ;;  %v11794_v22 = vcombine.low %v5697_v38, %v5729_v40  ;;  %v5569_v33 = vld [vmem:[%s17695_s6 + $0x400] sm:$0xff] }
 0x30a   :  { %v5134_v50 = vpop.f32.mrf.mxu1 }
 0x30b   :  { %v5135_v49 = vadd.f32 %v5134_v50, %v5092_v44 }
 0x342   :  { %v5171_v60 = vpop.f32.mrf.mxu0 }
 0x343   :  { %v5172_v14 = vadd.f32 %v5171_v60, %v5129_v58  ;;  %v17717_v60 = vld [vmem:[#allocation2_spill] sm:$0xff]  ;;  %v11731_v58 = vcombine.high %v5633_v30, %v5665_v0 }
 0x344   :  { %v5214_v20 = vpop.f32.mrf.mxu1  ;;  %v5173_v21 = vpop.f32.mrf.mxu0 }
 0x345   :  { %v5174_v48 = vadd.f32 %v5173_v21, %v5131_v41  ;;  %v5215_v2 = vadd.f32 %v5214_v20, %v5172_v14  ;;  %v5857_v20 = vld [vmem:[%s17695_s6 + $0xd00] sm:$0xff]  ;;  %v11858_v21 = vcombine.low %v5761_v57, %v5793_v32  ;;  %v5796_v57 = vld [vmem:[%s17695_s6 + $0xb18] sm:$0xff] }
 0x346   :  { %v5216_v26 = vpop.f32.mrf.mxu1  ;;  %v5175_v35 = vpop.f32.mrf.mxu0  ;;  %v11923_v6 = vcombine.high %v5825_v63, %v5857_v20  ;;  %v11922_v13 = vcombine.low %v5825_v63, %v5857_v20  ;;  %v5505_v14 = vld [vmem:[%s17695_s6 + $0x200] sm:$0xff] }
 0x347   :  { %v5176_v42 = vadd.f32 %v5175_v35, %v5133_v15  ;;  %v5217_v45 = vadd.f32 %v5216_v26, %v5174_v48  ;;  %v17718_v26 = vld [vmem:[#allocation3_spill] sm:$0xff]  ;;  %v5601_v35 = vld [vmem:[%s17695_s6 + $0x500] sm:$0xff] }
 0x348   :  { %v5218_v55 = vpop.f32.mrf.mxu1  ;;  %v5177_v37 = vpop.f32.mrf.mxu0  ;;  %v17719_v7 = vcombine.low %v17717_v60, %v17718_v26  ;;  %v11667_v41 = vcombine.high %v5569_v33, %v5601_v35  ;;  %v11666_v44 = vcombine.low %v5569_v33, %v5601_v35  ;;  %v5506_v15 = vld [vmem:[%s17695_s6 + $0x208] sm:$0xff]  ;;  %v5636_v33 = vld [vmem:[%s17695_s6 + $0x618] sm:$0xff] }
 0x349   :  { %v5178_v56 = vadd.f32 %v5177_v37, %v5135_v49  ;;  %v5219_v59 = vadd.f32 %v5218_v55, %v5176_v42  ;;  %v11795_v55 = vcombine.high %v5697_v38, %v5729_v40  ;;  %v5538_v37 = vld [vmem:[%s17695_s6 + $0x308] sm:$0xff]  ;;  %v5700_v38 = vld [vmem:[%s17695_s6 + $0x818] sm:$0xff] }
 0x34a   :  { %v5220_v17 = vpop.f32.mrf.mxu1  ;;  %v11605_v42 = vcombine.high %v5506_v15, %v5538_v37  ;;  %v5732_v40 = vld [vmem:[%s17695_s6 + $0x918] sm:$0xff] }
 0x34b   :  { %v5221_v9 = vadd.f32 %v5220_v17, %v5178_v56  ;;  %v11730_v17 = vcombine.low %v5633_v30, %v5665_v0  ;;  %v11801_v0 = vcombine.high %v5700_v38, %v5732_v40  ;;  %v5668_v35 = vld [vmem:[%s17695_s6 + $0x718] sm:$0xff] }
 0x34c   :  { %v5300_v39 = vpop.f32.mrf.mxu1  ;;  %8904 = vmatprep.subr.bf16.mxu0 %v11605_v42 }
 0x34e   :  { %v5302_v53 = vpop.f32.mrf.mxu1 }
 0x350   :  { %v5304_v8 = vpop.f32.mrf.mxu1 }
 0x352   :  { %v5306_v43 = vpop.f32.mrf.mxu1 }
 0x382   :  { %v5257_v3 = vpop.f32.mrf.mxu0 }
 0x383   :  { %v5258_v47 = vadd.f32 %v5257_v3, %v5215_v2  ;;  %v11604_v2 = vcombine.low %v5506_v15, %v5538_v37  ;;  %v5473_v3 = vld [vmem:[%s17695_s6 + $0x100] sm:$0xff]  ;;  %v5603_v15 = vld [vmem:[%s17695_s6 + $0x510] sm:$0xff]  ;;  %v5604_v37 = vld [vmem:[%s17695_s6 + $0x518] sm:$0xff] }
 0x384   :  { %v5259_v51 = vpop.f32.mrf.mxu0 }
 0x385   :  { %v5301_v61 = vadd.f32 %v5300_v39, %v5258_v47  ;;  %v5260_v52 = vadd.f32 %v5259_v51, %v5217_v45  ;;  %v5537_v39 = vld [vmem:[%s17695_s6 + $0x300] sm:$0xff]  ;;  %v5442_v45 = vld [vmem:[%s17695_s6 + $0x8] sm:$0xff]  ;;  %8905 = vmatpush1.bf16.msra.mxu0 %v11604_v2  ;;  %v11736_v2 = vcombine.low %v5636_v33, %v5668_v35 }
 0x386   :  { %v5261_v10 = vpop.f32.mrf.mxu0  ;;  %v11603_v48 = vcombine.high %v5505_v14, %v5537_v39  ;;  %v11602_v49 = vcombine.low %v5505_v14, %v5537_v39  ;;  %v5474_v47 = vld [vmem:[%s17695_s6 + $0x108] sm:$0xff]  ;;  %v11737_v14 = vcombine.high %v5636_v33, %v5668_v35  ;;  %v5571_v39 = vld [vmem:[%s17695_s6 + $0x410] sm:$0xff]  ;;  %v5637_v33 = vld [vmem:[%s17695_s6 + $0x620] sm:$0xff] }
 0x387   :  { %5309 = vst [vmem:[%s17697_s8] sm:$0xff] %v5301_v61  ;;  %v5303_v19 = vadd.f32 %v5302_v53, %v5260_v52  ;;  %v5262_v54 = vadd.f32 %v5261_v10, %v5219_v59  ;;  %v5441_v53 = vld [vmem:[%s17695_s6] sm:$0xff]  ;;  %v11540_v59 = vcombine.low %v5442_v45, %v5474_v47  ;;  %v5891_v52 = vld [vmem:[%s17695_s6 + $0xe10] sm:$0xff]  ;;  %v5892_v10 = vld [vmem:[%s17695_s6 + $0xe18] sm:$0xff]  ;;  %v11671_v42 = vcombine.high %v5571_v39, %v5603_v15 }
 0x388   :  { %v5263_v27 = vpop.f32.mrf.mxu0  ;;  %v11539_v56 = vcombine.high %v5441_v53, %v5473_v3  ;;  %v11538_v51 = vcombine.low %v5441_v53, %v5473_v3  ;;  %v5507_v3 = vld [vmem:[%s17695_s6 + $0x210] sm:$0xff]  ;;  %v5669_v35 = vld [vmem:[%s17695_s6 + $0x720] sm:$0xff] }
 0x389   :  { %5310 = vst [vmem:[%s17697_s8 + $0x8] sm:$0xff] %v5303_v19  ;;  %v5315_v16 = vmul.f32 0.5, %v5303_v19  ;;  %v5305_v62 = vadd.f32 %v5304_v8, %v5262_v54  ;;  %v5264_v4 = vadd.f32 %v5263_v27, %v5221_v9  ;;  %v5923_v8 = vld [vmem:[%s17695_s6 + $0xf10] sm:$0xff]  ;;  %v5924_v19 = vld [vmem:[%s17695_s6 + $0xf18] sm:$0xff] }
 0x38a   :  { %v11991_v9 = vcombine.high %v5891_v52, %v5923_v8  ;;  %v11990_v54 = vcombine.low %v5891_v52, %v5923_v8  ;;  %v11992_v27 = vcombine.low %v5892_v10, %v5924_v19  ;;  %v5443_v8 = vld [vmem:[%s17695_s6 + $0x10] sm:$0xff] }
 0x38b   :  { %v5317_v18 = vmul.f32 1.442695, %v5315_v16  ;;  %5311 = vst [vmem:[%s17697_s8 + $0x10] sm:$0xff] %v5305_v62  ;;  %v5307_v11 = vadd.f32 %v5306_v43, %v5264_v4  ;;  %v11993_v16 = vcombine.high %v5892_v10, %v5924_v19  ;;  %v5475_v10 = vld [vmem:[%s17695_s6 + $0x110] sm:$0xff]  ;;  %v5476_v19 = vld [vmem:[%s17695_s6 + $0x118] sm:$0xff] }
 0x38d   :  { %13296 = vpow2.f32 %v5317_v18  ;;  %5312 = vst [vmem:[%s17697_s8 + $0x18] sm:$0xff] %v5307_v11  ;;  %v5316_v1 = vmul.f32 0.5, %v5307_v11 }
 0x38f   :  { %v5319_v5 = vmul.f32 1.442695, %v5316_v1 }
 0x391   :  { %13298 = vpow2.f32 %v5319_v5  ;;  %v5827_v5 = vld [vmem:[%s17695_s6 + $0xc10] sm:$0xff] }
 0x39a   :  { %v13297_v24 = vpop.eup %13296 }
 0x39b   :  { %v5321_v50 = vmul.f32 %v13297_v24, %v5313_v25  ;;  %v5859_v25 = vld [vmem:[%s17695_s6 + $0xd10] sm:$0xff] }
 0x39c   :  { %v11927_v20 = vcombine.high %v5827_v5, %v5859_v25  ;;  %v11926_v32 = vcombine.low %v5827_v5, %v5859_v25 }
 0x39d   :  { %v5323_v31 = vadd.f32 %v5321_v50, %v5301_v61  ;;  %v11541_v61 = vcombine.high %v5442_v45, %v5474_v47  ;;  %v5860_v50 = vld [vmem:[%s17695_s6 + $0xd18] sm:$0xff]  ;;  %v5539_v45 = vld [vmem:[%s17695_s6 + $0x310] sm:$0xff] }
 0x39e   :  { %v13299_v12 = vpop.eup %13298  ;;  %v5540_v47 = vld [vmem:[%s17695_s6 + $0x318] sm:$0xff] }
 0x39f   :  { %v5322_v46 = vmul.f32 %v13299_v12, %v5314_v28  ;;  %8906 = vmatprep.subr.bf16.mxu0 %v11541_v61  ;;  %v5828_v28 = vld [vmem:[%s17695_s6 + $0xc18] sm:$0xff]  ;;  %v11607_v61 = vcombine.high %v5507_v3, %v5539_v45 }
 0x3a0   :  { %8907 = vmatpush1.bf16.msra.mxu0 %v11540_v59  ;;  %v11928_v60 = vcombine.low %v5828_v28, %v5860_v50 }
 0x3a1   :  { %v5324_v23 = vadd.f32 %v5322_v46, %v5305_v62  ;;  %8978 = vmatprep.subr.bf16.mxu0 %v11993_v16  ;;  %v11529_v62 = vld [vmem:[%s17699_s5] ss:$0 sm:$0xff]  ;;  %v11543_v16 = vcombine.high %v5443_v8, %v5475_v10 }
 0x3a3   :  { %v5325_v29 = vpack.c.bf16 %v5324_v23, %v5323_v31  ;;  %v11929_v31 = vcombine.high %v5828_v28, %v5860_v50  ;;  %v5763_v23 = vld [vmem:[%s17695_s6 + $0xa10] sm:$0xff]  ;;  %v5829_v28 = vld [vmem:[%s17695_s6 + $0xc20] sm:$0xff] }
 0x3a4   :  { %v5861_v50 = vld [vmem:[%s17695_s6 + $0xd20] sm:$0xff] }
 0x3a5   :  { %12204 = vmatmul.mubr.bf16.vlgmr.msra.gmra.mxu1 %v5325_v29  ;;  %v5795_v29 = vld [vmem:[%s17695_s6 + $0xb10] sm:$0xff] }
 0x3a6   :  { %8850 = vmatpush1.bf16.msra.mxu1 %v17719_v7  ;;  %8881 = vmatprep.mubr.bf16.mxu1 %v17720_v36  ;;  %v11863_v26 = vcombine.high %v5763_v23, %v5795_v29 }
 0x3a7   :  { %8851 = vmatprep.subr.bf16.mxu1 %v11923_v6  ;;  %v5764_v6 = vld [vmem:[%s17695_s6 + $0xa18] sm:$0xff] }
 0x3a8   :  { %v11865_v7 = vcombine.high %v5764_v6, %v5796_v57 }
 0x3aa   :  { %8852 = vmatpush1.bf16.msra.mxu1 %v11922_v13  ;;  %v5699_v13 = vld [vmem:[%s17695_s6 + $0x810] sm:$0xff] }
 0x3ab   :  { %8853 = vmatprep.subr.bf16.mxu1 %v11859_v34  ;;  %v5731_v34 = vld [vmem:[%s17695_s6 + $0x910] sm:$0xff] }
 0x3ac   :  { %v11799_v30 = vcombine.high %v5699_v13, %v5731_v34 }
 0x3ae   :  { %8854 = vmatpush1.bf16.msra.mxu1 %v11858_v21  ;;  %v11862_v21 = vcombine.low %v5763_v23, %v5795_v29  ;;  %v11931_v23 = vcombine.high %v5829_v28, %v5861_v50 }
 0x3af   :  { %8855 = vmatprep.subr.bf16.mxu1 %v11795_v55  ;;  %v11864_v55 = vcombine.low %v5764_v6, %v5796_v57  ;;  %v5765_v6 = vld [vmem:[%s17695_s6 + $0xa20] sm:$0xff] }
 0x3b0   :  { %v5797_v57 = vld [vmem:[%s17695_s6 + $0xb20] sm:$0xff] }
 0x3b2   :  { %8856 = vmatpush1.bf16.msra.mxu1 %v11794_v22  ;;  %v5635_v22 = vld [vmem:[%s17695_s6 + $0x610] sm:$0xff] }
 0x3b3   :  { %8857 = vmatprep.subr.bf16.mxu1 %v11731_v58  ;;  %v5667_v58 = vld [vmem:[%s17695_s6 + $0x710] sm:$0xff] }
 0x3b6   :  { %8858 = vmatpush1.bf16.msra.mxu1 %v11730_v17  ;;  %v11798_v17 = vcombine.low %v5699_v13, %v5731_v34  ;;  %v11867_v13 = vcombine.high %v5765_v6, %v5797_v57 }
 0x3b7   :  { %8859 = vmatprep.subr.bf16.mxu1 %v11667_v41  ;;  %v11800_v41 = vcombine.low %v5700_v38, %v5732_v40  ;;  %v5701_v38 = vld [vmem:[%s17695_s6 + $0x820] sm:$0xff] }
 0x3b8   :  { %v5733_v40 = vld [vmem:[%s17695_s6 + $0x920] sm:$0xff] }
 0x3ba   :  { %8860 = vmatpush1.bf16.msra.mxu1 %v11666_v44  ;;  %v11735_v44 = vcombine.high %v5635_v22, %v5667_v58 }
 0x3bb   :  { %8861 = vmatprep.subr.bf16.mxu1 %v11603_v48  ;;  %v5572_v48 = vld [vmem:[%s17695_s6 + $0x418] sm:$0xff] }
 0x3bc   :  { %v11673_v53 = vcombine.high %v5572_v48, %v5604_v37  ;;  %v11672_v59 = vcombine.low %v5572_v48, %v5604_v37  ;;  %v5573_v48 = vld [vmem:[%s17695_s6 + $0x420] sm:$0xff] }
 0x3bd   :  { %v5605_v37 = vld [vmem:[%s17695_s6 + $0x520] sm:$0xff] }
 0x3be   :  { %8862 = vmatpush1.bf16.msra.mxu1 %v11602_v49  ;;  %v11734_v49 = vcombine.low %v5635_v22, %v5667_v58  ;;  %v11803_v22 = vcombine.high %v5701_v38, %v5733_v40 }
 0x3bf   :  { %8863 = vmatprep.subr.bf16.mxu1 %v11539_v56  ;;  %v5508_v56 = vld [vmem:[%s17695_s6 + $0x218] sm:$0xff] }
 0x3c0   :  { %v11609_v52 = vcombine.high %v5508_v56, %v5540_v47 }
 0x3c2   :  { %8864 = vmatpush1.bf16.msra.mxu1 %v11538_v51  ;;  %v11670_v51 = vcombine.low %v5571_v39, %v5603_v15  ;;  %v11739_v39 = vcombine.high %v5637_v33, %v5669_v35 }
 0x3c3   :  { %8935 = vmatprep.subr.bf16.mxu1 %v11991_v9  ;;  %v5444_v9 = vld [vmem:[%s17695_s6 + $0x18] sm:$0xff] }
 0x3c4   :  { %v11544_v5 = vcombine.low %v5444_v9, %v5476_v19 }
 0x465   :  { %v5431_v4 = vpop.f32.mrf.mxu1 }
 0x466   :  { %v5432_v18 = vadd.f32 %v11529_v62, %v5431_v4  ;;  %v5893_v4 = vld [vmem:[%s17695_s6 + $0xe20] sm:$0xff] }
 0x467   :  { %v12205_v43 = vpop.f32.mrf.mxu1 }
 0x468   :  { %v5438_v12 = vmax.f32 %v5432_v18, 0.0  ;;  %v5925_v43 = vld [vmem:[%s17695_s6 + $0xf20] sm:$0xff]  ;;  %v5894_v18 = vld [vmem:[%s17695_s6 + $0xe28] sm:$0xff] }
 0x469   :  { %v5434_v11 = vpop.f32.mrf.mxu1 }
 0x46a   :  { %v5435_v1 = vadd.f32 %v11529_v62, %v5434_v11  ;;  %v11545_v62 = vcombine.high %v5444_v9, %v5476_v19  ;;  %v5926_v11 = vld [vmem:[%s17695_s6 + $0xf28] sm:$0xff]  ;;  %v5445_v9 = vld [vmem:[%s17695_s6 + $0x20] sm:$0xff] }
 0x46b   :  { %v12206_v24 = vpop.f32.mrf.mxu1  ;;  %v11997_v25 = vcombine.high %v5894_v18, %v5926_v11  ;;  %v5477_v19 = vld [vmem:[%s17695_s6 + $0x120] sm:$0xff] }
 0x46c   :  { %v5439_v46 = vmax.f32 %v5435_v1, 0.0  ;;  %v11542_v1 = vcombine.low %v5443_v8, %v5475_v10  ;;  %v11995_v24 = vcombine.high %v5893_v4, %v5925_v43 }
 0x46e   :  { %v15864_v63 = vpack.c.bf16 %v5439_v46, %v5438_v12  ;;  %v5830_v12 = vld [vmem:[%s17695_s6 + $0xc28] sm:$0xff] }
 0x46f   :  { %v5862_v46 = vld [vmem:[%s17695_s6 + $0xd28] sm:$0xff] }
 0x470   :  { %8882 = vmatmul.mubr.bf16.vlgmr.msra.gmra.mxu1 %v15864_v63  ;;  %8925 = vmatmul.mubr.bf16.vlgmr.msra.gmra.mxu0 %v15864_v63  ;;  %v11933_v29 = vcombine.high %v5830_v12, %v5862_v46 }
 0x471   :  { %8936 = vmatpush1.bf16.msra.mxu1 %v11990_v54  ;;  %8979 = vmatpush1.bf16.msra.mxu0 %v11992_v27  ;;  %v11606_v54 = vcombine.low %v5507_v3, %v5539_v45  ;;  %v11608_v27 = vcombine.low %v5508_v56, %v5540_v47  ;;  %v11675_v3 = vcombine.high %v5573_v48, %v5605_v37  ;;  %v5509_v56 = vld [vmem:[%s17695_s6 + $0x220] sm:$0xff] }
 0x472   :  { %8937 = vmatprep.subr.bf16.mxu1 %v11927_v20  ;;  %8980 = vmatprep.subr.bf16.mxu0 %v11929_v31  ;;  %v11994_v20 = vcombine.low %v5893_v4, %v5925_v43  ;;  %v11996_v31 = vcombine.low %v5894_v18, %v5926_v11  ;;  %v5541_v47 = vld [vmem:[%s17695_s6 + $0x320] sm:$0xff]  ;;  %v11547_v4 = vcombine.high %v5445_v9, %v5477_v19  ;;  %v5895_v18 = vld [vmem:[%s17695_s6 + $0xe30] sm:$0xff] }
 0x473   :  { %8967 = vmatprep.mubr.bf16.mxu1 %v17720_v36  ;;  %9010 = vmatprep.mubr.bf16.mxu0 %v17720_v36  ;;  %v11611_v8 = vcombine.high %v5509_v56, %v5541_v47  ;;  %v5927_v11 = vld [vmem:[%s17695_s6 + $0xf30] sm:$0xff] }
 0x475   :  { %8938 = vmatpush1.bf16.msra.mxu1 %v11926_v32  ;;  %8981 = vmatpush1.bf16.msra.mxu0 %v11928_v60  ;;  %v5766_v32 = vld [vmem:[%s17695_s6 + $0xa28] sm:$0xff] }
 0x476   :  { %8939 = vmatprep.subr.bf16.mxu1 %v11863_v26  ;;  %8982 = vmatprep.subr.bf16.mxu0 %v11865_v7  ;;  %v5798_v60 = vld [vmem:[%s17695_s6 + $0xb28] sm:$0xff]  ;;  %v11930_v26 = vcombine.low %v5829_v28, %v5861_v50  ;;  %v11932_v7 = vcombine.low %v5830_v12, %v5862_v46  ;;  %v11999_v28 = vcombine.high %v5895_v18, %v5927_v11  ;;  %v5831_v12 = vld [vmem:[%s17695_s6 + $0xc30] sm:$0xff] }
 0x477   :  { %v11869_v34 = vcombine.high %v5766_v32, %v5798_v60  ;;  %v5863_v46 = vld [vmem:[%s17695_s6 + $0xd30] sm:$0xff] }
 0x479   :  { %8940 = vmatpush1.bf16.msra.mxu1 %v11862_v21  ;;  %8983 = vmatpush1.bf16.msra.mxu0 %v11864_v55  ;;  %v5702_v21 = vld [vmem:[%s17695_s6 + $0x828] sm:$0xff] }
 0x47a   :  { %8941 = vmatprep.subr.bf16.mxu1 %v11799_v30  ;;  %8984 = vmatprep.subr.bf16.mxu0 %v11801_v0  ;;  %v5734_v55 = vld [vmem:[%s17695_s6 + $0x928] sm:$0xff]  ;;  %v11866_v30 = vcombine.low %v5765_v6, %v5797_v57  ;;  %v11868_v0 = vcombine.low %v5766_v32, %v5798_v60  ;;  %v11935_v6 = vcombine.high %v5831_v12, %v5863_v46  ;;  %v5767_v32 = vld [vmem:[%s17695_s6 + $0xa30] sm:$0xff] }
 0x47b   :  { %v11805_v58 = vcombine.high %v5702_v21, %v5734_v55  ;;  %v5799_v60 = vld [vmem:[%s17695_s6 + $0xb30] sm:$0xff] }
 0x47d   :  { %8942 = vmatpush1.bf16.msra.mxu1 %v11798_v17  ;;  %8985 = vmatpush1.bf16.msra.mxu0 %v11800_v41  ;;  %v5638_v17 = vld [vmem:[%s17695_s6 + $0x628] sm:$0xff] }
 0x47e   :  { %8943 = vmatprep.subr.bf16.mxu1 %v11735_v44  ;;  %8986 = vmatprep.subr.bf16.mxu0 %v11737_v14  ;;  %v5670_v41 = vld [vmem:[%s17695_s6 + $0x728] sm:$0xff]  ;;  %v11802_v44 = vcombine.low %v5701_v38, %v5733_v40  ;;  %v11804_v14 = vcombine.low %v5702_v21, %v5734_v55  ;;  %v11871_v38 = vcombine.high %v5767_v32, %v5799_v60  ;;  %v5703_v21 = vld [vmem:[%s17695_s6 + $0x830] sm:$0xff] }
 0x47f   :  { %v11741_v15 = vcombine.high %v5638_v17, %v5670_v41  ;;  %v5735_v55 = vld [vmem:[%s17695_s6 + $0x930] sm:$0xff] }
 0x481   :  { %8944 = vmatpush1.bf16.msra.mxu1 %v11734_v49  ;;  %8987 = vmatpush1.bf16.msra.mxu0 %v11736_v2  ;;  %v5574_v49 = vld [vmem:[%s17695_s6 + $0x428] sm:$0xff] }
 0x482   :  { %8945 = vmatprep.subr.bf16.mxu1 %v11671_v42  ;;  %8988 = vmatprep.subr.bf16.mxu0 %v11673_v53  ;;  %v5606_v2 = vld [vmem:[%s17695_s6 + $0x528] sm:$0xff]  ;;  %v11738_v42 = vcombine.low %v5637_v33, %v5669_v35  ;;  %v11740_v53 = vcombine.low %v5638_v17, %v5670_v41  ;;  %v11807_v33 = vcombine.high %v5703_v21, %v5735_v55  ;;  %v5639_v17 = vld [vmem:[%s17695_s6 + $0x630] sm:$0xff] }
 0x483   :  { %v11677_v45 = vcombine.high %v5574_v49, %v5606_v2  ;;  %v5671_v41 = vld [vmem:[%s17695_s6 + $0x730] sm:$0xff] }
 0x485   :  { %8946 = vmatpush1.bf16.msra.mxu1 %v11670_v51  ;;  %8989 = vmatpush1.bf16.msra.mxu0 %v11672_v59  ;;  %v5510_v51 = vld [vmem:[%s17695_s6 + $0x228] sm:$0xff] }
 0x486   :  { %8947 = vmatprep.subr.bf16.mxu1 %v11607_v61  ;;  %8990 = vmatprep.subr.bf16.mxu0 %v11609_v52  ;;  %v5542_v59 = vld [vmem:[%s17695_s6 + $0x328] sm:$0xff]  ;;  %v11674_v61 = vcombine.low %v5573_v48, %v5605_v37  ;;  %v11676_v52 = vcombine.low %v5574_v49, %v5606_v2  ;;  %v11743_v48 = vcombine.high %v5639_v17, %v5671_v41  ;;  %v5575_v49 = vld [vmem:[%s17695_s6 + $0x430] sm:$0xff] }
 0x487   :  { %v11613_v10 = vcombine.high %v5510_v51, %v5542_v59  ;;  %v5607_v2 = vld [vmem:[%s17695_s6 + $0x530] sm:$0xff] }
 0x489   :  { %8948 = vmatpush1.bf16.msra.mxu1 %v11606_v54  ;;  %8991 = vmatpush1.bf16.msra.mxu0 %v11608_v27  ;;  %v5446_v54 = vld [vmem:[%s17695_s6 + $0x28] sm:$0xff] }
 0x48a   :  { %8949 = vmatprep.subr.bf16.mxu1 %v11543_v16  ;;  %8992 = vmatprep.subr.bf16.mxu0 %v11545_v62  ;;  %v5478_v27 = vld [vmem:[%s17695_s6 + $0x128] sm:$0xff]  ;;  %v11610_v16 = vcombine.low %v5509_v56, %v5541_v47  ;;  %v11612_v62 = vcombine.low %v5510_v51, %v5542_v59  ;;  %v11679_v56 = vcombine.high %v5575_v49, %v5607_v2  ;;  %v5511_v51 = vld [vmem:[%s17695_s6 + $0x230] sm:$0xff] }
 0x48b   :  { %v11549_v43 = vcombine.high %v5446_v54, %v5478_v27  ;;  %v5543_v59 = vld [vmem:[%s17695_s6 + $0x330] sm:$0xff] }
 0x48d   :  { %8950 = vmatpush1.bf16.msra.mxu1 %v11542_v1  ;;  %8993 = vmatpush1.bf16.msra.mxu0 %v11544_v5  ;;  %v5896_v1 = vld [vmem:[%s17695_s6 + $0xe38] sm:$0xff] }
 0x48e   :  { %9021 = vmatprep.subr.bf16.mxu1 %v11995_v24  ;;  %9064 = vmatprep.subr.bf16.mxu0 %v11997_v25  ;;  %v5928_v5 = vld [vmem:[%s17695_s6 + $0xf38] sm:$0xff]  ;;  %v11546_v24 = vcombine.low %v5445_v9, %v5477_v19  ;;  %v11548_v25 = vcombine.low %v5446_v54, %v5478_v27  ;;  %v11615_v9 = vcombine.high %v5511_v51, %v5543_v59  ;;  %v5447_v54 = vld [vmem:[%s17695_s6 + $0x30] sm:$0xff] }
 0x48f   :  { %v12001_v50 = vcombine.high %v5896_v1, %v5928_v5  ;;  %v5479_v27 = vld [vmem:[%s17695_s6 + $0x130] sm:$0xff] }
 0x490   :  { %8968 = vmatmul.mubr.bf16.vlgmr.msra.gmra.mxu1 %v15864_v63  ;;  %9011 = vmatmul.mubr.bf16.vlgmr.msra.gmra.mxu0 %v15864_v63 }
 0x491   :  { %9022 = vmatpush1.bf16.msra.mxu1 %v11994_v20  ;;  %9065 = vmatpush1.bf16.msra.mxu0 %v11996_v31  ;;  %v5832_v20 = vld [vmem:[%s17695_s6 + $0xc38] sm:$0xff] }
 0x492   :  { %9023 = vmatprep.subr.bf16.mxu1 %v11931_v23  ;;  %9066 = vmatprep.subr.bf16.mxu0 %v11933_v29  ;;  %v5864_v31 = vld [vmem:[%s17695_s6 + $0xd38] sm:$0xff]  ;;  %v11998_v23 = vcombine.low %v5895_v18, %v5927_v11  ;;  %v12000_v29 = vcombine.low %v5896_v1, %v5928_v5  ;;  %v11551_v18 = vcombine.high %v5447_v54, %v5479_v27  ;;  %v5897_v1 = vld [vmem:[%s17695_s6 + $0xe40] sm:$0xff] }
 0x493   :  { %9053 = vmatprep.mubr.bf16.mxu1 %v17720_v36  ;;  %9096 = vmatprep.mubr.bf16.mxu0 %v17720_v36  ;;  %v11937_v57 = vcombine.high %v5832_v20, %v5864_v31  ;;  %v5929_v5 = vld [vmem:[%s17695_s6 + $0xf40] sm:$0xff] }
 0x495   :  { %9024 = vmatpush1.bf16.msra.mxu1 %v11930_v26  ;;  %9067 = vmatpush1.bf16.msra.mxu0 %v11932_v7  ;;  %v5768_v26 = vld [vmem:[%s17695_s6 + $0xa38] sm:$0xff] }
 0x496   :  { %9025 = vmatprep.subr.bf16.mxu1 %v11867_v13  ;;  %9068 = vmatprep.subr.bf16.mxu0 %v11869_v34  ;;  %v5800_v7 = vld [vmem:[%s17695_s6 + $0xb38] sm:$0xff]  ;;  %v11934_v13 = vcombine.low %v5831_v12, %v5863_v46  ;;  %v11936_v34 = vcombine.low %v5832_v20, %v5864_v31  ;;  %v12003_v12 = vcombine.high %v5897_v1, %v5929_v5  ;;  %v5833_v20 = vld [vmem:[%s17695_s6 + $0xc40] sm:$0xff] }
 0x497   :  { %v11873_v40 = vcombine.high %v5768_v26, %v5800_v7  ;;  %v5865_v31 = vld [vmem:[%s17695_s6 + $0xd40] sm:$0xff] }
 0x499   :  { %9026 = vmatpush1.bf16.msra.mxu1 %v11866_v30  ;;  %9069 = vmatpush1.bf16.msra.mxu0 %v11868_v0  ;;  %v5704_v30 = vld [vmem:[%s17695_s6 + $0x838] sm:$0xff] }
 0x49a   :  { %9027 = vmatprep.subr.bf16.mxu1 %v11803_v22  ;;  %9070 = vmatprep.subr.bf16.mxu0 %v11805_v58  ;;  %v5736_v0 = vld [vmem:[%s17695_s6 + $0x938] sm:$0xff]  ;;  %v11870_v22 = vcombine.low %v5767_v32, %v5799_v60  ;;  %v11872_v58 = vcombine.low %v5768_v26, %v5800_v7  ;;  %v11939_v32 = vcombine.high %v5833_v20, %v5865_v31  ;;  %v5769_v26 = vld [vmem:[%s17695_s6 + $0xa40] sm:$0xff] }
 0x49b   :  { %v11809_v35 = vcombine.high %v5704_v30, %v5736_v0  ;;  %v5801_v7 = vld [vmem:[%s17695_s6 + $0xb40] sm:$0xff] }
 0x49d   :  { %9028 = vmatpush1.bf16.msra.mxu1 %v11802_v44  ;;  %9071 = vmatpush1.bf16.msra.mxu0 %v11804_v14  ;;  %v5640_v44 = vld [vmem:[%s17695_s6 + $0x638] sm:$0xff] }
 0x49e   :  { %9029 = vmatprep.subr.bf16.mxu1 %v11739_v39  ;;  %9072 = vmatprep.subr.bf16.mxu0 %v11741_v15  ;;  %v5672_v14 = vld [vmem:[%s17695_s6 + $0x738] sm:$0xff]  ;;  %v11806_v39 = vcombine.low %v5703_v21, %v5735_v55  ;;  %v11808_v15 = vcombine.low %v5704_v30, %v5736_v0  ;;  %v11875_v21 = vcombine.high %v5769_v26, %v5801_v7  ;;  %v5705_v30 = vld [vmem:[%s17695_s6 + $0x840] sm:$0xff] }
 0x49f   :  { %v11745_v37 = vcombine.high %v5640_v44, %v5672_v14  ;;  %v5737_v0 = vld [vmem:[%s17695_s6 + $0x940] sm:$0xff] }
 0x4a1   :  { %9030 = vmatpush1.bf16.msra.mxu1 %v11738_v42  ;;  %9073 = vmatpush1.bf16.msra.mxu0 %v11740_v53  ;;  %v5576_v42 = vld [vmem:[%s17695_s6 + $0x438] sm:$0xff] }
 0x4a2   :  { %9031 = vmatprep.subr.bf16.mxu1 %v11675_v3  ;;  %9074 = vmatprep.subr.bf16.mxu0 %v11677_v45  ;;  %v5608_v53 = vld [vmem:[%s17695_s6 + $0x538] sm:$0xff]  ;;  %v11742_v3 = vcombine.low %v5639_v17, %v5671_v41  ;;  %v11744_v45 = vcombine.low %v5640_v44, %v5672_v14  ;;  %v11811_v17 = vcombine.high %v5705_v30, %v5737_v0  ;;  %v5641_v44 = vld [vmem:[%s17695_s6 + $0x640] sm:$0xff] }
 0x4a3   :  { %v11681_v47 = vcombine.high %v5576_v42, %v5608_v53  ;;  %v5673_v14 = vld [vmem:[%s17695_s6 + $0x740] sm:$0xff] }
 0x4a5   :  { %9032 = vmatpush1.bf16.msra.mxu1 %v11674_v61  ;;  %9075 = vmatpush1.bf16.msra.mxu0 %v11676_v52  ;;  %v5512_v61 = vld [vmem:[%s17695_s6 + $0x238] sm:$0xff] }
 0x4a6   :  { %9033 = vmatprep.subr.bf16.mxu1 %v11611_v8  ;;  %9076 = vmatprep.subr.bf16.mxu0 %v11613_v10  ;;  %v5544_v52 = vld [vmem:[%s17695_s6 + $0x338] sm:$0xff]  ;;  %v11678_v8 = vcombine.low %v5575_v49, %v5607_v2  ;;  %v11680_v10 = vcombine.low %v5576_v42, %v5608_v53  ;;  %v11747_v49 = vcombine.high %v5641_v44, %v5673_v14  ;;  %v5577_v42 = vld [vmem:[%s17695_s6 + $0x440] sm:$0xff] }
 0x4a7   :  { %v11617_v19 = vcombine.high %v5512_v61, %v5544_v52  ;;  %v5609_v53 = vld [vmem:[%s17695_s6 + $0x540] sm:$0xff] }
 0x4a9   :  { %9034 = vmatpush1.bf16.msra.mxu1 %v11610_v16  ;;  %9077 = vmatpush1.bf16.msra.mxu0 %v11612_v62  ;;  %v5448_v16 = vld [vmem:[%s17695_s6 + $0x38] sm:$0xff] }
 0x4aa   :  { %9035 = vmatprep.subr.bf16.mxu1 %v11547_v4  ;;  %9078 = vmatprep.subr.bf16.mxu0 %v11549_v43  ;;  %v5480_v62 = vld [vmem:[%s17695_s6 + $0x138] sm:$0xff]  ;;  %v11614_v4 = vcombine.low %v5511_v51, %v5543_v59  ;;  %v11616_v43 = vcombine.low %v5512_v61, %v5544_v52  ;;  %v11683_v51 = vcombine.high %v5577_v42, %v5609_v53  ;;  %v5513_v61 = vld [vmem:[%s17695_s6 + $0x240] sm:$0xff] }
 0x4ab   :  { %v11553_v11 = vcombine.high %v5448_v16, %v5480_v62  ;;  %v5545_v52 = vld [vmem:[%s17695_s6 + $0x340] sm:$0xff] }
 0x4ad   :  { %9036 = vmatpush1.bf16.msra.mxu1 %v11546_v24  ;;  %9079 = vmatpush1.bf16.msra.mxu0 %v11548_v25  ;;  %v5898_v24 = vld [vmem:[%s17695_s6 + $0xe48] sm:$0xff] }
 0x4ae   :  { %9107 = vmatprep.subr.bf16.mxu1 %v11999_v28  ;;  %9150 = vmatprep.subr.bf16.mxu0 %v12001_v50  ;;  %v5930_v25 = vld [vmem:[%s17695_s6 + $0xf48] sm:$0xff]  ;;  %v11550_v28 = vcombine.low %v5447_v54, %v5479_v27  ;;  %v11552_v50 = vcombine.low %v5448_v16, %v5480_v62  ;;  %v11619_v54 = vcombine.high %v5513_v61, %v5545_v52  ;;  %v5449_v16 = vld [vmem:[%s17695_s6 + $0x40] sm:$0xff] }
 0x4af   :  { %v12005_v46 = vcombine.high %v5898_v24, %v5930_v25  ;;  %v5481_v62 = vld [vmem:[%s17695_s6 + $0x140] sm:$0xff] }
 0x4b0   :  { %9054 = vmatmul.mubr.bf16.vlgmr.msra.gmra.mxu1 %v15864_v63  ;;  %9097 = vmatmul.mubr.bf16.vlgmr.msra.gmra.mxu0 %v15864_v63 }
 0x4b1   :  { %9108 = vmatpush1.bf16.msra.mxu1 %v11998_v23  ;;  %9151 = vmatpush1.bf16.msra.mxu0 %v12000_v29  ;;  %v5834_v23 = vld [vmem:[%s17695_s6 + $0xc48] sm:$0xff] }
 0x4b2   :  { %9109 = vmatprep.subr.bf16.mxu1 %v11935_v6  ;;  %9152 = vmatprep.subr.bf16.mxu0 %v11937_v57  ;;  %v5866_v29 = vld [vmem:[%s17695_s6 + $0xd48] sm:$0xff]  ;;  %v12002_v6 = vcombine.low %v5897_v1, %v5929_v5  ;;  %v12004_v57 = vcombine.low %v5898_v24, %v5930_v25  ;;  %v11555_v1 = vcombine.high %v5449_v16, %v5481_v62  ;;  %v5899_v24 = vld [vmem:[%s17695_s6 + $0xe50] sm:$0xff] }
 0x4b3   :  { %9139 = vmatprep.mubr.bf16.mxu1 %v17720_v36  ;;  %9182 = vmatprep.mubr.bf16.mxu0 %v17720_v36  ;;  %v11941_v60 = vcombine.high %v5834_v23, %v5866_v29  ;;  %v5931_v25 = vld [vmem:[%s17695_s6 + $0xf50] sm:$0xff] }
 0x4b5   :  { %9110 = vmatpush1.bf16.msra.mxu1 %v11934_v13  ;;  %9153 = vmatpush1.bf16.msra.mxu0 %v11936_v34  ;;  %v5770_v13 = vld [vmem:[%s17695_s6 + $0xa48] sm:$0xff] }
 0x4b6   :  { %9111 = vmatprep.subr.bf16.mxu1 %v11871_v38  ;;  %9154 = vmatprep.subr.bf16.mxu0 %v11873_v40  ;;  %v5802_v34 = vld [vmem:[%s17695_s6 + $0xb48] sm:$0xff]  ;;  %v11938_v38 = vcombine.low %v5833_v20, %v5865_v31  ;;  %v11940_v40 = vcombine.low %v5834_v23, %v5866_v29  ;;  %v12007_v20 = vcombine.high %v5899_v24, %v5931_v25  ;;  %v5835_v23 = vld [vmem:[%s17695_s6 + $0xc50] sm:$0xff] }
 0x4b7   :  { %v11877_v55 = vcombine.high %v5770_v13, %v5802_v34  ;;  %v5867_v29 = vld [vmem:[%s17695_s6 + $0xd50] sm:$0xff] }
 0x4b9   :  { %9112 = vmatpush1.bf16.msra.mxu1 %v11870_v22  ;;  %9155 = vmatpush1.bf16.msra.mxu0 %v11872_v58  ;;  %v5706_v22 = vld [vmem:[%s17695_s6 + $0x848] sm:$0xff] }
 0x4ba   :  { %9113 = vmatprep.subr.bf16.mxu1 %v11807_v33  ;;  %9156 = vmatprep.subr.bf16.mxu0 %v11809_v35  ;;  %v5738_v58 = vld [vmem:[%s17695_s6 + $0x948] sm:$0xff]  ;;  %v11874_v33 = vcombine.low %v5769_v26, %v5801_v7  ;;  %v11876_v35 = vcombine.low %v5770_v13, %v5802_v34  ;;  %v11943_v26 = vcombine.high %v5835_v23, %v5867_v29  ;;  %v5771_v13 = vld [vmem:[%s17695_s6 + $0xa50] sm:$0xff] }
 0x4bb   :  { %v11813_v41 = vcombine.high %v5706_v22, %v5738_v58  ;;  %v5803_v34 = vld [vmem:[%s17695_s6 + $0xb50] sm:$0xff] }
 0x4bd   :  { %9114 = vmatpush1.bf16.msra.mxu1 %v11806_v39  ;;  %9157 = vmatpush1.bf16.msra.mxu0 %v11808_v15  ;;  %v5642_v39 = vld [vmem:[%s17695_s6 + $0x648] sm:$0xff] }
 0x4be   :  { %9115 = vmatprep.subr.bf16.mxu1 %v11743_v48  ;;  %9158 = vmatprep.subr.bf16.mxu0 %v11745_v37  ;;  %v5674_v15 = vld [vmem:[%s17695_s6 + $0x748] sm:$0xff]  ;;  %v11810_v48 = vcombine.low %v5705_v30, %v5737_v0  ;;  %v11812_v37 = vcombine.low %v5706_v22, %v5738_v58  ;;  %v11879_v30 = vcombine.high %v5771_v13, %v5803_v34  ;;  %v5707_v22 = vld [vmem:[%s17695_s6 + $0x850] sm:$0xff] }
 0x4bf   :  { %v11749_v2 = vcombine.high %v5642_v39, %v5674_v15  ;;  %v5739_v58 = vld [vmem:[%s17695_s6 + $0x950] sm:$0xff] }
 0x4c1   :  { %9116 = vmatpush1.bf16.msra.mxu1 %v11742_v3  ;;  %9159 = vmatpush1.bf16.msra.mxu0 %v11744_v45  ;;  %v5578_v3 = vld [vmem:[%s17695_s6 + $0x448] sm:$0xff] }
 0x4c2   :  { %9117 = vmatprep.subr.bf16.mxu1 %v11679_v56  ;;  %9160 = vmatprep.subr.bf16.mxu0 %v11681_v47  ;;  %v5610_v45 = vld [vmem:[%s17695_s6 + $0x548] sm:$0xff]  ;;  %v11746_v56 = vcombine.low %v5641_v44, %v5673_v14  ;;  %v11748_v47 = vcombine.low %v5642_v39, %v5674_v15  ;;  %v11815_v44 = vcombine.high %v5707_v22, %v5739_v58  ;;  %v5643_v39 = vld [vmem:[%s17695_s6 + $0x650] sm:$0xff] }
 0x4c3   :  { %v11685_v59 = vcombine.high %v5578_v3, %v5610_v45  ;;  %v5675_v15 = vld [vmem:[%s17695_s6 + $0x750] sm:$0xff] }
 0x4c5   :  { %9118 = vmatpush1.bf16.msra.mxu1 %v11678_v8  ;;  %9161 = vmatpush1.bf16.msra.mxu0 %v11680_v10  ;;  %v5514_v8 = vld [vmem:[%s17695_s6 + $0x248] sm:$0xff] }
 0x4c6   :  { %9119 = vmatprep.subr.bf16.mxu1 %v11615_v9  ;;  %9162 = vmatprep.subr.bf16.mxu0 %v11617_v19  ;;  %v5546_v10 = vld [vmem:[%s17695_s6 + $0x348] sm:$0xff]  ;;  %v11682_v9 = vcombine.low %v5577_v42, %v5609_v53  ;;  %v11684_v19 = vcombine.low %v5578_v3, %v5610_v45  ;;  %v11751_v42 = vcombine.high %v5643_v39, %v5675_v15  ;;  %v5579_v3 = vld [vmem:[%s17695_s6 + $0x450] sm:$0xff] }
 0x4c7   :  { %v11621_v27 = vcombine.high %v5514_v8, %v5546_v10  ;;  %v5611_v45 = vld [vmem:[%s17695_s6 + $0x550] sm:$0xff] }
 0x4c9   :  { %9120 = vmatpush1.bf16.msra.mxu1 %v11614_v4  ;;  %9163 = vmatpush1.bf16.msra.mxu0 %v11616_v43  ;;  %v5450_v4 = vld [vmem:[%s17695_s6 + $0x48] sm:$0xff] }
 0x4ca   :  { %9121 = vmatprep.subr.bf16.mxu1 %v11551_v18  ;;  %9164 = vmatprep.subr.bf16.mxu0 %v11553_v11  ;;  %v5482_v43 = vld [vmem:[%s17695_s6 + $0x148] sm:$0xff]  ;;  %v11618_v18 = vcombine.low %v5513_v61, %v5545_v52  ;;  %v11620_v11 = vcombine.low %v5514_v8, %v5546_v10  ;;  %v11687_v61 = vcombine.high %v5579_v3, %v5611_v45  ;;  %v5515_v8 = vld [vmem:[%s17695_s6 + $0x250] sm:$0xff] }
 0x4cb   :  { %v11557_v5 = vcombine.high %v5450_v4, %v5482_v43  ;;  %v5547_v10 = vld [vmem:[%s17695_s6 + $0x350] sm:$0xff] }
 0x4cd   :  { %9122 = vmatpush1.bf16.msra.mxu1 %v11550_v28  ;;  %9165 = vmatpush1.bf16.msra.mxu0 %v11552_v50  ;;  %v5900_v28 = vld [vmem:[%s17695_s6 + $0xe58] sm:$0xff] }
 0x4ce   :  { %9193 = vmatprep.subr.bf16.mxu1 %v12003_v12  ;;  %9236 = vmatprep.subr.bf16.mxu0 %v12005_v46  ;;  %v5932_v50 = vld [vmem:[%s17695_s6 + $0xf58] sm:$0xff]  ;;  %v11554_v12 = vcombine.low %v5449_v16, %v5481_v62  ;;  %v11556_v46 = vcombine.low %v5450_v4, %v5482_v43  ;;  %v11623_v16 = vcombine.high %v5515_v8, %v5547_v10  ;;  %v5451_v4 = vld [vmem:[%s17695_s6 + $0x50] sm:$0xff] }
 0x4cf   :  { %v12009_v31 = vcombine.high %v5900_v28, %v5932_v50  ;;  %v5483_v43 = vld [vmem:[%s17695_s6 + $0x150] sm:$0xff] }
 0x4d0   :  { %9140 = vmatmul.mubr.bf16.vlgmr.msra.gmra.mxu1 %v15864_v63  ;;  %9183 = vmatmul.mubr.bf16.vlgmr.msra.gmra.mxu0 %v15864_v63 }
 0x4d1   :  { %9194 = vmatpush1.bf16.msra.mxu1 %v12002_v6  ;;  %9237 = vmatpush1.bf16.msra.mxu0 %v12004_v57  ;;  %v5836_v6 = vld [vmem:[%s17695_s6 + $0xc58] sm:$0xff] }
 0x4d2   :  { %9195 = vmatprep.subr.bf16.mxu1 %v11939_v32  ;;  %9238 = vmatprep.subr.bf16.mxu0 %v11941_v60  ;;  %v5868_v57 = vld [vmem:[%s17695_s6 + $0xd58] sm:$0xff]  ;;  %v12006_v32 = vcombine.low %v5899_v24, %v5931_v25  ;;  %v12008_v60 = vcombine.low %v5900_v28, %v5932_v50  ;;  %v11559_v24 = vcombine.high %v5451_v4, %v5483_v43  ;;  %v5901_v28 = vld [vmem:[%s17695_s6 + $0xe60] sm:$0xff] }
 0x4d3   :  { %9225 = vmatprep.mubr.bf16.mxu1 %v17720_v36  ;;  %9268 = vmatprep.mubr.bf16.mxu0 %v17720_v36  ;;  %v11945_v7 = vcombine.high %v5836_v6, %v5868_v57  ;;  %v5933_v50 = vld [vmem:[%s17695_s6 + $0xf60] sm:$0xff] }
 0x4d5   :  { %9196 = vmatpush1.bf16.msra.mxu1 %v11938_v38  ;;  %9239 = vmatpush1.bf16.msra.mxu0 %v11940_v40  ;;  %v5772_v38 = vld [vmem:[%s17695_s6 + $0xa58] sm:$0xff] }
 0x4d6   :  { %9197 = vmatprep.subr.bf16.mxu1 %v11875_v21  ;;  %9240 = vmatprep.subr.bf16.mxu0 %v11877_v55  ;;  %v5804_v40 = vld [vmem:[%s17695_s6 + $0xb58] sm:$0xff]  ;;  %v11942_v21 = vcombine.low %v5835_v23, %v5867_v29  ;;  %v11944_v55 = vcombine.low %v5836_v6, %v5868_v57  ;;  %v12011_v23 = vcombine.high %v5901_v28, %v5933_v50  ;;  %v5837_v6 = vld [vmem:[%s17695_s6 + $0xc60] sm:$0xff] }
 0x4d7   :  { %v11881_v0 = vcombine.high %v5772_v38, %v5804_v40  ;;  %v5869_v57 = vld [vmem:[%s17695_s6 + $0xd60] sm:$0xff] }
 0x4d9   :  { %9198 = vmatpush1.bf16.msra.mxu1 %v11874_v33  ;;  %9241 = vmatpush1.bf16.msra.mxu0 %v11876_v35  ;;  %v5708_v33 = vld [vmem:[%s17695_s6 + $0x858] sm:$0xff] }
 0x4da   :  { %9199 = vmatprep.subr.bf16.mxu1 %v11811_v17  ;;  %9242 = vmatprep.subr.bf16.mxu0 %v11813_v41  ;;  %v5740_v35 = vld [vmem:[%s17695_s6 + $0x958] sm:$0xff]  ;;  %v11878_v17 = vcombine.low %v5771_v13, %v5803_v34  ;;  %v11880_v41 = vcombine.low %v5772_v38, %v5804_v40  ;;  %v11947_v13 = vcombine.high %v5837_v6, %v5869_v57  ;;  %v5773_v38 = vld [vmem:[%s17695_s6 + $0xa60] sm:$0xff] }
 0x4db   :  { %v11817_v14 = vcombine.high %v5708_v33, %v5740_v35  ;;  %v5805_v40 = vld [vmem:[%s17695_s6 + $0xb60] sm:$0xff] }
 0x4dd   :  { %9200 = vmatpush1.bf16.msra.mxu1 %v11810_v48  ;;  %9243 = vmatpush1.bf16.msra.mxu0 %v11812_v37  ;;  %v5644_v48 = vld [vmem:[%s17695_s6 + $0x658] sm:$0xff] }
 0x4de   :  { %9201 = vmatprep.subr.bf16.mxu1 %v11747_v49  ;;  %9244 = vmatprep.subr.bf16.mxu0 %v11749_v2  ;;  %v5676_v37 = vld [vmem:[%s17695_s6 + $0x758] sm:$0xff]  ;;  %v11814_v49 = vcombine.low %v5707_v22, %v5739_v58  ;;  %v11816_v2 = vcombine.low %v5708_v33, %v5740_v35  ;;  %v11883_v22 = vcombine.high %v5773_v38, %v5805_v40  ;;  %v5709_v33 = vld [vmem:[%s17695_s6 + $0x860] sm:$0xff] }
 0x4df   :  { %v11753_v53 = vcombine.high %v5644_v48, %v5676_v37  ;;  %v5741_v35 = vld [vmem:[%s17695_s6 + $0x960] sm:$0xff] }
 0x4e1   :  { %9202 = vmatpush1.bf16.msra.mxu1 %v11746_v56  ;;  %9245 = vmatpush1.bf16.msra.mxu0 %v11748_v47  ;;  %v5580_v56 = vld [vmem:[%s17695_s6 + $0x458] sm:$0xff] }
 0x4e2   :  { %9203 = vmatprep.subr.bf16.mxu1 %v11683_v51  ;;  %9246 = vmatprep.subr.bf16.mxu0 %v11685_v59  ;;  %v5612_v47 = vld [vmem:[%s17695_s6 + $0x558] sm:$0xff]  ;;  %v11750_v51 = vcombine.low %v5643_v39, %v5675_v15  ;;  %v11752_v59 = vcombine.low %v5644_v48, %v5676_v37  ;;  %v11819_v39 = vcombine.high %v5709_v33, %v5741_v35  ;;  %v5645_v48 = vld [vmem:[%s17695_s6 + $0x660] sm:$0xff] }
 0x4e3   :  { %v11689_v52 = vcombine.high %v5580_v56, %v5612_v47  ;;  %v5677_v37 = vld [vmem:[%s17695_s6 + $0x760] sm:$0xff] }
 0x4e5   :  { %9204 = vmatpush1.bf16.msra.mxu1 %v11682_v9  ;;  %9247 = vmatpush1.bf16.msra.mxu0 %v11684_v19  ;;  %v5516_v9 = vld [vmem:[%s17695_s6 + $0x258] sm:$0xff] }
 0x4e6   :  { %9205 = vmatprep.subr.bf16.mxu1 %v11619_v54  ;;  %9248 = vmatprep.subr.bf16.mxu0 %v11621_v27  ;;  %v5548_v19 = vld [vmem:[%s17695_s6 + $0x358] sm:$0xff]  ;;  %v11686_v54 = vcombine.low %v5579_v3, %v5611_v45  ;;  %v11688_v27 = vcombine.low %v5580_v56, %v5612_v47  ;;  %v11755_v3 = vcombine.high %v5645_v48, %v5677_v37  ;;  %v5581_v56 = vld [vmem:[%s17695_s6 + $0x460] sm:$0xff] }
 0x4e7   :  { %v11625_v62 = vcombine.high %v5516_v9, %v5548_v19  ;;  %v5613_v47 = vld [vmem:[%s17695_s6 + $0x560] sm:$0xff] }
 0x4e9   :  { %9206 = vmatpush1.bf16.msra.mxu1 %v11618_v18  ;;  %9249 = vmatpush1.bf16.msra.mxu0 %v11620_v11  ;;  %v5452_v18 = vld [vmem:[%s17695_s6 + $0x58] sm:$0xff] }
 0x4ea   :  { %9207 = vmatprep.subr.bf16.mxu1 %v11555_v1  ;;  %9250 = vmatprep.subr.bf16.mxu0 %v11557_v5  ;;  %v5484_v11 = vld [vmem:[%s17695_s6 + $0x158] sm:$0xff]  ;;  %v11622_v1 = vcombine.low %v5515_v8, %v5547_v10  ;;  %v11624_v5 = vcombine.low %v5516_v9, %v5548_v19  ;;  %v11691_v8 = vcombine.high %v5581_v56, %v5613_v47  ;;  %v5517_v9 = vld [vmem:[%s17695_s6 + $0x260] sm:$0xff] }
 0x4eb   :  { %v11561_v25 = vcombine.high %v5452_v18, %v5484_v11  ;;  %v5549_v19 = vld [vmem:[%s17695_s6 + $0x360] sm:$0xff] }
 0x4ed   :  { %9208 = vmatpush1.bf16.msra.mxu1 %v11554_v12  ;;  %9251 = vmatpush1.bf16.msra.mxu0 %v11556_v46  ;;  %v5902_v12 = vld [vmem:[%s17695_s6 + $0xe68] sm:$0xff] }
 0x4ee   :  { %9279 = vmatprep.subr.bf16.mxu1 %v12007_v20  ;;  %9322 = vmatprep.subr.bf16.mxu0 %v12009_v31  ;;  %v5934_v46 = vld [vmem:[%s17695_s6 + $0xf68] sm:$0xff]  ;;  %v11558_v20 = vcombine.low %v5451_v4, %v5483_v43  ;;  %v11560_v31 = vcombine.low %v5452_v18, %v5484_v11  ;;  %v11627_v4 = vcombine.high %v5517_v9, %v5549_v19  ;;  %v5453_v18 = vld [vmem:[%s17695_s6 + $0x60] sm:$0xff] }
 0x4ef   :  { %v12013_v29 = vcombine.high %v5902_v12, %v5934_v46  ;;  %v5485_v11 = vld [vmem:[%s17695_s6 + $0x160] sm:$0xff] }
 0x4f0   :  { %9226 = vmatmul.mubr.bf16.vlgmr.msra.gmra.mxu1 %v15864_v63  ;;  %9269 = vmatmul.mubr.bf16.vlgmr.msra.gmra.mxu0 %v15864_v63 }
 0x4f1   :  { %9280 = vmatpush1.bf16.msra.mxu1 %v12006_v32  ;;  %9323 = vmatpush1.bf16.msra.mxu0 %v12008_v60  ;;  %v5838_v32 = vld [vmem:[%s17695_s6 + $0xc68] sm:$0xff] }
 0x4f2   :  { %9281 = vmatprep.subr.bf16.mxu1 %v11943_v26  ;;  %9324 = vmatprep.subr.bf16.mxu0 %v11945_v7  ;;  %v5870_v60 = vld [vmem:[%s17695_s6 + $0xd68] sm:$0xff]  ;;  %v12010_v26 = vcombine.low %v5901_v28, %v5933_v50  ;;  %v12012_v7 = vcombine.low %v5902_v12, %v5934_v46  ;;  %v11563_v28 = vcombine.high %v5453_v18, %v5485_v11  ;;  %v5903_v12 = vld [vmem:[%s17695_s6 + $0xe70] sm:$0xff] }
 0x4f3   :  { %9311 = vmatprep.mubr.bf16.mxu1 %v17720_v36  ;;  %9354 = vmatprep.mubr.bf16.mxu0 %v17720_v36  ;;  %v11949_v34 = vcombine.high %v5838_v32, %v5870_v60  ;;  %v5935_v46 = vld [vmem:[%s17695_s6 + $0xf70] sm:$0xff] }
 0x4f5   :  { %9282 = vmatpush1.bf16.msra.mxu1 %v11942_v21  ;;  %9325 = vmatpush1.bf16.msra.mxu0 %v11944_v55  ;;  %v5774_v21 = vld [vmem:[%s17695_s6 + $0xa68] sm:$0xff] }
 0x4f6   :  { %9283 = vmatprep.subr.bf16.mxu1 %v11879_v30  ;;  %9326 = vmatprep.subr.bf16.mxu0 %v11881_v0  ;;  %v5806_v55 = vld [vmem:[%s17695_s6 + $0xb68] sm:$0xff]  ;;  %v11946_v30 = vcombine.low %v5837_v6, %v5869_v57  ;;  %v11948_v0 = vcombine.low %v5838_v32, %v5870_v60  ;;  %v17721_v6 = vld [vmem:[#allocation4_spill] sm:$0xff]  ;;  %v12015_v32 = vcombine.high %v5903_v12, %v5935_v46 }
 0x4f7   :  { %v11885_v58 = vcombine.high %v5774_v21, %v5806_v55  ;;  %v16455_v57 = vsub.s32 2, %v17721_v6 }
 0x4f9   :  { %9284 = vmatpush1.bf16.msra.mxu1 %v11878_v17  ;;  %9327 = vmatpush1.bf16.msra.mxu0 %v11880_v41  ;;  %v5710_v17 = vld [vmem:[%s17695_s6 + $0x868] sm:$0xff] }
 0x4fa   :  { %9285 = vmatprep.subr.bf16.mxu1 %v11815_v44  ;;  %9328 = vmatprep.subr.bf16.mxu0 %v11817_v14  ;;  %v5742_v41 = vld [vmem:[%s17695_s6 + $0x968] sm:$0xff]  ;;  %v11882_v44 = vcombine.low %v5773_v38, %v5805_v40  ;;  %v11884_v14 = vcombine.low %v5774_v21, %v5806_v55  ;;  %v5840_v38 = vld [vmem:[%s17695_s6 + $0xc78] sm:$0xff]  ;;  %v12014_v21 = vcombine.low %v5903_v12, %v5935_v46 }
 0x4fb   :  { %v11821_v15 = vcombine.high %v5710_v17, %v5742_v41  ;;  %v5872_v40 = vld [vmem:[%s17695_s6 + $0xd78] sm:$0xff] }
 0x4fc   :  { %v5648_v12 = vld [vmem:[%s17695_s6 + $0x678] sm:$0xff] }
 0x4fd   :  { %9286 = vmatpush1.bf16.msra.mxu1 %v11814_v49  ;;  %9329 = vmatpush1.bf16.msra.mxu0 %v11816_v2  ;;  %v5646_v49 = vld [vmem:[%s17695_s6 + $0x668] sm:$0xff]  ;;  %v5680_v46 = vld [vmem:[%s17695_s6 + $0x778] sm:$0xff] }
 0x4fe   :  { %9287 = vmatprep.subr.bf16.mxu1 %v11751_v42  ;;  %9330 = vmatprep.subr.bf16.mxu0 %v11753_v53  ;;  %v5678_v2 = vld [vmem:[%s17695_s6 + $0x768] sm:$0xff]  ;;  %v11818_v42 = vcombine.low %v5709_v33, %v5741_v35  ;;  %v11820_v53 = vcombine.low %v5710_v17, %v5742_v41  ;;  %v11953_v33 = vcombine.high %v5840_v38, %v5872_v40  ;;  %v5775_v35 = vld [vmem:[%s17695_s6 + $0xa70] sm:$0xff]  ;;  %v17723_v17 = vld [vmem:[#allocation6_spill] sm:$0xff] }
 0x4ff   :  { %v11757_v45 = vcombine.high %v5646_v49, %v5678_v2 }
 0x501   :  { %9288 = vmatpush1.bf16.msra.mxu1 %v11750_v51  ;;  %9331 = vmatpush1.bf16.msra.mxu0 %v11752_v59  ;;  %v5582_v51 = vld [vmem:[%s17695_s6 + $0x468] sm:$0xff] }
 0x502   :  { %9289 = vmatprep.subr.bf16.mxu1 %v11687_v61  ;;  %9332 = vmatprep.subr.bf16.mxu0 %v11689_v52  ;;  %v5614_v59 = vld [vmem:[%s17695_s6 + $0x568] sm:$0xff]  ;;  %v11754_v61 = vcombine.low %v5645_v48, %v5677_v37  ;;  %v11756_v52 = vcombine.low %v5646_v49, %v5678_v2 }
 0x503   :  { %v11693_v10 = vcombine.high %v5582_v51, %v5614_v59 }
 0x505   :  { %9290 = vmatpush1.bf16.msra.mxu1 %v11686_v54  ;;  %9333 = vmatpush1.bf16.msra.mxu0 %v11688_v27  ;;  %v5518_v54 = vld [vmem:[%s17695_s6 + $0x268] sm:$0xff] }
 0x506   :  { %9291 = vmatprep.subr.bf16.mxu1 %v11623_v16  ;;  %9334 = vmatprep.subr.bf16.mxu0 %v11625_v62  ;;  %v5550_v27 = vld [vmem:[%s17695_s6 + $0x368] sm:$0xff]  ;;  %v11690_v16 = vcombine.low %v5581_v56, %v5613_v47  ;;  %v11692_v62 = vcombine.low %v5582_v51, %v5614_v59 }
 0x507   :  { %v11629_v43 = vcombine.high %v5518_v54, %v5550_v27 }
 0x509   :  { %9292 = vmatpush1.bf16.msra.mxu1 %v11622_v1  ;;  %9335 = vmatpush1.bf16.msra.mxu0 %v11624_v5  ;;  %v5454_v1 = vld [vmem:[%s17695_s6 + $0x68] sm:$0xff] }
 0x50a   :  { %9293 = vmatprep.subr.bf16.mxu1 %v11559_v24  ;;  %9336 = vmatprep.subr.bf16.mxu0 %v11561_v25  ;;  %v5486_v5 = vld [vmem:[%s17695_s6 + $0x168] sm:$0xff]  ;;  %v11626_v24 = vcombine.low %v5517_v9, %v5549_v19  ;;  %v11628_v25 = vcombine.low %v5518_v54, %v5550_v27 }
 0x50b   :  { %v11565_v50 = vcombine.high %v5454_v1, %v5486_v5 }
 0x50d   :  { %9294 = vmatpush1.bf16.msra.mxu1 %v11558_v20  ;;  %9337 = vmatpush1.bf16.msra.mxu0 %v11560_v31  ;;  %v5904_v20 = vld [vmem:[%s17695_s6 + $0xe78] sm:$0xff] }
 0x50e   :  { %9365 = vmatprep.subr.bf16.mxu1 %v12011_v23  ;;  %9408 = vmatprep.subr.bf16.mxu0 %v12013_v29  ;;  %v5936_v31 = vld [vmem:[%s17695_s6 + $0xf78] sm:$0xff]  ;;  %v11562_v23 = vcombine.low %v5453_v18, %v5485_v11  ;;  %v11564_v29 = vcombine.low %v5454_v1, %v5486_v5  ;;  %v5647_v11 = vld [vmem:[%s17695_s6 + $0x670] sm:$0xff] }
 0x50f   :  { %v12017_v60 = vcombine.high %v5904_v20, %v5936_v31  ;;  %v12016_v55 = vcombine.low %v5904_v20, %v5936_v31 }
 0x510   :  { %9312 = vmatmul.mubr.bf16.vlgmr.msra.gmra.mxu1 %v15864_v63  ;;  %9355 = vmatmul.mubr.bf16.vlgmr.msra.gmra.mxu0 %v15864_v63 }
 0x511   :  { %9366 = vmatpush1.bf16.msra.mxu1 %v12010_v26  ;;  %9409 = vmatpush1.bf16.msra.mxu0 %v12012_v7  ;;  %v16460_v26 = vld [vmem:[%s17700_s7] sm:$0xff]  ;;  %v5839_v7 = vld [vmem:[%s17695_s6 + $0xc70] sm:$0xff] }
 0x512   :  { %9367 = vmatprep.subr.bf16.mxu1 %v11947_v13  ;;  %9410 = vmatprep.subr.bf16.mxu0 %v11949_v34  ;;  %v16466_v13 = vsub.s32 3, %v17721_v6  ;;  %v5871_v34 = vld [vmem:[%s17695_s6 + $0xd70] sm:$0xff]  ;;  %v5976_v41 = vrot.slane %v16460_v26, %v17723_v17 }
 0x513   :  { %9397 = vmatprep.mubr.bf16.mxu1 %v17720_v36  ;;  %9440 = vmatprep.mubr.bf16.mxu0 %v17720_v36  ;;  %v11950_v49 = vcombine.low %v5839_v7, %v5871_v34 }
 0x515   :  { %9368 = vmatpush1.bf16.msra.mxu1 %v11946_v30  ;;  %9411 = vmatpush1.bf16.msra.mxu0 %v11948_v0  ;;  %v17722_v30 = vld [vmem:[#allocation5_spill] sm:$0xff] }
 0x516   :  { %9369 = vmatprep.subr.bf16.mxu1 %v11883_v22  ;;  %9412 = vmatprep.subr.bf16.mxu0 %v11885_v58  ;;  %v5972_v0 = vrot.slane %v16460_v26, %v17722_v30  ;;  %v5980_v22 = vrot.slane %v16460_v26, %v16455_v57  ;;  %v11951_v58 = vcombine.high %v5839_v7, %v5871_v34 }
 0x517   :  { %v11761_v34 = vcombine.high %v5648_v12, %v5680_v46 }
 0x519   :  { %9370 = vmatpush1.bf16.msra.mxu1 %v11882_v44  ;;  %9413 = vmatpush1.bf16.msra.mxu0 %v11884_v14  ;;  %v5984_v44 = vrot.slane %v16460_v26, %v16466_v13  ;;  %v5807_v14 = vld [vmem:[%s17695_s6 + $0xb70] sm:$0xff] }
 0x51a   :  { %9371 = vmatprep.subr.bf16.mxu1 %v11819_v39  ;;  %9414 = vmatprep.subr.bf16.mxu0 %v11821_v15  ;;  %v5776_v39 = vld [vmem:[%s17695_s6 + $0xa78] sm:$0xff]  ;;  %v11887_v51 = vcombine.high %v5775_v35, %v5807_v14  ;;  %v11886_v54 = vcombine.low %v5775_v35, %v5807_v14  ;;  %v11760_v14 = vcombine.low %v5648_v12, %v5680_v46 }
 0x51b   :  { %v5808_v15 = vld [vmem:[%s17695_s6 + $0xb78] sm:$0xff] }
 0x51c   :  { %v11889_v59 = vcombine.high %v5776_v39, %v5808_v15  ;;  %v11888_v27 = vcombine.low %v5776_v39, %v5808_v15 }
 0x51d   :  { %9372 = vmatpush1.bf16.msra.mxu1 %v11818_v42  ;;  %9415 = vmatpush1.bf16.msra.mxu0 %v11820_v53  ;;  %v11952_v53 = vcombine.low %v5840_v38, %v5872_v40 }
 0x51e   :  { %9373 = vmatprep.subr.bf16.mxu1 %v11755_v3  ;;  %9416 = vmatprep.subr.bf16.mxu0 %v11757_v45  ;;  %v5711_v3 = vld [vmem:[%s17695_s6 + $0x870] sm:$0xff] }
 0x51f   :  { %v5743_v45 = vld [vmem:[%s17695_s6 + $0x970] sm:$0xff] }
 0x521   :  { %9374 = vmatpush1.bf16.msra.mxu1 %v11754_v61  ;;  %9417 = vmatpush1.bf16.msra.mxu0 %v11756_v52 }
 0x522   :  { %9375 = vmatprep.subr.bf16.mxu1 %v11691_v8  ;;  %9418 = vmatprep.subr.bf16.mxu0 %v11693_v10  ;;  %v5712_v8 = vld [vmem:[%s17695_s6 + $0x878] sm:$0xff] }
 0x523   :  { %v5744_v10 = vld [vmem:[%s17695_s6 + $0x978] sm:$0xff] }
 0x525   :  { %9376 = vmatpush1.bf16.msra.mxu1 %v11690_v16  ;;  %9419 = vmatpush1.bf16.msra.mxu0 %v11692_v62  ;;  %v11823_v16 = vcombine.high %v5711_v3, %v5743_v45 }
 0x526   :  { %9377 = vmatprep.subr.bf16.mxu1 %v11627_v4  ;;  %9420 = vmatprep.subr.bf16.mxu0 %v11629_v43 }
 0x529   :  { %9378 = vmatpush1.bf16.msra.mxu1 %v11626_v24  ;;  %9421 = vmatpush1.bf16.msra.mxu0 %v11628_v25 }
 0x52a   :  { %9379 = vmatprep.subr.bf16.mxu1 %v11563_v28  ;;  %9422 = vmatprep.subr.bf16.mxu0 %v11565_v50  ;;  %v11825_v28 = vcombine.high %v5712_v8, %v5744_v10  ;;  %v5679_v50 = vld [vmem:[%s17695_s6 + $0x770] sm:$0xff] }
 0x52b   :  { %v11759_v7 = vcombine.high %v5647_v11, %v5679_v50 }
 0x52d   :  { %9380 = vmatpush1.bf16.msra.mxu1 %v11562_v23  ;;  %9423 = vmatpush1.bf16.msra.mxu0 %v11564_v29 }
 0x52e   :  { %9451 = vmatprep.subr.bf16.mxu1 %v12015_v32  ;;  %9494 = vmatprep.subr.bf16.mxu0 %v12017_v60  ;;  %v11822_v32 = vcombine.low %v5711_v3, %v5743_v45  ;;  %v11824_v60 = vcombine.low %v5712_v8, %v5744_v10 }
 0x530   :  { %9398 = vmatmul.mubr.bf16.vlgmr.msra.gmra.mxu1 %v15864_v63  ;;  %9441 = vmatmul.mubr.bf16.vlgmr.msra.gmra.mxu0 %v15864_v63  ;;  %v8883_v48 = vpop.f32.mrf.mxu1  ;;  %v8926_v37 = vpop.f32.mrf.mxu0 }
 0x531   :  { %v8884_v2 = vadd.f32 %v8883_v48, %v5972_v0  ;;  %v8927_v42 = vadd.f32 %v8926_v37, %v5980_v22  ;;  %9452 = vmatpush1.bf16.msra.mxu1 %v12014_v21  ;;  %9495 = vmatpush1.bf16.msra.mxu0 %v12016_v55  ;;  %v5519_v48 = vld [vmem:[%s17695_s6 + $0x270] sm:$0xff] }
 0x532   :  { %v8885_v56 = vpop.f32.mrf.mxu1  ;;  %v8928_v47 = vpop.f32.mrf.mxu0  ;;  %9453 = vmatprep.subr.bf16.mxu1 %v11951_v58  ;;  %9496 = vmatprep.subr.bf16.mxu0 %v11953_v33  ;;  %v5584_v58 = vld [vmem:[%s17695_s6 + $0x478] sm:$0xff]  ;;  %v5551_v37 = vld [vmem:[%s17695_s6 + $0x370] sm:$0xff] }
 0x533   :  { %v8886_v61 = vadd.f32 %v8885_v56, %v5976_v41  ;;  %v8929_v52 = vadd.f32 %v8928_v47, %v5984_v44  ;;  %9483 = vmatprep.mubr.bf16.mxu1 %v17720_v36  ;;  %9526 = vmatprep.mubr.bf16.mxu0 %v17720_v36  ;;  %v10225_v62 = vmax.f32 %v8884_v2, 0.0  ;;  %v10227_v4 = vmax.f32 %v8927_v42, 0.0  ;;  %v5616_v33 = vld [vmem:[%s17695_s6 + $0x578] sm:$0xff]  ;;  %v5455_v56 = vld [vmem:[%s17695_s6 + $0x70] sm:$0xff] }
 0x534   :  { %v8887_v9 = vpop.f32.mrf.mxu1  ;;  %v8930_v19 = vpop.f32.mrf.mxu0  ;;  %v11697_v15 = vcombine.high %v5584_v58, %v5616_v33  ;;  %v5552_v2 = vld [vmem:[%s17695_s6 + $0x378] sm:$0xff]  ;;  %v11631_v3 = vcombine.high %v5519_v48, %v5551_v37  ;;  %v5487_v47 = vld [vmem:[%s17695_s6 + $0x170] sm:$0xff] }
 0x535   :  { %v10226_v43 = vmax.f32 %v8886_v61, 0.0  ;;  %v10228_v18 = vmax.f32 %v8929_v52, 0.0  ;;  %9454 = vmatpush1.bf16.msra.mxu1 %v11950_v49  ;;  %9497 = vmatpush1.bf16.msra.mxu0 %v11952_v53  ;;  %v8888_v1 = vadd.f32 %v8887_v9, %v5972_v0  ;;  %v8931_v5 = vadd.f32 %v8930_v19, %v5980_v22  ;;  %v5583_v0 = vld [vmem:[%s17695_s6 + $0x470] sm:$0xff]  ;;  %v5520_v49 = vld [vmem:[%s17695_s6 + $0x278] sm:$0xff]  ;;  %v5905_v9 = vld [vmem:[%s17695_s6 + $0xe80] sm:$0xff] }
 0x536   :  { %v8889_v24 = vpop.f32.mrf.mxu1  ;;  %v8932_v25 = vpop.f32.mrf.mxu0  ;;  %9455 = vmatprep.subr.bf16.mxu1 %v11887_v51  ;;  %9498 = vmatprep.subr.bf16.mxu0 %v11889_v59  ;;  %v5615_v22 = vld [vmem:[%s17695_s6 + $0x570] sm:$0xff]  ;;  %v11696_v53 = vcombine.low %v5584_v58, %v5616_v33  ;;  %v11633_v45 = vcombine.high %v5520_v49, %v5552_v2  ;;  %v5456_v51 = vld [vmem:[%s17695_s6 + $0x78] sm:$0xff]  ;;  %v11630_v61 = vcombine.low %v5519_v48, %v5551_v37  ;;  %v5937_v19 = vld [vmem:[%s17695_s6 + $0xf80] sm:$0xff] }
 0x537   :  { %v12114_v20 = vpack.c.bf16 %v10226_v43, %v10225_v62  ;;  %v12115_v31 = vpack.c.bf16 %v10228_v18, %v10227_v4  ;;  %v8890_v23 = vadd.f32 %v8889_v24, %v5976_v41  ;;  %v8933_v29 = vadd.f32 %v8932_v25, %v5984_v44  ;;  %v5488_v59 = vld [vmem:[%s17695_s6 + $0x178] sm:$0xff]  ;;  %v5873_v25 = vld [vmem:[%s17695_s6 + $0xd80] sm:$0xff]  ;;  %v5714_v48 = vld [vmem:[%s17695_s6 + $0x888] sm:$0xff] }
 0x538   :  { %v10289_v38 = vmax.f32 %v8888_v1, 0.0  ;;  %v10291_v40 = vmax.f32 %v8931_v5, 0.0  ;;  %v11758_v44 = vcombine.low %v5647_v11, %v5679_v50  ;;  %v11695_v39 = vcombine.high %v5583_v0, %v5615_v22  ;;  %v5841_v1 = vld [vmem:[%s17695_s6 + $0xc80] sm:$0xff]  ;;  %v5874_v50 = vld [vmem:[%s17695_s6 + $0xd88] sm:$0xff] }
 0x539   :  { %10737 = vst [vmem:[%s17701_s9] sm:$0xff] %v12114_v20  ;;  %10738 = vst [vmem:[%s17701_s9 + $0x8] sm:$0xff] %v12115_v31  ;;  %9456 = vmatpush1.bf16.msra.mxu1 %v11886_v54  ;;  %9499 = vmatpush1.bf16.msra.mxu0 %v11888_v27  ;;  %v10290_v21 = vmax.f32 %v8890_v23, 0.0  ;;  %v10292_v55 = vmax.f32 %v8933_v29, 0.0  ;;  %v11694_v42 = vcombine.low %v5583_v0, %v5615_v22  ;;  %v5906_v54 = vld [vmem:[%s17695_s6 + $0xe88] sm:$0xff]  ;;  %v16589_v43 = vsub.s32 6, %v17721_v6  ;;  %v5777_v29 = vld [vmem:[%s17695_s6 + $0xa80] sm:$0xff] }
 0x53a   :  { %9457 = vmatprep.subr.bf16.mxu1 %v11823_v16  ;;  %9500 = vmatprep.subr.bf16.mxu0 %v11825_v28  ;;  %v11632_v52 = vcombine.low %v5520_v49, %v5552_v2  ;;  %v11567_v8 = vcombine.high %v5455_v56, %v5487_v47  ;;  %v11569_v10 = vcombine.high %v5456_v51, %v5488_v59  ;;  %v5938_v27 = vld [vmem:[%s17695_s6 + $0xf88] sm:$0xff]  ;;  %v16586_v16 = vsub.s32 4, %v17721_v6  ;;  %v5713_v58 = vld [vmem:[%s17695_s6 + $0x880] sm:$0xff] }
 0x53b   :  { %v12146_v35 = vpack.c.bf16 %v10290_v21, %v10289_v38  ;;  %v12147_v41 = vpack.c.bf16 %v10292_v55, %v10291_v40  ;;  %v11566_v62 = vcombine.low %v5455_v56, %v5487_v47  ;;  %v11568_v4 = vcombine.low %v5456_v51, %v5488_v59  ;;  %v5842_v28 = vld [vmem:[%s17695_s6 + $0xc88] sm:$0xff]  ;;  %v5745_v33 = vld [vmem:[%s17695_s6 + $0x980] sm:$0xff] }
 0x53c   :  { %v12019_v18 = vcombine.high %v5905_v9, %v5937_v19  ;;  %v12021_v11 = vcombine.high %v5906_v54, %v5938_v27  ;;  %v16595_v5 = vsub.s32 5, %v17721_v6  ;;  %v16598_v24 = vsub.s32 7, %v17721_v6  ;;  %v5810_v38 = vld [vmem:[%s17695_s6 + $0xb88] sm:$0xff]  ;;  %v5649_v59 = vld [vmem:[%s17695_s6 + $0x680] sm:$0xff] }
 0x53d   :  { %9458 = vmatpush1.bf16.msra.mxu1 %v11822_v32  ;;  %9501 = vmatpush1.bf16.msra.mxu0 %v11824_v60  ;;  %10769 = vst [vmem:[%s17701_s9 + $0x100] sm:$0xff] %v12146_v35  ;;  %10770 = vst [vmem:[%s17701_s9 + $0x108] sm:$0xff] %v12147_v41  ;;  %v5988_v12 = vrot.slane %v16460_v26, %v16586_v16  ;;  %v5996_v6 = vrot.slane %v16460_v26, %v16589_v43  ;;  %v5746_v37 = vld [vmem:[%s17695_s6 + $0x988] sm:$0xff] }
 0x53e   :  { %9459 = vmatprep.subr.bf16.mxu1 %v11759_v7  ;;  %9502 = vmatprep.subr.bf16.mxu0 %v11761_v34  ;;  %v12018_v46 = vcombine.low %v5905_v9, %v5937_v19  ;;  %v12020_v20 = vcombine.low %v5906_v54, %v5938_v27  ;;  %v11955_v31 = vcombine.high %v5841_v1, %v5873_v25  ;;  %v5809_v7 = vld [vmem:[%s17695_s6 + $0xb80] sm:$0xff]  ;;  %v5778_v34 = vld [vmem:[%s17695_s6 + $0xa88] sm:$0xff] }
 0x53f   :  { %v11957_v23 = vcombine.high %v5842_v28, %v5874_v50  ;;  %v5992_v32 = vrot.slane %v16460_v26, %v16595_v5  ;;  %v6000_v60 = vrot.slane %v16460_v26, %v16598_v24  ;;  %v11954_v55 = vcombine.low %v5841_v1, %v5873_v25  ;;  %v5681_v19 = vld [vmem:[%s17695_s6 + $0x780] sm:$0xff]  ;;  %v5650_v54 = vld [vmem:[%s17695_s6 + $0x688] sm:$0xff] }
 0x540   :  { %v11956_v22 = vcombine.low %v5842_v28, %v5874_v50  ;;  %v11829_v9 = vcombine.high %v5714_v48, %v5746_v37  ;;  %v5682_v27 = vld [vmem:[%s17695_s6 + $0x788] sm:$0xff]  ;;  %v11826_v1 = vcombine.low %v5713_v58, %v5745_v33  ;;  %v11828_v25 = vcombine.low %v5714_v48, %v5746_v37 }
 0x541   :  { %9460 = vmatpush1.bf16.msra.mxu1 %v11758_v44  ;;  %9503 = vmatpush1.bf16.msra.mxu0 %v11760_v14  ;;  %v11891_v44 = vcombine.high %v5777_v29, %v5809_v7  ;;  %v11893_v14 = vcombine.high %v5778_v34, %v5810_v38  ;;  %v11763_v28 = vcombine.high %v5649_v59, %v5681_v19 }
 0x542   :  { %9461 = vmatprep.subr.bf16.mxu1 %v11695_v39  ;;  %9504 = vmatprep.subr.bf16.mxu0 %v11697_v15  ;;  %v11765_v50 = vcombine.high %v5650_v54, %v5682_v27 }
 0x545   :  { %9462 = vmatpush1.bf16.msra.mxu1 %v11694_v42  ;;  %9505 = vmatpush1.bf16.msra.mxu0 %v11696_v53  ;;  %v11890_v42 = vcombine.low %v5777_v29, %v5809_v7  ;;  %v11892_v53 = vcombine.low %v5778_v34, %v5810_v38  ;;  %v5586_v29 = vld [vmem:[%s17695_s6 + $0x488] sm:$0xff]  ;;  %v11762_v34 = vcombine.low %v5649_v59, %v5681_v19 }
 0x546   :  { %9463 = vmatprep.subr.bf16.mxu1 %v11631_v3  ;;  %9506 = vmatprep.subr.bf16.mxu0 %v11633_v45  ;;  %v11827_v3 = vcombine.high %v5713_v58, %v5745_v33  ;;  %v11764_v38 = vcombine.low %v5650_v54, %v5682_v27 }
 0x549   :  { %9464 = vmatpush1.bf16.msra.mxu1 %v11630_v61  ;;  %9507 = vmatpush1.bf16.msra.mxu0 %v11632_v52 }
 0x54a   :  { %9465 = vmatprep.subr.bf16.mxu1 %v11567_v8  ;;  %9508 = vmatprep.subr.bf16.mxu0 %v11569_v10 }
 0x54d   :  { %9466 = vmatpush1.bf16.msra.mxu1 %v11566_v62  ;;  %9509 = vmatpush1.bf16.msra.mxu0 %v11568_v4 }
 0x54e   :  { %9537 = vmatprep.subr.bf16.mxu1 %v12019_v18  ;;  %9580 = vmatprep.subr.bf16.mxu0 %v12021_v11 }
 0x550   :  { %v8969_v40 = vpop.f32.mrf.mxu1  ;;  %v9012_v21 = vpop.f32.mrf.mxu0  ;;  %9484 = vmatmul.mubr.bf16.vlgmr.msra.gmra.mxu1 %v15864_v63  ;;  %9527 = vmatmul.mubr.bf16.vlgmr.msra.gmra.mxu0 %v15864_v63 }
 0x551   :  { %v8970_v26 = vadd.f32 %v8969_v40, %v5988_v12  ;;  %v9013_v0 = vadd.f32 %v9012_v21, %v5996_v6  ;;  %9538 = vmatpush1.bf16.msra.mxu1 %v12018_v46  ;;  %9581 = vmatpush1.bf16.msra.mxu0 %v12020_v20 }
 0x552   :  { %v8971_v35 = vpop.f32.mrf.mxu1  ;;  %v9014_v41 = vpop.f32.mrf.mxu0  ;;  %9539 = vmatprep.subr.bf16.mxu1 %v11955_v31  ;;  %9582 = vmatprep.subr.bf16.mxu0 %v11957_v23  ;;  %v5585_v31 = vld [vmem:[%s17695_s6 + $0x480] sm:$0xff] }
 0x553   :  { %v8972_v39 = vadd.f32 %v8971_v35, %v5992_v32  ;;  %v9015_v15 = vadd.f32 %v9014_v41, %v6000_v60  ;;  %9569 = vmatprep.mubr.bf16.mxu1 %v17720_v36  ;;  %9612 = vmatprep.mubr.bf16.mxu0 %v17720_v36  ;;  %v10229_v45 = vmax.f32 %v8970_v26, 0.0  ;;  %v10231_v56 = vmax.f32 %v9013_v0, 0.0  ;;  %v5617_v23 = vld [vmem:[%s17695_s6 + $0x580] sm:$0xff]  ;;  %v5522_v0 = vld [vmem:[%s17695_s6 + $0x288] sm:$0xff] }
 0x554   :  { %v8973_v49 = vpop.f32.mrf.mxu1  ;;  %v9016_v2 = vpop.f32.mrf.mxu0  ;;  %v11699_v40 = vcombine.high %v5585_v31, %v5617_v23  ;;  %v5553_v26 = vld [vmem:[%s17695_s6 + $0x380] sm:$0xff]  ;;  %v11698_v58 = vcombine.low %v5585_v31, %v5617_v23 }
 0x555   :  { %v10230_v47 = vmax.f32 %v8972_v39, 0.0  ;;  %v10232_v51 = vmax.f32 %v9015_v15, 0.0  ;;  %9540 = vmatpush1.bf16.msra.mxu1 %v11954_v55  ;;  %9583 = vmatpush1.bf16.msra.mxu0 %v11956_v22  ;;  %v8974_v61 = vadd.f32 %v8973_v49, %v5988_v12  ;;  %v9017_v52 = vadd.f32 %v9016_v2, %v5996_v6  ;;  %v5521_v55 = vld [vmem:[%s17695_s6 + $0x280] sm:$0xff]  ;;  %v5554_v22 = vld [vmem:[%s17695_s6 + $0x388] sm:$0xff] }
 0x556   :  { %v8975_v8 = vpop.f32.mrf.mxu1  ;;  %v9018_v10 = vpop.f32.mrf.mxu0  ;;  %9541 = vmatprep.subr.bf16.mxu1 %v11891_v44  ;;  %9584 = vmatprep.subr.bf16.mxu0 %v11893_v14  ;;  %v11635_v35 = vcombine.high %v5521_v55, %v5553_v26  ;;  %v11637_v41 = vcombine.high %v5522_v0, %v5554_v22  ;;  %v5457_v44 = vld [vmem:[%s17695_s6 + $0x80] sm:$0xff]  ;;  %v5458_v39 = vld [vmem:[%s17695_s6 + $0x88] sm:$0xff]  ;;  %v11634_v48 = vcombine.low %v5521_v55, %v5553_v26  ;;  %v5716_v26 = vld [vmem:[%s17695_s6 + $0x898] sm:$0xff] }
 0x557   :  { %v12116_v62 = vpack.c.bf16 %v10230_v47, %v10229_v45  ;;  %v12117_v4 = vpack.c.bf16 %v10232_v51, %v10231_v56  ;;  %v8976_v18 = vadd.f32 %v8975_v8, %v5992_v32  ;;  %v9019_v11 = vadd.f32 %v9018_v10, %v6000_v60  ;;  %v5618_v32 = vld [vmem:[%s17695_s6 + $0x588] sm:$0xff]  ;;  %v5489_v14 = vld [vmem:[%s17695_s6 + $0x180] sm:$0xff]  ;;  %v5940_v45 = vld [vmem:[%s17695_s6 + $0xf98] sm:$0xff] }
 0x558   :  { %v10293_v12 = vmax.f32 %v8974_v61, 0.0  ;;  %v10295_v6 = vmax.f32 %v9017_v52, 0.0  ;;  %v11701_v21 = vcombine.high %v5586_v29, %v5618_v32  ;;  %v11700_v33 = vcombine.low %v5586_v29, %v5618_v32  ;;  %v5490_v15 = vld [vmem:[%s17695_s6 + $0x188] sm:$0xff]  ;;  %v5843_v52 = vld [vmem:[%s17695_s6 + $0xc90] sm:$0xff]  ;;  %v5844_v10 = vld [vmem:[%s17695_s6 + $0xc98] sm:$0xff] }
 0x559   :  { %10739 = vst [vmem:[%s17701_s9 + $0x10] sm:$0xff] %v12116_v62  ;;  %10740 = vst [vmem:[%s17701_s9 + $0x18] sm:$0xff] %v12117_v4  ;;  %9542 = vmatpush1.bf16.msra.mxu1 %v11890_v42  ;;  %9585 = vmatpush1.bf16.msra.mxu0 %v11892_v53  ;;  %v10294_v46 = vmax.f32 %v8976_v18, 0.0  ;;  %v10296_v20 = vmax.f32 %v9019_v11, 0.0  ;;  %v11636_v37 = vcombine.low %v5522_v0, %v5554_v22  ;;  %v5907_v42 = vld [vmem:[%s17695_s6 + $0xe90] sm:$0xff]  ;;  %v16720_v51 = vld [vmem:[%s17700_s7 + $0x8] sm:$0xff] }
 0x55a   :  { %9543 = vmatprep.subr.bf16.mxu1 %v11827_v3  ;;  %9586 = vmatprep.subr.bf16.mxu0 %v11829_v9  ;;  %v11571_v49 = vcombine.high %v5457_v44, %v5489_v14  ;;  %v11573_v2 = vcombine.high %v5458_v39, %v5490_v15  ;;  %v5939_v53 = vld [vmem:[%s17695_s6 + $0xf90] sm:$0xff]  ;;  %v5908_v3 = vld [vmem:[%s17695_s6 + $0xe98] sm:$0xff]  ;;  %v11570_v56 = vcombine.low %v5457_v44, %v5489_v14 }
 0x55b   :  { %v12148_v60 = vpack.c.bf16 %v10294_v46, %v10293_v12  ;;  %v12149_v7 = vpack.c.bf16 %v10296_v20, %v10295_v6  ;;  %v11572_v47 = vcombine.low %v5458_v39, %v5490_v15  ;;  %v12023_v59 = vcombine.high %v5907_v42, %v5939_v53  ;;  %v5875_v8 = vld [vmem:[%s17695_s6 + $0xd90] sm:$0xff]  ;;  %v5876_v9 = vld [vmem:[%s17695_s6 + $0xd98] sm:$0xff] }
 0x55c   :  { %v12025_v61 = vcombine.high %v5908_v3, %v5940_v45  ;;  %v6004_v19 = vrot.slane %v16720_v51, %v17722_v30  ;;  %v6012_v54 = vrot.slane %v16720_v51, %v16455_v57  ;;  %v12022_v27 = vcombine.low %v5907_v42, %v5939_v53  ;;  %v5779_v11 = vld [vmem:[%s17695_s6 + $0xa90] sm:$0xff]  ;;  %v5812_v12 = vld [vmem:[%s17695_s6 + $0xb98] sm:$0xff] }
 0x55d   :  { %9544 = vmatpush1.bf16.msra.mxu1 %v11826_v1  ;;  %9587 = vmatpush1.bf16.msra.mxu0 %v11828_v25  ;;  %10771 = vst [vmem:[%s17701_s9 + $0x110] sm:$0xff] %v12148_v60  ;;  %10772 = vst [vmem:[%s17701_s9 + $0x118] sm:$0xff] %v12149_v7  ;;  %v12024_v62 = vcombine.low %v5908_v3, %v5940_v45  ;;  %v11959_v4 = vcombine.high %v5843_v52, %v5875_v8  ;;  %v5715_v32 = vld [vmem:[%s17695_s6 + $0x890] sm:$0xff]  ;;  %v5748_v0 = vld [vmem:[%s17695_s6 + $0x998] sm:$0xff] }
 0x55e   :  { %9545 = vmatprep.subr.bf16.mxu1 %v11763_v28  ;;  %9588 = vmatprep.subr.bf16.mxu0 %v11765_v50  ;;  %v11961_v18 = vcombine.high %v5844_v10, %v5876_v9  ;;  %v6008_v1 = vrot.slane %v16720_v51, %v17723_v17  ;;  %v6016_v25 = vrot.slane %v16720_v51, %v16466_v13  ;;  %v5811_v28 = vld [vmem:[%s17695_s6 + $0xb90] sm:$0xff]  ;;  %v5780_v50 = vld [vmem:[%s17695_s6 + $0xa98] sm:$0xff] }
 0x55f   :  { %v11958_v20 = vcombine.low %v5843_v52, %v5875_v8  ;;  %v11960_v29 = vcombine.low %v5844_v10, %v5876_v9  ;;  %v5747_v60 = vld [vmem:[%s17695_s6 + $0x990] sm:$0xff]  ;;  %v11833_v53 = vcombine.high %v5716_v26, %v5748_v0  ;;  %v5652_v45 = vld [vmem:[%s17695_s6 + $0x698] sm:$0xff]  ;;  %v11832_v10 = vcombine.low %v5716_v26, %v5748_v0 }
 0x560   :  { %v5683_v3 = vld [vmem:[%s17695_s6 + $0x790] sm:$0xff]  ;;  %v11830_v8 = vcombine.low %v5715_v32, %v5747_v60  ;;  %v5492_v26 = vld [vmem:[%s17695_s6 + $0x198] sm:$0xff] }
 0x561   :  { %9546 = vmatpush1.bf16.msra.mxu1 %v11762_v34  ;;  %9589 = vmatpush1.bf16.msra.mxu0 %v11764_v38  ;;  %v11895_v38 = vcombine.high %v5779_v11, %v5811_v28 }
 0x562   :  { %9547 = vmatprep.subr.bf16.mxu1 %v11699_v40  ;;  %9590 = vmatprep.subr.bf16.mxu0 %v11701_v21  ;;  %v11897_v40 = vcombine.high %v5780_v50, %v5812_v12 }
 0x565   :  { %9548 = vmatpush1.bf16.msra.mxu1 %v11698_v58  ;;  %9591 = vmatpush1.bf16.msra.mxu0 %v11700_v33  ;;  %v11894_v33 = vcombine.low %v5779_v11, %v5811_v28  ;;  %v5619_v11 = vld [vmem:[%s17695_s6 + $0x590] sm:$0xff] }
 0x566   :  { %9549 = vmatprep.subr.bf16.mxu1 %v11635_v35  ;;  %9592 = vmatprep.subr.bf16.mxu0 %v11637_v41  ;;  %v11896_v35 = vcombine.low %v5780_v50, %v5812_v12  ;;  %v11831_v41 = vcombine.high %v5715_v32, %v5747_v60  ;;  %v5556_v32 = vld [vmem:[%s17695_s6 + $0x398] sm:$0xff] }
 0x569   :  { %9550 = vmatpush1.bf16.msra.mxu1 %v11634_v48  ;;  %9593 = vmatpush1.bf16.msra.mxu0 %v11636_v37  ;;  %v5651_v48 = vld [vmem:[%s17695_s6 + $0x690] sm:$0xff] }
 0x56a   :  { %9551 = vmatprep.subr.bf16.mxu1 %v11571_v49  ;;  %9594 = vmatprep.subr.bf16.mxu0 %v11573_v2  ;;  %v11767_v9 = vcombine.high %v5651_v48, %v5683_v3  ;;  %v11766_v12 = vcombine.low %v5651_v48, %v5683_v3  ;;  %v6020_v3 = vrot.slane %v16720_v51, %v16586_v16 }
 0x56d   :  { %9552 = vmatpush1.bf16.msra.mxu1 %v11570_v56  ;;  %9595 = vmatpush1.bf16.msra.mxu0 %v11572_v47  ;;  %v5684_v56 = vld [vmem:[%s17695_s6 + $0x798] sm:$0xff] }
 0x56e   :  { %9623 = vmatprep.subr.bf16.mxu1 %v12023_v59  ;;  %9666 = vmatprep.subr.bf16.mxu0 %v12025_v61 }
 0x570   :  { %v9055_v6 = vpop.f32.mrf.mxu1  ;;  %v9098_v46 = vpop.f32.mrf.mxu0  ;;  %9570 = vmatmul.mubr.bf16.vlgmr.msra.gmra.mxu1 %v15864_v63  ;;  %9613 = vmatmul.mubr.bf16.vlgmr.msra.gmra.mxu0 %v15864_v63 }
 0x571   :  { %v9056_v31 = vadd.f32 %v9055_v6, %v6004_v19  ;;  %v9099_v23 = vadd.f32 %v9098_v46, %v6012_v54  ;;  %9624 = vmatpush1.bf16.msra.mxu1 %v12022_v27  ;;  %9667 = vmatpush1.bf16.msra.mxu0 %v12024_v62  ;;  %v11768_v6 = vcombine.low %v5652_v45, %v5684_v56 }
 0x572   :  { %v9057_v7 = vpop.f32.mrf.mxu1  ;;  %v9100_v34 = vpop.f32.mrf.mxu0  ;;  %9625 = vmatprep.subr.bf16.mxu1 %v11959_v4  ;;  %9668 = vmatprep.subr.bf16.mxu0 %v11961_v18  ;;  %v5587_v18 = vld [vmem:[%s17695_s6 + $0x490] sm:$0xff] }
 0x573   :  { %v9058_v21 = vadd.f32 %v9057_v7, %v6008_v1  ;;  %v9101_v55 = vadd.f32 %v9100_v34, %v6016_v25  ;;  %9655 = vmatprep.mubr.bf16.mxu1 %v17720_v36  ;;  %9698 = vmatprep.mubr.bf16.mxu0 %v17720_v36  ;;  %v10233_v44 = vmax.f32 %v9056_v31, 0.0  ;;  %v10235_v14 = vmax.f32 %v9099_v23, 0.0  ;;  %v5523_v31 = vld [vmem:[%s17695_s6 + $0x290] sm:$0xff] }
 0x574   :  { %v9059_v22 = vpop.f32.mrf.mxu1  ;;  %v9102_v58 = vpop.f32.mrf.mxu0  ;;  %v11703_v46 = vcombine.high %v5587_v18, %v5619_v11  ;;  %v5555_v23 = vld [vmem:[%s17695_s6 + $0x390] sm:$0xff]  ;;  %v11702_v60 = vcombine.low %v5587_v18, %v5619_v11 }
 0x575   :  { %v10234_v39 = vmax.f32 %v9058_v21, 0.0  ;;  %v10236_v15 = vmax.f32 %v9101_v55, 0.0  ;;  %9626 = vmatpush1.bf16.msra.mxu1 %v11958_v20  ;;  %9669 = vmatpush1.bf16.msra.mxu0 %v11960_v29  ;;  %v9060_v37 = vadd.f32 %v9059_v22, %v6004_v19  ;;  %v9103_v49 = vadd.f32 %v9102_v58, %v6012_v54  ;;  %v5524_v29 = vld [vmem:[%s17695_s6 + $0x298] sm:$0xff]  ;;  %v5491_v21 = vld [vmem:[%s17695_s6 + $0x190] sm:$0xff] }
 0x576   :  { %v9061_v2 = vpop.f32.mrf.mxu1  ;;  %v9104_v42 = vpop.f32.mrf.mxu0  ;;  %9627 = vmatprep.subr.bf16.mxu1 %v11895_v38  ;;  %9670 = vmatprep.subr.bf16.mxu0 %v11897_v40  ;;  %v11769_v19 = vcombine.high %v5652_v45, %v5684_v56  ;;  %v11639_v34 = vcombine.high %v5523_v31, %v5555_v23  ;;  %v11641_v38 = vcombine.high %v5524_v29, %v5556_v32  ;;  %v5459_v40 = vld [vmem:[%s17695_s6 + $0x90] sm:$0xff]  ;;  %v5460_v55 = vld [vmem:[%s17695_s6 + $0x98] sm:$0xff] }
 0x577   :  { %v12118_v47 = vpack.c.bf16 %v10234_v39, %v10233_v44  ;;  %v12119_v59 = vpack.c.bf16 %v10236_v15, %v10235_v14  ;;  %v9062_v61 = vadd.f32 %v9061_v2, %v6008_v1  ;;  %v9105_v52 = vadd.f32 %v9104_v42, %v6016_v25  ;;  %v5588_v1 = vld [vmem:[%s17695_s6 + $0x498] sm:$0xff]  ;;  %v5910_v44 = vld [vmem:[%s17695_s6 + $0xea8] sm:$0xff]  ;;  %v5877_v2 = vld [vmem:[%s17695_s6 + $0xda0] sm:$0xff] }
 0x578   :  { %v10297_v54 = vmax.f32 %v9060_v37, 0.0  ;;  %v10299_v27 = vmax.f32 %v9103_v49, 0.0  ;;  %v5620_v25 = vld [vmem:[%s17695_s6 + $0x598] sm:$0xff]  ;;  %v11638_v0 = vcombine.low %v5523_v31, %v5555_v23  ;;  %v11640_v22 = vcombine.low %v5524_v29, %v5556_v32  ;;  %v5942_v14 = vld [vmem:[%s17695_s6 + $0xfa8] sm:$0xff]  ;;  %v5845_v49 = vld [vmem:[%s17695_s6 + $0xca0] sm:$0xff] }
 0x579   :  { %10741 = vst [vmem:[%s17701_s9 + $0x20] sm:$0xff] %v12118_v47  ;;  %10742 = vst [vmem:[%s17701_s9 + $0x28] sm:$0xff] %v12119_v59  ;;  %9628 = vmatpush1.bf16.msra.mxu1 %v11894_v33  ;;  %9671 = vmatpush1.bf16.msra.mxu0 %v11896_v35  ;;  %v10298_v62 = vmax.f32 %v9062_v61, 0.0  ;;  %v10300_v4 = vmax.f32 %v9105_v52, 0.0  ;;  %v11705_v20 = vcombine.high %v5588_v1, %v5620_v25  ;;  %v5909_v35 = vld [vmem:[%s17695_s6 + $0xea0] sm:$0xff]  ;;  %v5846_v42 = vld [vmem:[%s17695_s6 + $0xca8] sm:$0xff] }
 0x57a   :  { %9629 = vmatprep.subr.bf16.mxu1 %v11831_v41  ;;  %9672 = vmatprep.subr.bf16.mxu0 %v11833_v53  ;;  %v11704_v7 = vcombine.low %v5588_v1, %v5620_v25  ;;  %v11575_v58 = vcombine.high %v5459_v40, %v5491_v21  ;;  %v11577_v33 = vcombine.high %v5460_v55, %v5492_v26  ;;  %v5941_v41 = vld [vmem:[%s17695_s6 + $0xfa0] sm:$0xff]  ;;  %v5878_v53 = vld [vmem:[%s17695_s6 + $0xda8] sm:$0xff] }
 0x57b   :  { %v12150_v28 = vpack.c.bf16 %v10298_v62, %v10297_v54  ;;  %v12151_v50 = vpack.c.bf16 %v10300_v4, %v10299_v27  ;;  %v11574_v39 = vcombine.low %v5459_v40, %v5491_v21  ;;  %v11576_v15 = vcombine.low %v5460_v55, %v5492_v26  ;;  %v5781_v52 = vld [vmem:[%s17695_s6 + $0xaa0] sm:$0xff]  ;;  %v5814_v54 = vld [vmem:[%s17695_s6 + $0xba8] sm:$0xff] }
 0x57c   :  { %v12027_v48 = vcombine.high %v5909_v35, %v5941_v41  ;;  %v12029_v37 = vcombine.high %v5910_v44, %v5942_v14  ;;  %v6028_v45 = vrot.slane %v16720_v51, %v16589_v43  ;;  %v12026_v56 = vcombine.low %v5909_v35, %v5941_v41  ;;  %v5717_v1 = vld [vmem:[%s17695_s6 + $0x8a0] sm:$0xff]  ;;  %v5718_v31 = vld [vmem:[%s17695_s6 + $0x8a8] sm:$0xff] }
 0x57d   :  { %9630 = vmatpush1.bf16.msra.mxu1 %v11830_v8  ;;  %9673 = vmatpush1.bf16.msra.mxu0 %v11832_v10  ;;  %10773 = vst [vmem:[%s17701_s9 + $0x120] sm:$0xff] %v12150_v28  ;;  %10774 = vst [vmem:[%s17701_s9 + $0x128] sm:$0xff] %v12151_v50  ;;  %v12028_v47 = vcombine.low %v5910_v44, %v5942_v14  ;;  %v11963_v59 = vcombine.high %v5845_v49, %v5877_v2  ;;  %v5749_v25 = vld [vmem:[%s17695_s6 + $0x9a0] sm:$0xff]  ;;  %v5750_v23 = vld [vmem:[%s17695_s6 + $0x9a8] sm:$0xff] }
 0x57e   :  { %9631 = vmatprep.subr.bf16.mxu1 %v11767_v9  ;;  %9674 = vmatprep.subr.bf16.mxu0 %v11769_v19  ;;  %v11965_v61 = vcombine.high %v5846_v42, %v5878_v53  ;;  %v6024_v8 = vrot.slane %v16720_v51, %v16595_v5  ;;  %v6032_v10 = vrot.slane %v16720_v51, %v16598_v24  ;;  %v5813_v9 = vld [vmem:[%s17695_s6 + $0xba0] sm:$0xff]  ;;  %v5782_v19 = vld [vmem:[%s17695_s6 + $0xaa8] sm:$0xff] }
 0x57f   :  { %v11962_v4 = vcombine.low %v5845_v49, %v5877_v2  ;;  %v11964_v11 = vcombine.low %v5846_v42, %v5878_v53  ;;  %v5653_v26 = vld [vmem:[%s17695_s6 + $0x6a0] sm:$0xff]  ;;  %v11837_v35 = vcombine.high %v5718_v31, %v5750_v23  ;;  %v5654_v44 = vld [vmem:[%s17695_s6 + $0x6a8] sm:$0xff]  ;;  %v11834_v49 = vcombine.low %v5717_v1, %v5749_v25 }
 0x580   :  { %v5685_v41 = vld [vmem:[%s17695_s6 + $0x7a0] sm:$0xff]  ;;  %v5686_v14 = vld [vmem:[%s17695_s6 + $0x7a8] sm:$0xff]  ;;  %v11836_v2 = vcombine.low %v5718_v31, %v5750_v23 }
 0x581   :  { %9632 = vmatpush1.bf16.msra.mxu1 %v11766_v12  ;;  %9675 = vmatpush1.bf16.msra.mxu0 %v11768_v6  ;;  %v11899_v12 = vcombine.high %v5781_v52, %v5813_v9  ;;  %v11901_v6 = vcombine.high %v5782_v19, %v5814_v54  ;;  %v11771_v42 = vcombine.high %v5653_v26, %v5685_v41 }
 0x582   :  { %9633 = vmatprep.subr.bf16.mxu1 %v11703_v46  ;;  %9676 = vmatprep.subr.bf16.mxu0 %v11705_v20  ;;  %v11773_v53 = vcombine.high %v5654_v44, %v5686_v14 }
 0x585   :  { %9634 = vmatpush1.bf16.msra.mxu1 %v11702_v60  ;;  %9677 = vmatpush1.bf16.msra.mxu0 %v11704_v7  ;;  %v11898_v60 = vcombine.low %v5781_v52, %v5813_v9  ;;  %v11900_v7 = vcombine.low %v5782_v19, %v5814_v54  ;;  %v5590_v52 = vld [vmem:[%s17695_s6 + $0x4a8] sm:$0xff]  ;;  %v11770_v19 = vcombine.low %v5653_v26, %v5685_v41 }
 0x586   :  { %9635 = vmatprep.subr.bf16.mxu1 %v11639_v34  ;;  %9678 = vmatprep.subr.bf16.mxu0 %v11641_v38  ;;  %v11835_v34 = vcombine.high %v5717_v1, %v5749_v25  ;;  %v11772_v54 = vcombine.low %v5654_v44, %v5686_v14 }
 0x589   :  { %9636 = vmatpush1.bf16.msra.mxu1 %v11638_v0  ;;  %9679 = vmatpush1.bf16.msra.mxu0 %v11640_v22 }
 0x58a   :  { %9637 = vmatprep.subr.bf16.mxu1 %v11575_v58  ;;  %9680 = vmatprep.subr.bf16.mxu0 %v11577_v33 }
 0x58d   :  { %9638 = vmatpush1.bf16.msra.mxu1 %v11574_v39  ;;  %9681 = vmatpush1.bf16.msra.mxu0 %v11576_v15 }
 0x58e   :  { %9709 = vmatprep.subr.bf16.mxu1 %v12027_v48  ;;  %9752 = vmatprep.subr.bf16.mxu0 %v12029_v37 }
 0x590   :  { %v9141_v27 = vpop.f32.mrf.mxu1  ;;  %v9184_v62 = vpop.f32.mrf.mxu0  ;;  %9656 = vmatmul.mubr.bf16.vlgmr.msra.gmra.mxu1 %v15864_v63  ;;  %9699 = vmatmul.mubr.bf16.vlgmr.msra.gmra.mxu0 %v15864_v63 }
 0x591   :  { %v9142_v51 = vadd.f32 %v9141_v27, %v6020_v3  ;;  %v9185_v18 = vadd.f32 %v9184_v62, %v6028_v45  ;;  %9710 = vmatpush1.bf16.msra.mxu1 %v12026_v56  ;;  %9753 = vmatpush1.bf16.msra.mxu0 %v12028_v47 }
 0x592   :  { %v9143_v28 = vpop.f32.mrf.mxu1  ;;  %v9186_v50 = vpop.f32.mrf.mxu0  ;;  %9711 = vmatprep.subr.bf16.mxu1 %v11963_v59  ;;  %9754 = vmatprep.subr.bf16.mxu0 %v11965_v61  ;;  %v5589_v59 = vld [vmem:[%s17695_s6 + $0x4a0] sm:$0xff] }
 0x593   :  { %v9144_v46 = vadd.f32 %v9143_v28, %v6024_v8  ;;  %v9187_v20 = vadd.f32 %v9186_v50, %v6032_v10  ;;  %9741 = vmatprep.mubr.bf16.mxu1 %v17720_v36  ;;  %9784 = vmatprep.mubr.bf16.mxu0 %v17720_v36  ;;  %v10237_v38 = vmax.f32 %v9142_v51, 0.0  ;;  %v10239_v40 = vmax.f32 %v9185_v18, 0.0  ;;  %v5621_v61 = vld [vmem:[%s17695_s6 + $0x5a0] sm:$0xff]  ;;  %v5526_v18 = vld [vmem:[%s17695_s6 + $0x2a8] sm:$0xff] }
 0x594   :  { %v9145_v29 = vpop.f32.mrf.mxu1  ;;  %v9188_v32 = vpop.f32.mrf.mxu0  ;;  %v11707_v27 = vcombine.high %v5589_v59, %v5621_v61  ;;  %v5557_v51 = vld [vmem:[%s17695_s6 + $0x3a0] sm:$0xff]  ;;  %v11706_v1 = vcombine.low %v5589_v59, %v5621_v61 }
 0x595   :  { %v10238_v21 = vmax.f32 %v9144_v46, 0.0  ;;  %v10240_v55 = vmax.f32 %v9187_v20, 0.0  ;;  %9712 = vmatpush1.bf16.msra.mxu1 %v11962_v4  ;;  %9755 = vmatpush1.bf16.msra.mxu0 %v11964_v11  ;;  %v9146_v0 = vadd.f32 %v9145_v29, %v6020_v3  ;;  %v9189_v22 = vadd.f32 %v9188_v32, %v6028_v45  ;;  %v5525_v4 = vld [vmem:[%s17695_s6 + $0x2a0] sm:$0xff]  ;;  %v5558_v11 = vld [vmem:[%s17695_s6 + $0x3a8] sm:$0xff] }
 0x596   :  { %v9147_v58 = vpop.f32.mrf.mxu1  ;;  %v9190_v33 = vpop.f32.mrf.mxu0  ;;  %9713 = vmatprep.subr.bf16.mxu1 %v11899_v12  ;;  %9756 = vmatprep.subr.bf16.mxu0 %v11901_v6  ;;  %v11643_v28 = vcombine.high %v5525_v4, %v5557_v51  ;;  %v11645_v50 = vcombine.high %v5526_v18, %v5558_v11  ;;  %v5461_v12 = vld [vmem:[%s17695_s6 + $0xa0] sm:$0xff]  ;;  %v5462_v46 = vld [vmem:[%s17695_s6 + $0xa8] sm:$0xff]  ;;  %v11642_v31 = vcombine.low %v5525_v4, %v5557_v51  ;;  %v5720_v51 = vld [vmem:[%s17695_s6 + $0x8b8] sm:$0xff] }
 0x597   :  { %v12120_v39 = vpack.c.bf16 %v10238_v21, %v10237_v38  ;;  %v12121_v15 = vpack.c.bf16 %v10240_v55, %v10239_v40  ;;  %v9148_v48 = vadd.f32 %v9147_v58, %v6024_v8  ;;  %v9191_v37 = vadd.f32 %v9190_v33, %v6032_v10  ;;  %v5622_v8 = vld [vmem:[%s17695_s6 + $0x5a8] sm:$0xff]  ;;  %v5493_v6 = vld [vmem:[%s17695_s6 + $0x1a0] sm:$0xff]  ;;  %v5944_v38 = vld [vmem:[%s17695_s6 + $0xfb8] sm:$0xff] }
 0x598   :  { %v10301_v3 = vmax.f32 %v9146_v0, 0.0  ;;  %v10303_v45 = vmax.f32 %v9189_v22, 0.0  ;;  %v11709_v62 = vcombine.high %v5590_v52, %v5622_v8  ;;  %v11708_v25 = vcombine.low %v5590_v52, %v5622_v8  ;;  %v5494_v20 = vld [vmem:[%s17695_s6 + $0x1a8] sm:$0xff]  ;;  %v16965_v55 = vld [vmem:[%s17700_s7 + $0x10] sm:$0xff]  ;;  %v5848_v33 = vld [vmem:[%s17695_s6 + $0xcb8] sm:$0xff] }
 0x599   :  { %10743 = vst [vmem:[%s17701_s9 + $0x30] sm:$0xff] %v12120_v39  ;;  %10744 = vst [vmem:[%s17701_s9 + $0x38] sm:$0xff] %v12121_v15  ;;  %9714 = vmatpush1.bf16.msra.mxu1 %v11898_v60  ;;  %9757 = vmatpush1.bf16.msra.mxu0 %v11900_v7  ;;  %v10302_v56 = vmax.f32 %v9148_v48, 0.0  ;;  %v10304_v47 = vmax.f32 %v9191_v37, 0.0  ;;  %v11644_v23 = vcombine.low %v5526_v18, %v5558_v11  ;;  %v5911_v60 = vld [vmem:[%s17695_s6 + $0xeb0] sm:$0xff]  ;;  %v5752_v18 = vld [vmem:[%s17695_s6 + $0x9b8] sm:$0xff] }
 0x59a   :  { %9715 = vmatprep.subr.bf16.mxu1 %v11835_v34  ;;  %9758 = vmatprep.subr.bf16.mxu0 %v11837_v35  ;;  %v11579_v29 = vcombine.high %v5461_v12, %v5493_v6  ;;  %v11581_v32 = vcombine.high %v5462_v46, %v5494_v20  ;;  %v5943_v7 = vld [vmem:[%s17695_s6 + $0xfb0] sm:$0xff]  ;;  %v5912_v34 = vld [vmem:[%s17695_s6 + $0xeb8] sm:$0xff]  ;;  %v11578_v40 = vcombine.low %v5461_v12, %v5493_v6 }
 0x59b   :  { %v12152_v10 = vpack.c.bf16 %v10302_v56, %v10301_v3  ;;  %v12153_v9 = vpack.c.bf16 %v10304_v47, %v10303_v45  ;;  %v11580_v21 = vcombine.low %v5462_v46, %v5494_v20  ;;  %v12031_v26 = vcombine.high %v5911_v60, %v5943_v7  ;;  %v5847_v22 = vld [vmem:[%s17695_s6 + $0xcb0] sm:$0xff]  ;;  %v5880_v35 = vld [vmem:[%s17695_s6 + $0xdb8] sm:$0xff] }
 0x59c   :  { %v12033_v0 = vcombine.high %v5912_v34, %v5944_v38  ;;  %v5879_v58 = vld [vmem:[%s17695_s6 + $0xdb0] sm:$0xff]  ;;  %v6036_v41 = vrot.slane %v16965_v55, %v17722_v30  ;;  %v6044_v44 = vrot.slane %v16965_v55, %v16455_v57  ;;  %v12030_v14 = vcombine.low %v5911_v60, %v5943_v7  ;;  %v5816_v3 = vld [vmem:[%s17695_s6 + $0xbb8] sm:$0xff] }
 0x59d   :  { %9716 = vmatpush1.bf16.msra.mxu1 %v11834_v49  ;;  %9759 = vmatpush1.bf16.msra.mxu0 %v11836_v2  ;;  %10775 = vst [vmem:[%s17701_s9 + $0x130] sm:$0xff] %v12152_v10  ;;  %10776 = vst [vmem:[%s17701_s9 + $0x138] sm:$0xff] %v12153_v9  ;;  %v12032_v39 = vcombine.low %v5912_v34, %v5944_v38  ;;  %v11967_v15 = vcombine.high %v5847_v22, %v5879_v58  ;;  %v5783_v37 = vld [vmem:[%s17695_s6 + $0xab0] sm:$0xff]  ;;  %v5656_v38 = vld [vmem:[%s17695_s6 + $0x6b8] sm:$0xff] }
 0x59e   :  { %9717 = vmatprep.subr.bf16.mxu1 %v11771_v42  ;;  %9760 = vmatprep.subr.bf16.mxu0 %v11773_v53  ;;  %v11969_v48 = vcombine.high %v5848_v33, %v5880_v35  ;;  %v6040_v49 = vrot.slane %v16965_v55, %v17723_v17  ;;  %v6048_v2 = vrot.slane %v16965_v55, %v16466_v13  ;;  %v5815_v42 = vld [vmem:[%s17695_s6 + $0xbb0] sm:$0xff]  ;;  %v5784_v53 = vld [vmem:[%s17695_s6 + $0xab8] sm:$0xff] }
 0x59f   :  { %v11966_v47 = vcombine.low %v5847_v22, %v5879_v58  ;;  %v11968_v52 = vcombine.low %v5848_v33, %v5880_v35  ;;  %v5719_v8 = vld [vmem:[%s17695_s6 + $0x8b0] sm:$0xff]  ;;  %v11841_v7 = vcombine.high %v5720_v51, %v5752_v18  ;;  %v11840_v33 = vcombine.low %v5720_v51, %v5752_v18  ;;  %v5496_v51 = vld [vmem:[%s17695_s6 + $0x1b8] sm:$0xff] }
 0x5a0   :  { %v5751_v10 = vld [vmem:[%s17695_s6 + $0x9b0] sm:$0xff] }
 0x5a1   :  { %9718 = vmatpush1.bf16.msra.mxu1 %v11770_v19  ;;  %9761 = vmatpush1.bf16.msra.mxu0 %v11772_v54  ;;  %v11903_v54 = vcombine.high %v5783_v37, %v5815_v42  ;;  %v5687_v34 = vld [vmem:[%s17695_s6 + $0x7b0] sm:$0xff]  ;;  %v11838_v58 = vcombine.low %v5719_v8, %v5751_v10 }
 0x5a2   :  { %9719 = vmatprep.subr.bf16.mxu1 %v11707_v27  ;;  %9762 = vmatprep.subr.bf16.mxu0 %v11709_v62  ;;  %v11905_v27 = vcombine.high %v5784_v53, %v5816_v3 }
 0x5a5   :  { %9720 = vmatpush1.bf16.msra.mxu1 %v11706_v1  ;;  %9763 = vmatpush1.bf16.msra.mxu0 %v11708_v25  ;;  %v11902_v25 = vcombine.low %v5783_v37, %v5815_v42  ;;  %v5623_v37 = vld [vmem:[%s17695_s6 + $0x5b0] sm:$0xff] }
 0x5a6   :  { %9721 = vmatprep.subr.bf16.mxu1 %v11643_v28  ;;  %9764 = vmatprep.subr.bf16.mxu0 %v11645_v50  ;;  %v11904_v28 = vcombine.low %v5784_v53, %v5816_v3  ;;  %v11839_v50 = vcombine.high %v5719_v8, %v5751_v10  ;;  %v5560_v8 = vld [vmem:[%s17695_s6 + $0x3b8] sm:$0xff] }
 0x5a9   :  { %9722 = vmatpush1.bf16.msra.mxu1 %v11642_v31  ;;  %9765 = vmatpush1.bf16.msra.mxu0 %v11644_v23  ;;  %v5655_v31 = vld [vmem:[%s17695_s6 + $0x6b0] sm:$0xff] }
 0x5aa   :  { %9723 = vmatprep.subr.bf16.mxu1 %v11579_v29  ;;  %9766 = vmatprep.subr.bf16.mxu0 %v11581_v32  ;;  %v11775_v35 = vcombine.high %v5655_v31, %v5687_v34  ;;  %v11774_v3 = vcombine.low %v5655_v31, %v5687_v34  ;;  %v6052_v34 = vrot.slane %v16965_v55, %v16586_v16 }
 0x5ad   :  { %9724 = vmatpush1.bf16.msra.mxu1 %v11578_v40  ;;  %9767 = vmatpush1.bf16.msra.mxu0 %v11580_v21  ;;  %v5688_v40 = vld [vmem:[%s17695_s6 + $0x7b8] sm:$0xff] }
 0x5ae   :  { %9795 = vmatprep.subr.bf16.mxu1 %v12031_v26  ;;  %9838 = vmatprep.subr.bf16.mxu0 %v12033_v0 }
 0x5b0   :  { %v9227_v45 = vpop.f32.mrf.mxu1  ;;  %v9270_v56 = vpop.f32.mrf.mxu0  ;;  %9742 = vmatmul.mubr.bf16.vlgmr.msra.gmra.mxu1 %v15864_v63  ;;  %9785 = vmatmul.mubr.bf16.vlgmr.msra.gmra.mxu0 %v15864_v63 }
 0x5b1   :  { %v9228_v59 = vadd.f32 %v9227_v45, %v6036_v41  ;;  %v9271_v61 = vadd.f32 %v9270_v56, %v6044_v44  ;;  %9796 = vmatpush1.bf16.msra.mxu1 %v12030_v14  ;;  %9839 = vmatpush1.bf16.msra.mxu0 %v12032_v39  ;;  %v11776_v45 = vcombine.low %v5656_v38, %v5688_v40 }
 0x5b2   :  { %v9229_v9 = vpop.f32.mrf.mxu1  ;;  %v9272_v19 = vpop.f32.mrf.mxu0  ;;  %9797 = vmatprep.subr.bf16.mxu1 %v11967_v15  ;;  %9840 = vmatprep.subr.bf16.mxu0 %v11969_v48  ;;  %v5591_v48 = vld [vmem:[%s17695_s6 + $0x4b0] sm:$0xff] }
 0x5b3   :  { %v9230_v62 = vadd.f32 %v9229_v9, %v6040_v49  ;;  %v9273_v4 = vadd.f32 %v9272_v19, %v6048_v2  ;;  %9827 = vmatprep.mubr.bf16.mxu1 %v17720_v36  ;;  %9870 = vmatprep.mubr.bf16.mxu0 %v17720_v36  ;;  %v10241_v12 = vmax.f32 %v9228_v59, 0.0  ;;  %v10243_v6 = vmax.f32 %v9271_v61, 0.0  ;;  %v5527_v59 = vld [vmem:[%s17695_s6 + $0x2b0] sm:$0xff] }
 0x5b4   :  { %v9231_v11 = vpop.f32.mrf.mxu1  ;;  %v9274_v1 = vpop.f32.mrf.mxu0  ;;  %v11711_v56 = vcombine.high %v5591_v48, %v5623_v37  ;;  %v5559_v61 = vld [vmem:[%s17695_s6 + $0x3b0] sm:$0xff]  ;;  %v11710_v10 = vcombine.low %v5591_v48, %v5623_v37 }
 0x5b5   :  { %v10242_v46 = vmax.f32 %v9230_v62, 0.0  ;;  %v10244_v20 = vmax.f32 %v9273_v4, 0.0  ;;  %9798 = vmatpush1.bf16.msra.mxu1 %v11966_v47  ;;  %9841 = vmatpush1.bf16.msra.mxu0 %v11968_v52  ;;  %v9232_v23 = vadd.f32 %v9231_v11, %v6036_v41  ;;  %v9275_v29 = vadd.f32 %v9274_v1, %v6044_v44  ;;  %v5528_v52 = vld [vmem:[%s17695_s6 + $0x2b8] sm:$0xff]  ;;  %v5495_v62 = vld [vmem:[%s17695_s6 + $0x1b0] sm:$0xff] }
 0x5b6   :  { %v9233_v32 = vpop.f32.mrf.mxu1  ;;  %v9276_v60 = vpop.f32.mrf.mxu0  ;;  %9799 = vmatprep.subr.bf16.mxu1 %v11903_v54  ;;  %9842 = vmatprep.subr.bf16.mxu0 %v11905_v27  ;;  %v11777_v41 = vcombine.high %v5656_v38, %v5688_v40  ;;  %v11647_v19 = vcombine.high %v5527_v59, %v5559_v61  ;;  %v11649_v54 = vcombine.high %v5528_v52, %v5560_v8  ;;  %v5463_v27 = vld [vmem:[%s17695_s6 + $0xb0] sm:$0xff]  ;;  %v5464_v4 = vld [vmem:[%s17695_s6 + $0xb8] sm:$0xff] }
 0x5b7   :  { %v12122_v21 = vpack.c.bf16 %v10242_v46, %v10241_v12  ;;  %v12123_v26 = vpack.c.bf16 %v10244_v20, %v10243_v6  ;;  %v9234_v0 = vadd.f32 %v9233_v32, %v6040_v49  ;;  %v9277_v22 = vadd.f32 %v9276_v60, %v6048_v2  ;;  %v5592_v49 = vld [vmem:[%s17695_s6 + $0x4b8] sm:$0xff]  ;;  %v5914_v12 = vld [vmem:[%s17695_s6 + $0xec8] sm:$0xff]  ;;  %v5881_v32 = vld [vmem:[%s17695_s6 + $0xdc0] sm:$0xff] }
 0x5b8   :  { %v10305_v44 = vmax.f32 %v9232_v23, 0.0  ;;  %v10307_v14 = vmax.f32 %v9275_v29, 0.0  ;;  %v5624_v2 = vld [vmem:[%s17695_s6 + $0x5b8] sm:$0xff]  ;;  %v11646_v18 = vcombine.low %v5527_v59, %v5559_v61  ;;  %v11648_v11 = vcombine.low %v5528_v52, %v5560_v8  ;;  %v5946_v6 = vld [vmem:[%s17695_s6 + $0xfc8] sm:$0xff]  ;;  %v5849_v29 = vld [vmem:[%s17695_s6 + $0xcc0] sm:$0xff] }
 0x5b9   :  { %10745 = vst [vmem:[%s17701_s9 + $0x40] sm:$0xff] %v12122_v21  ;;  %10746 = vst [vmem:[%s17701_s9 + $0x48] sm:$0xff] %v12123_v26  ;;  %9800 = vmatpush1.bf16.msra.mxu1 %v11902_v25  ;;  %9843 = vmatpush1.bf16.msra.mxu0 %v11904_v28  ;;  %v10306_v39 = vmax.f32 %v9234_v0, 0.0  ;;  %v10308_v15 = vmax.f32 %v9277_v22, 0.0  ;;  %v11713_v47 = vcombine.high %v5592_v49, %v5624_v2  ;;  %v5913_v28 = vld [vmem:[%s17695_s6 + $0xec0] sm:$0xff]  ;;  %v5850_v60 = vld [vmem:[%s17695_s6 + $0xcc8] sm:$0xff] }
 0x5ba   :  { %9801 = vmatprep.subr.bf16.mxu1 %v11839_v50  ;;  %9844 = vmatprep.subr.bf16.mxu0 %v11841_v7  ;;  %v11712_v9 = vcombine.low %v5592_v49, %v5624_v2  ;;  %v11583_v1 = vcombine.high %v5463_v27, %v5495_v62  ;;  %v11585_v25 = vcombine.high %v5464_v4, %v5496_v51  ;;  %v5945_v50 = vld [vmem:[%s17695_s6 + $0xfc0] sm:$0xff]  ;;  %v5882_v7 = vld [vmem:[%s17695_s6 + $0xdc8] sm:$0xff] }
 0x5bb   :  { %v12154_v42 = vpack.c.bf16 %v10306_v39, %v10305_v44  ;;  %v12155_v53 = vpack.c.bf16 %v10308_v15, %v10307_v14  ;;  %v11582_v46 = vcombine.low %v5463_v27, %v5495_v62  ;;  %v11584_v20 = vcombine.low %v5464_v4, %v5496_v51  ;;  %v5785_v22 = vld [vmem:[%s17695_s6 + $0xac0] sm:$0xff]  ;;  %v5818_v44 = vld [vmem:[%s17695_s6 + $0xbc8] sm:$0xff] }
 0x5bc   :  { %v12035_v31 = vcombine.high %v5913_v28, %v5945_v50  ;;  %v12037_v23 = vcombine.high %v5914_v12, %v5946_v6  ;;  %v6060_v38 = vrot.slane %v16965_v55, %v16589_v43  ;;  %v12034_v40 = vcombine.low %v5913_v28, %v5945_v50  ;;  %v5721_v49 = vld [vmem:[%s17695_s6 + $0x8c0] sm:$0xff]  ;;  %v5722_v59 = vld [vmem:[%s17695_s6 + $0x8c8] sm:$0xff] }
 0x5bd   :  { %9802 = vmatpush1.bf16.msra.mxu1 %v11838_v58  ;;  %9845 = vmatpush1.bf16.msra.mxu0 %v11840_v33  ;;  %10777 = vst [vmem:[%s17701_s9 + $0x140] sm:$0xff] %v12154_v42  ;;  %10778 = vst [vmem:[%s17701_s9 + $0x148] sm:$0xff] %v12155_v53  ;;  %v12036_v21 = vcombine.low %v5914_v12, %v5946_v6  ;;  %v11971_v26 = vcombine.high %v5849_v29, %v5881_v32  ;;  %v5753_v2 = vld [vmem:[%s17695_s6 + $0x9c0] sm:$0xff]  ;;  %v5754_v61 = vld [vmem:[%s17695_s6 + $0x9c8] sm:$0xff] }
 0x5be   :  { %9803 = vmatprep.subr.bf16.mxu1 %v11775_v35  ;;  %9846 = vmatprep.subr.bf16.mxu0 %v11777_v41  ;;  %v11973_v0 = vcombine.high %v5850_v60, %v5882_v7  ;;  %v6056_v58 = vrot.slane %v16965_v55, %v16595_v5  ;;  %v6064_v33 = vrot.slane %v16965_v55, %v16598_v24  ;;  %v5817_v35 = vld [vmem:[%s17695_s6 + $0xbc0] sm:$0xff]  ;;  %v5786_v41 = vld [vmem:[%s17695_s6 + $0xac8] sm:$0xff] }
 0x5bf   :  { %v11970_v15 = vcombine.low %v5849_v29, %v5881_v32  ;;  %v11972_v37 = vcombine.low %v5850_v60, %v5882_v7  ;;  %v5657_v51 = vld [vmem:[%s17695_s6 + $0x6c0] sm:$0xff]  ;;  %v11845_v28 = vcombine.high %v5722_v59, %v5754_v61  ;;  %v5658_v12 = vld [vmem:[%s17695_s6 + $0x6c8] sm:$0xff]  ;;  %v11842_v29 = vcombine.low %v5721_v49, %v5753_v2 }
 0x5c0   :  { %v5689_v50 = vld [vmem:[%s17695_s6 + $0x7c0] sm:$0xff]  ;;  %v5690_v6 = vld [vmem:[%s17695_s6 + $0x7c8] sm:$0xff]  ;;  %v11844_v32 = vcombine.low %v5722_v59, %v5754_v61 }
 0x5c1   :  { %9804 = vmatpush1.bf16.msra.mxu1 %v11774_v3  ;;  %9847 = vmatpush1.bf16.msra.mxu0 %v11776_v45  ;;  %v11907_v3 = vcombine.high %v5785_v22, %v5817_v35  ;;  %v11909_v45 = vcombine.high %v5786_v41, %v5818_v44  ;;  %v11779_v60 = vcombine.high %v5657_v51, %v5689_v50 }
 0x5c2   :  { %9805 = vmatprep.subr.bf16.mxu1 %v11711_v56  ;;  %9848 = vmatprep.subr.bf16.mxu0 %v11713_v47  ;;  %v11781_v7 = vcombine.high %v5658_v12, %v5690_v6 }
 0x5c5   :  { %9806 = vmatpush1.bf16.msra.mxu1 %v11710_v10  ;;  %9849 = vmatpush1.bf16.msra.mxu0 %v11712_v9  ;;  %v11906_v10 = vcombine.low %v5785_v22, %v5817_v35  ;;  %v11908_v9 = vcombine.low %v5786_v41, %v5818_v44  ;;  %v5594_v22 = vld [vmem:[%s17695_s6 + $0x4c8] sm:$0xff]  ;;  %v11778_v41 = vcombine.low %v5657_v51, %v5689_v50 }
 0x5c6   :  { %9807 = vmatprep.subr.bf16.mxu1 %v11647_v19  ;;  %9850 = vmatprep.subr.bf16.mxu0 %v11649_v54  ;;  %v11843_v19 = vcombine.high %v5721_v49, %v5753_v2  ;;  %v11780_v44 = vcombine.low %v5658_v12, %v5690_v6 }
 0x5c9   :  { %9808 = vmatpush1.bf16.msra.mxu1 %v11646_v18  ;;  %9851 = vmatpush1.bf16.msra.mxu0 %v11648_v11 }
 0x5ca   :  { %9809 = vmatprep.subr.bf16.mxu1 %v11583_v1  ;;  %9852 = vmatprep.subr.bf16.mxu0 %v11585_v25 }
 0x5cd   :  { %9810 = vmatpush1.bf16.msra.mxu1 %v11582_v46  ;;  %9853 = vmatpush1.bf16.msra.mxu0 %v11584_v20 }
 0x5ce   :  { %9881 = vmatprep.subr.bf16.mxu1 %v12035_v31  ;;  %9924 = vmatprep.subr.bf16.mxu0 %v12037_v23 }
 0x5d0   :  { %v9313_v14 = vpop.f32.mrf.mxu1  ;;  %v9356_v39 = vpop.f32.mrf.mxu0  ;;  %9828 = vmatmul.mubr.bf16.vlgmr.msra.gmra.mxu1 %v15864_v63  ;;  %9871 = vmatmul.mubr.bf16.vlgmr.msra.gmra.mxu0 %v15864_v63 }
 0x5d1   :  { %v9314_v55 = vadd.f32 %v9313_v14, %v6052_v34  ;;  %v9357_v48 = vadd.f32 %v9356_v39, %v6060_v38  ;;  %9882 = vmatpush1.bf16.msra.mxu1 %v12034_v40  ;;  %9925 = vmatpush1.bf16.msra.mxu0 %v12036_v21 }
 0x5d2   :  { %v9315_v42 = vpop.f32.mrf.mxu1  ;;  %v9358_v53 = vpop.f32.mrf.mxu0  ;;  %9883 = vmatprep.subr.bf16.mxu1 %v11971_v26  ;;  %9926 = vmatprep.subr.bf16.mxu0 %v11973_v0  ;;  %v5593_v26 = vld [vmem:[%s17695_s6 + $0x4c0] sm:$0xff] }
 0x5d3   :  { %v9316_v56 = vadd.f32 %v9315_v42, %v6056_v58  ;;  %v9359_v47 = vadd.f32 %v9358_v53, %v6064_v33  ;;  %9913 = vmatprep.mubr.bf16.mxu1 %v17720_v36  ;;  %9956 = vmatprep.mubr.bf16.mxu0 %v17720_v36  ;;  %v10245_v54 = vmax.f32 %v9314_v55, 0.0  ;;  %v10247_v27 = vmax.f32 %v9357_v48, 0.0  ;;  %v5625_v0 = vld [vmem:[%s17695_s6 + $0x5c0] sm:$0xff]  ;;  %v5530_v48 = vld [vmem:[%s17695_s6 + $0x2c8] sm:$0xff] }
 0x5d4   :  { %v9317_v52 = vpop.f32.mrf.mxu1  ;;  %v9360_v8 = vpop.f32.mrf.mxu0  ;;  %v11715_v14 = vcombine.high %v5593_v26, %v5625_v0  ;;  %v5561_v55 = vld [vmem:[%s17695_s6 + $0x3c0] sm:$0xff]  ;;  %v11714_v49 = vcombine.low %v5593_v26, %v5625_v0 }
 0x5d5   :  { %v10246_v62 = vmax.f32 %v9316_v56, 0.0  ;;  %v10248_v4 = vmax.f32 %v9359_v47, 0.0  ;;  %9884 = vmatpush1.bf16.msra.mxu1 %v11970_v15  ;;  %9927 = vmatpush1.bf16.msra.mxu0 %v11972_v37  ;;  %v9318_v18 = vadd.f32 %v9317_v52, %v6052_v34  ;;  %v9361_v11 = vadd.f32 %v9360_v8, %v6060_v38  ;;  %v5529_v15 = vld [vmem:[%s17695_s6 + $0x2c0] sm:$0xff]  ;;  %v5562_v37 = vld [vmem:[%s17695_s6 + $0x3c8] sm:$0xff] }
 0x5d6   :  { %v9319_v1 = vpop.f32.mrf.mxu1  ;;  %v9362_v25 = vpop.f32.mrf.mxu0  ;;  %9885 = vmatprep.subr.bf16.mxu1 %v11907_v3  ;;  %9928 = vmatprep.subr.bf16.mxu0 %v11909_v45  ;;  %v11651_v42 = vcombine.high %v5529_v15, %v5561_v55  ;;  %v11653_v53 = vcombine.high %v5530_v48, %v5562_v37  ;;  %v5465_v3 = vld [vmem:[%s17695_s6 + $0xc0] sm:$0xff]  ;;  %v5466_v56 = vld [vmem:[%s17695_s6 + $0xc8] sm:$0xff]  ;;  %v11650_v59 = vcombine.low %v5529_v15, %v5561_v55  ;;  %v5724_v55 = vld [vmem:[%s17695_s6 + $0x8d8] sm:$0xff] }
 0x5d7   :  { %v12124_v46 = vpack.c.bf16 %v10246_v62, %v10245_v54  ;;  %v12125_v20 = vpack.c.bf16 %v10248_v4, %v10247_v27  ;;  %v9320_v31 = vadd.f32 %v9319_v1, %v6056_v58  ;;  %v9363_v23 = vadd.f32 %v9362_v25, %v6064_v33  ;;  %v5626_v58 = vld [vmem:[%s17695_s6 + $0x5c8] sm:$0xff]  ;;  %v5497_v45 = vld [vmem:[%s17695_s6 + $0x1c0] sm:$0xff]  ;;  %v5948_v54 = vld [vmem:[%s17695_s6 + $0xfd8] sm:$0xff] }
 0x5d8   :  { %v10309_v34 = vmax.f32 %v9318_v18, 0.0  ;;  %v10311_v38 = vmax.f32 %v9361_v11, 0.0  ;;  %v11717_v39 = vcombine.high %v5594_v22, %v5626_v58  ;;  %v11716_v2 = vcombine.low %v5594_v22, %v5626_v58  ;;  %v5498_v47 = vld [vmem:[%s17695_s6 + $0x1c8] sm:$0xff]  ;;  %v17210_v4 = vld [vmem:[%s17700_s7 + $0x18] sm:$0xff]  ;;  %v5851_v11 = vld [vmem:[%s17695_s6 + $0xcd0] sm:$0xff] }
 0x5d9   :  { %10747 = vst [vmem:[%s17701_s9 + $0x50] sm:$0xff] %v12124_v46  ;;  %10748 = vst [vmem:[%s17701_s9 + $0x58] sm:$0xff] %v12125_v20  ;;  %9886 = vmatpush1.bf16.msra.mxu1 %v11906_v10  ;;  %9929 = vmatpush1.bf16.msra.mxu0 %v11908_v9  ;;  %v10310_v40 = vmax.f32 %v9320_v31, 0.0  ;;  %v10312_v21 = vmax.f32 %v9363_v23, 0.0  ;;  %v11652_v61 = vcombine.low %v5530_v48, %v5562_v37  ;;  %v5915_v10 = vld [vmem:[%s17695_s6 + $0xed0] sm:$0xff]  ;;  %v5852_v25 = vld [vmem:[%s17695_s6 + $0xcd8] sm:$0xff] }
 0x5da   :  { %9887 = vmatprep.subr.bf16.mxu1 %v11843_v19  ;;  %9930 = vmatprep.subr.bf16.mxu0 %v11845_v28  ;;  %v11587_v52 = vcombine.high %v5465_v3, %v5497_v45  ;;  %v11589_v8 = vcombine.high %v5466_v56, %v5498_v47  ;;  %v5947_v9 = vld [vmem:[%s17695_s6 + $0xfd0] sm:$0xff]  ;;  %v5916_v19 = vld [vmem:[%s17695_s6 + $0xed8] sm:$0xff]  ;;  %v11586_v27 = vcombine.low %v5465_v3, %v5497_v45 }
 0x5db   :  { %v12156_v33 = vpack.c.bf16 %v10310_v40, %v10309_v34  ;;  %v12157_v35 = vpack.c.bf16 %v10312_v21, %v10311_v38  ;;  %v11588_v62 = vcombine.low %v5466_v56, %v5498_v47  ;;  %v12039_v51 = vcombine.high %v5915_v10, %v5947_v9  ;;  %v5883_v1 = vld [vmem:[%s17695_s6 + $0xdd0] sm:$0xff]  ;;  %v5884_v28 = vld [vmem:[%s17695_s6 + $0xdd8] sm:$0xff] }
 0x5dc   :  { %v12041_v18 = vcombine.high %v5916_v19, %v5948_v54  ;;  %v6068_v50 = vrot.slane %v17210_v4, %v17722_v30  ;;  %v6076_v12 = vrot.slane %v17210_v4, %v16455_v57  ;;  %v12038_v6 = vcombine.low %v5915_v10, %v5947_v9  ;;  %v5787_v23 = vld [vmem:[%s17695_s6 + $0xad0] sm:$0xff]  ;;  %v5820_v34 = vld [vmem:[%s17695_s6 + $0xbd8] sm:$0xff] }
 0x5dd   :  { %9888 = vmatpush1.bf16.msra.mxu1 %v11842_v29  ;;  %9931 = vmatpush1.bf16.msra.mxu0 %v11844_v32  ;;  %10779 = vst [vmem:[%s17701_s9 + $0x150] sm:$0xff] %v12156_v33  ;;  %10780 = vst [vmem:[%s17701_s9 + $0x158] sm:$0xff] %v12157_v35  ;;  %v12040_v46 = vcombine.low %v5916_v19, %v5948_v54  ;;  %v11975_v20 = vcombine.high %v5851_v11, %v5883_v1  ;;  %v5723_v58 = vld [vmem:[%s17695_s6 + $0x8d0] sm:$0xff]  ;;  %v5756_v48 = vld [vmem:[%s17695_s6 + $0x9d8] sm:$0xff] }
 0x5de   :  { %9889 = vmatprep.subr.bf16.mxu1 %v11779_v60  ;;  %9932 = vmatprep.subr.bf16.mxu0 %v11781_v7  ;;  %v11977_v31 = vcombine.high %v5852_v25, %v5884_v28  ;;  %v6072_v29 = vrot.slane %v17210_v4, %v17723_v17  ;;  %v6080_v32 = vrot.slane %v17210_v4, %v16466_v13  ;;  %v5819_v60 = vld [vmem:[%s17695_s6 + $0xbd0] sm:$0xff]  ;;  %v5788_v7 = vld [vmem:[%s17695_s6 + $0xad8] sm:$0xff] }
 0x5df   :  { %v11974_v21 = vcombine.low %v5851_v11, %v5883_v1  ;;  %v11976_v22 = vcombine.low %v5852_v25, %v5884_v28  ;;  %v5755_v33 = vld [vmem:[%s17695_s6 + $0x9d0] sm:$0xff]  ;;  %v11849_v9 = vcombine.high %v5724_v55, %v5756_v48  ;;  %v5660_v54 = vld [vmem:[%s17695_s6 + $0x6d8] sm:$0xff]  ;;  %v11848_v25 = vcombine.low %v5724_v55, %v5756_v48 }
 0x5e0   :  { %v5691_v19 = vld [vmem:[%s17695_s6 + $0x7d0] sm:$0xff]  ;;  %v11846_v1 = vcombine.low %v5723_v58, %v5755_v33  ;;  %v5500_v55 = vld [vmem:[%s17695_s6 + $0x1d8] sm:$0xff] }
 0x5e1   :  { %9890 = vmatpush1.bf16.msra.mxu1 %v11778_v41  ;;  %9933 = vmatpush1.bf16.msra.mxu0 %v11780_v44  ;;  %v11911_v44 = vcombine.high %v5787_v23, %v5819_v60 }
 0x5e2   :  { %9891 = vmatprep.subr.bf16.mxu1 %v11715_v14  ;;  %9934 = vmatprep.subr.bf16.mxu0 %v11717_v39  ;;  %v11913_v14 = vcombine.high %v5788_v7, %v5820_v34 }
 0x5e5   :  { %9892 = vmatpush1.bf16.msra.mxu1 %v11714_v49  ;;  %9935 = vmatpush1.bf16.msra.mxu0 %v11716_v2  ;;  %v11910_v2 = vcombine.low %v5787_v23, %v5819_v60  ;;  %v5627_v23 = vld [vmem:[%s17695_s6 + $0x5d0] sm:$0xff] }
 0x5e6   :  { %9893 = vmatprep.subr.bf16.mxu1 %v11651_v42  ;;  %9936 = vmatprep.subr.bf16.mxu0 %v11653_v53  ;;  %v11912_v42 = vcombine.low %v5788_v7, %v5820_v34  ;;  %v11847_v53 = vcombine.high %v5723_v58, %v5755_v33  ;;  %v5564_v58 = vld [vmem:[%s17695_s6 + $0x3d8] sm:$0xff] }
 0x5e9   :  { %9894 = vmatpush1.bf16.msra.mxu1 %v11650_v59  ;;  %9937 = vmatpush1.bf16.msra.mxu0 %v11652_v61  ;;  %v5659_v59 = vld [vmem:[%s17695_s6 + $0x6d0] sm:$0xff] }
 0x5ea   :  { %9895 = vmatprep.subr.bf16.mxu1 %v11587_v52  ;;  %9938 = vmatprep.subr.bf16.mxu0 %v11589_v8  ;;  %v11783_v28 = vcombine.high %v5659_v59, %v5691_v19  ;;  %v11782_v34 = vcombine.low %v5659_v59, %v5691_v19  ;;  %v6084_v19 = vrot.slane %v17210_v4, %v16586_v16 }
 0x5ed   :  { %9896 = vmatpush1.bf16.msra.mxu1 %v11586_v27  ;;  %9939 = vmatpush1.bf16.msra.mxu0 %v11588_v62  ;;  %v5692_v27 = vld [vmem:[%s17695_s6 + $0x7d8] sm:$0xff] }
 0x5ee   :  { %9967 = vmatprep.subr.bf16.mxu1 %v12039_v51  ;;  %10010 = vmatprep.subr.bf16.mxu0 %v12041_v18 }
 0x5f0   :  { %v9399_v38 = vpop.f32.mrf.mxu1  ;;  %v9442_v40 = vpop.f32.mrf.mxu0  ;;  %9914 = vmatmul.mubr.bf16.vlgmr.msra.gmra.mxu1 %v15864_v63  ;;  %9957 = vmatmul.mubr.bf16.vlgmr.msra.gmra.mxu0 %v15864_v63 }
 0x5f1   :  { %v9400_v26 = vadd.f32 %v9399_v38, %v6068_v50  ;;  %v9443_v0 = vadd.f32 %v9442_v40, %v6076_v12  ;;  %9968 = vmatpush1.bf16.msra.mxu1 %v12038_v6  ;;  %10011 = vmatpush1.bf16.msra.mxu0 %v12040_v46  ;;  %v11784_v38 = vcombine.low %v5660_v54, %v5692_v27 }
 0x5f2   :  { %v9401_v35 = vpop.f32.mrf.mxu1  ;;  %v9444_v41 = vpop.f32.mrf.mxu0  ;;  %9969 = vmatprep.subr.bf16.mxu1 %v11975_v20  ;;  %10012 = vmatprep.subr.bf16.mxu0 %v11977_v31  ;;  %v5595_v31 = vld [vmem:[%s17695_s6 + $0x4d0] sm:$0xff] }
 0x5f3   :  { %v9402_v39 = vadd.f32 %v9401_v35, %v6072_v29  ;;  %v9445_v15 = vadd.f32 %v9444_v41, %v6080_v32  ;;  %9999 = vmatprep.mubr.bf16.mxu1 %v17720_v36  ;;  %10042 = vmatprep.mubr.bf16.mxu0 %v17720_v36  ;;  %v10249_v3 = vmax.f32 %v9400_v26, 0.0  ;;  %v10251_v45 = vmax.f32 %v9443_v0, 0.0  ;;  %v5531_v26 = vld [vmem:[%s17695_s6 + $0x2d0] sm:$0xff] }
 0x5f4   :  { %v9403_v37 = vpop.f32.mrf.mxu1  ;;  %v9446_v49 = vpop.f32.mrf.mxu0  ;;  %v11719_v40 = vcombine.high %v5595_v31, %v5627_v23  ;;  %v5563_v0 = vld [vmem:[%s17695_s6 + $0x3d0] sm:$0xff]  ;;  %v11718_v33 = vcombine.low %v5595_v31, %v5627_v23 }
 0x5f5   :  { %v10250_v56 = vmax.f32 %v9402_v39, 0.0  ;;  %v10252_v47 = vmax.f32 %v9445_v15, 0.0  ;;  %9970 = vmatpush1.bf16.msra.mxu1 %v11974_v21  ;;  %10013 = vmatpush1.bf16.msra.mxu0 %v11976_v22  ;;  %v9404_v61 = vadd.f32 %v9403_v37, %v6068_v50  ;;  %v9447_v52 = vadd.f32 %v9446_v49, %v6076_v12  ;;  %v5532_v22 = vld [vmem:[%s17695_s6 + $0x2d8] sm:$0xff]  ;;  %v5499_v39 = vld [vmem:[%s17695_s6 + $0x1d0] sm:$0xff] }
 0x5f6   :  { %v9405_v8 = vpop.f32.mrf.mxu1  ;;  %v9448_v10 = vpop.f32.mrf.mxu0  ;;  %9971 = vmatprep.subr.bf16.mxu1 %v11911_v44  ;;  %10014 = vmatprep.subr.bf16.mxu0 %v11913_v14  ;;  %v11785_v50 = vcombine.high %v5660_v54, %v5692_v27  ;;  %v11655_v41 = vcombine.high %v5531_v26, %v5563_v0  ;;  %v11657_v44 = vcombine.high %v5532_v22, %v5564_v58  ;;  %v5467_v14 = vld [vmem:[%s17695_s6 + $0xd0] sm:$0xff]  ;;  %v5468_v15 = vld [vmem:[%s17695_s6 + $0xd8] sm:$0xff] }
 0x5f7   :  { %v12126_v62 = vpack.c.bf16 %v10250_v56, %v10249_v3  ;;  %v12127_v51 = vpack.c.bf16 %v10252_v47, %v10251_v45  ;;  %v9406_v18 = vadd.f32 %v9405_v8, %v6072_v29  ;;  %v9449_v11 = vadd.f32 %v9448_v10, %v6080_v32  ;;  %v5596_v29 = vld [vmem:[%s17695_s6 + $0x4d8] sm:$0xff]  ;;  %v5918_v3 = vld [vmem:[%s17695_s6 + $0xee8] sm:$0xff]  ;;  %v5885_v8 = vld [vmem:[%s17695_s6 + $0xde0] sm:$0xff] }
 0x5f8   :  { %v10313_v12 = vmax.f32 %v9404_v61, 0.0  ;;  %v10315_v6 = vmax.f32 %v9447_v52, 0.0  ;;  %v5628_v32 = vld [vmem:[%s17695_s6 + $0x5d8] sm:$0xff]  ;;  %v11654_v48 = vcombine.low %v5531_v26, %v5563_v0  ;;  %v11656_v37 = vcombine.low %v5532_v22, %v5564_v58  ;;  %v5950_v45 = vld [vmem:[%s17695_s6 + $0xfe8] sm:$0xff]  ;;  %v5853_v52 = vld [vmem:[%s17695_s6 + $0xce0] sm:$0xff] }
 0x5f9   :  { %10749 = vst [vmem:[%s17701_s9 + $0x60] sm:$0xff] %v12126_v62  ;;  %10750 = vst [vmem:[%s17701_s9 + $0x68] sm:$0xff] %v12127_v51  ;;  %9972 = vmatpush1.bf16.msra.mxu1 %v11910_v2  ;;  %10015 = vmatpush1.bf16.msra.mxu0 %v11912_v42  ;;  %v10314_v46 = vmax.f32 %v9406_v18, 0.0  ;;  %v10316_v20 = vmax.f32 %v9449_v11, 0.0  ;;  %v11721_v21 = vcombine.high %v5596_v29, %v5628_v32  ;;  %v5917_v42 = vld [vmem:[%s17695_s6 + $0xee0] sm:$0xff]  ;;  %v5854_v10 = vld [vmem:[%s17695_s6 + $0xce8] sm:$0xff] }
 0x5fa   :  { %9973 = vmatprep.subr.bf16.mxu1 %v11847_v53  ;;  %10016 = vmatprep.subr.bf16.mxu0 %v11849_v9  ;;  %v11720_v35 = vcombine.low %v5596_v29, %v5628_v32  ;;  %v11591_v49 = vcombine.high %v5467_v14, %v5499_v39  ;;  %v11593_v2 = vcombine.high %v5468_v15, %v5500_v55  ;;  %v5949_v53 = vld [vmem:[%s17695_s6 + $0xfe0] sm:$0xff]  ;;  %v5886_v9 = vld [vmem:[%s17695_s6 + $0xde8] sm:$0xff] }
 0x5fb   :  { %v12158_v60 = vpack.c.bf16 %v10314_v46, %v10313_v12  ;;  %v12159_v7 = vpack.c.bf16 %v10316_v20, %v10315_v6  ;;  %v11590_v56 = vcombine.low %v5467_v14, %v5499_v39  ;;  %v11592_v47 = vcombine.low %v5468_v15, %v5500_v55  ;;  %v5789_v11 = vld [vmem:[%s17695_s6 + $0xae0] sm:$0xff]  ;;  %v5822_v12 = vld [vmem:[%s17695_s6 + $0xbe8] sm:$0xff] }
 0x5fc   :  { %v12043_v59 = vcombine.high %v5917_v42, %v5949_v53  ;;  %v12045_v61 = vcombine.high %v5918_v3, %v5950_v45  ;;  %v6092_v54 = vrot.slane %v17210_v4, %v16589_v43  ;;  %v12042_v27 = vcombine.low %v5917_v42, %v5949_v53  ;;  %v5725_v29 = vld [vmem:[%s17695_s6 + $0x8e0] sm:$0xff]  ;;  %v5726_v26 = vld [vmem:[%s17695_s6 + $0x8e8] sm:$0xff] }
 0x5fd   :  { %9974 = vmatpush1.bf16.msra.mxu1 %v11846_v1  ;;  %10017 = vmatpush1.bf16.msra.mxu0 %v11848_v25  ;;  %10781 = vst [vmem:[%s17701_s9 + $0x160] sm:$0xff] %v12158_v60  ;;  %10782 = vst [vmem:[%s17701_s9 + $0x168] sm:$0xff] %v12159_v7  ;;  %v12044_v62 = vcombine.low %v5918_v3, %v5950_v45  ;;  %v11979_v51 = vcombine.high %v5853_v52, %v5885_v8  ;;  %v5757_v32 = vld [vmem:[%s17695_s6 + $0x9e0] sm:$0xff]  ;;  %v5758_v0 = vld [vmem:[%s17695_s6 + $0x9e8] sm:$0xff] }
 0x5fe   :  { %9975 = vmatprep.subr.bf16.mxu1 %v11783_v28  ;;  %10018 = vmatprep.subr.bf16.mxu0 %v11785_v50  ;;  %v11981_v18 = vcombine.high %v5854_v10, %v5886_v9  ;;  %v6088_v1 = vrot.slane %v17210_v4, %v16595_v5  ;;  %v6096_v25 = vrot.slane %v17210_v4, %v16598_v24  ;;  %v5821_v28 = vld [vmem:[%s17695_s6 + $0xbe0] sm:$0xff]  ;;  %v5790_v50 = vld [vmem:[%s17695_s6 + $0xae8] sm:$0xff] }
 0x5ff   :  { %v11978_v20 = vcombine.low %v5853_v52, %v5885_v8  ;;  %v11980_v23 = vcombine.low %v5854_v10, %v5886_v9  ;;  %v5661_v55 = vld [vmem:[%s17695_s6 + $0x6e0] sm:$0xff]  ;;  %v11853_v42 = vcombine.high %v5726_v26, %v5758_v0  ;;  %v5662_v3 = vld [vmem:[%s17695_s6 + $0x6e8] sm:$0xff]  ;;  %v11850_v52 = vcombine.low %v5725_v29, %v5757_v32 }
 0x600   :  { %v5693_v53 = vld [vmem:[%s17695_s6 + $0x7e0] sm:$0xff]  ;;  %v5694_v45 = vld [vmem:[%s17695_s6 + $0x7e8] sm:$0xff]  ;;  %v11852_v8 = vcombine.low %v5726_v26, %v5758_v0 }
 0x601   :  { %9976 = vmatpush1.bf16.msra.mxu1 %v11782_v34  ;;  %10019 = vmatpush1.bf16.msra.mxu0 %v11784_v38  ;;  %v11915_v34 = vcombine.high %v5789_v11, %v5821_v28  ;;  %v11917_v38 = vcombine.high %v5790_v50, %v5822_v12  ;;  %v11787_v10 = vcombine.high %v5661_v55, %v5693_v53 }
 0x602   :  { %9977 = vmatprep.subr.bf16.mxu1 %v11719_v40  ;;  %10020 = vmatprep.subr.bf16.mxu0 %v11721_v21  ;;  %v11789_v9 = vcombine.high %v5662_v3, %v5694_v45 }
 0x605   :  { %9978 = vmatpush1.bf16.msra.mxu1 %v11718_v33  ;;  %10021 = vmatpush1.bf16.msra.mxu0 %v11720_v35  ;;  %v11914_v33 = vcombine.low %v5789_v11, %v5821_v28  ;;  %v11916_v35 = vcombine.low %v5790_v50, %v5822_v12  ;;  %v5598_v11 = vld [vmem:[%s17695_s6 + $0x4e8] sm:$0xff]  ;;  %v11786_v50 = vcombine.low %v5661_v55, %v5693_v53 }
 0x606   :  { %9979 = vmatprep.subr.bf16.mxu1 %v11655_v41  ;;  %10022 = vmatprep.subr.bf16.mxu0 %v11657_v44  ;;  %v11851_v41 = vcombine.high %v5725_v29, %v5757_v32  ;;  %v11788_v12 = vcombine.low %v5662_v3, %v5694_v45 }
 0x609   :  { %9980 = vmatpush1.bf16.msra.mxu1 %v11654_v48  ;;  %10023 = vmatpush1.bf16.msra.mxu0 %v11656_v37 }
 0x60a   :  { %9981 = vmatprep.subr.bf16.mxu1 %v11591_v49  ;;  %10024 = vmatprep.subr.bf16.mxu0 %v11593_v2 }
 0x60d   :  { %9982 = vmatpush1.bf16.msra.mxu1 %v11590_v56  ;;  %10025 = vmatpush1.bf16.msra.mxu0 %v11592_v47 }
 0x60e   :  { %10053 = vmatprep.subr.bf16.mxu1 %v12043_v59  ;;  %10096 = vmatprep.subr.bf16.mxu0 %v12045_v61 }
 0x610   :  { %v9485_v6 = vpop.f32.mrf.mxu1  ;;  %v9528_v46 = vpop.f32.mrf.mxu0  ;;  %10000 = vmatmul.mubr.bf16.vlgmr.msra.gmra.mxu1 %v15864_v63  ;;  %10043 = vmatmul.mubr.bf16.vlgmr.msra.gmra.mxu0 %v15864_v63 }
 0x611   :  { %v9486_v4 = vadd.f32 %v9485_v6, %v6084_v19  ;;  %v9529_v31 = vadd.f32 %v9528_v46, %v6092_v54  ;;  %10054 = vmatpush1.bf16.msra.mxu1 %v12042_v27  ;;  %10097 = vmatpush1.bf16.msra.mxu0 %v12044_v62 }
 0x612   :  { %v9487_v60 = vpop.f32.mrf.mxu1  ;;  %v9530_v7 = vpop.f32.mrf.mxu0  ;;  %10055 = vmatprep.subr.bf16.mxu1 %v11979_v51  ;;  %10098 = vmatprep.subr.bf16.mxu0 %v11981_v18  ;;  %v5597_v51 = vld [vmem:[%s17695_s6 + $0x4e0] sm:$0xff] }
 0x613   :  { %v9488_v40 = vadd.f32 %v9487_v60, %v6088_v1  ;;  %v9531_v21 = vadd.f32 %v9530_v7, %v6096_v25  ;;  %10085 = vmatprep.mubr.bf16.mxu1 %v17720_v36  ;;  %10128 = vmatprep.mubr.bf16.mxu0 %v17720_v36  ;;  %v10253_v44 = vmax.f32 %v9486_v4, 0.0  ;;  %v10255_v14 = vmax.f32 %v9529_v31, 0.0  ;;  %v5629_v18 = vld [vmem:[%s17695_s6 + $0x5e0] sm:$0xff]  ;;  %v5534_v31 = vld [vmem:[%s17695_s6 + $0x2e8] sm:$0xff] }
 0x614   :  { %v9489_v22 = vpop.f32.mrf.mxu1  ;;  %v9532_v58 = vpop.f32.mrf.mxu0  ;;  %v11723_v6 = vcombine.high %v5597_v51, %v5629_v18  ;;  %v5565_v4 = vld [vmem:[%s17695_s6 + $0x3e0] sm:$0xff]  ;;  %v11722_v29 = vcombine.low %v5597_v51, %v5629_v18 }
 0x615   :  { %v10254_v39 = vmax.f32 %v9488_v40, 0.0  ;;  %v10256_v15 = vmax.f32 %v9531_v21, 0.0  ;;  %10056 = vmatpush1.bf16.msra.mxu1 %v11978_v20  ;;  %10099 = vmatpush1.bf16.msra.mxu0 %v11980_v23  ;;  %v9490_v48 = vadd.f32 %v9489_v22, %v6084_v19  ;;  %v9533_v37 = vadd.f32 %v9532_v58, %v6092_v54  ;;  %v5533_v20 = vld [vmem:[%s17695_s6 + $0x2e0] sm:$0xff]  ;;  %v5566_v23 = vld [vmem:[%s17695_s6 + $0x3e8] sm:$0xff] }
 0x616   :  { %v9491_v49 = vpop.f32.mrf.mxu1  ;;  %v9534_v2 = vpop.f32.mrf.mxu0  ;;  %10057 = vmatprep.subr.bf16.mxu1 %v11915_v34  ;;  %10100 = vmatprep.subr.bf16.mxu0 %v11917_v38  ;;  %v11659_v60 = vcombine.high %v5533_v20, %v5565_v4  ;;  %v11661_v7 = vcombine.high %v5534_v31, %v5566_v23  ;;  %v5469_v34 = vld [vmem:[%s17695_s6 + $0xe0] sm:$0xff]  ;;  %v5470_v40 = vld [vmem:[%s17695_s6 + $0xe8] sm:$0xff]  ;;  %v11658_v26 = vcombine.low %v5533_v20, %v5565_v4  ;;  %v5728_v4 = vld [vmem:[%s17695_s6 + $0x8f8] sm:$0xff] }
 0x617   :  { %v12128_v56 = vpack.c.bf16 %v10254_v39, %v10253_v44  ;;  %v12129_v47 = vpack.c.bf16 %v10256_v15, %v10255_v14  ;;  %v9492_v59 = vadd.f32 %v9491_v49, %v6088_v1  ;;  %v9535_v61 = vadd.f32 %v9534_v2, %v6096_v25  ;;  %v5630_v1 = vld [vmem:[%s17695_s6 + $0x5e8] sm:$0xff]  ;;  %v5501_v38 = vld [vmem:[%s17695_s6 + $0x1e0] sm:$0xff]  ;;  %v5952_v44 = vld [vmem:[%s17695_s6 + $0xff8] sm:$0xff] }
 0x618   :  { %v10317_v19 = vmax.f32 %v9490_v48, 0.0  ;;  %v10319_v54 = vmax.f32 %v9533_v37, 0.0  ;;  %v11725_v46 = vcombine.high %v5598_v11, %v5630_v1  ;;  %v11724_v32 = vcombine.low %v5598_v11, %v5630_v1  ;;  %v5502_v21 = vld [vmem:[%s17695_s6 + $0x1e8] sm:$0xff]  ;;  %v17455_v15 = vld [vmem:[%s17700_s7 + $0x20] sm:$0xff]  ;;  %v5855_v37 = vld [vmem:[%s17695_s6 + $0xcf0] sm:$0xff] }
 0x619   :  { %10751 = vst [vmem:[%s17701_s9 + $0x70] sm:$0xff] %v12128_v56  ;;  %10752 = vst [vmem:[%s17701_s9 + $0x78] sm:$0xff] %v12129_v47  ;;  %10058 = vmatpush1.bf16.msra.mxu1 %v11914_v33  ;;  %10101 = vmatpush1.bf16.msra.mxu0 %v11916_v35  ;;  %v10318_v27 = vmax.f32 %v9492_v59, 0.0  ;;  %v10320_v62 = vmax.f32 %v9535_v61, 0.0  ;;  %v11660_v0 = vcombine.low %v5534_v31, %v5566_v23  ;;  %v5919_v33 = vld [vmem:[%s17695_s6 + $0xef0] sm:$0xff]  ;;  %v5856_v2 = vld [vmem:[%s17695_s6 + $0xcf8] sm:$0xff] }
 0x61a   :  { %10059 = vmatprep.subr.bf16.mxu1 %v11851_v41  ;;  %10102 = vmatprep.subr.bf16.mxu0 %v11853_v42  ;;  %v11595_v22 = vcombine.high %v5469_v34, %v5501_v38  ;;  %v11597_v58 = vcombine.high %v5470_v40, %v5502_v21  ;;  %v5951_v35 = vld [vmem:[%s17695_s6 + $0xff0] sm:$0xff]  ;;  %v5920_v41 = vld [vmem:[%s17695_s6 + $0xef8] sm:$0xff]  ;;  %v11594_v14 = vcombine.low %v5469_v34, %v5501_v38 }
 0x61b   :  { %v12160_v25 = vpack.c.bf16 %v10318_v27, %v10317_v19  ;;  %v12161_v28 = vpack.c.bf16 %v10320_v62, %v10319_v54  ;;  %v11596_v39 = vcombine.low %v5470_v40, %v5502_v21  ;;  %v12047_v55 = vcombine.high %v5919_v33, %v5951_v35  ;;  %v5887_v49 = vld [vmem:[%s17695_s6 + $0xdf0] sm:$0xff]  ;;  %v5888_v42 = vld [vmem:[%s17695_s6 + $0xdf8] sm:$0xff] }
 0x61c   :  { %v12049_v48 = vcombine.high %v5920_v41, %v5952_v44  ;;  %v6100_v53 = vrot.slane %v17455_v15, %v17722_v30  ;;  %v6108_v3 = vrot.slane %v17455_v15, %v16455_v57  ;;  %v12046_v45 = vcombine.low %v5919_v33, %v5951_v35  ;;  %v5791_v61 = vld [vmem:[%s17695_s6 + $0xaf0] sm:$0xff]  ;;  %v5824_v19 = vld [vmem:[%s17695_s6 + $0xbf8] sm:$0xff] }
 0x61d   :  { %10060 = vmatpush1.bf16.msra.mxu1 %v11850_v52  ;;  %10103 = vmatpush1.bf16.msra.mxu0 %v11852_v8  ;;  %10783 = vst [vmem:[%s17701_s9 + $0x170] sm:$0xff] %v12160_v25  ;;  %10784 = vst [vmem:[%s17701_s9 + $0x178] sm:$0xff] %v12161_v28  ;;  %v12048_v56 = vcombine.low %v5920_v41, %v5952_v44  ;;  %v11983_v47 = vcombine.high %v5855_v37, %v5887_v49  ;;  %v5727_v1 = vld [vmem:[%s17695_s6 + $0x8f0] sm:$0xff]  ;;  %v5760_v31 = vld [vmem:[%s17695_s6 + $0x9f8] sm:$0xff] }
 0x61e   :  { %10061 = vmatprep.subr.bf16.mxu1 %v11787_v10  ;;  %10104 = vmatprep.subr.bf16.mxu0 %v11789_v9  ;;  %v11985_v59 = vcombine.high %v5856_v2, %v5888_v42  ;;  %v6104_v52 = vrot.slane %v17455_v15, %v17723_v17  ;;  %v6112_v8 = vrot.slane %v17455_v15, %v16466_v13  ;;  %v5823_v10 = vld [vmem:[%s17695_s6 + $0xbf0] sm:$0xff]  ;;  %v5792_v9 = vld [vmem:[%s17695_s6 + $0xaf8] sm:$0xff] }
 0x61f   :  { %v11982_v62 = vcombine.low %v5855_v37, %v5887_v49  ;;  %v11984_v11 = vcombine.low %v5856_v2, %v5888_v42  ;;  %v5759_v25 = vld [vmem:[%s17695_s6 + $0x9f0] sm:$0xff]  ;;  %v5664_v41 = vld [vmem:[%s17695_s6 + $0x6f8] sm:$0xff]  ;;  %v11856_v49 = vcombine.low %v5728_v4, %v5760_v31 }
 0x620   :  { %v5695_v35 = vld [vmem:[%s17695_s6 + $0x7f0] sm:$0xff]  ;;  %v5696_v44 = vld [vmem:[%s17695_s6 + $0x7f8] sm:$0xff]  ;;  %v11854_v37 = vcombine.low %v5727_v1, %v5759_v25 }
 0x621   :  { %10062 = vmatpush1.bf16.msra.mxu1 %v11786_v50  ;;  %10105 = vmatpush1.bf16.msra.mxu0 %v11788_v12  ;;  %v11919_v12 = vcombine.high %v5791_v61, %v5823_v10  ;;  %v11793_v42 = vcombine.high %v5664_v41, %v5696_v44 }
 0x622   :  { %10063 = vmatprep.subr.bf16.mxu1 %v11723_v6  ;;  %10106 = vmatprep.subr.bf16.mxu0 %v11725_v46  ;;  %v11921_v6 = vcombine.high %v5792_v9, %v5824_v19 }
 0x625   :  { %10064 = vmatpush1.bf16.msra.mxu1 %v11722_v29  ;;  %10107 = vmatpush1.bf16.msra.mxu0 %v11724_v32  ;;  %v11918_v32 = vcombine.low %v5791_v61, %v5823_v10  ;;  %v5600_v61 = vld [vmem:[%s17695_s6 + $0x4f8] sm:$0xff] }
 0x626   :  { %10065 = vmatprep.subr.bf16.mxu1 %v11659_v60  ;;  %10108 = vmatprep.subr.bf16.mxu0 %v11661_v7  ;;  %v11920_v60 = vcombine.low %v5792_v9, %v5824_v19  ;;  %v11855_v7 = vcombine.high %v5727_v1, %v5759_v25  ;;  %v11792_v19 = vcombine.low %v5664_v41, %v5696_v44 }
 0x629   :  { %10066 = vmatpush1.bf16.msra.mxu1 %v11658_v26  ;;  %10109 = vmatpush1.bf16.msra.mxu0 %v11660_v0  ;;  %v5663_v26 = vld [vmem:[%s17695_s6 + $0x6f0] sm:$0xff] }
 0x62a   :  { %10067 = vmatprep.subr.bf16.mxu1 %v11595_v22  ;;  %10110 = vmatprep.subr.bf16.mxu0 %v11597_v58  ;;  %v11791_v2 = vcombine.high %v5663_v26, %v5695_v35  ;;  %v11790_v9 = vcombine.low %v5663_v26, %v5695_v35 }
 0x62d   :  { %10068 = vmatpush1.bf16.msra.mxu1 %v11594_v14  ;;  %10111 = vmatpush1.bf16.msra.mxu0 %v11596_v39 }
 0x62e   :  { %10139 = vmatprep.subr.bf16.mxu1 %v12047_v55  ;;  %10182 = vmatprep.subr.bf16.mxu0 %v12049_v48 }
 0x630   :  { %v9571_v54 = vpop.f32.mrf.mxu1  ;;  %v9614_v27 = vpop.f32.mrf.mxu0  ;;  %10086 = vmatmul.mubr.bf16.vlgmr.msra.gmra.mxu1 %v15864_v63  ;;  %10129 = vmatmul.mubr.bf16.vlgmr.msra.gmra.mxu0 %v15864_v63 }
 0x631   :  { %v9572_v51 = vadd.f32 %v9571_v54, %v6100_v53  ;;  %v9615_v18 = vadd.f32 %v9614_v27, %v6108_v3  ;;  %10140 = vmatpush1.bf16.msra.mxu1 %v12046_v45  ;;  %10183 = vmatpush1.bf16.msra.mxu0 %v12048_v56 }
 0x632   :  { %v9573_v28 = vpop.f32.mrf.mxu1  ;;  %v9616_v50 = vpop.f32.mrf.mxu0  ;;  %10141 = vmatprep.subr.bf16.mxu1 %v11983_v47  ;;  %10184 = vmatprep.subr.bf16.mxu0 %v11985_v59  ;;  %v5599_v47 = vld [vmem:[%s17695_s6 + $0x4f0] sm:$0xff] }
 0x633   :  { %v9574_v46 = vadd.f32 %v9573_v28, %v6104_v52  ;;  %v9617_v20 = vadd.f32 %v9616_v50, %v6112_v8  ;;  %10171 = vmatprep.mubr.bf16.mxu1 %v17720_v36  ;;  %10214 = vmatprep.mubr.bf16.mxu0 %v17720_v36  ;;  %v10257_v34 = vmax.f32 %v9572_v51, 0.0  ;;  %v10259_v38 = vmax.f32 %v9615_v18, 0.0  ;;  %v5631_v59 = vld [vmem:[%s17695_s6 + $0x5f0] sm:$0xff]  ;;  %v5536_v18 = vld [vmem:[%s17695_s6 + $0x2f8] sm:$0xff] }
 0x634   :  { %v9575_v23 = vpop.f32.mrf.mxu1  ;;  %v9618_v29 = vpop.f32.mrf.mxu0  ;;  %v11857_v36 = vcombine.high %v5728_v4, %v5760_v31  ;;  %v11727_v54 = vcombine.high %v5599_v47, %v5631_v59  ;;  %v5567_v51 = vld [vmem:[%s17695_s6 + $0x3f0] sm:$0xff]  ;;  %v11726_v1 = vcombine.low %v5599_v47, %v5631_v59 }
 0x635   :  { %v10258_v40 = vmax.f32 %v9574_v46, 0.0  ;;  %v10260_v21 = vmax.f32 %v9617_v20, 0.0  ;;  %10142 = vmatpush1.bf16.msra.mxu1 %v11982_v62  ;;  %10185 = vmatpush1.bf16.msra.mxu0 %v11984_v11  ;;  %v9576_v0 = vadd.f32 %v9575_v23, %v6100_v53  ;;  %v9619_v22 = vadd.f32 %v9618_v29, %v6108_v3  ;;  %v5535_v62 = vld [vmem:[%s17695_s6 + $0x2f0] sm:$0xff]  ;;  %v5568_v11 = vld [vmem:[%s17695_s6 + $0x3f8] sm:$0xff] }
 0x636   :  { %v9577_v58 = vpop.f32.mrf.mxu1  ;;  %v9620_v33 = vpop.f32.mrf.mxu0  ;;  %10143 = vmatprep.subr.bf16.mxu1 %v11919_v12  ;;  %10186 = vmatprep.subr.bf16.mxu0 %v11921_v6  ;;  %v11663_v28 = vcombine.high %v5535_v62, %v5567_v51  ;;  %v11665_v50 = vcombine.high %v5536_v18, %v5568_v11  ;;  %v5471_v12 = vld [vmem:[%s17695_s6 + $0xf0] sm:$0xff]  ;;  %v5472_v46 = vld [vmem:[%s17695_s6 + $0xf8] sm:$0xff]  ;;  %v11662_v4 = vcombine.low %v5535_v62, %v5567_v51 }
 0x637   :  { %v12130_v14 = vpack.c.bf16 %v10258_v40, %v10257_v34  ;;  %v12131_v39 = vpack.c.bf16 %v10260_v21, %v10259_v38  ;;  %v9578_v55 = vadd.f32 %v9577_v58, %v6104_v52  ;;  %v9621_v48 = vadd.f32 %v9620_v33, %v6112_v8  ;;  %v5632_v52 = vld [vmem:[%s17695_s6 + $0x5f8] sm:$0xff]  ;;  %v5503_v6 = vld [vmem:[%s17695_s6 + $0x1f0] sm:$0xff] }
 0x638   :  { %v10321_v53 = vmax.f32 %v9576_v0, 0.0  ;;  %v10323_v3 = vmax.f32 %v9619_v22, 0.0  ;;  %v11729_v27 = vcombine.high %v5600_v61, %v5632_v52  ;;  %v11728_v25 = vcombine.low %v5600_v61, %v5632_v52  ;;  %v5504_v20 = vld [vmem:[%s17695_s6 + $0x1f8] sm:$0xff] }
 0x639   :  { %10753 = vst [vmem:[%s17701_s9 + $0x80] sm:$0xff] %v12130_v14  ;;  %10754 = vst [vmem:[%s17701_s9 + $0x88] sm:$0xff] %v12131_v39  ;;  %10144 = vmatpush1.bf16.msra.mxu1 %v11918_v32  ;;  %10187 = vmatpush1.bf16.msra.mxu0 %v11920_v60  ;;  %v10322_v45 = vmax.f32 %v9578_v55, 0.0  ;;  %v10324_v56 = vmax.f32 %v9621_v48, 0.0  ;;  %v11664_v31 = vcombine.low %v5536_v18, %v5568_v11 }
 0x63a   :  { %10145 = vmatprep.subr.bf16.mxu1 %v11855_v7  ;;  %10188 = vmatprep.subr.bf16.mxu0 %v11857_v36  ;;  %v11599_v23 = vcombine.high %v5471_v12, %v5503_v6  ;;  %v11601_v29 = vcombine.high %v5472_v46, %v5504_v20  ;;  %v11598_v32 = vcombine.low %v5471_v12, %v5503_v6 }
 0x63b   :  { %v12162_v8 = vpack.c.bf16 %v10322_v45, %v10321_v53  ;;  %v12163_v10 = vpack.c.bf16 %v10324_v56, %v10323_v3  ;;  %v11600_v60 = vcombine.low %v5472_v46, %v5504_v20  ;;  %v6116_v7 = vrot.slane %v17455_v15, %v16586_v16 }
 0x63c   :  { %v6124_v34 = vrot.slane %v17455_v15, %v16589_v43  ;;  %v6120_v38 = vrot.slane %v17455_v15, %v16595_v5  ;;  %v6128_v40 = vrot.slane %v17455_v15, %v16598_v24 }
 0x63d   :  { %10146 = vmatpush1.bf16.msra.mxu1 %v11854_v37  ;;  %10189 = vmatpush1.bf16.msra.mxu0 %v11856_v49  ;;  %10785 = vst [vmem:[%s17701_s9 + $0x180] sm:$0xff] %v12162_v8  ;;  %10786 = vst [vmem:[%s17701_s9 + $0x188] sm:$0xff] %v12163_v10  ;;  %v5958_v8 = vld [vmem:[%s17700_s7 + $0x28] sm:$0xff] }
 0x63e   :  { %10147 = vmatprep.subr.bf16.mxu1 %v11791_v2  ;;  %10190 = vmatprep.subr.bf16.mxu0 %v11793_v42  ;;  %v6132_v10 = vrot.slane %v5958_v8, %v17722_v30 }
 0x641   :  { %10148 = vmatpush1.bf16.msra.mxu1 %v11790_v9  ;;  %10191 = vmatpush1.bf16.msra.mxu0 %v11792_v19  ;;  %v6140_v9 = vrot.slane %v5958_v8, %v16455_v57  ;;  %v6136_v19 = vrot.slane %v5958_v8, %v17723_v17 }
 0x642   :  { %10149 = vmatprep.subr.bf16.mxu1 %v11727_v54  ;;  %10192 = vmatprep.subr.bf16.mxu0 %v11729_v27  ;;  %v6144_v54 = vrot.slane %v5958_v8, %v16466_v13 }
 0x645   :  { %10150 = vmatpush1.bf16.msra.mxu1 %v11726_v1  ;;  %10193 = vmatpush1.bf16.msra.mxu0 %v11728_v25 }
 0x646   :  { %10151 = vmatprep.subr.bf16.mxu1 %v11663_v28  ;;  %10194 = vmatprep.subr.bf16.mxu0 %v11665_v50 }
 0x649   :  { %10152 = vmatpush1.bf16.msra.mxu1 %v11662_v4  ;;  %10195 = vmatpush1.bf16.msra.mxu0 %v11664_v31 }
 0x64a   :  { %10153 = vmatprep.subr.bf16.mxu1 %v11599_v23  ;;  %10196 = vmatprep.subr.bf16.mxu0 %v11601_v29 }
 0x64d   :  { %10154 = vmatpush1.bf16.msra.mxu1 %v11598_v32  ;;  %10197 = vmatpush1.bf16.msra.mxu0 %v11600_v60 }
 0x650   :  { %v9657_v21 = vpop.f32.mrf.mxu1  ;;  %v9700_v26 = vpop.f32.mrf.mxu0  ;;  %10172 = vmatmul.mubr.bf16.vlgmr.msra.gmra.mxu1 %v15864_v63  ;;  %10215 = vmatmul.mubr.bf16.vlgmr.msra.gmra.mxu0 %v15864_v63 }
 0x651   :  { %v9658_v0 = vadd.f32 %v9657_v21, %v6116_v7  ;;  %v9701_v22 = vadd.f32 %v9700_v26, %v6124_v34 }
 0x652   :  { %v9659_v58 = vpop.f32.mrf.mxu1  ;;  %v9702_v33 = vpop.f32.mrf.mxu0 }
 0x653   :  { %v9660_v36 = vadd.f32 %v9659_v58, %v6120_v38  ;;  %v9703_v35 = vadd.f32 %v9702_v33, %v6128_v40  ;;  %v10261_v14 = vmax.f32 %v9658_v0, 0.0  ;;  %v10263_v39 = vmax.f32 %v9701_v22, 0.0 }
 0x654   :  { %v9661_v41 = vpop.f32.mrf.mxu1  ;;  %v9704_v44 = vpop.f32.mrf.mxu0  ;;  %v6148_v33 = vrot.slane %v5958_v8, %v16586_v16 }
 0x655   :  { %v10262_v55 = vmax.f32 %v9660_v36, 0.0  ;;  %v10264_v48 = vmax.f32 %v9703_v35, 0.0  ;;  %v9662_v37 = vadd.f32 %v9661_v41, %v6116_v7  ;;  %v9705_v15 = vadd.f32 %v9704_v44, %v6124_v34 }
 0x656   :  { %v9663_v49 = vpop.f32.mrf.mxu1  ;;  %v9706_v2 = vpop.f32.mrf.mxu0  ;;  %v6156_v36 = vrot.slane %v5958_v8, %v16589_v43  ;;  %v6152_v35 = vrot.slane %v5958_v8, %v16595_v5  ;;  %v6160_v41 = vrot.slane %v5958_v8, %v16598_v24 }
 0x657   :  { %v12132_v42 = vpack.c.bf16 %v10262_v55, %v10261_v14  ;;  %v12133_v53 = vpack.c.bf16 %v10264_v48, %v10263_v39  ;;  %v9664_v3 = vadd.f32 %v9663_v49, %v6120_v38  ;;  %v9707_v63 = vadd.f32 %v9706_v2, %v6128_v40 }
 0x658   :  { %v10325_v45 = vmax.f32 %v9662_v37, 0.0  ;;  %v10327_v56 = vmax.f32 %v9705_v15, 0.0 }
 0x659   :  { %10755 = vst [vmem:[%s17701_s9 + $0x90] sm:$0xff] %v12132_v42  ;;  %10756 = vst [vmem:[%s17701_s9 + $0x98] sm:$0xff] %v12133_v53  ;;  %v10326_v47 = vmax.f32 %v9664_v3, 0.0  ;;  %v10328_v59 = vmax.f32 %v9707_v63, 0.0 }
 0x65b   :  { %v12164_v61 = vpack.c.bf16 %v10326_v47, %v10325_v45  ;;  %v12165_v52 = vpack.c.bf16 %v10328_v59, %v10327_v56 }
 0x65d   :  { %10787 = vst [vmem:[%s17701_s9 + $0x190] sm:$0xff] %v12164_v61  ;;  %10788 = vst [vmem:[%s17701_s9 + $0x198] sm:$0xff] %v12165_v52 }
 0x670   :  { %v9743_v27 = vpop.f32.mrf.mxu1  ;;  %v9786_v62 = vpop.f32.mrf.mxu0 }
 0x671   :  { %v9744_v51 = vadd.f32 %v9743_v27, %v6132_v10  ;;  %v9787_v18 = vadd.f32 %v9786_v62, %v6140_v9 }
 0x672   :  { %v9745_v11 = vpop.f32.mrf.mxu1  ;;  %v9788_v1 = vpop.f32.mrf.mxu0 }
 0x673   :  { %v9746_v25 = vadd.f32 %v9745_v11, %v6136_v19  ;;  %v9789_v28 = vadd.f32 %v9788_v1, %v6144_v54  ;;  %v10265_v6 = vmax.f32 %v9744_v51, 0.0  ;;  %v10267_v46 = vmax.f32 %v9787_v18, 0.0  ;;  %v5959_v11 = vld [vmem:[%s17700_s7 + $0x30] sm:$0xff] }
 0x674   :  { %v9747_v50 = vpop.f32.mrf.mxu1  ;;  %v9790_v12 = vpop.f32.mrf.mxu0  ;;  %v6164_v1 = vrot.slane %v5959_v11, %v17722_v30 }
 0x675   :  { %v10266_v20 = vmax.f32 %v9746_v25, 0.0  ;;  %v10268_v4 = vmax.f32 %v9789_v28, 0.0  ;;  %v9748_v31 = vadd.f32 %v9747_v50, %v6132_v10  ;;  %v9791_v23 = vadd.f32 %v9790_v12, %v6140_v9 }
 0x676   :  { %v9749_v29 = vpop.f32.mrf.mxu1  ;;  %v9792_v32 = vpop.f32.mrf.mxu0  ;;  %v6172_v25 = vrot.slane %v5959_v11, %v16455_v57  ;;  %v6168_v28 = vrot.slane %v5959_v11, %v17723_v17  ;;  %v6176_v50 = vrot.slane %v5959_v11, %v16466_v13 }
 0x677   :  { %v12134_v60 = vpack.c.bf16 %v10266_v20, %v10265_v6  ;;  %v12135_v7 = vpack.c.bf16 %v10268_v4, %v10267_v46  ;;  %v9750_v34 = vadd.f32 %v9749_v29, %v6136_v19  ;;  %v9793_v38 = vadd.f32 %v9792_v32, %v6144_v54 }
 0x678   :  { %v10329_v40 = vmax.f32 %v9748_v31, 0.0  ;;  %v10331_v21 = vmax.f32 %v9791_v23, 0.0 }
 0x679   :  { %10757 = vst [vmem:[%s17701_s9 + $0xa0] sm:$0xff] %v12134_v60  ;;  %10758 = vst [vmem:[%s17701_s9 + $0xa8] sm:$0xff] %v12135_v7  ;;  %v10330_v26 = vmax.f32 %v9750_v34, 0.0  ;;  %v10332_v0 = vmax.f32 %v9793_v38, 0.0 }
 0x67b   :  { %v12166_v22 = vpack.c.bf16 %v10330_v26, %v10329_v40  ;;  %v12167_v58 = vpack.c.bf16 %v10332_v0, %v10331_v21 }
 0x67d   :  { %10789 = vst [vmem:[%s17701_s9 + $0x1a0] sm:$0xff] %v12166_v22  ;;  %10790 = vst [vmem:[%s17701_s9 + $0x1a8] sm:$0xff] %v12167_v58 }
 0x690   :  { %v9829_v44 = vpop.f32.mrf.mxu1  ;;  %v9872_v14 = vpop.f32.mrf.mxu0 }
 0x691   :  { %v9830_v39 = vadd.f32 %v9829_v44, %v6148_v33  ;;  %v9873_v55 = vadd.f32 %v9872_v14, %v6156_v36 }
 0x692   :  { %v9831_v48 = vpop.f32.mrf.mxu1  ;;  %v9874_v37 = vpop.f32.mrf.mxu0 }
 0x693   :  { %v9832_v15 = vadd.f32 %v9831_v48, %v6152_v35  ;;  %v9875_v49 = vadd.f32 %v9874_v37, %v6160_v41  ;;  %v10269_v53 = vmax.f32 %v9830_v39, 0.0  ;;  %v10271_v3 = vmax.f32 %v9873_v55, 0.0 }
 0x694   :  { %v9833_v2 = vpop.f32.mrf.mxu1  ;;  %v9876_v42 = vpop.f32.mrf.mxu0  ;;  %v6180_v37 = vrot.slane %v5959_v11, %v16586_v16 }
 0x695   :  { %v10270_v63 = vmax.f32 %v9832_v15, 0.0  ;;  %v10272_v45 = vmax.f32 %v9875_v49, 0.0  ;;  %v9834_v56 = vadd.f32 %v9833_v2, %v6148_v33  ;;  %v9877_v47 = vadd.f32 %v9876_v42, %v6156_v36 }
 0x696   :  { %v9835_v59 = vpop.f32.mrf.mxu1  ;;  %v9878_v61 = vpop.f32.mrf.mxu0  ;;  %v6188_v15 = vrot.slane %v5959_v11, %v16589_v43  ;;  %v6184_v49 = vrot.slane %v5959_v11, %v16595_v5  ;;  %v6192_v2 = vrot.slane %v5959_v11, %v16598_v24 }
 0x697   :  { %v12136_v52 = vpack.c.bf16 %v10270_v63, %v10269_v53  ;;  %v12137_v8 = vpack.c.bf16 %v10272_v45, %v10271_v3  ;;  %v9836_v10 = vadd.f32 %v9835_v59, %v6152_v35  ;;  %v9879_v9 = vadd.f32 %v9878_v61, %v6160_v41 }
 0x698   :  { %v10333_v19 = vmax.f32 %v9834_v56, 0.0  ;;  %v10335_v54 = vmax.f32 %v9877_v47, 0.0 }
 0x699   :  { %10759 = vst [vmem:[%s17701_s9 + $0xb0] sm:$0xff] %v12136_v52  ;;  %10760 = vst [vmem:[%s17701_s9 + $0xb8] sm:$0xff] %v12137_v8  ;;  %v10334_v27 = vmax.f32 %v9836_v10, 0.0  ;;  %v10336_v62 = vmax.f32 %v9879_v9, 0.0 }
 0x69b   :  { %v12168_v51 = vpack.c.bf16 %v10334_v27, %v10333_v19  ;;  %v12169_v18 = vpack.c.bf16 %v10336_v62, %v10335_v54 }
 0x69d   :  { %10791 = vst [vmem:[%s17701_s9 + $0x1b0] sm:$0xff] %v12168_v51  ;;  %10792 = vst [vmem:[%s17701_s9 + $0x1b8] sm:$0xff] %v12169_v18 }
 0x6b0   :  { %v9915_v12 = vpop.f32.mrf.mxu1  ;;  %v9958_v6 = vpop.f32.mrf.mxu0 }
 0x6b1   :  { %v9916_v46 = vadd.f32 %v9915_v12, %v6164_v1  ;;  %v9959_v20 = vadd.f32 %v9958_v6, %v6172_v25 }
 0x6b2   :  { %v9917_v4 = vpop.f32.mrf.mxu1  ;;  %v9960_v31 = vpop.f32.mrf.mxu0 }
 0x6b3   :  { %v9918_v23 = vadd.f32 %v9917_v4, %v6168_v28  ;;  %v9961_v29 = vadd.f32 %v9960_v31, %v6176_v50  ;;  %v10273_v7 = vmax.f32 %v9916_v46, 0.0  ;;  %v10275_v34 = vmax.f32 %v9959_v20, 0.0  ;;  %v5960_v4 = vld [vmem:[%s17700_s7 + $0x38] sm:$0xff] }
 0x6b4   :  { %v9919_v32 = vpop.f32.mrf.mxu1  ;;  %v9962_v60 = vpop.f32.mrf.mxu0  ;;  %v6196_v31 = vrot.slane %v5960_v4, %v17722_v30 }
 0x6b5   :  { %v10274_v38 = vmax.f32 %v9918_v23, 0.0  ;;  %v10276_v40 = vmax.f32 %v9961_v29, 0.0  ;;  %v9920_v21 = vadd.f32 %v9919_v32, %v6164_v1  ;;  %v9963_v26 = vadd.f32 %v9962_v60, %v6172_v25 }
 0x6b6   :  { %v9921_v0 = vpop.f32.mrf.mxu1  ;;  %v9964_v22 = vpop.f32.mrf.mxu0  ;;  %v6204_v23 = vrot.slane %v5960_v4, %v16455_v57  ;;  %v6200_v29 = vrot.slane %v5960_v4, %v17723_v17  ;;  %v6208_v32 = vrot.slane %v5960_v4, %v16466_v13 }
 0x6b7   :  { %v12138_v58 = vpack.c.bf16 %v10274_v38, %v10273_v7  ;;  %v12139_v33 = vpack.c.bf16 %v10276_v40, %v10275_v34  ;;  %v9922_v36 = vadd.f32 %v9921_v0, %v6168_v28  ;;  %v9965_v35 = vadd.f32 %v9964_v22, %v6176_v50 }
 0x6b8   :  { %v10337_v41 = vmax.f32 %v9920_v21, 0.0  ;;  %v10339_v44 = vmax.f32 %v9963_v26, 0.0 }
 0x6b9   :  { %10761 = vst [vmem:[%s17701_s9 + $0xc0] sm:$0xff] %v12138_v58  ;;  %10762 = vst [vmem:[%s17701_s9 + $0xc8] sm:$0xff] %v12139_v33  ;;  %v10338_v14 = vmax.f32 %v9922_v36, 0.0  ;;  %v10340_v39 = vmax.f32 %v9965_v35, 0.0 }
 0x6bb   :  { %v12170_v55 = vpack.c.bf16 %v10338_v14, %v10337_v41  ;;  %v12171_v48 = vpack.c.bf16 %v10340_v39, %v10339_v44 }
 0x6bd   :  { %10793 = vst [vmem:[%s17701_s9 + $0x1c0] sm:$0xff] %v12170_v55  ;;  %10794 = vst [vmem:[%s17701_s9 + $0x1c8] sm:$0xff] %v12171_v48 }
 0x6d0   :  { %v10001_v42 = vpop.f32.mrf.mxu1  ;;  %v10044_v53 = vpop.f32.mrf.mxu0 }
 0x6d1   :  { %v10002_v3 = vadd.f32 %v10001_v42, %v6180_v37  ;;  %v10045_v63 = vadd.f32 %v10044_v53, %v6188_v15  ;;  %v6212_v53 = vrot.slane %v5960_v4, %v16586_v16 }
 0x6d2   :  { %v10003_v45 = vpop.f32.mrf.mxu1  ;;  %v10046_v56 = vpop.f32.mrf.mxu0 }
 0x6d3   :  { %v10004_v47 = vadd.f32 %v10003_v45, %v6184_v49  ;;  %v10047_v59 = vadd.f32 %v10046_v56, %v6192_v2  ;;  %v10277_v8 = vmax.f32 %v10002_v3, 0.0  ;;  %v10279_v10 = vmax.f32 %v10045_v63, 0.0 }
 0x6d4   :  { %v10005_v61 = vpop.f32.mrf.mxu1  ;;  %v10048_v52 = vpop.f32.mrf.mxu0  ;;  %v6220_v3 = vrot.slane %v5960_v4, %v16589_v43  ;;  %v6216_v63 = vrot.slane %v5960_v4, %v16595_v5  ;;  %v6224_v45 = vrot.slane %v5960_v4, %v16598_v24 }
 0x6d5   :  { %v10278_v9 = vmax.f32 %v10004_v47, 0.0  ;;  %v10280_v19 = vmax.f32 %v10047_v59, 0.0  ;;  %v10006_v54 = vadd.f32 %v10005_v61, %v6180_v37  ;;  %v10049_v27 = vadd.f32 %v10048_v52, %v6188_v15 }
 0x6d6   :  { %v10007_v62 = vpop.f32.mrf.mxu1  ;;  %v10050_v51 = vpop.f32.mrf.mxu0 }
 0x6d7   :  { %v12140_v18 = vpack.c.bf16 %v10278_v9, %v10277_v8  ;;  %v12141_v11 = vpack.c.bf16 %v10280_v19, %v10279_v10  ;;  %v10008_v1 = vadd.f32 %v10007_v62, %v6184_v49  ;;  %v10051_v25 = vadd.f32 %v10050_v51, %v6192_v2 }
 0x6d8   :  { %v10341_v28 = vmax.f32 %v10006_v54, 0.0  ;;  %v10343_v50 = vmax.f32 %v10049_v27, 0.0 }
 0x6d9   :  { %10763 = vst [vmem:[%s17701_s9 + $0xd0] sm:$0xff] %v12140_v18  ;;  %10764 = vst [vmem:[%s17701_s9 + $0xd8] sm:$0xff] %v12141_v11  ;;  %v10342_v12 = vmax.f32 %v10008_v1, 0.0  ;;  %v10344_v6 = vmax.f32 %v10051_v25, 0.0 }
 0x6db   :  { %v12172_v46 = vpack.c.bf16 %v10342_v12, %v10341_v28  ;;  %v12173_v20 = vpack.c.bf16 %v10344_v6, %v10343_v50 }
 0x6dd   :  { %10795 = vst [vmem:[%s17701_s9 + $0x1d0] sm:$0xff] %v12172_v46  ;;  %10796 = vst [vmem:[%s17701_s9 + $0x1d8] sm:$0xff] %v12173_v20 }
 0x6f0   :  { %v10087_v60 = vpop.f32.mrf.mxu1  ;;  %v10130_v7 = vpop.f32.mrf.mxu0 }
 0x6f1   :  { %v10088_v34 = vadd.f32 %v10087_v60, %v6196_v31  ;;  %v10131_v38 = vadd.f32 %v10130_v7, %v6204_v23 }
 0x6f2   :  { %v10089_v40 = vpop.f32.mrf.mxu1  ;;  %v10132_v21 = vpop.f32.mrf.mxu0 }
 0x6f3   :  { %v10090_v26 = vadd.f32 %v10089_v40, %v6200_v29  ;;  %v10133_v0 = vadd.f32 %v10132_v21, %v6208_v32  ;;  %v10281_v33 = vmax.f32 %v10088_v34, 0.0  ;;  %v10283_v36 = vmax.f32 %v10131_v38, 0.0 }
 0x6f4   :  { %v10091_v22 = vpop.f32.mrf.mxu1  ;;  %v10134_v58 = vpop.f32.mrf.mxu0 }
 0x6f5   :  { %v10282_v35 = vmax.f32 %v10090_v26, 0.0  ;;  %v10284_v30 = vmax.f32 %v10133_v0, 0.0  ;;  %v10092_v41 = vadd.f32 %v10091_v22, %v6196_v31  ;;  %v10135_v57 = vadd.f32 %v10134_v58, %v6204_v23 }
 0x6f6   :  { %v10093_v44 = vpop.f32.mrf.mxu1  ;;  %v10136_v17 = vpop.f32.mrf.mxu0 }
 0x6f7   :  { %v12142_v14 = vpack.c.bf16 %v10282_v35, %v10281_v33  ;;  %v12143_v13 = vpack.c.bf16 %v10284_v30, %v10283_v36  ;;  %v10094_v39 = vadd.f32 %v10093_v44, %v6200_v29  ;;  %v10137_v55 = vadd.f32 %v10136_v17, %v6208_v32 }
 0x6f8   :  { %v10345_v48 = vmax.f32 %v10092_v41, 0.0  ;;  %v10347_v37 = vmax.f32 %v10135_v57, 0.0 }
 0x6f9   :  { %10765 = vst [vmem:[%s17701_s9 + $0xe0] sm:$0xff] %v12142_v14  ;;  %10766 = vst [vmem:[%s17701_s9 + $0xe8] sm:$0xff] %v12143_v13  ;;  %v10346_v15 = vmax.f32 %v10094_v39, 0.0  ;;  %v10348_v49 = vmax.f32 %v10137_v55, 0.0 }
 0x6fb   :  { %v12174_v2 = vpack.c.bf16 %v10346_v15, %v10345_v48  ;;  %v12175_v42 = vpack.c.bf16 %v10348_v49, %v10347_v37 }
 0x6fd   :  { %10797 = vst [vmem:[%s17701_s9 + $0x1e0] sm:$0xff] %v12174_v2  ;;  %10798 = vst [vmem:[%s17701_s9 + $0x1e8] sm:$0xff] %v12175_v42 }
 0x710   :  { %v10173_v56 = vpop.f32.mrf.mxu1  ;;  %v10216_v47 = vpop.f32.mrf.mxu0 }
 0x711   :  { %v10174_v59 = vadd.f32 %v10173_v56, %v6212_v53  ;;  %v10217_v61 = vadd.f32 %v10216_v47, %v6220_v3 }
 0x712   :  { %v10175_v52 = vpop.f32.mrf.mxu1  ;;  %v10218_v8 = vpop.f32.mrf.mxu0 }
 0x713   :  { %v10176_v10 = vadd.f32 %v10175_v52, %v6216_v63  ;;  %v10219_v9 = vadd.f32 %v10218_v8, %v6224_v45  ;;  %v10285_v27 = vmax.f32 %v10174_v59, 0.0  ;;  %v10287_v62 = vmax.f32 %v10217_v61, 0.0 }
 0x714   :  { %v10177_v19 = vpop.f32.mrf.mxu1  ;;  %v10220_v54 = vpop.f32.mrf.mxu0 }
 0x715   :  { %v10286_v51 = vmax.f32 %v10176_v10, 0.0  ;;  %v10288_v16 = vmax.f32 %v10219_v9, 0.0  ;;  %v10178_v18 = vadd.f32 %v10177_v19, %v6212_v53  ;;  %v10221_v43 = vadd.f32 %v10220_v54, %v6220_v3 }
 0x716   :  { %v10179_v11 = vpop.f32.mrf.mxu1  ;;  %v10222_v5 = vpop.f32.mrf.mxu0 }
 0x717   :  { %v12144_v1 = vpack.c.bf16 %v10286_v51, %v10285_v27  ;;  %v12145_v24 = vpack.c.bf16 %v10288_v16, %v10287_v62  ;;  %v10180_v25 = vadd.f32 %v10179_v11, %v6216_v63  ;;  %v10223_v28 = vadd.f32 %v10222_v5, %v6224_v45 }
 0x718   :  { %v10349_v50 = vmax.f32 %v10178_v18, 0.0  ;;  %v10351_v12 = vmax.f32 %v10221_v43, 0.0 }
 0x719   :  { %10767 = vst [vmem:[%s17701_s9 + $0xf0] sm:$0xff] %v12144_v1  ;;  %10768 = vst [vmem:[%s17701_s9 + $0xf8] sm:$0xff] %v12145_v24  ;;  %v10350_v6 = vmax.f32 %v10180_v25, 0.0  ;;  %v10352_v46 = vmax.f32 %v10223_v28, 0.0 }
 0x71b   :  { %v12176_v20 = vpack.c.bf16 %v10350_v6, %v10349_v50  ;;  %v12177_v4 = vpack.c.bf16 %v10352_v46, %v10351_v12 }
 0x71d   :  { %10799 = vst [vmem:[%s17701_s9 + $0x1f0] sm:$0xff] %v12176_v20  ;;  %10800 = vst [vmem:[%s17701_s9 + $0x1f8] sm:$0xff] %v12177_v4 }

// kernel: squeeze.4
= control target key start
LH: loop header
LB: loop body
LE: loop exit
PB: predicated region body
PF: predicated region fallthrough
CT: control target
= control target key end

     0   :  { %s473_s16 = smov 113   ;;  %vm290_vm0 = vcmask 965632   ;;  %vm307_vm1 = vcmask 973824   ;;  %s474_s17 = smov 120   ;;  %vm27_vm2 = vcmask 138240   ;;  %vm325_vm3 = vcmask 1031168   ;;  %s827_s0 = inlined_call_operand.vmem [shape: f32[3,578], index: 0, kind: input, shape index: {}]   ;;  %s828_s1 = inlined_call_operand.vmem [shape: f32[3,2,17,17], index: 1, kind: output, shape index: {}]  }
   0x1   :  { %v361_v0 = vld [vmem:[%s827_s0 + $0xc] sm:$0xf]  ;;  %v360_v1 = vld [vmem:[%s827_s0 + $0x10] sm:$0xf]  ;;  %v363_v2 = vld [vmem:[%s827_s0 + $0x4] sm:$0xf] }
   0x2   :  { %14 = vst [vmem:[#allocation0 + $0x18] sm:$0xf] %v361_v0  ;;  %9 = vst [vmem:[#allocation0 + $0x20] sm:$0xf] %v360_v1  ;;  %v362_v3 = vld [vmem:[%s827_s0 + $0x8] sm:$0xf] }
   0x3   :  { %23 = vst [vmem:[#allocation0 + $0x8] sm:$0xf] %v363_v2  ;;  %19 = vst [vmem:[#allocation0 + $0x10] sm:$0xf] %v362_v3  ;;  %v24_v4 = vld [vmem:[%s827_s0] sm:$0xf] }
   0x4   :  { %25 = vst [vmem:[#allocation0] sm:$0xf] %v24_v4  ;;  %s472_s0 = smov 121   ;;  %s475_s18 = smov 112   ;;  %vm343_vm4 = vcmask 1039360   ;;  %vm294_vm5 = vcmask 80896  }
   0x5   :  { %s476_s23 = smov 10   ;;  %s477_s24 = smov 9   ;;  %vm311_vm6 = vcmask 72704   ;;  %vm299_vm7 = vcmask 138320   ;;  %vm316_vm8 = vcmask 138312   ;;  %vm329_vm9 = vcmask 15360  }
   0x6   :  { %s478_s25 = smov 2   ;;  %s479_s26 = smov 1   ;;  %vm347_vm10 = vcmask 7168   ;;  %vm334_vm11 = vcmask 138256   ;;  %vm352_vm12 = vcmask 138248  }
   0x7   :  { %s480_s27 = smov 111   ;;  %s481_s28 = smov 104  }
   0x8   :  { %s482_s29 = smov 103   ;;  %s483_s30 = smov 96  }
   0x9   :  { %v32_v5 = vld.sshfl [vmem:[#allocation0 + $0x18] sm:$0xff pattern:$0x22222201]   ;;  %v50_v6 = vld [vmem:[#allocation0 + $0x20] sm:$0x7]   ;;  %s484_s2 = smov 95  }
   0xa   :  { %33 = vrot.lane.b32.xlu0 %v32_v5, %s472_s0  ;;  %51 = vrot.lane.b32.xlu1 %v50_v6, %s473_s16  ;;  %v41_v7 = vld [vmem:[#allocation0 + $0x8] sm:$0x7]   ;;  %v530_v8 = vld.sshfl [vmem:[#allocation0 + $0x10] sm:$0xff pattern:$0x22222201]   ;;  %s485_s3 = smov 94  }
   0xb   :  { %v304_v9 = vld [vmem:[#allocation0] sm:$0x7]   ;;  %v306_v10 = vld [vmem:[#allocation0 + $0x8] sm:$0x7]   ;;  %v291_v12 = vsel %vm290_vm0, %v32_v5, %v530_v8  ;;  %v322_v14 = vld [vmem:[#allocation0 + $0x18] sm:$0x7]  }
   0xc   :  { %v26_v11 = vld [vmem:[#allocation0] sm:$0x7]   ;;  %v308_v13 = vsel %vm307_vm1, %v306_v10, %v304_v9  ;;  %v340_v16 = vld [vmem:[#allocation0 + $0x8] sm:$0x7]   ;;  %v342_v17 = vld [vmem:[#allocation0 + $0x10] sm:$0x7]  }
   0xd   :  { %28 = vst.msk [vmem:[%s828_s1] ss:$48 sm:$0x3] %vm27_vm2, %v26_v11   ;;  %364 = vst.msk [vmem:[%s828_s1 + $0x5e] sm:$0x4] %vm27_vm2, %v26_v11   ;;  %v344_v19 = vsel %vm343_vm4, %v342_v17, %v340_v16  ;;  %s486_s4 = smov 87  }
   0xe   :  { %42 = vrot.lane.b32.xlu0 %v41_v7, %s474_s17  ;;  %60 = vrot.lane.b32.xlu1 %v530_v8, %s475_s18  ;;  %v324_v15 = vld [vmem:[#allocation0 + $0x20] sm:$0x7]   ;;  %v85_v21 = vld [vmem:[#allocation0 + $0x8] sm:$0x7]   ;;  %v120_v24 = vld [vmem:[#allocation0 + $0x18] sm:$0x7]  }
   0xf   :  { %v326_v18 = vsel %vm325_vm3, %v324_v15, %v322_v14  ;;  %v67_v20 = vld [vmem:[#allocation0] sm:$0x7]   ;;  %v129_v25 = vld [vmem:[#allocation0 + $0x8] sm:$0x7]   ;;  %s487_s5 = smov 86   ;;  %s488_s6 = smov 79  }
  0x10   :  { %v94_v22 = vld [vmem:[#allocation0 + $0x20] sm:$0x7]   ;;  %s489_s7 = smov 78   ;;  %v164_v28 = vld [vmem:[#allocation0 + $0x18] sm:$0x7]   ;;  %s490_s8 = smov 77  }
  0x11   :  { %v111_v23 = vld [vmem:[#allocation0] sm:$0x7]   ;;  %s491_s9 = smov 70   ;;  %v173_v29 = vld [vmem:[#allocation0 + $0x8] sm:$0x7]   ;;  %s492_s10 = smov 69  }
  0x12   :  { %292 = vrot.lane.b32.xlu0 %v291_v12, %s476_s23  ;;  %309 = vrot.lane.b32.xlu1 %v308_v13, %s477_s24  ;;  %v138_v26 = vld [vmem:[#allocation0 + $0x20] sm:$0x7]   ;;  %s493_s11 = smov 61   ;;  %v199_v31 = vld [vmem:[#allocation0 + $0x18] sm:$0x7]   ;;  %s494_s12 = smov 60  }
  0x13   :  { %v155_v27 = vld [vmem:[#allocation0] sm:$0x7]   ;;  %s495_s13 = smov 53   ;;  %v208_v32 = vld [vmem:[#allocation0 + $0x8] sm:$0x7]   ;;  %s496_s14 = smov 52  }
  0x14   :  { %v190_v30 = vld [vmem:[#allocation0] sm:$0x7]   ;;  %s497_s15 = smov 44   ;;  %v234_v34 = vld [vmem:[#allocation0 + $0x18] sm:$0x7]   ;;  %s498_s0 = smov 43  }
  0x15   :  { %v225_v33 = vld [vmem:[#allocation0] sm:$0x7]   ;;  %s499_s16 = smov 36   ;;  %v243_v35 = vld [vmem:[#allocation0 + $0x8] sm:$0x7]   ;;  %s500_s17 = smov 35  }
  0x16   :  { %327 = vrot.lane.b32.xlu0 %v326_v18, %s478_s25  ;;  %345 = vrot.lane.b32.xlu1 %v344_v19, %s479_s26  ;;  %s501_s18 = smov 27   ;;  %v260_v36 = vld [vmem:[#allocation0] sm:$0x7]   ;;  %v269_v37 = vld [vmem:[#allocation0 + $0x18] sm:$0x7]   ;;  %s502_s19 = smov 26  }
  0x17   :  { %s503_s20 = smov 19   ;;  %v278_v38 = vld [vmem:[#allocation0 + $0x8] sm:$0x7]   ;;  %s504_s21 = smov 18  }
  0x1a   :  { %68 = vrot.lane.b32.xlu0 %v67_v20, %s480_s27  ;;  %77 = vrot.lane.b32.xlu1 %v32_v5, %s481_s28 }
  0x1e   :  { %86 = vrot.lane.b32.xlu0 %v85_v21, %s482_s29  ;;  %95 = vrot.lane.b32.xlu1 %v94_v22, %s483_s30 }
  0x22   :  { %104 = vrot.lane.b32.xlu0 %v530_v8, %s484_s2  ;;  %112 = vrot.lane.b32.xlu1 %v111_v23, %s485_s3 }
  0x26   :  { %121 = vrot.lane.b32.xlu0 %v120_v24, %s486_s4  ;;  %130 = vrot.lane.b32.xlu1 %v129_v25, %s487_s5 }
  0x2a   :  { %139 = vrot.lane.b32.xlu0 %v138_v26, %s488_s6  ;;  %148 = vrot.lane.b32.xlu1 %v530_v8, %s489_s7 }
  0x2e   :  { %156 = vrot.lane.b32.xlu0 %v155_v27, %s490_s8  ;;  %165 = vrot.lane.b32.xlu1 %v164_v28, %s491_s9 }
  0x32   :  { %174 = vrot.lane.b32.xlu0 %v173_v29, %s492_s10  ;;  %183 = vrot.lane.b32.xlu1 %v530_v8, %s493_s11 }
  0x36   :  { %191 = vrot.lane.b32.xlu0 %v190_v30, %s494_s12  ;;  %200 = vrot.lane.b32.xlu1 %v199_v31, %s495_s13 }
  0x3a   :  { %209 = vrot.lane.b32.xlu0 %v208_v32, %s496_s14  ;;  %218 = vrot.lane.b32.xlu1 %v530_v8, %s497_s15 }
  0x3e   :  { %226 = vrot.lane.b32.xlu0 %v225_v33, %s498_s0  ;;  %235 = vrot.lane.b32.xlu1 %v234_v34, %s499_s16 }
  0x42   :  { %244 = vrot.lane.b32.xlu0 %v243_v35, %s500_s17  ;;  %253 = vrot.lane.b32.xlu1 %v530_v8, %s501_s18 }
  0x46   :  { %261 = vrot.lane.b32.xlu0 %v260_v36, %s502_s19  ;;  %270 = vrot.lane.b32.xlu1 %v269_v37, %s503_s20 }
  0x4a   :  { %279 = vrot.lane.b32.xlu0 %v278_v38, %s504_s21 }
  0x7c   :  { %v34_v39 = vpop.permute.xlu0 %33   ;;  %v52_v40 = vpop.permute.xlu1 %51  }
  0x7d   :  { %365 = vst.msk [vmem:[%s828_s1 + $0x4e] ss:$-48 sm:$0x3] %vm27_vm2, %v34_v39   ;;  %366 = vst.msk [vmem:[%s828_s1 + $0x7c] sm:$0x4] %vm27_vm2, %v34_v39  }
  0x7e   :  { %369 = vst.msk [vmem:[%s828_s1 + $0x26] ss:$48 sm:$0x3] %vm27_vm2, %v52_v40   ;;  %370 = vst.msk [vmem:[%s828_s1 + $0x84] sm:$0x4] %vm27_vm2, %v52_v40  }
  0x80   :  { %v43_v41 = vpop.permute.xlu0 %42   ;;  %v61_v42 = vpop.permute.xlu1 %60  }
  0x81   :  { %367 = vst.msk [vmem:[%s828_s1 + $0x8] ss:$48 sm:$0x3] %vm27_vm2, %v43_v41   ;;  %368 = vst.msk [vmem:[%s828_s1 + $0x66] sm:$0x4] %vm27_vm2, %v43_v41  }
  0x82   :  { %371 = vst.msk [vmem:[%s828_s1 + $0x40] ss:$-48 sm:$0x3] %vm27_vm2, %v61_v42   ;;  %372 = vst.msk [vmem:[%s828_s1 + $0x6e] sm:$0x4] %vm27_vm2, %v61_v42  }
  0x84   :  { %v293_v43 = vpop.permute.xlu0 %292   ;;  %v310_v44 = vpop.permute.xlu1 %309  }
  0x85   :  { %423 = vst.msk [vmem:[%s828_s1 + $0x4d] ss:$-48 sm:$0x3] %vm294_vm5, %v293_v43   ;;  %424 = vst.msk [vmem:[%s828_s1 + $0x7b] sm:$0x4] %vm294_vm5, %v293_v43  }
  0x86   :  { %427 = vst.msk [vmem:[%s828_s1 + $0x7] ss:$48 sm:$0x3] %vm311_vm6, %v310_v44   ;;  %428 = vst.msk [vmem:[%s828_s1 + $0x65] sm:$0x4] %vm311_vm6, %v310_v44  }
  0x87   :  { %425 = vst.msk [vmem:[%s828_s1 + $0x4d] ss:$-48 sm:$0x3] %vm299_vm7, %v293_v43   ;;  %426 = vst.msk [vmem:[%s828_s1 + $0x7b] sm:$0x4] %vm299_vm7, %v293_v43  }
  0x88   :  { %429 = vst.msk [vmem:[%s828_s1 + $0x7] ss:$48 sm:$0x3] %vm316_vm8, %v310_v44   ;;  %430 = vst.msk [vmem:[%s828_s1 + $0x65] sm:$0x4] %vm316_vm8, %v310_v44   ;;  %v328_v45 = vpop.permute.xlu0 %327   ;;  %v346_v46 = vpop.permute.xlu1 %345  }
  0x89   :  { %431 = vst.msk [vmem:[%s828_s1 + $0x25] ss:$48 sm:$0x3] %vm329_vm9, %v328_v45   ;;  %432 = vst.msk [vmem:[%s828_s1 + $0x83] sm:$0x4] %vm329_vm9, %v328_v45  }
  0x8a   :  { %435 = vst.msk [vmem:[%s828_s1 + $0xf] ss:$48 sm:$0x3] %vm347_vm10, %v346_v46   ;;  %436 = vst.msk [vmem:[%s828_s1 + $0x6d] sm:$0x4] %vm347_vm10, %v346_v46  }
  0x8b   :  { %433 = vst.msk [vmem:[%s828_s1 + $0x25] ss:$48 sm:$0x3] %vm334_vm11, %v328_v45   ;;  %434 = vst.msk [vmem:[%s828_s1 + $0x83] sm:$0x4] %vm334_vm11, %v328_v45  }
  0x8c   :  { %437 = vst.msk [vmem:[%s828_s1 + $0xf] ss:$48 sm:$0x3] %vm352_vm12, %v346_v46   ;;  %438 = vst.msk [vmem:[%s828_s1 + $0x6d] sm:$0x4] %vm352_vm12, %v346_v46   ;;  %v69_v47 = vpop.permute.xlu0 %68   ;;  %v78_v48 = vpop.permute.xlu1 %77  }
  0x8d   :  { %373 = vst.msk [vmem:[%s828_s1 + $0x1] ss:$48 sm:$0x3] %vm27_vm2, %v69_v47   ;;  %374 = vst.msk [vmem:[%s828_s1 + $0x5f] sm:$0x4] %vm27_vm2, %v69_v47  }
  0x8e   :  { %375 = vst.msk [vmem:[%s828_s1 + $0x4f] ss:$-48 sm:$0x3] %vm27_vm2, %v78_v48   ;;  %376 = vst.msk [vmem:[%s828_s1 + $0x7d] sm:$0x4] %vm27_vm2, %v78_v48  }
  0x90   :  { %v87_v49 = vpop.permute.xlu0 %86   ;;  %v96_v50 = vpop.permute.xlu1 %95  }
  0x91   :  { %377 = vst.msk [vmem:[%s828_s1 + $0x9] ss:$48 sm:$0x3] %vm27_vm2, %v87_v49   ;;  %378 = vst.msk [vmem:[%s828_s1 + $0x67] sm:$0x4] %vm27_vm2, %v87_v49  }
  0x92   :  { %379 = vst.msk [vmem:[%s828_s1 + $0x27] ss:$48 sm:$0x3] %vm27_vm2, %v96_v50   ;;  %380 = vst.msk [vmem:[%s828_s1 + $0x85] sm:$0x4] %vm27_vm2, %v96_v50  }
  0x94   :  { %v105_v51 = vpop.permute.xlu0 %104   ;;  %v113_v52 = vpop.permute.xlu1 %112  }
  0x95   :  { %381 = vst.msk [vmem:[%s828_s1 + $0x48] ss:$-48 sm:$0x3] %vm27_vm2, %v105_v51   ;;  %382 = vst.msk [vmem:[%s828_s1 + $0x76] sm:$0x4] %vm27_vm2, %v105_v51  }
  0x96   :  { %383 = vst.msk [vmem:[%s828_s1 + $0x2] ss:$48 sm:$0x3] %vm27_vm2, %v113_v52   ;;  %384 = vst.msk [vmem:[%s828_s1 + $0x60] sm:$0x4] %vm27_vm2, %v113_v52  }
  0x98   :  { %v122_v53 = vpop.permute.xlu0 %121   ;;  %v131_v54 = vpop.permute.xlu1 %130  }
  0x99   :  { %385 = vst.msk [vmem:[%s828_s1 + $0x20] ss:$48 sm:$0x3] %vm27_vm2, %v122_v53   ;;  %386 = vst.msk [vmem:[%s828_s1 + $0x7e] sm:$0x4] %vm27_vm2, %v122_v53  }
  0x9a   :  { %387 = vst.msk [vmem:[%s828_s1 + $0xa] ss:$48 sm:$0x3] %vm27_vm2, %v131_v54   ;;  %388 = vst.msk [vmem:[%s828_s1 + $0x68] sm:$0x4] %vm27_vm2, %v131_v54  }
  0x9c   :  { %v140_v55 = vpop.permute.xlu0 %139   ;;  %v149_v56 = vpop.permute.xlu1 %148  }
  0x9d   :  { %389 = vst.msk [vmem:[%s828_s1 + $0x28] ss:$48 sm:$0x3] %vm27_vm2, %v140_v55   ;;  %390 = vst.msk [vmem:[%s828_s1 + $0x86] sm:$0x4] %vm27_vm2, %v140_v55  }
  0x9e   :  { %391 = vst.msk [vmem:[%s828_s1 + $0x49] ss:$-48 sm:$0x3] %vm27_vm2, %v149_v56   ;;  %392 = vst.msk [vmem:[%s828_s1 + $0x77] sm:$0x4] %vm27_vm2, %v149_v56  }
  0xa0   :  { %v157_v57 = vpop.permute.xlu0 %156   ;;  %v166_v58 = vpop.permute.xlu1 %165  }
  0xa1   :  { %393 = vst.msk [vmem:[%s828_s1 + $0x3] ss:$48 sm:$0x3] %vm27_vm2, %v157_v57   ;;  %394 = vst.msk [vmem:[%s828_s1 + $0x61] sm:$0x4] %vm27_vm2, %v157_v57  }
  0xa2   :  { %395 = vst.msk [vmem:[%s828_s1 + $0x21] ss:$48 sm:$0x3] %vm27_vm2, %v166_v58   ;;  %396 = vst.msk [vmem:[%s828_s1 + $0x7f] sm:$0x4] %vm27_vm2, %v166_v58  }
  0xa4   :  { %v175_v59 = vpop.permute.xlu0 %174   ;;  %v184_v60 = vpop.permute.xlu1 %183  }
  0xa5   :  { %397 = vst.msk [vmem:[%s828_s1 + $0xb] ss:$48 sm:$0x3] %vm27_vm2, %v175_v59   ;;  %398 = vst.msk [vmem:[%s828_s1 + $0x69] sm:$0x4] %vm27_vm2, %v175_v59  }
  0xa6   :  { %399 = vst.msk [vmem:[%s828_s1 + $0x4a] ss:$-48 sm:$0x3] %vm27_vm2, %v184_v60   ;;  %400 = vst.msk [vmem:[%s828_s1 + $0x78] sm:$0x4] %vm27_vm2, %v184_v60  }
  0xa8   :  { %v192_v61 = vpop.permute.xlu0 %191   ;;  %v201_v62 = vpop.permute.xlu1 %200  }
  0xa9   :  { %401 = vst.msk [vmem:[%s828_s1 + $0x4] ss:$48 sm:$0x3] %vm27_vm2, %v192_v61   ;;  %402 = vst.msk [vmem:[%s828_s1 + $0x62] sm:$0x4] %vm27_vm2, %v192_v61  }
  0xaa   :  { %403 = vst.msk [vmem:[%s828_s1 + $0x22] ss:$48 sm:$0x3] %vm27_vm2, %v201_v62   ;;  %404 = vst.msk [vmem:[%s828_s1 + $0x80] sm:$0x4] %vm27_vm2, %v201_v62  }
  0xac   :  { %v210_v63 = vpop.permute.xlu0 %209   ;;  %v219_v0 = vpop.permute.xlu1 %218  }
  0xad   :  { %405 = vst.msk [vmem:[%s828_s1 + $0xc] ss:$48 sm:$0x3] %vm27_vm2, %v210_v63   ;;  %406 = vst.msk [vmem:[%s828_s1 + $0x6a] sm:$0x4] %vm27_vm2, %v210_v63  }
  0xae   :  { %407 = vst.msk [vmem:[%s828_s1 + $0x4b] ss:$-48 sm:$0x3] %vm27_vm2, %v219_v0   ;;  %408 = vst.msk [vmem:[%s828_s1 + $0x79] sm:$0x4] %vm27_vm2, %v219_v0  }
  0xb0   :  { %v227_v1 = vpop.permute.xlu0 %226   ;;  %v236_v2 = vpop.permute.xlu1 %235  }
  0xb1   :  { %409 = vst.msk [vmem:[%s828_s1 + $0x5] ss:$48 sm:$0x3] %vm27_vm2, %v227_v1   ;;  %410 = vst.msk [vmem:[%s828_s1 + $0x63] sm:$0x4] %vm27_vm2, %v227_v1  }
  0xb2   :  { %411 = vst.msk [vmem:[%s828_s1 + $0x23] ss:$48 sm:$0x3] %vm27_vm2, %v236_v2   ;;  %412 = vst.msk [vmem:[%s828_s1 + $0x81] sm:$0x4] %vm27_vm2, %v236_v2  }
  0xb4   :  { %v245_v3 = vpop.permute.xlu0 %244   ;;  %v254_v4 = vpop.permute.xlu1 %253  }
  0xb5   :  { %413 = vst.msk [vmem:[%s828_s1 + $0xd] ss:$48 sm:$0x3] %vm27_vm2, %v245_v3   ;;  %414 = vst.msk [vmem:[%s828_s1 + $0x6b] sm:$0x4] %vm27_vm2, %v245_v3  }
  0xb6   :  { %415 = vst.msk [vmem:[%s828_s1 + $0x4c] ss:$-48 sm:$0x3] %vm27_vm2, %v254_v4   ;;  %416 = vst.msk [vmem:[%s828_s1 + $0x7a] sm:$0x4] %vm27_vm2, %v254_v4  }
  0xb8   :  { %v262_v5 = vpop.permute.xlu0 %261   ;;  %v271_v6 = vpop.permute.xlu1 %270  }
  0xb9   :  { %417 = vst.msk [vmem:[%s828_s1 + $0x6] ss:$48 sm:$0x3] %vm27_vm2, %v262_v5   ;;  %418 = vst.msk [vmem:[%s828_s1 + $0x64] sm:$0x4] %vm27_vm2, %v262_v5  }
  0xba   :  { %419 = vst.msk [vmem:[%s828_s1 + $0x24] ss:$48 sm:$0x3] %vm27_vm2, %v271_v6   ;;  %420 = vst.msk [vmem:[%s828_s1 + $0x82] sm:$0x4] %vm27_vm2, %v271_v6  }
  0xbc   :  { %v280_v7 = vpop.permute.xlu0 %279  }
  0xbd   :  { %421 = vst.msk [vmem:[%s828_s1 + $0xe] ss:$48 sm:$0x3] %vm27_vm2, %v280_v7   ;;  %422 = vst.msk [vmem:[%s828_s1 + $0x6c] sm:$0x4] %vm27_vm2, %v280_v7  }

// kernel: vae_forward.13
= control target key start
LH: loop header
LB: loop body
LE: loop exit
PB: predicated region body
PF: predicated region fallthrough
CT: control target
= control target key end

     0   :  { %v565_v1 = vmov 0   ;;  %v566_v33 = vmov 0.0   ;;  %vm567_vm0 = vmmov 0   ;;  %vm422_vm1 = vcmask 539648   ;;  %s747_s1 = inlined_call_operand.vmem [shape: bf16[128,578], index: 1, kind: input, shape index: {}]   ;;  %s748_s0 = inlined_call_operand.vmem [shape: bf16[12,128], index: 0, kind: input, shape index: {}]   ;;  %s749_s2 = inlined_call_operand.vmem [shape: f32[12,1], index: 2, kind: input, shape index: {}]   ;;  %s750_s3 = inlined_call_operand.vmem [shape: f32[12,578], index: 3, kind: output, shape index: {}]  }
   0x1   :  { %v508_v0 = vld [vmem:[%s747_s1 + $0x11c] ss:$20 sps:$4 sm:$0xff]   ;;  %323 = vmatprep.mubr.bf16.mxu0 %v565_v1  ;;  %366 = vmatprep.mubr.bf16.mxu1 %v565_v1  ;;  %v510_v2 = vld [vmem:[%s747_s1 + $0x118] ss:$20 sps:$4 sm:$0xff]   ;;  %v511_v3 = vld [vmem:[%s747_s1 + $0xf4] ss:$20 sps:$4 sm:$0xff]  }
   0x2   :  { %507 = vset.pattern.permute.xlu0 %v565_v1  ;;  %291 = vmatprep.subr.bf16.mxu0 %v508_v0  ;;  %v513_v4 = vld [vmem:[%s747_s1 + $0xf0] ss:$20 sps:$4 sm:$0xff]   ;;  %v514_v5 = vld [vmem:[%s747_s1 + $0xcc] ss:$20 sps:$4 sm:$0xff]   ;;  %v516_v6 = vld [vmem:[%s747_s1 + $0xc8] ss:$20 sps:$4 sm:$0xff]  }
   0x3   :  { %292 = vmatpush1.bf16.msra.mxu0 %v510_v2  ;;  %v517_v7 = vld [vmem:[%s747_s1 + $0xa4] ss:$20 sps:$4 sm:$0xff]   ;;  %v531_v9 = vld [vmem:[%s747_s1 + $0x120] ss:$20 sps:$4 sm:$0xff]   ;;  %v520_v11 = vld [vmem:[%s747_s1 + $0x7c] ss:$20 sps:$4 sm:$0xff]  }
   0x4   :  { %293 = vmatprep.subr.bf16.mxu0 %v511_v3  ;;  %v528_v8 = vld [vmem:[%s747_s1 + $0x124] ss:$20 sps:$4 sm:$0xff]   ;;  %v519_v10 = vld [vmem:[%s747_s1 + $0xa0] ss:$20 sps:$4 sm:$0xff]   ;;  %v534_v12 = vld [vmem:[%s747_s1 + $0xfc] ss:$20 sps:$4 sm:$0xff]  }
   0x5   :  { %334 = vmatprep.subr.bf16.mxu1 %v528_v8  ;;  %v537_v13 = vld [vmem:[%s747_s1 + $0xf8] ss:$20 sps:$4 sm:$0xff]   ;;  %v523_v15 = vld [vmem:[%s747_s1 + $0x54] ss:$20 sps:$4 sm:$0xff]   ;;  %v541_v17 = vld [vmem:[%s747_s1 + $0xd0] ss:$20 sps:$4 sm:$0xff]  }
   0x6   :  { %335 = vmatpush1.bf16.msra.mxu1 %v531_v9  ;;  %v522_v14 = vld [vmem:[%s747_s1 + $0x78] ss:$20 sps:$4 sm:$0xff]   ;;  %v539_v16 = vld [vmem:[%s747_s1 + $0xd4] ss:$20 sps:$4 sm:$0xff]   ;;  %v525_v19 = vld [vmem:[%s747_s1 + $0x50] ss:$20 sps:$4 sm:$0xff]  }
   0x7   :  { %294 = vmatpush1.bf16.msra.mxu0 %v513_v4  ;;  %336 = vmatprep.subr.bf16.mxu1 %v534_v12  ;;  %v543_v18 = vld [vmem:[%s747_s1 + $0xac] ss:$20 sps:$4 sm:$0xff]   ;;  %v545_v21 = vld [vmem:[%s747_s1 + $0xa8] ss:$20 sps:$4 sm:$0xff]   ;;  %v547_v22 = vld [vmem:[%s747_s1 + $0x84] ss:$20 sps:$4 sm:$0xff]  }
   0x8   :  { %295 = vmatprep.subr.bf16.mxu0 %v514_v5  ;;  %v526_v20 = vld [vmem:[%s747_s1 + $0x2c] ss:$20 sps:$4 sm:$0xff]   ;;  %v530_v23 = vld [vmem:[%s747_s1 + $0x28] ss:$20 sps:$4 sm:$0xff]   ;;  %v532_v24 = vld [vmem:[%s747_s1 + $0x4] ss:$20 sps:$4 sm:$0xff]  }
   0x9   :  { %v549_v25 = vld [vmem:[%s747_s1 + $0x80] ss:$20 sps:$4 sm:$0xff]   ;;  %v551_v26 = vld [vmem:[%s747_s1 + $0x5c] ss:$20 sps:$4 sm:$0xff]   ;;  %v553_v28 = vld [vmem:[%s747_s1 + $0x58] ss:$20 sps:$4 sm:$0xff]  }
   0xa   :  { %337 = vmatpush1.bf16.msra.mxu1 %v537_v13  ;;  %v536_v27 = vld [vmem:[%s747_s1] ss:$20 sps:$4 sm:$0xff]   ;;  %v542_v32 = vld [vmem:[%s747_s1 + $0x128] ss:$20 sps:$4 sm:$0xff]   ;;  %v557_v34 = vld [vmem:[%s747_s1 + $0x30] ss:$20 sps:$4 sm:$0xff]  }
   0xb   :  { %296 = vmatpush1.bf16.msra.mxu0 %v516_v6  ;;  %338 = vmatprep.subr.bf16.mxu1 %v539_v16  ;;  %v555_v29 = vld [vmem:[%s747_s1 + $0x34] ss:$20 sps:$4 sm:$0xff]   ;;  %v538_v30 = vld [vmem:[%s748_s0] sm:$0x3f]   ;;  %v550_v39 = vld [vmem:[%s747_s1 + $0xd8] ss:$20 sps:$4 sm:$0xff]  }
   0xc   :  { %297 = vmatprep.subr.bf16.mxu0 %v517_v7  ;;  %v65_v31 = vld [vmem:[%s749_s2] sm:$0xff]  ;;  %v66_v36 = vld [vmem:[%s749_s2 + $0x8] sm:$0xf]  ;;  %v563_v43 = vld [vmem:[%s747_s1 + $0x38] ss:$20 sps:$4 sm:$0xff]   ;;  %vm428_vm2 = vcmask 535552  }
   0xd   :  { %69 = vperm.xlu0 %507, %v65_v31   ;;  %v559_v35 = vld [vmem:[%s747_s1 + $0xc] ss:$20 sps:$4 sm:$0xff]   ;;  %v561_v38 = vld [vmem:[%s747_s1 + $0x8] ss:$20 sps:$4 sm:$0xff]   ;;  %v554_v40 = vld [vmem:[%s747_s1 + $0xb0] ss:$20 sps:$4 sm:$0xff]  }
   0xe   :  { %339 = vmatpush1.bf16.msra.mxu1 %v541_v17  ;;  %v546_v37 = vld [vmem:[%s747_s1 + $0x100] ss:$20 sps:$4 sm:$0xff]   ;;  %v558_v41 = vld [vmem:[%s747_s1 + $0x88] ss:$20 sps:$4 sm:$0xff]   ;;  %v564_v44 = vld [vmem:[%s747_s1 + $0x10] ss:$20 sps:$4 sm:$0xff]  }
   0xf   :  { %298 = vmatpush1.bf16.msra.mxu0 %v519_v10  ;;  %340 = vmatprep.subr.bf16.mxu1 %v543_v18  ;;  %v562_v42 = vld [vmem:[%s747_s1 + $0x60] ss:$20 sps:$4 sm:$0xff]  }
  0x10   :  { %299 = vmatprep.subr.bf16.mxu0 %v520_v11 }
  0x11   :  { %74 = vperm.xlu0 %507, %v66_v36  }
  0x12   :  { %341 = vmatpush1.bf16.msra.mxu1 %v545_v21 }
  0x13   :  { %300 = vmatpush1.bf16.msra.mxu0 %v522_v14  ;;  %342 = vmatprep.subr.bf16.mxu1 %v547_v22 }
  0x14   :  { %301 = vmatprep.subr.bf16.mxu0 %v523_v15 }
  0x16   :  { %343 = vmatpush1.bf16.msra.mxu1 %v549_v25 }
  0x17   :  { %302 = vmatpush1.bf16.msra.mxu0 %v525_v19  ;;  %344 = vmatprep.subr.bf16.mxu1 %v551_v26 }
  0x18   :  { %303 = vmatprep.subr.bf16.mxu0 %v526_v20 }
  0x1a   :  { %345 = vmatpush1.bf16.msra.mxu1 %v553_v28 }
  0x1b   :  { %304 = vmatpush1.bf16.msra.mxu0 %v530_v23  ;;  %346 = vmatprep.subr.bf16.mxu1 %v555_v29 }
  0x1c   :  { %305 = vmatprep.subr.bf16.mxu0 %v532_v24 }
  0x1e   :  { %347 = vmatpush1.bf16.msra.mxu1 %v557_v34 }
  0x1f   :  { %306 = vmatpush1.bf16.msra.mxu0 %v536_v27  ;;  %348 = vmatprep.subr.bf16.mxu1 %v559_v35 }
  0x20   :  { %484 = vmatprep.subr.bf16.mxu0 %v566_v33 }
  0x22   :  { %324 = vmatmul.mubr.bf16.vlgmr.msra.gmra.mxu0 %v538_v30  ;;  %349 = vmatpush1.bf16.msra.mxu1 %v561_v38 }
  0x23   :  { %485 = vmatpush3.bf16.msra.mxu0 %v542_v32  ;;  %500 = vmatprep.mubr.msk.bf16.mxu0 %vm567_vm0, %v566_v33 }
  0x24   :  { %486 = vmatprep.subr.bf16.mxu0 %v566_v33 }
  0x25   :  { %367 = vmatmul.mubr.bf16.vlgmr.msra.gmra.mxu1 %v538_v30 }
  0x27   :  { %487 = vmatpush3.bf16.msra.mxu0 %v546_v37 }
  0x28   :  { %488 = vmatprep.subr.bf16.mxu0 %v566_v33 }
  0x2b   :  { %489 = vmatpush3.bf16.msra.mxu0 %v550_v39 }
  0x2c   :  { %490 = vmatprep.subr.bf16.mxu0 %v566_v33 }
  0x2f   :  { %491 = vmatpush3.bf16.msra.mxu0 %v554_v40 }
  0x30   :  { %492 = vmatprep.subr.bf16.mxu0 %v566_v33 }
  0x33   :  { %493 = vmatpush3.bf16.msra.mxu0 %v558_v41 }
  0x34   :  { %494 = vmatprep.subr.bf16.mxu0 %v566_v33 }
  0x37   :  { %495 = vmatpush3.bf16.msra.mxu0 %v562_v42 }
  0x38   :  { %496 = vmatprep.subr.bf16.mxu0 %v566_v33 }
  0x3b   :  { %497 = vmatpush3.bf16.msra.mxu0 %v563_v43 }
  0x3c   :  { %498 = vmatprep.subr.bf16.mxu0 %v566_v33 }
  0x3f   :  { %499 = vmatpush3.bf16.msra.mxu0 %v564_v44 }
  0x42   :  { %501 = vmatmul.mubr.bf16.vlgmr.msra.gmra.mxu0 %v538_v30 }
  0x88   :  { %v70_v45 = vpop.permute.xlu0 %69 }
  0x8c   :  { %v75_v49 = vpop.permute.xlu0 %74 }
  0xe2   :  { %v325_v46 = vpop.f32.mrf.mxu0 }
  0xe3   :  { %v326_v47 = vadd.f32 %v325_v46, %v70_v45 }
  0xe4   :  { %v327_v48 = vpop.f32.mrf.mxu0 }
  0xe5   :  { %418 = vst [vmem:[%s750_s3] sm:$0xff] %v326_v47  ;;  %v328_v50 = vadd.f32 %v327_v48, %v70_v45  ;;  %v368_v55 = vpop.f32.mrf.mxu1 }
  0xe6   :  { %v329_v51 = vpop.f32.mrf.mxu0  ;;  %v369_v56 = vadd.f32 %v368_v55, %v70_v45 }
  0xe7   :  { %419 = vst [vmem:[%s750_s3 + $0x8] sm:$0xff] %v328_v50  ;;  %v330_v52 = vadd.f32 %v329_v51, %v75_v49  ;;  %v370_v57 = vpop.f32.mrf.mxu1 }
  0xe8   :  { %v331_v53 = vpop.f32.mrf.mxu0  ;;  %420 = vst [vmem:[%s750_s3 + $0x10] sm:$0xff] %v369_v56  ;;  %v371_v58 = vadd.f32 %v370_v57, %v70_v45 }
  0xe9   :  { %424 = vst [vmem:[%s750_s3 + $0x28] sm:$0xf] %v330_v52  ;;  %v332_v54 = vadd.f32 %v331_v53, %v75_v49  ;;  %v372_v59 = vpop.f32.mrf.mxu1 }
  0xea   :  { %421 = vst [vmem:[%s750_s3 + $0x18] sm:$0xff] %v371_v58  ;;  %v373_v60 = vadd.f32 %v372_v59, %v75_v49 }
  0xeb   :  { %425 = vst [vmem:[%s750_s3 + $0x30] sm:$0xf] %v332_v54  ;;  %v374_v61 = vpop.f32.mrf.mxu1 }
  0xec   :  { %426 = vst [vmem:[%s750_s3 + $0x38] sm:$0xf] %v373_v60  ;;  %v375_v62 = vadd.f32 %v374_v61, %v75_v49 }
  0xee   :  { %427 = vst [vmem:[%s750_s3 + $0x40] sm:$0xf] %v375_v62 }
 0x102   :  { %v411_v63 = vpop.f32.mrf.mxu0 }
 0x103   :  { %v412_v0 = vadd.f32 %v411_v63, %v70_v45 }
 0x104   :  { %v502_v1 = vpop.f32.mrf.mxu0 }
 0x105   :  { %423 = vst.msk [vmem:[%s750_s3 + $0x20] sm:$0xff] %vm422_vm1, %v412_v0 }
 0x106   :  { %v414_v2 = vpop.f32.mrf.mxu0 }
 0x107   :  { %v415_v3 = vadd.f32 %v414_v2, %v75_v49 }
 0x108   :  { %v503_v4 = vpop.f32.mrf.mxu0 }
 0x109   :  { %429 = vst.msk [vmem:[%s750_s3 + $0x48] sm:$0xf] %vm428_vm2, %v415_v3 }

</bundles_post_ra>
